<compile_context>
chip_gen: v7x
topology: tpu7x:2x2x1
jax: 0.10.0
libtpu: 0.0.40
codegen_flags: <defaults>
</compile_context>

<pallas_src>
import functools

import jax
import jax.numpy as jnp
from jax.experimental import pallas as pl
from jax.experimental.pallas import tpu as pltpu


def _round_up(x, m):
    return (x + m - 1) // m * m


# Model dimensions.
IN1, OUT1 = 22080, 2048
OUT2, OUT3 = 256, 128
ACT = 2
LANE = 128

# Layer-1 tiling.
TK1 = 2048                      # 22528 / 2048 = 11 k-steps
K1P = _round_up(IN1, TK1)       # 22528 (zero-padded K; padded rows are zero)
TN1 = 1024                      # split path: 2 "parallel" N blocks (v7x megacore)


# ---------------------------------------------------------------------------
# Split path, layer 1: tiled matmul with bf16 x/W tiles, f32 accumulation
# directly in the VMEM-resident output block, bias + ReLU at the last k.
# ---------------------------------------------------------------------------
def _linear_relu_kernel(x_ref, w_ref, b_ref, o_ref):
    k = pl.program_id(2)

    @pl.when(k == 0)
    def _():
        o_ref[...] = jnp.zeros_like(o_ref)

    o_ref[...] += jnp.dot(
        x_ref[...], w_ref[...], preferred_element_type=jnp.float32
    )

    @pl.when(k == pl.num_programs(2) - 1)
    def _():
        o_ref[...] = jnp.maximum(o_ref[...] + b_ref[...], 0.0)


def layer1_pallas(xp, w1p, b1p):
    """xp: [Mp, K1P] bf16, w1p: [K1P, OUT1] bf16, b1p: [1, OUT1] f32."""
    Mp = xp.shape[0]
    tm = Mp  # tiny batch (padded to a multiple of 8); single M block
    grid = (Mp // tm, OUT1 // TN1, K1P // TK1)

    return pl.pallas_call(
        _linear_relu_kernel,
        out_shape=jax.ShapeDtypeStruct((Mp, OUT1), jnp.float32),
        grid_spec=pltpu.PrefetchScalarGridSpec(
            num_scalar_prefetch=0,
            grid=grid,
            in_specs=[
                pl.BlockSpec((tm, TK1), lambda i, j, k: (i, k)),
                pl.BlockSpec((TK1, TN1), lambda i, j, k: (k, j)),
                pl.BlockSpec((1, TN1), lambda i, j, k: (0, j)),
            ],
            out_specs=pl.BlockSpec((tm, TN1), lambda i, j, k: (i, j)),
        ),
        compiler_params=pltpu.CompilerParams(
            dimension_semantics=("parallel", "parallel", "arbitrary"),
            # bf16 weight tiles: (2048x1024x2B) x 2 buffers = 8 MB + small
            # activation/output blocks; 32 MB leaves margin on every gen while
            # staying well clear of v7x's 64 MiB physical VMEM.
            vmem_limit_bytes=32 * 1024 * 1024,
        ),
    )(xp, w1p, b1p)


# ---------------------------------------------------------------------------
# Split path, tail: Linear(2048,256)+ReLU -> Linear(256,128)+ReLU ->
# Linear(130,1) with the action concat folded in as a second matmul on the
# split W4 (h-part / action-part).  Single grid step; everything fits in VMEM.
# ---------------------------------------------------------------------------
def _tail_kernel(h1_ref, a_ref, w2_ref, b2_ref, w3_ref, b3_ref,
                 w4h_ref, w4a_ref, b4_ref, o_ref):
    h2 = jnp.maximum(
        jnp.dot(h1_ref[...], w2_ref[...], preferred_element_type=jnp.float32)
        + b2_ref[...],
        0.0,
    )
    h3 = jnp.maximum(
        jnp.dot(h2, w3_ref[...], preferred_element_type=jnp.float32)
        + b3_ref[...],
        0.0,
    )
    o_ref[...] = (
        jnp.dot(h3, w4h_ref[...], preferred_element_type=jnp.float32)
        + jnp.dot(a_ref[...], w4a_ref[...], preferred_element_type=jnp.float32)
        + b4_ref[...]
    )


def tail_pallas(h1, a_pad, w2, b2p, w3, b3p, w4h, w4a, b4p):
    Mp = h1.shape[0]
    full = lambda shape: pl.BlockSpec(shape, lambda i: (0, 0))
    return pl.pallas_call(
        _tail_kernel,
        out_shape=jax.ShapeDtypeStruct((Mp, LANE), jnp.float32),
        grid_spec=pltpu.PrefetchScalarGridSpec(
            num_scalar_prefetch=0,
            grid=(1,),
            in_specs=[
                full((Mp, OUT1)),        # h1
                full((Mp, LANE)),        # padded action
                full((OUT1, OUT2)),      # w2
                full((1, OUT2)),         # b2
                full((OUT2, OUT3)),      # w3
                full((1, OUT3)),         # b3
                full((OUT3, LANE)),      # w4 (h part, padded to 128 cols)
                full((LANE, LANE)),      # w4 (action part, padded)
                full((1, LANE)),         # b4 (padded)
            ],
            out_specs=full((Mp, LANE)),
        ),
        compiler_params=pltpu.CompilerParams(
            dimension_semantics=("arbitrary",),
        ),
    )(h1, a_pad, w2, b2p, w3, b3p, w4h, w4a, b4p)


# ---------------------------------------------------------------------------
# Fused path (v5e / v6e, single TensorCore): one kernel, grid=(11,) over K.
# Layer 1 accumulates the full 2048-wide h1 in a VMEM scratch; at the last k
# the whole tail (layers 2-4 + action term) runs as the epilogue.
# ---------------------------------------------------------------------------
def _fused_kernel(x_ref, w1_ref, b1_ref, a_ref, w2_ref, b2_ref, w3_ref, b3_ref,
                  w4h_ref, w4a_ref, b4_ref, o_ref, acc_ref):
    k = pl.program_id(0)

    @pl.when(k == 0)
    def _():
        acc_ref[...] = jnp.zeros_like(acc_ref)

    acc_ref[...] += jnp.dot(
        x_ref[...], w1_ref[...], preferred_element_type=jnp.float32
    )

    @pl.when(k == pl.num_programs(0) - 1)
    def _():
        h1 = jnp.maximum(acc_ref[...] + b1_ref[...], 0.0)
        h2 = jnp.maximum(
            jnp.dot(h1, w2_ref[...], preferred_element_type=jnp.float32)
            + b2_ref[...],
            0.0,
        )
        h3 = jnp.maximum(
            jnp.dot(h2, w3_ref[...], preferred_element_type=jnp.float32)
            + b3_ref[...],
            0.0,
        )
        o_ref[...] = (
            jnp.dot(h3, w4h_ref[...], preferred_element_type=jnp.float32)
            + jnp.dot(a_ref[...], w4a_ref[...], preferred_element_type=jnp.float32)
            + b4_ref[...]
        )


def fused_forward_pallas(xp, ap, prep):
    Mp = xp.shape[0]
    const2d = lambda shape: pl.BlockSpec(shape, lambda k: (0, 0))
    return pl.pallas_call(
        _fused_kernel,
        out_shape=jax.ShapeDtypeStruct((Mp, LANE), jnp.float32),
        grid_spec=pltpu.PrefetchScalarGridSpec(
            num_scalar_prefetch=0,
            grid=(K1P // TK1,),
            in_specs=[
                pl.BlockSpec((Mp, TK1), lambda k: (0, k)),      # x (bf16)
                pl.BlockSpec((TK1, OUT1), lambda k: (k, 0)),    # w1 (bf16)
                const2d((1, OUT1)),                             # b1
                const2d((Mp, LANE)),                            # padded action
                const2d((OUT1, OUT2)),                          # w2
                const2d((1, OUT2)),                             # b2
                const2d((OUT2, OUT3)),                          # w3
                const2d((1, OUT3)),                             # b3
                const2d((OUT3, LANE)),                          # w4 h-part
                const2d((LANE, LANE)),                          # w4 action-part
                const2d((1, LANE)),                             # b4
            ],
            out_specs=const2d((Mp, LANE)),
            scratch_shapes=[pltpu.VMEM((Mp, OUT1), jnp.float32)],
        ),
        compiler_params=pltpu.CompilerParams(
            dimension_semantics=("arbitrary",),
            # bf16 W1 tiles (2048x2048x2B x 2 buffers = 16 MB) + ~4.6 MB tail
            # weights + 64 KB scratch ~= 21 MB; 40 MB gives slack.  This path
            # only runs on v5e/v6e (128 MiB physical VMEM).
            vmem_limit_bytes=40 * 1024 * 1024,
        ),
    )(xp, prep["w1p"], prep["b1p"], ap, prep["w2"], prep["b2p"], prep["w3"],
      prep["b3p"], prep["w4h"], prep["w4a"], prep["b4p"])


# ---------------------------------------------------------------------------
# Parameters.
# ---------------------------------------------------------------------------
def init_params(key):
    """Deterministic synthetic parameters matching the module's shapes.

    Weights stored [in_features, out_features] (transposed vs nn.Linear)."""
    sizes = [(IN1, OUT1), (OUT1, OUT2), (OUT2, OUT3), (OUT3 + ACT, 1)]
    params = []
    for i, (fan_in, fan_out) in enumerate(sizes):
        kw, kb = jax.random.split(jax.random.fold_in(key, i))
        bound = 1.0 / jnp.sqrt(jnp.float32(fan_in))
        w = jax.random.uniform(
            kw, (fan_in, fan_out), jnp.float32, minval=-bound, maxval=bound
        )
        b = jax.random.uniform(
            kb, (fan_out,), jnp.float32, minval=-bound, maxval=bound
        )
        params.append((w, b))
    return params


def prepare_params(params):
    """One-time padding / dtype conversion of parameters into kernel layouts."""
    (w1, b1), (w2, b2), (w3, b3), (w4, b4) = params
    # W1 stored once in bf16 (halves the dominant ~181 MB HBM stream); the dot
    # still accumulates in f32 via preferred_element_type.
    w1p = jnp.zeros((K1P, OUT1), jnp.bfloat16).at[:IN1, :].set(
        w1.astype(jnp.bfloat16))
    b1p = b1.reshape(1, OUT1)
    b2p = b2.reshape(1, OUT2)
    b3p = b3.reshape(1, OUT3)
    # Split last layer: rows [:128] act on h3, rows [128:130] on the action.
    # Pad the 1-wide output dimension to 128 lanes (only column 0 meaningful).
    w4h = jnp.zeros((OUT3, LANE), jnp.float32).at[:, 0].set(w4[:OUT3, 0])
    w4a = jnp.zeros((LANE, LANE), jnp.float32).at[:ACT, 0].set(w4[OUT3:, 0])
    b4p = jnp.zeros((1, LANE), jnp.float32).at[0, 0].set(b4[0])
    return dict(w1p=w1p, b1p=b1p, w2=w2, b2p=b2p, w3=w3, b3p=b3p,
                w4h=w4h, w4a=w4a, b4p=b4p)


def use_fused_tail():
    """Fuse the tail into layer 1 only on single-TensorCore chips (v5e/v6e).

    On v7x (2 TCs) the split path keeps both cores streaming W1; misdetection
    only affects performance, never correctness."""
    try:
        kind = jax.devices()[0].device_kind.lower()
    except Exception:
        return False
    return ("v5" in kind) or ("v6" in kind)


# ---------------------------------------------------------------------------
# Forward pass.
# ---------------------------------------------------------------------------
@functools.partial(jax.jit, static_argnames=("fused",))
def ddpg_value2_forward(prep, state, action, *, fused=False):
    B = state.shape[0]
    Mp = _round_up(B, 8)
    # Only the tiny activations get padded per call; the big weight was padded
    # (and cast to bf16) once in prepare_params.
    xp = jnp.zeros((Mp, K1P), jnp.bfloat16).at[:B, :IN1].set(
        state.astype(jnp.bfloat16))
    ap = jnp.zeros((Mp, LANE), jnp.float32).at[:B, :ACT].set(action)

    if fused:
        out_full = fused_forward_pallas(xp, ap, prep)
    else:
        h1 = layer1_pallas(xp, prep["w1p"], prep["b1p"])
        out_full = tail_pallas(
            h1, ap, prep["w2"], prep["b2p"], prep["w3"], prep["b3p"],
            prep["w4h"], prep["w4a"], prep["b4p"],
        )
    # Padded batch rows B..Mp-1 carry garbage (ReLU(b1)-propagated) -> sliced.
    return out_full[:B, :1]


if __name__ == "__main__":
    key = jax.random.PRNGKey(0)
    k_params, k_state, k_action = jax.random.split(key, 3)

    B = 2
    state = jax.random.normal(k_state, (B, IN1), jnp.float32)
    action = jax.random.normal(k_action, (B, ACT), jnp.float32)

    params = init_params(k_params)
    prep = prepare_params(params)           # one-time padding + bf16 cast
    fused = use_fused_tail()

    out = ddpg_value2_forward(prep, state, action, fused=fused)
    out = jax.block_until_ready(out)

    # Reference 1: mirrors the kernel's bf16 W1 / bf16 state quantization with
    # f32 accumulation -> differences are accumulation-order only.
    def ref_bf16(params, state, action):
        (w1, b1), (w2, b2), (w3, b3), (w4, b4) = params
        h = jnp.maximum(
            jnp.dot(state.astype(jnp.bfloat16), w1.astype(jnp.bfloat16),
                    preferred_element_type=jnp.float32) + b1, 0.0)
        h = jnp.maximum(h @ w2 + b2, 0.0)
        h = jnp.maximum(h @ w3 + b3, 0.0)
        h = jnp.concatenate([h, action], axis=1)
        return h @ w4 + b4

    # Reference 2: full-f32 semantics of the original module (looser check that
    # bounds the bf16 weight-quantization error).
    def ref_f32(params, state, action):
        (w1, b1), (w2, b2), (w3, b3), (w4, b4) = params
        h = jnp.maximum(state @ w1 + b1, 0.0)
        h = jnp.maximum(h @ w2 + b2, 0.0)
        h = jnp.maximum(h @ w3 + b3, 0.0)
        h = jnp.concatenate([h, action], axis=1)
        return h @ w4 + b4

    exp_q = ref_bf16(params, state, action)
    exp_f = ref_f32(params, state, action)
    assert out.shape == (B, 1), out.shape
    assert jnp.allclose(out, exp_q, atol=2e-3, rtol=2e-3), (out, exp_q)
    assert jnp.allclose(out, exp_f, atol=2e-2, rtol=2e-2), (out, exp_f)
    print("KERNEL_OK")
</pallas_src>

<mosaic_0001>
module attributes {stable_mosaic.version = 11 : i64} {
  func.func @_linear_relu_kernel(%arg0: i32, %arg1: i32, %arg2: i32, %arg3: memref<8x2048xbf16, #tpu.memory_space<vmem>>, %arg4: memref<2048x1024xbf16, #tpu.memory_space<vmem>>, %arg5: memref<1x1024xf32, #tpu.memory_space<vmem>>, %arg6: memref<8x1024xf32, #tpu.memory_space<vmem>>) attributes {dimension_semantics = [#tpu.dimension_semantics<parallel>, #tpu.dimension_semantics<parallel>, #tpu.dimension_semantics<arbitrary>], iteration_bounds = array<i64: 1, 2, 11>, scalar_prefetch = 0 : i64, scratch_operands = 0 : i64, tpu.core_type = #tpu.core_type<tc>, window_params = [{transform_indices = @transform_0, window_bounds = array<i64: 8, 2048>}, {transform_indices = @transform_1, window_bounds = array<i64: 2048, 1024>}, {transform_indices = @transform_2, window_bounds = array<i64: 1, 1024>}, {transform_indices = @transform_3, window_bounds = array<i64: 8, 1024>}]} {
    %c0_i32 = arith.constant 0 : i32
    %0 = arith.cmpi eq, %arg2, %c0_i32 : i32
    %1 = arith.extui %0 : i1 to i32
    %c0_i32_0 = arith.constant 0 : i32
    %2 = arith.cmpi ne, %1, %c0_i32_0 : i32
    scf.if %2 {
      %cst_9 = arith.constant 0.000000e+00 : f32
      %12 = vector.broadcast %cst_9 : f32 to vector<8x1024xf32>
      %c0_10 = arith.constant 0 : index
      %c0_11 = arith.constant 0 : index
      %13 = vector.load %arg6[%c0_10, %c0_11] : memref<8x1024xf32, #tpu.memory_space<vmem>>, vector<8x1024xf32>
      tpu.vector_store %arg6[%c0_10, %c0_11], %12 {strides = array<i32>} : memref<8x1024xf32, #tpu.memory_space<vmem>>, vector<8x1024xf32>,
    } else {
    }
    %c0 = arith.constant 0 : index
    %c0_1 = arith.constant 0 : index
    %3 = vector.load %arg6[%c0, %c0_1] : memref<8x1024xf32, #tpu.memory_space<vmem>>, vector<8x1024xf32>
    %c0_2 = arith.constant 0 : index
    %c0_3 = arith.constant 0 : index
    %4 = vector.load %arg3[%c0_2, %c0_3] : memref<8x2048xbf16, #tpu.memory_space<vmem>>, vector<8x2048xbf16>
    %c0_4 = arith.constant 0 : index
    %c0_5 = arith.constant 0 : index
    %5 = vector.load %arg4[%c0_4, %c0_5] : memref<2048x1024xbf16, #tpu.memory_space<vmem>>, vector<2048x1024xbf16>
    %cst = arith.constant dense<0.000000e+00> : vector<8x1024xf32>
    %6 = tpu.matmul %4, %5, %cst {dimension_numbers = #tpu.dot_dimension_numbers<[1], [0], [0], [1], [0, 0, 1, 1], [], []>} : vector<8x2048xbf16>, vector<2048x1024xbf16>, vector<8x1024xf32> -> vector<8x1024xf32>
    %7 = arith.addf %3, %6 : vector<8x1024xf32>
    %c0_6 = arith.constant 0 : index
    %c0_7 = arith.constant 0 : index
    %8 = vector.load %arg6[%c0_6, %c0_7] : memref<8x1024xf32, #tpu.memory_space<vmem>>, vector<8x1024xf32>
    tpu.vector_store %arg6[%c0_6, %c0_7], %7 {strides = array<i32>} : memref<8x1024xf32, #tpu.memory_space<vmem>>, vector<8x1024xf32>,
    %c10_i32 = arith.constant 10 : i32
    %9 = arith.cmpi eq, %arg2, %c10_i32 : i32
    %10 = arith.extui %9 : i1 to i32
    %c0_i32_8 = arith.constant 0 : i32
    %11 = arith.cmpi ne, %10, %c0_i32_8 : i32
    scf.if %11 {
      %c0_9 = arith.constant 0 : index
      %c0_10 = arith.constant 0 : index
      %12 = vector.load %arg6[%c0_9, %c0_10] : memref<8x1024xf32, #tpu.memory_space<vmem>>, vector<8x1024xf32>
      %c0_11 = arith.constant 0 : index
      %c0_12 = arith.constant 0 : index
      %13 = vector.load %arg5[%c0_11, %c0_12] : memref<1x1024xf32, #tpu.memory_space<vmem>>, vector<1x1024xf32>
      %14 = vector.broadcast %13 : vector<1x1024xf32> to vector<8x1024xf32>
      %15 = arith.addf %12, %14 : vector<8x1024xf32>
      %cst_13 = arith.constant 0.000000e+00 : f32
      %16 = vector.broadcast %cst_13 : f32 to vector<8x1024xf32>
      %17 = arith.maximumf %15, %16 : vector<8x1024xf32>
      %c0_14 = arith.constant 0 : index
      %c0_15 = arith.constant 0 : index
      %18 = vector.load %arg6[%c0_14, %c0_15] : memref<8x1024xf32, #tpu.memory_space<vmem>>, vector<8x1024xf32>
      tpu.vector_store %arg6[%c0_14, %c0_15], %17 {strides = array<i32>} : memref<8x1024xf32, #tpu.memory_space<vmem>>, vector<8x1024xf32>,
    } else {
    }
    return
  }
  func.func @transform_0(%arg0: i32, %arg1: i32, %arg2: i32) -> (i32, i32) {
    %c0_i32 = arith.constant 0 : i32
    return %arg0, %arg2 : i32, i32
  }
  func.func @transform_1(%arg0: i32, %arg1: i32, %arg2: i32) -> (i32, i32) {
    %c0_i32 = arith.constant 0 : i32
    return %arg2, %arg1 : i32, i32
  }
  func.func @transform_2(%arg0: i32, %arg1: i32, %arg2: i32) -> (i32, i32) {
    %c0_i32 = arith.constant 0 : i32
    %c0_i32_0 = arith.constant 0 : i32
    return %c0_i32, %arg1 : i32, i32
  }
  func.func @transform_3(%arg0: i32, %arg1: i32, %arg2: i32) -> (i32, i32) {
    %c0_i32 = arith.constant 0 : i32
    return %arg0, %arg1 : i32, i32
  }
}

module attributes {stable_mosaic.version = 11 : i64} {
  func.func @_tail_kernel(%arg0: i32, %arg1: memref<8x2048xf32, #tpu.memory_space<vmem>>, %arg2: memref<8x128xf32, #tpu.memory_space<vmem>>, %arg3: memref<2048x256xf32, #tpu.memory_space<vmem>>, %arg4: memref<1x256xf32, #tpu.memory_space<vmem>>, %arg5: memref<256x128xf32, #tpu.memory_space<vmem>>, %arg6: memref<1x128xf32, #tpu.memory_space<vmem>>, %arg7: memref<128x128xf32, #tpu.memory_space<vmem>>, %arg8: memref<128x128xf32, #tpu.memory_space<vmem>>, %arg9: memref<1x128xf32, #tpu.memory_space<vmem>>, %arg10: memref<8x128xf32, #tpu.memory_space<vmem>>) attributes {dimension_semantics = [#tpu.dimension_semantics<arbitrary>], iteration_bounds = array<i64: 1>, scalar_prefetch = 0 : i64, scratch_operands = 0 : i64, tpu.core_type = #tpu.core_type<tc>, window_params = [{pipeline_mode = #tpu.pipeline_mode<synchronous>, transform_indices = @transform_0, window_bounds = array<i64: 8, 2048>}, {pipeline_mode = #tpu.pipeline_mode<synchronous>, transform_indices = @transform_1, window_bounds = array<i64: 8, 128>}, {pipeline_mode = #tpu.pipeline_mode<synchronous>, transform_indices = @transform_2, window_bounds = array<i64: 2048, 256>}, {pipeline_mode = #tpu.pipeline_mode<synchronous>, transform_indices = @transform_3, window_bounds = array<i64: 1, 256>}, {pipeline_mode = #tpu.pipeline_mode<synchronous>, transform_indices = @transform_4, window_bounds = array<i64: 256, 128>}, {pipeline_mode = #tpu.pipeline_mode<synchronous>, transform_indices = @transform_5, window_bounds = array<i64: 1, 128>}, {pipeline_mode = #tpu.pipeline_mode<synchronous>, transform_indices = @transform_6, window_bounds = array<i64: 128, 128>}, {pipeline_mode = #tpu.pipeline_mode<synchronous>, transform_indices = @transform_7, window_bounds = array<i64: 128, 128>}, {pipeline_mode = #tpu.pipeline_mode<synchronous>, transform_indices = @transform_8, window_bounds = array<i64: 1, 128>}, {pipeline_mode = #tpu.pipeline_mode<synchronous>, transform_indices = @transform_9, window_bounds = array<i64: 8, 128>}]} {
    %c0 = arith.constant 0 : index
    %c0_0 = arith.constant 0 : index
    %0 = vector.load %arg1[%c0, %c0_0] : memref<8x2048xf32, #tpu.memory_space<vmem>>, vector<8x2048xf32>
    %c0_1 = arith.constant 0 : index
    %c0_2 = arith.constant 0 : index
    %1 = vector.load %arg3[%c0_1, %c0_2] : memref<2048x256xf32, #tpu.memory_space<vmem>>, vector<2048x256xf32>
    %cst = arith.constant dense<0.000000e+00> : vector<8x256xf32>
    %2 = tpu.matmul %0, %1, %cst {dimension_numbers = #tpu.dot_dimension_numbers<[1], [0], [0], [1], [0, 0, 1, 1], [], []>} : vector<8x2048xf32>, vector<2048x256xf32>, vector<8x256xf32> -> vector<8x256xf32>
    %c0_3 = arith.constant 0 : index
    %c0_4 = arith.constant 0 : index
    %3 = vector.load %arg4[%c0_3, %c0_4] : memref<1x256xf32, #tpu.memory_space<vmem>>, vector<1x256xf32>
    %4 = vector.broadcast %3 : vector<1x256xf32> to vector<8x256xf32>
    %5 = arith.addf %2, %4 : vector<8x256xf32>
    %cst_5 = arith.constant 0.000000e+00 : f32
    %6 = vector.broadcast %cst_5 : f32 to vector<8x256xf32>
    %7 = arith.maximumf %5, %6 : vector<8x256xf32>
    %c0_6 = arith.constant 0 : index
    %c0_7 = arith.constant 0 : index
    %8 = vector.load %arg5[%c0_6, %c0_7] : memref<256x128xf32, #tpu.memory_space<vmem>>, vector<256x128xf32>
    %cst_8 = arith.constant dense<0.000000e+00> : vector<8x128xf32>
    %9 = tpu.matmul %7, %8, %cst_8 {dimension_numbers = #tpu.dot_dimension_numbers<[1], [0], [0], [1], [0, 0, 1, 1], [], []>} : vector<8x256xf32>, vector<256x128xf32>, vector<8x128xf32> -> vector<8x128xf32>
    %c0_9 = arith.constant 0 : index
    %c0_10 = arith.constant 0 : index
    %10 = vector.load %arg6[%c0_9, %c0_10] : memref<1x128xf32, #tpu.memory_space<vmem>>, vector<1x128xf32>
    %11 = vector.broadcast %10 : vector<1x128xf32> to vector<8x128xf32>
    %12 = arith.addf %9, %11 : vector<8x128xf32>
    %cst_11 = arith.constant 0.000000e+00 : f32
    %13 = vector.broadcast %cst_11 : f32 to vector<8x128xf32>
    %14 = arith.maximumf %12, %13 : vector<8x128xf32>
    %c0_12 = arith.constant 0 : index
    %c0_13 = arith.constant 0 : index
    %15 = vector.load %arg7[%c0_12, %c0_13] : memref<128x128xf32, #tpu.memory_space<vmem>>, vector<128x128xf32>
    %cst_14 = arith.constant dense<0.000000e+00> : vector<8x128xf32>
    %16 = tpu.matmul %14, %15, %cst_14 {dimension_numbers = #tpu.dot_dimension_numbers<[1], [0], [0], [1], [0, 0, 1, 1], [], []>} : vector<8x128xf32>, vector<128x128xf32>, vector<8x128xf32> -> vector<8x128xf32>
    %c0_15 = arith.constant 0 : index
    %c0_16 = arith.constant 0 : index
    %17 = vector.load %arg2[%c0_15, %c0_16] : memref<8x128xf32, #tpu.memory_space<vmem>>, vector<8x128xf32>
    %c0_17 = arith.constant 0 : index
    %c0_18 = arith.constant 0 : index
    %18 = vector.load %arg8[%c0_17, %c0_18] : memref<128x128xf32, #tpu.memory_space<vmem>>, vector<128x128xf32>
    %cst_19 = arith.constant dense<0.000000e+00> : vector<8x128xf32>
    %19 = tpu.matmul %17, %18, %cst_19 {dimension_numbers = #tpu.dot_dimension_numbers<[1], [0], [0], [1], [0, 0, 1, 1], [], []>} : vector<8x128xf32>, vector<128x128xf32>, vector<8x128xf32> -> vector<8x128xf32>
    %20 = arith.addf %16, %19 : vector<8x128xf32>
    %c0_20 = arith.constant 0 : index
    %c0_21 = arith.constant 0 : index
    %21 = vector.load %arg9[%c0_20, %c0_21] : memref<1x128xf32, #tpu.memory_space<vmem>>, vector<1x128xf32>
    %22 = vector.broadcast %21 : vector<1x128xf32> to vector<8x128xf32>
    %23 = arith.addf %20, %22 : vector<8x128xf32>
    %c0_22 = arith.constant 0 : index
    %c0_23 = arith.constant 0 : index
    %24 = vector.load %arg10[%c0_22, %c0_23] : memref<8x128xf32, #tpu.memory_space<vmem>>, vector<8x128xf32>
    tpu.vector_store %arg10[%c0_22, %c0_23], %23 {strides = array<i32>} : memref<8x128xf32, #tpu.memory_space<vmem>>, vector<8x128xf32>,
    return
  }
  func.func @transform_0(%arg0: i32) -> (i32, i32) {
    %c0_i32 = arith.constant 0 : i32
    %c0_i32_0 = arith.constant 0 : i32
    %c0_i32_1 = arith.constant 0 : i32
    return %c0_i32, %c0_i32_0 : i32, i32
  }
  func.func @transform_1(%arg0: i32) -> (i32, i32) {
    %c0_i32 = arith.constant 0 : i32
    %c0_i32_0 = arith.constant 0 : i32
    %c0_i32_1 = arith.constant 0 : i32
    return %c0_i32, %c0_i32_0 : i32, i32
  }
  func.func @transform_2(%arg0: i32) -> (i32, i32) {
    %c0_i32 = arith.constant 0 : i32
    %c0_i32_0 = arith.constant 0 : i32
    %c0_i32_1 = arith.constant 0 : i32
    return %c0_i32, %c0_i32_0 : i32, i32
  }
  func.func @transform_3(%arg0: i32) -> (i32, i32) {
    %c0_i32 = arith.constant 0 : i32
    %c0_i32_0 = arith.constant 0 : i32
    %c0_i32_1 = arith.constant 0 : i32
    return %c0_i32, %c0_i32_0 : i32, i32
  }
  func.func @transform_4(%arg0: i32) -> (i32, i32) {
    %c0_i32 = arith.constant 0 : i32
    %c0_i32_0 = arith.constant 0 : i32
    %c0_i32_1 = arith.constant 0 : i32
    return %c0_i32, %c0_i32_0 : i32, i32
  }
  func.func @transform_5(%arg0: i32) -> (i32, i32) {
    %c0_i32 = arith.constant 0 : i32
    %c0_i32_0 = arith.constant 0 : i32
    %c0_i32_1 = arith.constant 0 : i32
    return %c0_i32, %c0_i32_0 : i32, i32
  }
  func.func @transform_6(%arg0: i32) -> (i32, i32) {
    %c0_i32 = arith.constant 0 : i32
    %c0_i32_0 = arith.constant 0 : i32
    %c0_i32_1 = arith.constant 0 : i32
    return %c0_i32, %c0_i32_0 : i32, i32
  }
  func.func @transform_7(%arg0: i32) -> (i32, i32) {
    %c0_i32 = arith.constant 0 : i32
    %c0_i32_0 = arith.constant 0 : i32
    %c0_i32_1 = arith.constant 0 : i32
    return %c0_i32, %c0_i32_0 : i32, i32
  }
  func.func @transform_8(%arg0: i32) -> (i32, i32) {
    %c0_i32 = arith.constant 0 : i32
    %c0_i32_0 = arith.constant 0 : i32
    %c0_i32_1 = arith.constant 0 : i32
    return %c0_i32, %c0_i32_0 : i32, i32
  }
  func.func @transform_9(%arg0: i32) -> (i32, i32) {
    %c0_i32 = arith.constant 0 : i32
    %c0_i32_0 = arith.constant 0 : i32
    %c0_i32_1 = arith.constant 0 : i32
    return %c0_i32, %c0_i32_0 : i32, i32
  }
}

</mosaic_0001>

<bundles_post_ra>
// kernel: ddpg_value2_forward.3
= control target key start
LH: loop header
LB: loop body
LE: loop exit
PB: predicated region body
PF: predicated region fallthrough
CT: control target
= control target key end

     0   :  { %vm2191_vm0 = vmmov 0   ;;  %s4052_s2 = inlined_call_operand.vmem [shape: f32[2048,256], index: 2, kind: input, shape index: {}]   ;;  %s4053_s0 = inlined_call_operand.vmem [shape: f32[8,2048], index: 0, kind: input, shape index: {}]   ;;  %s4054_s4 = inlined_call_operand.vmem [shape: f32[256,128], index: 4, kind: input, shape index: {}]   ;;  %s4055_s3 = inlined_call_operand.vmem [shape: f32[1,256], index: 3, kind: input, shape index: {}]   ;;  %s4056_s7 = inlined_call_operand.vmem [shape: f32[128,128], index: 7, kind: input, shape index: {}]   ;;  %s4057_s6 = inlined_call_operand.vmem [shape: f32[128,128], index: 6, kind: input, shape index: {}]   ;;  %s4058_s1 = inlined_call_operand.vmem [shape: f32[8,128], index: 1, kind: input, shape index: {}]   ;;  %s4059_s5 = inlined_call_operand.vmem [shape: f32[1,128], index: 5, kind: input, shape index: {}]   ;;  %s4060_s8 = inlined_call_operand.vmem [shape: f32[1,128], index: 8, kind: input, shape index: {}]   ;;  %s4061_s9 = inlined_call_operand.vmem [shape: f32[8,128], index: 9, kind: output, shape index: {}]  }
   0x1   :  { %v49_v0 = vld [vmem:[%s4052_s2 + $0x8] sm:$0xff]  ;;  %v51_v1 = vld [vmem:[%s4052_s2 + $0x18] sm:$0xff]  ;;  %v48_v5 = vld [vmem:[%s4052_s2] sm:$0xff] }
   0x2   :  { %v241_v2 = vld [vmem:[%s4052_s2 + $0x608] sm:$0xff]  ;;  %v1579_v3 = vpack.c.bf16 %v51_v1, %v49_v0  ;;  %v243_v4 = vld [vmem:[%s4052_s2 + $0x618] sm:$0xff]  ;;  %v50_v6 = vld [vmem:[%s4052_s2 + $0x10] sm:$0xff] }
   0x3   :  { %v1771_v7 = vpack.c.bf16 %v243_v4, %v241_v2  ;;  %v1581_v8 = vpack.c.bf16 %v50_v6, %v48_v5  ;;  %v240_v9 = vld [vmem:[%s4052_s2 + $0x600] sm:$0xff]  ;;  %v242_v10 = vld [vmem:[%s4052_s2 + $0x610] sm:$0xff]  ;;  %v53_v11 = vld [vmem:[%s4052_s2 + $0x28] sm:$0xff] }
   0x4   :  { %1580 = vmatprep.subr.bf16.mxu1 %v1579_v3  ;;  %v1773_v12 = vpack.c.bf16 %v242_v10, %v240_v9  ;;  %v55_v13 = vld [vmem:[%s4052_s2 + $0x38] sm:$0xff]  ;;  %v245_v14 = vld [vmem:[%s4052_s2 + $0x628] sm:$0xff]  ;;  %v52_v18 = vld [vmem:[%s4052_s2 + $0x20] sm:$0xff] }
   0x5   :  { %v247_v15 = vld [vmem:[%s4052_s2 + $0x638] sm:$0xff]  ;;  %1772 = vmatprep.subr.bf16.mxu0 %v1771_v7  ;;  %1582 = vmatpush1.bf16.msra.mxu1 %v1581_v8  ;;  %v1583_v16 = vpack.c.bf16 %v55_v13, %v53_v11  ;;  %v54_v19 = vld [vmem:[%s4052_s2 + $0x30] sm:$0xff]  ;;  %v244_v20 = vld [vmem:[%s4052_s2 + $0x620] sm:$0xff] }
   0x6   :  { %v1775_v17 = vpack.c.bf16 %v247_v15, %v245_v14  ;;  %1774 = vmatpush1.bf16.msra.mxu0 %v1773_v12  ;;  %v1585_v21 = vpack.c.bf16 %v54_v19, %v52_v18  ;;  %v246_v22 = vld [vmem:[%s4052_s2 + $0x630] sm:$0xff]  ;;  %v57_v23 = vld [vmem:[%s4052_s2 + $0x48] sm:$0xff]  ;;  %v59_v24 = vld [vmem:[%s4052_s2 + $0x58] sm:$0xff] }
   0x7   :  { %1584 = vmatprep.subr.bf16.mxu1 %v1583_v16  ;;  %v1777_v25 = vpack.c.bf16 %v246_v22, %v244_v20  ;;  %v1587_v26 = vpack.c.bf16 %v59_v24, %v57_v23  ;;  %v249_v27 = vld [vmem:[%s4052_s2 + $0x648] sm:$0xff]  ;;  %v251_v28 = vld [vmem:[%s4052_s2 + $0x658] sm:$0xff]  ;;  %v56_v29 = vld [vmem:[%s4052_s2 + $0x40] sm:$0xff] }
   0x8   :  { %1776 = vmatprep.subr.bf16.mxu0 %v1775_v17  ;;  %v1779_v30 = vpack.c.bf16 %v251_v28, %v249_v27  ;;  %v58_v31 = vld [vmem:[%s4052_s2 + $0x50] sm:$0xff]  ;;  %v248_v32 = vld [vmem:[%s4052_s2 + $0x640] sm:$0xff]  ;;  %v61_v35 = vld [vmem:[%s4052_s2 + $0x68] sm:$0xff] }
   0x9   :  { %v250_v33 = vld [vmem:[%s4052_s2 + $0x650] sm:$0xff]  ;;  %1586 = vmatpush1.bf16.msra.mxu1 %v1585_v21  ;;  %v1589_v34 = vpack.c.bf16 %v58_v31, %v56_v29  ;;  %v63_v36 = vld [vmem:[%s4052_s2 + $0x78] sm:$0xff]  ;;  %v253_v37 = vld [vmem:[%s4052_s2 + $0x668] sm:$0xff] }
   0xa   :  { %1778 = vmatpush1.bf16.msra.mxu0 %v1777_v25  ;;  %1588 = vmatprep.subr.bf16.mxu1 %v1587_v26  ;;  %v1781_v38 = vpack.c.bf16 %v250_v33, %v248_v32  ;;  %v1591_v39 = vpack.c.bf16 %v63_v36, %v61_v35  ;;  %v255_v40 = vld [vmem:[%s4052_s2 + $0x678] sm:$0xff]  ;;  %v60_v41 = vld [vmem:[%s4052_s2 + $0x60] sm:$0xff]  ;;  %v62_v42 = vld [vmem:[%s4052_s2 + $0x70] sm:$0xff] }
   0xb   :  { %1780 = vmatprep.subr.bf16.mxu0 %v1779_v30  ;;  %v1783_v43 = vpack.c.bf16 %v255_v40, %v253_v37  ;;  %v252_v44 = vld [vmem:[%s4052_s2 + $0x660] sm:$0xff]  ;;  %v254_v45 = vld [vmem:[%s4052_s2 + $0x670] sm:$0xff]  ;;  %v65_v46 = vld [vmem:[%s4052_s2 + $0x88] sm:$0xff]  ;;  %v1593_v50 = vpack.c.bf16 %v62_v42, %v60_v41 }
   0xc   :  { %v67_v47 = vld [vmem:[%s4052_s2 + $0x98] sm:$0xff]  ;;  %v257_v48 = vld [vmem:[%s4052_s2 + $0x688] sm:$0xff]  ;;  %v1785_v51 = vpack.c.bf16 %v254_v45, %v252_v44  ;;  %v64_v53 = vld [vmem:[%s4052_s2 + $0x80] sm:$0xff] }
   0xd   :  { %v259_v49 = vld [vmem:[%s4052_s2 + $0x698] sm:$0xff]  ;;  %1590 = vmatpush1.bf16.msra.mxu1 %v1589_v34  ;;  %v1595_v52 = vpack.c.bf16 %v67_v47, %v65_v46  ;;  %v66_v54 = vld [vmem:[%s4052_s2 + $0x90] sm:$0xff]  ;;  %v256_v55 = vld [vmem:[%s4052_s2 + $0x680] sm:$0xff] }
   0xe   :  { %1782 = vmatpush1.bf16.msra.mxu0 %v1781_v38  ;;  %1592 = vmatprep.subr.bf16.mxu1 %v1591_v39  ;;  %v1787_v56 = vpack.c.bf16 %v259_v49, %v257_v48  ;;  %v258_v57 = vld [vmem:[%s4052_s2 + $0x690] sm:$0xff]  ;;  %v69_v58 = vld [vmem:[%s4052_s2 + $0xa8] sm:$0xff]  ;;  %v71_v59 = vld [vmem:[%s4052_s2 + $0xb8] sm:$0xff]  ;;  %v1597_v62 = vpack.c.bf16 %v66_v54, %v64_v53 }
   0xf   :  { %1784 = vmatprep.subr.bf16.mxu0 %v1783_v43  ;;  %v261_v60 = vld [vmem:[%s4052_s2 + $0x6a8] sm:$0xff]  ;;  %v263_v61 = vld [vmem:[%s4052_s2 + $0x6b8] sm:$0xff]  ;;  %v1789_v63 = vpack.c.bf16 %v258_v57, %v256_v55  ;;  %v1599_v0 = vpack.c.bf16 %v71_v59, %v69_v58  ;;  %v68_v1 = vld [vmem:[%s4052_s2 + $0xa0] sm:$0xff] }
  0x10   :  { %v70_v2 = vld [vmem:[%s4052_s2 + $0xb0] sm:$0xff]  ;;  %v260_v3 = vld [vmem:[%s4052_s2 + $0x6a0] sm:$0xff]  ;;  %v1791_v4 = vpack.c.bf16 %v263_v61, %v261_v60  ;;  %v73_v6 = vld [vmem:[%s4052_s2 + $0xc8] sm:$0xff] }
  0x11   :  { %1594 = vmatpush1.bf16.msra.mxu1 %v1593_v50  ;;  %v262_v5 = vld [vmem:[%s4052_s2 + $0x6b0] sm:$0xff]  ;;  %v75_v7 = vld [vmem:[%s4052_s2 + $0xd8] sm:$0xff]  ;;  %v265_v8 = vld [vmem:[%s4052_s2 + $0x6c8] sm:$0xff]  ;;  %v1601_v10 = vpack.c.bf16 %v70_v2, %v68_v1 }
  0x12   :  { %1786 = vmatpush1.bf16.msra.mxu0 %v1785_v51  ;;  %1596 = vmatprep.subr.bf16.mxu1 %v1595_v52  ;;  %v267_v9 = vld [vmem:[%s4052_s2 + $0x6d8] sm:$0xff]  ;;  %v1793_v11 = vpack.c.bf16 %v262_v5, %v260_v3  ;;  %v1603_v12 = vpack.c.bf16 %v75_v7, %v73_v6  ;;  %v72_v13 = vld [vmem:[%s4052_s2 + $0xc0] sm:$0xff]  ;;  %v74_v14 = vld [vmem:[%s4052_s2 + $0xd0] sm:$0xff] }
  0x13   :  { %1788 = vmatprep.subr.bf16.mxu0 %v1787_v56  ;;  %v264_v15 = vld [vmem:[%s4052_s2 + $0x6c0] sm:$0xff]  ;;  %v1795_v16 = vpack.c.bf16 %v267_v9, %v265_v8  ;;  %v266_v17 = vld [vmem:[%s4052_s2 + $0x6d0] sm:$0xff]  ;;  %v77_v18 = vld [vmem:[%s4052_s2 + $0xe8] sm:$0xff]  ;;  %v1605_v22 = vpack.c.bf16 %v74_v14, %v72_v13 }
  0x14   :  { %v79_v19 = vld [vmem:[%s4052_s2 + $0xf8] sm:$0xff]  ;;  %v269_v20 = vld [vmem:[%s4052_s2 + $0x6e8] sm:$0xff]  ;;  %v1797_v23 = vpack.c.bf16 %v266_v17, %v264_v15  ;;  %v76_v25 = vld [vmem:[%s4052_s2 + $0xe0] sm:$0xff] }
  0x15   :  { %1598 = vmatpush1.bf16.msra.mxu1 %v1597_v62  ;;  %v271_v21 = vld [vmem:[%s4052_s2 + $0x6f8] sm:$0xff]  ;;  %v1607_v24 = vpack.c.bf16 %v79_v19, %v77_v18  ;;  %v78_v26 = vld [vmem:[%s4052_s2 + $0xf0] sm:$0xff]  ;;  %v268_v27 = vld [vmem:[%s4052_s2 + $0x6e0] sm:$0xff] }
  0x16   :  { %1790 = vmatpush1.bf16.msra.mxu0 %v1789_v63  ;;  %1600 = vmatprep.subr.bf16.mxu1 %v1599_v0  ;;  %v1799_v28 = vpack.c.bf16 %v271_v21, %v269_v20  ;;  %v270_v29 = vld [vmem:[%s4052_s2 + $0x6f0] sm:$0xff]  ;;  %v81_v30 = vld [vmem:[%s4052_s2 + $0x108] sm:$0xff]  ;;  %v83_v31 = vld [vmem:[%s4052_s2 + $0x118] sm:$0xff]  ;;  %v1609_v34 = vpack.c.bf16 %v78_v26, %v76_v25 }
  0x17   :  { %1792 = vmatprep.subr.bf16.mxu0 %v1791_v4  ;;  %v273_v32 = vld [vmem:[%s4052_s2 + $0x708] sm:$0xff]  ;;  %v275_v33 = vld [vmem:[%s4052_s2 + $0x718] sm:$0xff]  ;;  %v1801_v35 = vpack.c.bf16 %v270_v29, %v268_v27  ;;  %v1611_v36 = vpack.c.bf16 %v83_v31, %v81_v30  ;;  %v80_v37 = vld [vmem:[%s4052_s2 + $0x100] sm:$0xff] }
  0x18   :  { %v82_v38 = vld [vmem:[%s4052_s2 + $0x110] sm:$0xff]  ;;  %v272_v39 = vld [vmem:[%s4052_s2 + $0x700] sm:$0xff]  ;;  %v1803_v40 = vpack.c.bf16 %v275_v33, %v273_v32  ;;  %v85_v42 = vld [vmem:[%s4052_s2 + $0x128] sm:$0xff] }
  0x19   :  { %1602 = vmatpush1.bf16.msra.mxu1 %v1601_v10  ;;  %v274_v41 = vld [vmem:[%s4052_s2 + $0x710] sm:$0xff]  ;;  %v87_v43 = vld [vmem:[%s4052_s2 + $0x138] sm:$0xff]  ;;  %v277_v44 = vld [vmem:[%s4052_s2 + $0x728] sm:$0xff]  ;;  %v1613_v46 = vpack.c.bf16 %v82_v38, %v80_v37 }
  0x1a   :  { %1794 = vmatpush1.bf16.msra.mxu0 %v1793_v11  ;;  %1604 = vmatprep.subr.bf16.mxu1 %v1603_v12  ;;  %v279_v45 = vld [vmem:[%s4052_s2 + $0x738] sm:$0xff]  ;;  %v1805_v47 = vpack.c.bf16 %v274_v41, %v272_v39  ;;  %v1615_v48 = vpack.c.bf16 %v87_v43, %v85_v42  ;;  %v84_v49 = vld [vmem:[%s4052_s2 + $0x120] sm:$0xff]  ;;  %v86_v50 = vld [vmem:[%s4052_s2 + $0x130] sm:$0xff] }
  0x1b   :  { %1796 = vmatprep.subr.bf16.mxu0 %v1795_v16  ;;  %v276_v51 = vld [vmem:[%s4052_s2 + $0x720] sm:$0xff]  ;;  %v1807_v52 = vpack.c.bf16 %v279_v45, %v277_v44  ;;  %v278_v53 = vld [vmem:[%s4052_s2 + $0x730] sm:$0xff]  ;;  %v89_v54 = vld [vmem:[%s4052_s2 + $0x148] sm:$0xff]  ;;  %v1617_v58 = vpack.c.bf16 %v86_v50, %v84_v49 }
  0x1c   :  { %v91_v55 = vld [vmem:[%s4052_s2 + $0x158] sm:$0xff]  ;;  %v281_v56 = vld [vmem:[%s4052_s2 + $0x748] sm:$0xff]  ;;  %v1809_v59 = vpack.c.bf16 %v278_v53, %v276_v51  ;;  %v88_v61 = vld [vmem:[%s4052_s2 + $0x140] sm:$0xff] }
  0x1d   :  { %1606 = vmatpush1.bf16.msra.mxu1 %v1605_v22  ;;  %v283_v57 = vld [vmem:[%s4052_s2 + $0x758] sm:$0xff]  ;;  %v1619_v60 = vpack.c.bf16 %v91_v55, %v89_v54  ;;  %v90_v62 = vld [vmem:[%s4052_s2 + $0x150] sm:$0xff]  ;;  %v280_v63 = vld [vmem:[%s4052_s2 + $0x740] sm:$0xff] }
  0x1e   :  { %1798 = vmatpush1.bf16.msra.mxu0 %v1797_v23  ;;  %1608 = vmatprep.subr.bf16.mxu1 %v1607_v24  ;;  %v1811_v0 = vpack.c.bf16 %v283_v57, %v281_v56  ;;  %v282_v1 = vld [vmem:[%s4052_s2 + $0x750] sm:$0xff]  ;;  %v93_v2 = vld [vmem:[%s4052_s2 + $0x168] sm:$0xff]  ;;  %v95_v3 = vld [vmem:[%s4052_s2 + $0x178] sm:$0xff]  ;;  %v1621_v6 = vpack.c.bf16 %v90_v62, %v88_v61 }
  0x1f   :  { %1800 = vmatprep.subr.bf16.mxu0 %v1799_v28  ;;  %v285_v4 = vld [vmem:[%s4052_s2 + $0x768] sm:$0xff]  ;;  %v287_v5 = vld [vmem:[%s4052_s2 + $0x778] sm:$0xff]  ;;  %v92_v7 = vld [vmem:[%s4052_s2 + $0x160] sm:$0xff]  ;;  %v1813_v8 = vpack.c.bf16 %v282_v1, %v280_v63  ;;  %v1623_v9 = vpack.c.bf16 %v95_v3, %v93_v2 }
  0x20   :  { %v94_v10 = vld [vmem:[%s4052_s2 + $0x170] sm:$0xff]  ;;  %v284_v11 = vld [vmem:[%s4052_s2 + $0x760] sm:$0xff]  ;;  %v1815_v13 = vpack.c.bf16 %v287_v5, %v285_v4  ;;  %v97_v14 = vld [vmem:[%s4052_s2 + $0x188] sm:$0xff] }
  0x21   :  { %1610 = vmatpush1.bf16.msra.mxu1 %v1609_v34  ;;  %v286_v12 = vld [vmem:[%s4052_s2 + $0x770] sm:$0xff]  ;;  %v99_v15 = vld [vmem:[%s4052_s2 + $0x198] sm:$0xff]  ;;  %v33_v16 = vld [vmem:[%s4053_s0 + $0x8] sm:$0xff]  ;;  %v1625_v20 = vpack.c.bf16 %v94_v10, %v92_v7 }
  0x22   :  { %1802 = vmatpush1.bf16.msra.mxu0 %v1801_v35  ;;  %1612 = vmatprep.subr.bf16.mxu1 %v1611_v36  ;;  %v289_v17 = vld [vmem:[%s4052_s2 + $0x788] sm:$0xff]  ;;  %v291_v18 = vld [vmem:[%s4052_s2 + $0x798] sm:$0xff]  ;;  %v1817_v21 = vpack.c.bf16 %v286_v12, %v284_v11  ;;  %v1627_v22 = vpack.c.bf16 %v99_v15, %v97_v14  ;;  %v96_v23 = vld [vmem:[%s4052_s2 + $0x180] sm:$0xff] }
  0x23   :  { %1804 = vmatprep.subr.bf16.mxu0 %v1803_v40  ;;  %636 = vmatprep.mubr.f32.mxu1 %v33_v16  ;;  %v39_v19 = vld [vmem:[%s4053_s0 + $0x38] sm:$0xff]  ;;  %v98_v24 = vld [vmem:[%s4052_s2 + $0x190] sm:$0xff]  ;;  %v288_v25 = vld [vmem:[%s4052_s2 + $0x780] sm:$0xff]  ;;  %v1819_v26 = vpack.c.bf16 %v291_v18, %v289_v17 }
  0x24   :  { %849 = vmatprep.mubr.f32.mxu0 %v39_v19  ;;  %v290_v27 = vld [vmem:[%s4052_s2 + $0x790] sm:$0xff]  ;;  %v101_v28 = vld [vmem:[%s4052_s2 + $0x1a8] sm:$0xff]  ;;  %v103_v29 = vld [vmem:[%s4052_s2 + $0x1b8] sm:$0xff]  ;;  %v1629_v32 = vpack.c.bf16 %v98_v24, %v96_v23 }
  0x25   :  { %1614 = vmatpush1.bf16.msra.mxu1 %v1613_v46  ;;  %v293_v30 = vld [vmem:[%s4052_s2 + $0x7a8] sm:$0xff]  ;;  %v295_v31 = vld [vmem:[%s4052_s2 + $0x7b8] sm:$0xff]  ;;  %v1821_v33 = vpack.c.bf16 %v290_v27, %v288_v25  ;;  %v1631_v34 = vpack.c.bf16 %v103_v29, %v101_v28  ;;  %v100_v35 = vld [vmem:[%s4052_s2 + $0x1a0] sm:$0xff] }
  0x26   :  { %1806 = vmatpush1.bf16.msra.mxu0 %v1805_v47  ;;  %1616 = vmatprep.subr.bf16.mxu1 %v1615_v48  ;;  %v102_v36 = vld [vmem:[%s4052_s2 + $0x1b0] sm:$0xff]  ;;  %v292_v37 = vld [vmem:[%s4052_s2 + $0x7a0] sm:$0xff]  ;;  %v1823_v38 = vpack.c.bf16 %v295_v31, %v293_v30  ;;  %v105_v40 = vld [vmem:[%s4052_s2 + $0x1c8] sm:$0xff] }
  0x27   :  { %1808 = vmatprep.subr.bf16.mxu0 %v1807_v52  ;;  %v294_v39 = vld [vmem:[%s4052_s2 + $0x7b0] sm:$0xff]  ;;  %v107_v41 = vld [vmem:[%s4052_s2 + $0x1d8] sm:$0xff]  ;;  %v297_v42 = vld [vmem:[%s4052_s2 + $0x7c8] sm:$0xff]  ;;  %v1633_v44 = vpack.c.bf16 %v102_v36, %v100_v35 }
  0x28   :  { %v299_v43 = vld [vmem:[%s4052_s2 + $0x7d8] sm:$0xff]  ;;  %v1825_v45 = vpack.c.bf16 %v294_v39, %v292_v37  ;;  %v1635_v46 = vpack.c.bf16 %v107_v41, %v105_v40  ;;  %v104_v47 = vld [vmem:[%s4052_s2 + $0x1c0] sm:$0xff]  ;;  %v106_v48 = vld [vmem:[%s4052_s2 + $0x1d0] sm:$0xff] }
  0x29   :  { %1618 = vmatpush1.bf16.msra.mxu1 %v1617_v58  ;;  %v296_v49 = vld [vmem:[%s4052_s2 + $0x7c0] sm:$0xff]  ;;  %v1827_v50 = vpack.c.bf16 %v299_v43, %v297_v42  ;;  %v298_v51 = vld [vmem:[%s4052_s2 + $0x7d0] sm:$0xff]  ;;  %v109_v52 = vld [vmem:[%s4052_s2 + $0x1e8] sm:$0xff]  ;;  %v1637_v56 = vpack.c.bf16 %v106_v48, %v104_v47 }
  0x2a   :  { %1810 = vmatpush1.bf16.msra.mxu0 %v1809_v59  ;;  %1620 = vmatprep.subr.bf16.mxu1 %v1619_v60  ;;  %v111_v53 = vld [vmem:[%s4052_s2 + $0x1f8] sm:$0xff]  ;;  %v301_v54 = vld [vmem:[%s4052_s2 + $0x7e8] sm:$0xff]  ;;  %v1829_v57 = vpack.c.bf16 %v298_v51, %v296_v49  ;;  %v108_v59 = vld [vmem:[%s4052_s2 + $0x1e0] sm:$0xff] }
  0x2b   :  { %1812 = vmatprep.subr.bf16.mxu0 %v1811_v0  ;;  %v303_v55 = vld [vmem:[%s4052_s2 + $0x7f8] sm:$0xff]  ;;  %v1639_v58 = vpack.c.bf16 %v111_v53, %v109_v52  ;;  %v110_v60 = vld [vmem:[%s4052_s2 + $0x1f0] sm:$0xff]  ;;  %v300_v61 = vld [vmem:[%s4052_s2 + $0x7e0] sm:$0xff] }
  0x2c   :  { %v1831_v62 = vpack.c.bf16 %v303_v55, %v301_v54  ;;  %v302_v63 = vld [vmem:[%s4052_s2 + $0x7f0] sm:$0xff]  ;;  %v113_v0 = vld [vmem:[%s4052_s2 + $0x208] sm:$0xff]  ;;  %v115_v1 = vld [vmem:[%s4052_s2 + $0x218] sm:$0xff]  ;;  %v1641_v4 = vpack.c.bf16 %v110_v60, %v108_v59 }
  0x2d   :  { %1622 = vmatpush1.bf16.msra.mxu1 %v1621_v6  ;;  %v305_v2 = vld [vmem:[%s4052_s2 + $0x808] sm:$0xff]  ;;  %v307_v3 = vld [vmem:[%s4052_s2 + $0x818] sm:$0xff]  ;;  %v1833_v5 = vpack.c.bf16 %v302_v63, %v300_v61  ;;  %v1643_v6 = vpack.c.bf16 %v115_v1, %v113_v0  ;;  %v112_v7 = vld [vmem:[%s4052_s2 + $0x200] sm:$0xff] }
  0x2e   :  { %1814 = vmatpush1.bf16.msra.mxu0 %v1813_v8  ;;  %1624 = vmatprep.subr.bf16.mxu1 %v1623_v9  ;;  %v114_v8 = vld [vmem:[%s4052_s2 + $0x210] sm:$0xff]  ;;  %v304_v9 = vld [vmem:[%s4052_s2 + $0x800] sm:$0xff]  ;;  %v1835_v10 = vpack.c.bf16 %v307_v3, %v305_v2  ;;  %v117_v12 = vld [vmem:[%s4052_s2 + $0x228] sm:$0xff] }
  0x2f   :  { %1816 = vmatprep.subr.bf16.mxu0 %v1815_v13  ;;  %v306_v11 = vld [vmem:[%s4052_s2 + $0x810] sm:$0xff]  ;;  %v119_v13 = vld [vmem:[%s4052_s2 + $0x238] sm:$0xff]  ;;  %v309_v14 = vld [vmem:[%s4052_s2 + $0x828] sm:$0xff]  ;;  %v1645_v17 = vpack.c.bf16 %v114_v8, %v112_v7 }
  0x30   :  { %v311_v15 = vld [vmem:[%s4052_s2 + $0x838] sm:$0xff]  ;;  %v32_v16 = vld [vmem:[%s4053_s0] sm:$0xff]  ;;  %v38_v18 = vld [vmem:[%s4053_s0 + $0x30] sm:$0xff]  ;;  %v1837_v19 = vpack.c.bf16 %v306_v11, %v304_v9 }
  0x31   :  { %1626 = vmatpush1.bf16.msra.mxu1 %v1625_v20  ;;  %v1647_v20 = vpack.c.bf16 %v119_v13, %v117_v12  ;;  %v308_v23 = vld [vmem:[%s4052_s2 + $0x820] sm:$0xff]  ;;  %v1839_v24 = vpack.c.bf16 %v311_v15, %v309_v14  ;;  %v310_v25 = vld [vmem:[%s4052_s2 + $0x830] sm:$0xff]  ;;  %v123_v27 = vld [vmem:[%s4052_s2 + $0x258] sm:$0xff] }
  0x32   :  { %1818 = vmatpush1.bf16.msra.mxu0 %v1817_v21  ;;  %1628 = vmatprep.subr.bf16.mxu1 %v1627_v22  ;;  %v116_v21 = vld [vmem:[%s4052_s2 + $0x220] sm:$0xff]  ;;  %v118_v22 = vld [vmem:[%s4052_s2 + $0x230] sm:$0xff]  ;;  %v313_v28 = vld [vmem:[%s4052_s2 + $0x848] sm:$0xff]  ;;  %v1841_v31 = vpack.c.bf16 %v310_v25, %v308_v23 }
  0x33   :  { %1820 = vmatprep.subr.bf16.mxu0 %v1819_v26  ;;  %v121_v26 = vld [vmem:[%s4052_s2 + $0x248] sm:$0xff]  ;;  %v315_v29 = vld [vmem:[%s4052_s2 + $0x858] sm:$0xff]  ;;  %v1649_v30 = vpack.c.bf16 %v118_v22, %v116_v21  ;;  %v312_v35 = vld [vmem:[%s4052_s2 + $0x840] sm:$0xff] }
  0x34   :  { %v1843_v36 = vpack.c.bf16 %v315_v29, %v313_v28  ;;  %v314_v37 = vld [vmem:[%s4052_s2 + $0x850] sm:$0xff]  ;;  %v127_v39 = vld [vmem:[%s4052_s2 + $0x278] sm:$0xff]  ;;  %v317_v40 = vld [vmem:[%s4052_s2 + $0x868] sm:$0xff] }
  0x35   :  { %1630 = vmatpush1.bf16.msra.mxu1 %v1629_v32  ;;  %v1651_v32 = vpack.c.bf16 %v123_v27, %v121_v26  ;;  %v319_v41 = vld [vmem:[%s4052_s2 + $0x878] sm:$0xff]  ;;  %v1845_v43 = vpack.c.bf16 %v314_v37, %v312_v35  ;;  %v316_v47 = vld [vmem:[%s4052_s2 + $0x860] sm:$0xff]  ;;  %v318_v49 = vld [vmem:[%s4052_s2 + $0x870] sm:$0xff] }
  0x36   :  { %1822 = vmatpush1.bf16.msra.mxu0 %v1821_v33  ;;  %1632 = vmatprep.subr.bf16.mxu1 %v1631_v34  ;;  %v120_v33 = vld [vmem:[%s4052_s2 + $0x240] sm:$0xff]  ;;  %v122_v34 = vld [vmem:[%s4052_s2 + $0x250] sm:$0xff]  ;;  %v1847_v48 = vpack.c.bf16 %v319_v41, %v317_v40  ;;  %v131_v51 = vld [vmem:[%s4052_s2 + $0x298] sm:$0xff]  ;;  %v1849_v55 = vpack.c.bf16 %v318_v49, %v316_v47 }
  0x37   :  { %1824 = vmatprep.subr.bf16.mxu0 %v1823_v38  ;;  %v125_v38 = vld [vmem:[%s4052_s2 + $0x268] sm:$0xff]  ;;  %v1653_v42 = vpack.c.bf16 %v122_v34, %v120_v33  ;;  %v323_v53 = vld [vmem:[%s4052_s2 + $0x898] sm:$0xff]  ;;  %v320_v59 = vld [vmem:[%s4052_s2 + $0x880] sm:$0xff] }
  0x38   :  { %v321_v52 = vld [vmem:[%s4052_s2 + $0x888] sm:$0xff]  ;;  %v322_v61 = vld [vmem:[%s4052_s2 + $0x890] sm:$0xff]  ;;  %v135_v63 = vld [vmem:[%s4052_s2 + $0x2b8] sm:$0xff] }
  0x39   :  { %1634 = vmatpush1.bf16.msra.mxu1 %v1633_v44  ;;  %v1655_v44 = vpack.c.bf16 %v127_v39, %v125_v38  ;;  %v1851_v60 = vpack.c.bf16 %v323_v53, %v321_v52  ;;  %v325_v0 = vld [vmem:[%s4052_s2 + $0x8a8] sm:$0xff]  ;;  %v327_v1 = vld [vmem:[%s4052_s2 + $0x8b8] sm:$0xff]  ;;  %v1853_v3 = vpack.c.bf16 %v322_v61, %v320_v59  ;;  %v324_v7 = vld [vmem:[%s4052_s2 + $0x8a0] sm:$0xff] }
  0x3a   :  { %1826 = vmatpush1.bf16.msra.mxu0 %v1825_v45  ;;  %1636 = vmatprep.subr.bf16.mxu1 %v1635_v46  ;;  %v124_v45 = vld [vmem:[%s4052_s2 + $0x260] sm:$0xff]  ;;  %v126_v46 = vld [vmem:[%s4052_s2 + $0x270] sm:$0xff]  ;;  %v1855_v8 = vpack.c.bf16 %v327_v1, %v325_v0  ;;  %v139_v11 = vld [vmem:[%s4052_s2 + $0x2d8] sm:$0xff] }
  0x3b   :  { %1828 = vmatprep.subr.bf16.mxu0 %v1827_v50  ;;  %v129_v50 = vld [vmem:[%s4052_s2 + $0x288] sm:$0xff]  ;;  %v1657_v54 = vpack.c.bf16 %v126_v46, %v124_v45  ;;  %v326_v9 = vld [vmem:[%s4052_s2 + $0x8b0] sm:$0xff]  ;;  %v331_v13 = vld [vmem:[%s4052_s2 + $0x8d8] sm:$0xff] }
  0x3c   :  { %v329_v12 = vld [vmem:[%s4052_s2 + $0x8c8] sm:$0xff]  ;;  %v136_v15 = vld [vmem:[%s4052_s2 + $0x2c0] sm:$0xff]  ;;  %v143_v23 = vld [vmem:[%s4052_s2 + $0x2f8] sm:$0xff] }
  0x3d   :  { %1638 = vmatpush1.bf16.msra.mxu1 %v1637_v56  ;;  %v1659_v56 = vpack.c.bf16 %v131_v51, %v129_v50  ;;  %v1859_v21 = vpack.c.bf16 %v331_v13, %v329_v12  ;;  %v141_v22 = vld [vmem:[%s4052_s2 + $0x2e8] sm:$0xff]  ;;  %v335_v26 = vld [vmem:[%s4052_s2 + $0x8f8] sm:$0xff]  ;;  %v332_v33 = vld [vmem:[%s4052_s2 + $0x8e0] sm:$0xff] }
  0x3e   :  { %1830 = vmatpush1.bf16.msra.mxu0 %v1829_v57  ;;  %1640 = vmatprep.subr.bf16.mxu1 %v1639_v58  ;;  %v128_v57 = vld [vmem:[%s4052_s2 + $0x280] sm:$0xff]  ;;  %v130_v58 = vld [vmem:[%s4052_s2 + $0x290] sm:$0xff]  ;;  %v333_v25 = vld [vmem:[%s4052_s2 + $0x8e8] sm:$0xff] }
  0x3f   :  { %1832 = vmatprep.subr.bf16.mxu0 %v1831_v62  ;;  %v133_v62 = vld [vmem:[%s4052_s2 + $0x2a8] sm:$0xff]  ;;  %v1661_v2 = vpack.c.bf16 %v130_v58, %v128_v57  ;;  %v1863_v34 = vpack.c.bf16 %v335_v26, %v333_v25  ;;  %v334_v35 = vld [vmem:[%s4052_s2 + $0x8f0] sm:$0xff]  ;;  %v147_v37 = vld [vmem:[%s4052_s2 + $0x318] sm:$0xff] }
  0x40   :  { %v41_v27 = vld [vmem:[%s4053_s0 + $0x48] sm:$0xff]  ;;  %v339_v39 = vld [vmem:[%s4052_s2 + $0x918] sm:$0xff]  ;;  %v1865_v41 = vpack.c.bf16 %v334_v35, %v332_v33  ;;  %v336_v45 = vld [vmem:[%s4052_s2 + $0x900] sm:$0xff] }
  0x41   :  { %1642 = vmatpush1.bf16.msra.mxu1 %v1641_v4  ;;  %v1663_v4 = vpack.c.bf16 %v135_v63, %v133_v62  ;;  %v337_v38 = vld [vmem:[%s4052_s2 + $0x908] sm:$0xff]  ;;  %v338_v47 = vld [vmem:[%s4052_s2 + $0x910] sm:$0xff]  ;;  %v151_v49 = vld [vmem:[%s4052_s2 + $0x338] sm:$0xff] }
  0x42   :  { %1834 = vmatpush1.bf16.msra.mxu0 %v1833_v5  ;;  %1644 = vmatprep.subr.bf16.mxu1 %v1643_v6  ;;  %v132_v5 = vld [vmem:[%s4052_s2 + $0x2a0] sm:$0xff]  ;;  %v134_v6 = vld [vmem:[%s4052_s2 + $0x2b0] sm:$0xff]  ;;  %v1867_v46 = vpack.c.bf16 %v339_v39, %v337_v38  ;;  %v341_v50 = vld [vmem:[%s4052_s2 + $0x928] sm:$0xff]  ;;  %v1869_v53 = vpack.c.bf16 %v338_v47, %v336_v45 }
  0x43   :  { %1836 = vmatprep.subr.bf16.mxu0 %v1835_v10  ;;  %v137_v10 = vld [vmem:[%s4052_s2 + $0x2c8] sm:$0xff]  ;;  %v1665_v14 = vpack.c.bf16 %v134_v6, %v132_v5  ;;  %v343_v51 = vld [vmem:[%s4052_s2 + $0x938] sm:$0xff]  ;;  %v340_v57 = vld [vmem:[%s4052_s2 + $0x920] sm:$0xff] }
  0x44   :  { %637 = vmatmul.mubr.f32.vlgmr.msra.gmra.mrb[0].mxu1 %v32_v16  ;;  %v1857_v16 = vpack.c.bf16 %v326_v9, %v324_v7  ;;  %v1871_v58 = vpack.c.bf16 %v343_v51, %v341_v50  ;;  %v342_v59 = vld [vmem:[%s4052_s2 + $0x930] sm:$0xff]  ;;  %v155_v61 = vld [vmem:[%s4052_s2 + $0x358] sm:$0xff]  ;;  %v345_v62 = vld [vmem:[%s4052_s2 + $0x948] sm:$0xff] }
  0x45   :  { %1646 = vmatpush1.bf16.msra.mxu1 %v1645_v17  ;;  %850 = vmatmul.mubr.f32.vlgmr.msra.gmra.mrb[0].mxu0 %v38_v18  ;;  %v1667_v17 = vpack.c.bf16 %v139_v11, %v137_v10  ;;  %v138_v18 = vld [vmem:[%s4052_s2 + $0x2d0] sm:$0xff]  ;;  %v347_v63 = vld [vmem:[%s4052_s2 + $0x958] sm:$0xff]  ;;  %v1873_v1 = vpack.c.bf16 %v342_v59, %v340_v57  ;;  %v344_v5 = vld [vmem:[%s4052_s2 + $0x940] sm:$0xff] }
  0x46   :  { %1838 = vmatpush1.bf16.msra.mxu0 %v1837_v19  ;;  %1648 = vmatprep.subr.bf16.mxu1 %v1647_v20  ;;  %v328_v19 = vld [vmem:[%s4052_s2 + $0x8c0] sm:$0xff]  ;;  %v330_v20 = vld [vmem:[%s4052_s2 + $0x8d0] sm:$0xff]  ;;  %v1669_v28 = vpack.c.bf16 %v138_v18, %v136_v15  ;;  %v1875_v6 = vpack.c.bf16 %v347_v63, %v345_v62  ;;  %v159_v9 = vld [vmem:[%s4052_s2 + $0x378] sm:$0xff] }
  0x47   :  { %1840 = vmatprep.subr.bf16.mxu0 %v1839_v24  ;;  %v35_v24 = vld [vmem:[%s4053_s0 + $0x18] sm:$0xff]  ;;  %920 = vmatprep.mubr.f32.mxu0 %v41_v27  ;;  %v1861_v29 = vpack.c.bf16 %v330_v20, %v328_v19  ;;  %v346_v7 = vld [vmem:[%s4052_s2 + $0x950] sm:$0xff]  ;;  %v349_v10 = vld [vmem:[%s4052_s2 + $0x968] sm:$0xff] }
  0x48   :  { %707 = vmatprep.mubr.f32.mxu1 %v35_v24  ;;  %v351_v11 = vld [vmem:[%s4052_s2 + $0x978] sm:$0xff]  ;;  %v1877_v13 = vpack.c.bf16 %v346_v7, %v344_v5  ;;  %v156_v15 = vld [vmem:[%s4052_s2 + $0x360] sm:$0xff]  ;;  %v350_v19 = vld [vmem:[%s4052_s2 + $0x970] sm:$0xff] }
  0x49   :  { %1650 = vmatpush1.bf16.msra.mxu1 %v1649_v30  ;;  %v1671_v30 = vpack.c.bf16 %v143_v23, %v141_v22  ;;  %v1879_v18 = vpack.c.bf16 %v351_v11, %v349_v10  ;;  %v161_v20 = vld [vmem:[%s4052_s2 + $0x388] sm:$0xff]  ;;  %v355_v23 = vld [vmem:[%s4052_s2 + $0x998] sm:$0xff]  ;;  %v160_v27 = vld [vmem:[%s4052_s2 + $0x380] sm:$0xff] }
  0x4a   :  { %1842 = vmatpush1.bf16.msra.mxu0 %v1841_v31  ;;  %1652 = vmatprep.subr.bf16.mxu1 %v1651_v32  ;;  %v140_v31 = vld [vmem:[%s4052_s2 + $0x2e0] sm:$0xff]  ;;  %v142_v32 = vld [vmem:[%s4052_s2 + $0x2f0] sm:$0xff]  ;;  %v353_v22 = vld [vmem:[%s4052_s2 + $0x988] sm:$0xff] }
  0x4b   :  { %1844 = vmatprep.subr.bf16.mxu0 %v1843_v36  ;;  %v145_v36 = vld [vmem:[%s4052_s2 + $0x308] sm:$0xff]  ;;  %v1673_v40 = vpack.c.bf16 %v142_v32, %v140_v31  ;;  %v354_v31 = vld [vmem:[%s4052_s2 + $0x990] sm:$0xff]  ;;  %v167_v33 = vld [vmem:[%s4052_s2 + $0x3b8] sm:$0xff] }
  0x4c   :  { %v165_v32 = vld [vmem:[%s4052_s2 + $0x3a8] sm:$0xff]  ;;  %v359_v35 = vld [vmem:[%s4052_s2 + $0x9b8] sm:$0xff]  ;;  %v164_v39 = vld [vmem:[%s4052_s2 + $0x3a0] sm:$0xff] }
  0x4d   :  { %1654 = vmatpush1.bf16.msra.mxu1 %v1653_v42  ;;  %v1675_v42 = vpack.c.bf16 %v147_v37, %v145_v36  ;;  %v1695_v38 = vpack.c.bf16 %v167_v33, %v165_v32  ;;  %v171_v45 = vld [vmem:[%s4052_s2 + $0x3d8] sm:$0xff]  ;;  %v168_v51 = vld [vmem:[%s4052_s2 + $0x3c0] sm:$0xff]  ;;  %v377_v32 = vld [vmem:[%s4052_s2 + $0xa48] sm:$0xff] }
  0x4e   :  { %1846 = vmatpush1.bf16.msra.mxu0 %v1845_v43  ;;  %1656 = vmatprep.subr.bf16.mxu1 %v1655_v44  ;;  %v144_v43 = vld [vmem:[%s4052_s2 + $0x300] sm:$0xff]  ;;  %v146_v44 = vld [vmem:[%s4052_s2 + $0x310] sm:$0xff]  ;;  %v363_v47 = vld [vmem:[%s4052_s2 + $0x9d8] sm:$0xff] }
  0x4f   :  { %1848 = vmatprep.subr.bf16.mxu0 %v1847_v48  ;;  %v149_v48 = vld [vmem:[%s4052_s2 + $0x328] sm:$0xff]  ;;  %v1677_v52 = vpack.c.bf16 %v146_v44, %v144_v43  ;;  %v358_v43 = vld [vmem:[%s4052_s2 + $0x9b0] sm:$0xff]  ;;  %v175_v57 = vld [vmem:[%s4052_s2 + $0x3f8] sm:$0xff] }
  0x50   :  { %v169_v44 = vld [vmem:[%s4052_s2 + $0x3c8] sm:$0xff]  ;;  %v367_v59 = vld [vmem:[%s4052_s2 + $0x9f8] sm:$0xff]  ;;  %v172_v63 = vld [vmem:[%s4052_s2 + $0x3e0] sm:$0xff] }
  0x51   :  { %1658 = vmatpush1.bf16.msra.mxu1 %v1657_v54  ;;  %v1679_v54 = vpack.c.bf16 %v151_v49, %v149_v48  ;;  %v1699_v50 = vpack.c.bf16 %v171_v45, %v169_v44  ;;  %v179_v5 = vld [vmem:[%s4052_s2 + $0x418] sm:$0xff]  ;;  %v176_v11 = vld [vmem:[%s4052_s2 + $0x400] sm:$0xff]  ;;  %v189_v44 = vld [vmem:[%s4052_s2 + $0x468] sm:$0xff] }
  0x52   :  { %1850 = vmatpush1.bf16.msra.mxu0 %v1849_v55  ;;  %1660 = vmatprep.subr.bf16.mxu1 %v1659_v56  ;;  %v148_v55 = vld [vmem:[%s4052_s2 + $0x320] sm:$0xff]  ;;  %v150_v56 = vld [vmem:[%s4052_s2 + $0x330] sm:$0xff]  ;;  %v371_v7 = vld [vmem:[%s4052_s2 + $0xa18] sm:$0xff] }
  0x53   :  { %1852 = vmatprep.subr.bf16.mxu0 %v1851_v60  ;;  %v153_v60 = vld [vmem:[%s4052_s2 + $0x348] sm:$0xff]  ;;  %v1681_v0 = vpack.c.bf16 %v150_v56, %v148_v55  ;;  %v362_v55 = vld [vmem:[%s4052_s2 + $0x9d0] sm:$0xff]  ;;  %v379_v33 = vld [vmem:[%s4052_s2 + $0xa58] sm:$0xff] }
  0x54   :  { %v173_v56 = vld [vmem:[%s4052_s2 + $0x3e8] sm:$0xff]  ;;  %v191_v45 = vld [vmem:[%s4052_s2 + $0x478] sm:$0xff] }
  0x55   :  { %1662 = vmatpush1.bf16.msra.mxu1 %v1661_v2  ;;  %v1683_v2 = vpack.c.bf16 %v155_v61, %v153_v60  ;;  %v1703_v62 = vpack.c.bf16 %v175_v57, %v173_v56  ;;  %v193_v56 = vld [vmem:[%s4052_s2 + $0x488] sm:$0xff]  ;;  %v195_v57 = vld [vmem:[%s4052_s2 + $0x498] sm:$0xff] }
  0x56   :  { %1854 = vmatpush1.bf16.msra.mxu0 %v1853_v3  ;;  %1664 = vmatprep.subr.bf16.mxu1 %v1663_v4  ;;  %v152_v3 = vld [vmem:[%s4052_s2 + $0x340] sm:$0xff]  ;;  %v154_v4 = vld [vmem:[%s4052_s2 + $0x350] sm:$0xff] }
  0x57   :  { %1856 = vmatprep.subr.bf16.mxu0 %v1855_v8  ;;  %v157_v8 = vld [vmem:[%s4052_s2 + $0x368] sm:$0xff]  ;;  %v1685_v12 = vpack.c.bf16 %v154_v4, %v152_v3  ;;  %v366_v3 = vld [vmem:[%s4052_s2 + $0x9f0] sm:$0xff] }
  0x58   :  { %v177_v4 = vld [vmem:[%s4052_s2 + $0x408] sm:$0xff] }
  0x59   :  { %1666 = vmatpush1.bf16.msra.mxu1 %v1665_v14  ;;  %v1687_v14 = vpack.c.bf16 %v159_v9, %v157_v8  ;;  %v1707_v10 = vpack.c.bf16 %v179_v5, %v177_v4  ;;  %v197_v4 = vld [vmem:[%s4052_s2 + $0x4a8] sm:$0xff]  ;;  %v199_v5 = vld [vmem:[%s4052_s2 + $0x4b8] sm:$0xff] }
  0x5a   :  { %1858 = vmatpush1.bf16.msra.mxu0 %v1857_v16  ;;  %1668 = vmatprep.subr.bf16.mxu1 %v1667_v17  ;;  %v158_v16 = vld [vmem:[%s4052_s2 + $0x370] sm:$0xff]  ;;  %v348_v17 = vld [vmem:[%s4052_s2 + $0x960] sm:$0xff] }
  0x5b   :  { %1860 = vmatprep.subr.bf16.mxu0 %v1859_v21  ;;  %v163_v21 = vld [vmem:[%s4052_s2 + $0x398] sm:$0xff]  ;;  %v1689_v24 = vpack.c.bf16 %v158_v16, %v156_v15  ;;  %v1881_v25 = vpack.c.bf16 %v350_v19, %v348_v17  ;;  %v370_v15 = vld [vmem:[%s4052_s2 + $0xa10] sm:$0xff]  ;;  %v181_v16 = vld [vmem:[%s4052_s2 + $0x428] sm:$0xff] }
  0x5c   :  { %v1691_v26 = vpack.c.bf16 %v163_v21, %v161_v20  ;;  %v183_v17 = vld [vmem:[%s4052_s2 + $0x438] sm:$0xff]  ;;  %v34_v20 = vld [vmem:[%s4053_s0 + $0x10] sm:$0xff] }
  0x5d   :  { %1670 = vmatpush1.bf16.msra.mxu1 %v1669_v28  ;;  %v162_v28 = vld [vmem:[%s4052_s2 + $0x390] sm:$0xff]  ;;  %v375_v19 = vld [vmem:[%s4052_s2 + $0xa38] sm:$0xff] }
  0x5e   :  { %1862 = vmatpush1.bf16.msra.mxu0 %v1861_v29  ;;  %1672 = vmatprep.subr.bf16.mxu1 %v1671_v30  ;;  %v352_v29 = vld [vmem:[%s4052_s2 + $0x980] sm:$0xff]  ;;  %v1883_v30 = vpack.c.bf16 %v355_v23, %v353_v22  ;;  %v1693_v36 = vpack.c.bf16 %v162_v28, %v160_v27 }
  0x5f   :  { %1864 = vmatprep.subr.bf16.mxu0 %v1863_v34  ;;  %v357_v34 = vld [vmem:[%s4052_s2 + $0x9a8] sm:$0xff]  ;;  %v1885_v37 = vpack.c.bf16 %v354_v31, %v352_v29  ;;  %v40_v22 = vld [vmem:[%s4053_s0 + $0x40] sm:$0xff]  ;;  %v374_v29 = vld [vmem:[%s4052_s2 + $0xa30] sm:$0xff] }
  0x60   :  { %v372_v27 = vld [vmem:[%s4052_s2 + $0xa20] sm:$0xff]  ;;  %v187_v31 = vld [vmem:[%s4052_s2 + $0x458] sm:$0xff] }
  0x61   :  { %1674 = vmatpush1.bf16.msra.mxu1 %v1673_v40  ;;  %v166_v40 = vld [vmem:[%s4052_s2 + $0x3b0] sm:$0xff] }
  0x62   :  { %1866 = vmatpush1.bf16.msra.mxu0 %v1865_v41  ;;  %1676 = vmatprep.subr.bf16.mxu1 %v1675_v42  ;;  %v356_v41 = vld [vmem:[%s4052_s2 + $0x9a0] sm:$0xff]  ;;  %v1887_v42 = vpack.c.bf16 %v359_v35, %v357_v34  ;;  %v1697_v48 = vpack.c.bf16 %v166_v40, %v164_v39  ;;  %v37_v34 = vld [vmem:[%s4053_s0 + $0x28] sm:$0xff]  ;;  %v186_v40 = vld [vmem:[%s4052_s2 + $0x450] sm:$0xff] }
  0x63   :  { %1868 = vmatprep.subr.bf16.mxu0 %v1867_v46  ;;  %v361_v46 = vld [vmem:[%s4052_s2 + $0x9c8] sm:$0xff]  ;;  %v1889_v49 = vpack.c.bf16 %v358_v43, %v356_v41  ;;  %v184_v39 = vld [vmem:[%s4052_s2 + $0x440] sm:$0xff]  ;;  %v378_v43 = vld [vmem:[%s4052_s2 + $0xa50] sm:$0xff] }
  0x64   :  { %v376_v41 = vld [vmem:[%s4052_s2 + $0xa40] sm:$0xff] }
  0x65   :  { %1678 = vmatpush1.bf16.msra.mxu1 %v1677_v52  ;;  %v170_v52 = vld [vmem:[%s4052_s2 + $0x3d0] sm:$0xff] }
  0x66   :  { %1870 = vmatpush1.bf16.msra.mxu0 %v1869_v53  ;;  %1680 = vmatprep.subr.bf16.mxu1 %v1679_v54  ;;  %v360_v53 = vld [vmem:[%s4052_s2 + $0x9c0] sm:$0xff]  ;;  %v1891_v54 = vpack.c.bf16 %v363_v47, %v361_v46  ;;  %v1701_v60 = vpack.c.bf16 %v170_v52, %v168_v51  ;;  %v381_v46 = vld [vmem:[%s4052_s2 + $0xa68] sm:$0xff]  ;;  %v383_v47 = vld [vmem:[%s4052_s2 + $0xa78] sm:$0xff] }
  0x67   :  { %1872 = vmatprep.subr.bf16.mxu0 %v1871_v58  ;;  %v365_v58 = vld [vmem:[%s4052_s2 + $0x9e8] sm:$0xff]  ;;  %v1893_v61 = vpack.c.bf16 %v362_v55, %v360_v53  ;;  %v188_v51 = vld [vmem:[%s4052_s2 + $0x460] sm:$0xff]  ;;  %v190_v52 = vld [vmem:[%s4052_s2 + $0x470] sm:$0xff] }
  0x68   :  { %v380_v53 = vld [vmem:[%s4052_s2 + $0xa60] sm:$0xff]  ;;  %v382_v55 = vld [vmem:[%s4052_s2 + $0xa70] sm:$0xff] }
  0x69   :  { %1682 = vmatpush1.bf16.msra.mxu1 %v1681_v0  ;;  %v174_v0 = vld [vmem:[%s4052_s2 + $0x3f0] sm:$0xff] }
  0x6a   :  { %1874 = vmatpush1.bf16.msra.mxu0 %v1873_v1  ;;  %1684 = vmatprep.subr.bf16.mxu1 %v1683_v2  ;;  %v364_v1 = vld [vmem:[%s4052_s2 + $0x9e0] sm:$0xff]  ;;  %v1895_v2 = vpack.c.bf16 %v367_v59, %v365_v58  ;;  %v1705_v8 = vpack.c.bf16 %v174_v0, %v172_v63  ;;  %v385_v58 = vld [vmem:[%s4052_s2 + $0xa88] sm:$0xff]  ;;  %v387_v59 = vld [vmem:[%s4052_s2 + $0xa98] sm:$0xff] }
  0x6b   :  { %1876 = vmatprep.subr.bf16.mxu0 %v1875_v6  ;;  %v369_v6 = vld [vmem:[%s4052_s2 + $0xa08] sm:$0xff]  ;;  %v1897_v9 = vpack.c.bf16 %v366_v3, %v364_v1  ;;  %v192_v63 = vld [vmem:[%s4052_s2 + $0x480] sm:$0xff]  ;;  %v194_v0 = vld [vmem:[%s4052_s2 + $0x490] sm:$0xff] }
  0x6c   :  { %v384_v1 = vld [vmem:[%s4052_s2 + $0xa80] sm:$0xff]  ;;  %v386_v3 = vld [vmem:[%s4052_s2 + $0xa90] sm:$0xff] }
  0x6d   :  { %1686 = vmatpush1.bf16.msra.mxu1 %v1685_v12  ;;  %v178_v12 = vld [vmem:[%s4052_s2 + $0x410] sm:$0xff] }
  0x6e   :  { %1878 = vmatpush1.bf16.msra.mxu0 %v1877_v13  ;;  %1688 = vmatprep.subr.bf16.mxu1 %v1687_v14  ;;  %v368_v13 = vld [vmem:[%s4052_s2 + $0xa00] sm:$0xff]  ;;  %v1899_v14 = vpack.c.bf16 %v371_v7, %v369_v6  ;;  %v1709_v21 = vpack.c.bf16 %v178_v12, %v176_v11  ;;  %v389_v6 = vld [vmem:[%s4052_s2 + $0xaa8] sm:$0xff]  ;;  %v391_v7 = vld [vmem:[%s4052_s2 + $0xab8] sm:$0xff] }
  0x6f   :  { %1880 = vmatprep.subr.bf16.mxu0 %v1879_v18  ;;  %v373_v18 = vld [vmem:[%s4052_s2 + $0xa28] sm:$0xff]  ;;  %v1901_v23 = vpack.c.bf16 %v370_v15, %v368_v13  ;;  %v196_v11 = vld [vmem:[%s4052_s2 + $0x4a0] sm:$0xff]  ;;  %v198_v12 = vld [vmem:[%s4052_s2 + $0x4b0] sm:$0xff] }
  0x70   :  { %v1903_v28 = vpack.c.bf16 %v375_v19, %v373_v18  ;;  %v388_v13 = vld [vmem:[%s4052_s2 + $0xaa0] sm:$0xff]  ;;  %v390_v15 = vld [vmem:[%s4052_s2 + $0xab0] sm:$0xff]  ;;  %v393_v18 = vld [vmem:[%s4052_s2 + $0xac8] sm:$0xff] }
  0x71   :  { %1690 = vmatpush1.bf16.msra.mxu1 %v1689_v24  ;;  %v1711_v24 = vpack.c.bf16 %v183_v17, %v181_v16  ;;  %v201_v16 = vld [vmem:[%s4052_s2 + $0x4c8] sm:$0xff]  ;;  %v203_v17 = vld [vmem:[%s4052_s2 + $0x4d8] sm:$0xff] }
  0x72   :  { %1882 = vmatpush1.bf16.msra.mxu0 %v1881_v25  ;;  %1692 = vmatprep.subr.bf16.mxu1 %v1691_v26  ;;  %v180_v25 = vld [vmem:[%s4052_s2 + $0x420] sm:$0xff]  ;;  %v182_v26 = vld [vmem:[%s4052_s2 + $0x430] sm:$0xff]  ;;  %v395_v19 = vld [vmem:[%s4052_s2 + $0xad8] sm:$0xff] }
  0x73   :  { %1884 = vmatprep.subr.bf16.mxu0 %v1883_v30  ;;  %v185_v30 = vld [vmem:[%s4052_s2 + $0x448] sm:$0xff]  ;;  %v1713_v35 = vpack.c.bf16 %v182_v26, %v180_v25  ;;  %v392_v25 = vld [vmem:[%s4052_s2 + $0xac0] sm:$0xff]  ;;  %v1923_v26 = vpack.c.bf16 %v395_v19, %v393_v18 }
  0x74   :  { %v220_v19 = vld [vmem:[%s4052_s2 + $0x560] sm:$0xff] }
  0x75   :  { %1694 = vmatpush1.bf16.msra.mxu1 %v1693_v36  ;;  %v43_v36 = vld [vmem:[%s4053_s0 + $0x58] sm:$0xff] }
  0x76   :  { %1886 = vmatpush1.bf16.msra.mxu0 %v1885_v37  ;;  %1696 = vmatprep.subr.bf16.mxu1 %v1695_v38  ;;  %v1905_v37 = vpack.c.bf16 %v374_v29, %v372_v27  ;;  %v1715_v38 = vpack.c.bf16 %v187_v31, %v185_v30  ;;  %v394_v27 = vld [vmem:[%s4052_s2 + $0xad0] sm:$0xff]  ;;  %v207_v29 = vld [vmem:[%s4052_s2 + $0x4f8] sm:$0xff]  ;;  %v397_v30 = vld [vmem:[%s4052_s2 + $0xae8] sm:$0xff] }
  0x77   :  { %1888 = vmatprep.subr.bf16.mxu0 %v1887_v42  ;;  %v1907_v42 = vpack.c.bf16 %v379_v33, %v377_v32  ;;  %v399_v31 = vld [vmem:[%s4052_s2 + $0xaf8] sm:$0xff]  ;;  %v1925_v33 = vpack.c.bf16 %v394_v27, %v392_v25 }
  0x78   :  { %v227_v25 = vld [vmem:[%s4052_s2 + $0x598] sm:$0xff] }
  0x79   :  { %1698 = vmatpush1.bf16.msra.mxu1 %v1697_v48  ;;  %v1717_v48 = vpack.c.bf16 %v186_v40, %v184_v39  ;;  %v398_v39 = vld [vmem:[%s4052_s2 + $0xaf0] sm:$0xff]  ;;  %v209_v40 = vld [vmem:[%s4052_s2 + $0x508] sm:$0xff]  ;;  %v419_v27 = vld [vmem:[%s4052_s2 + $0xb98] sm:$0xff] }
  0x7a   :  { %1890 = vmatpush1.bf16.msra.mxu0 %v1889_v49  ;;  %1700 = vmatprep.subr.bf16.mxu1 %v1699_v50  ;;  %v1909_v49 = vpack.c.bf16 %v378_v43, %v376_v41  ;;  %v1719_v50 = vpack.c.bf16 %v191_v45, %v189_v44  ;;  %v211_v41 = vld [vmem:[%s4052_s2 + $0x518] sm:$0xff] }
  0x7b   :  { %1892 = vmatprep.subr.bf16.mxu0 %v1891_v54  ;;  %v1911_v54 = vpack.c.bf16 %v383_v47, %v381_v46  ;;  %v403_v43 = vld [vmem:[%s4052_s2 + $0xb18] sm:$0xff]  ;;  %v1739_v46 = vpack.c.bf16 %v211_v41, %v209_v40  ;;  %v208_v47 = vld [vmem:[%s4052_s2 + $0x500] sm:$0xff] }
  0x7d   :  { %1702 = vmatpush1.bf16.msra.mxu1 %v1701_v60  ;;  %v1721_v60 = vpack.c.bf16 %v190_v52, %v188_v51  ;;  %v402_v51 = vld [vmem:[%s4052_s2 + $0xb10] sm:$0xff]  ;;  %v213_v52 = vld [vmem:[%s4052_s2 + $0x528] sm:$0xff] }
  0x7e   :  { %1894 = vmatpush1.bf16.msra.mxu0 %v1893_v61  ;;  %1704 = vmatprep.subr.bf16.mxu1 %v1703_v62  ;;  %v1913_v61 = vpack.c.bf16 %v382_v55, %v380_v53  ;;  %v1723_v62 = vpack.c.bf16 %v195_v57, %v193_v56  ;;  %v215_v53 = vld [vmem:[%s4052_s2 + $0x538] sm:$0xff] }
  0x7f   :  { %1896 = vmatprep.subr.bf16.mxu0 %v1895_v2  ;;  %v1915_v2 = vpack.c.bf16 %v387_v59, %v385_v58  ;;  %v407_v55 = vld [vmem:[%s4052_s2 + $0xb38] sm:$0xff]  ;;  %v1743_v58 = vpack.c.bf16 %v215_v53, %v213_v52  ;;  %v212_v59 = vld [vmem:[%s4052_s2 + $0x520] sm:$0xff] }
  0x81   :  { %1706 = vmatpush1.bf16.msra.mxu1 %v1705_v8  ;;  %v1725_v8 = vpack.c.bf16 %v194_v0, %v192_v63  ;;  %v406_v63 = vld [vmem:[%s4052_s2 + $0xb30] sm:$0xff]  ;;  %v217_v0 = vld [vmem:[%s4052_s2 + $0x548] sm:$0xff] }
  0x82   :  { %1898 = vmatpush1.bf16.msra.mxu0 %v1897_v9  ;;  %1708 = vmatprep.subr.bf16.mxu1 %v1707_v10  ;;  %v1917_v9 = vpack.c.bf16 %v386_v3, %v384_v1  ;;  %v1727_v10 = vpack.c.bf16 %v199_v5, %v197_v4  ;;  %v219_v1 = vld [vmem:[%s4052_s2 + $0x558] sm:$0xff] }
  0x83   :  { %1900 = vmatprep.subr.bf16.mxu0 %v1899_v14  ;;  %v1919_v14 = vpack.c.bf16 %v391_v7, %v389_v6  ;;  %v411_v3 = vld [vmem:[%s4052_s2 + $0xb58] sm:$0xff]  ;;  %v1747_v6 = vpack.c.bf16 %v219_v1, %v217_v0  ;;  %v216_v7 = vld [vmem:[%s4052_s2 + $0x540] sm:$0xff] }
  0x84   :  { %708 = vmatmul.mubr.f32.vlgmr.msra.gmra.mrb[0].mxu1 %v34_v20  ;;  %v1729_v20 = vpack.c.bf16 %v198_v12, %v196_v11  ;;  %v410_v11 = vld [vmem:[%s4052_s2 + $0xb50] sm:$0xff]  ;;  %v221_v12 = vld [vmem:[%s4052_s2 + $0x568] sm:$0xff] }
  0x85   :  { %1710 = vmatpush1.bf16.msra.mxu1 %v1709_v21  ;;  %921 = vmatmul.mubr.f32.vlgmr.msra.gmra.mrb[0].mxu0 %v40_v22  ;;  %v1921_v21 = vpack.c.bf16 %v390_v15, %v388_v13  ;;  %v1731_v22 = vpack.c.bf16 %v203_v17, %v201_v16  ;;  %v223_v13 = vld [vmem:[%s4052_s2 + $0x578] sm:$0xff] }
  0x86   :  { %1902 = vmatpush1.bf16.msra.mxu0 %v1901_v23  ;;  %1712 = vmatprep.subr.bf16.mxu1 %v1711_v24  ;;  %v200_v23 = vld [vmem:[%s4052_s2 + $0x4c0] sm:$0xff]  ;;  %v202_v24 = vld [vmem:[%s4052_s2 + $0x4d0] sm:$0xff]  ;;  %v415_v15 = vld [vmem:[%s4052_s2 + $0xb78] sm:$0xff]  ;;  %v1751_v18 = vpack.c.bf16 %v223_v13, %v221_v12 }
  0x87   :  { %1904 = vmatprep.subr.bf16.mxu0 %v1903_v28  ;;  %778 = vmatprep.mubr.f32.mxu1 %v37_v34  ;;  %v205_v28 = vld [vmem:[%s4052_s2 + $0x4e8] sm:$0xff]  ;;  %v1733_v32 = vpack.c.bf16 %v202_v24, %v200_v23  ;;  %v414_v23 = vld [vmem:[%s4052_s2 + $0xb70] sm:$0xff]  ;;  %v432_v13 = vld [vmem:[%s4052_s2 + $0xc00] sm:$0xff] }
  0x88   :  { %991 = vmatprep.mubr.f32.mxu0 %v43_v36  ;;  %v1735_v34 = vpack.c.bf16 %v207_v29, %v205_v28  ;;  %v206_v36 = vld [vmem:[%s4052_s2 + $0x4f0] sm:$0xff]  ;;  %v225_v24 = vld [vmem:[%s4052_s2 + $0x588] sm:$0xff] }
  0x89   :  { %1714 = vmatpush1.bf16.msra.mxu1 %v1713_v35  ;;  %v204_v35 = vld [vmem:[%s4052_s2 + $0x4e0] sm:$0xff] }
  0x8a   :  { %1906 = vmatpush1.bf16.msra.mxu0 %v1905_v37  ;;  %1716 = vmatprep.subr.bf16.mxu1 %v1715_v38  ;;  %v396_v37 = vld [vmem:[%s4052_s2 + $0xae0] sm:$0xff]  ;;  %v1927_v38 = vpack.c.bf16 %v399_v31, %v397_v30  ;;  %v1737_v44 = vpack.c.bf16 %v206_v36, %v204_v35  ;;  %v1755_v30 = vpack.c.bf16 %v227_v25, %v225_v24  ;;  %v418_v35 = vld [vmem:[%s4052_s2 + $0xb90] sm:$0xff]  ;;  %v229_v36 = vld [vmem:[%s4052_s2 + $0x5a8] sm:$0xff] }
  0x8b   :  { %1908 = vmatprep.subr.bf16.mxu0 %v1907_v42  ;;  %v401_v42 = vld [vmem:[%s4052_s2 + $0xb08] sm:$0xff]  ;;  %v1929_v45 = vpack.c.bf16 %v398_v39, %v396_v37  ;;  %v224_v31 = vld [vmem:[%s4052_s2 + $0x580] sm:$0xff]  ;;  %v231_v37 = vld [vmem:[%s4052_s2 + $0x5b8] sm:$0xff] }
  0x8c   :  { %v423_v39 = vld [vmem:[%s4052_s2 + $0xbb8] sm:$0xff]  ;;  %v441_v24 = vld [vmem:[%s4052_s2 + $0xc48] sm:$0xff] }
  0x8d   :  { %1718 = vmatpush1.bf16.msra.mxu1 %v1717_v48  ;;  %v210_v48 = vld [vmem:[%s4052_s2 + $0x510] sm:$0xff]  ;;  %v443_v25 = vld [vmem:[%s4052_s2 + $0xc58] sm:$0xff] }
  0x8e   :  { %1910 = vmatpush1.bf16.msra.mxu0 %v1909_v49  ;;  %1720 = vmatprep.subr.bf16.mxu1 %v1719_v50  ;;  %v400_v49 = vld [vmem:[%s4052_s2 + $0xb00] sm:$0xff]  ;;  %v1931_v50 = vpack.c.bf16 %v403_v43, %v401_v42  ;;  %v1741_v56 = vpack.c.bf16 %v210_v48, %v208_v47  ;;  %v1759_v42 = vpack.c.bf16 %v231_v37, %v229_v36  ;;  %v422_v47 = vld [vmem:[%s4052_s2 + $0xbb0] sm:$0xff]  ;;  %v233_v48 = vld [vmem:[%s4052_s2 + $0x5c8] sm:$0xff] }
  0x8f   :  { %1912 = vmatprep.subr.bf16.mxu0 %v1911_v54  ;;  %v405_v54 = vld [vmem:[%s4052_s2 + $0xb28] sm:$0xff]  ;;  %v1933_v57 = vpack.c.bf16 %v402_v51, %v400_v49  ;;  %v228_v43 = vld [vmem:[%s4052_s2 + $0x5a0] sm:$0xff]  ;;  %v235_v49 = vld [vmem:[%s4052_s2 + $0x5d8] sm:$0xff] }
  0x90   :  { %v427_v51 = vld [vmem:[%s4052_s2 + $0xbd8] sm:$0xff]  ;;  %v449_v36 = vld [vmem:[%s4052_s2 + $0xc88] sm:$0xff] }
  0x91   :  { %1722 = vmatpush1.bf16.msra.mxu1 %v1721_v60  ;;  %v214_v60 = vld [vmem:[%s4052_s2 + $0x530] sm:$0xff]  ;;  %v451_v37 = vld [vmem:[%s4052_s2 + $0xc98] sm:$0xff] }
  0x92   :  { %1914 = vmatpush1.bf16.msra.mxu0 %v1913_v61  ;;  %1724 = vmatprep.subr.bf16.mxu1 %v1723_v62  ;;  %v404_v61 = vld [vmem:[%s4052_s2 + $0xb20] sm:$0xff]  ;;  %v1935_v62 = vpack.c.bf16 %v407_v55, %v405_v54  ;;  %v1745_v4 = vpack.c.bf16 %v214_v60, %v212_v59  ;;  %v1763_v54 = vpack.c.bf16 %v235_v49, %v233_v48  ;;  %v426_v59 = vld [vmem:[%s4052_s2 + $0xbd0] sm:$0xff]  ;;  %v237_v60 = vld [vmem:[%s4052_s2 + $0x5e8] sm:$0xff] }
  0x93   :  { %1916 = vmatprep.subr.bf16.mxu0 %v1915_v2  ;;  %v409_v2 = vld [vmem:[%s4052_s2 + $0xb48] sm:$0xff]  ;;  %v1937_v5 = vpack.c.bf16 %v406_v63, %v404_v61  ;;  %v232_v55 = vld [vmem:[%s4052_s2 + $0x5c0] sm:$0xff]  ;;  %v239_v61 = vld [vmem:[%s4052_s2 + $0x5f8] sm:$0xff] }
  0x94   :  { %v431_v63 = vld [vmem:[%s4052_s2 + $0xbf8] sm:$0xff]  ;;  %v457_v48 = vld [vmem:[%s4052_s2 + $0xcc8] sm:$0xff] }
  0x95   :  { %1726 = vmatpush1.bf16.msra.mxu1 %v1725_v8  ;;  %v218_v8 = vld [vmem:[%s4052_s2 + $0x550] sm:$0xff]  ;;  %v459_v49 = vld [vmem:[%s4052_s2 + $0xcd8] sm:$0xff] }
  0x96   :  { %1918 = vmatpush1.bf16.msra.mxu0 %v1917_v9  ;;  %1728 = vmatprep.subr.bf16.mxu1 %v1727_v10  ;;  %v408_v9 = vld [vmem:[%s4052_s2 + $0xb40] sm:$0xff]  ;;  %v1939_v10 = vpack.c.bf16 %v411_v3, %v409_v2  ;;  %v1749_v16 = vpack.c.bf16 %v218_v8, %v216_v7  ;;  %v1767_v2 = vpack.c.bf16 %v239_v61, %v237_v60  ;;  %v430_v7 = vld [vmem:[%s4052_s2 + $0xbf0] sm:$0xff]  ;;  %v433_v8 = vld [vmem:[%s4052_s2 + $0xc08] sm:$0xff] }
  0x97   :  { %1920 = vmatprep.subr.bf16.mxu0 %v1919_v14  ;;  %v413_v14 = vld [vmem:[%s4052_s2 + $0xb68] sm:$0xff]  ;;  %v1941_v17 = vpack.c.bf16 %v410_v11, %v408_v9  ;;  %v236_v3 = vld [vmem:[%s4052_s2 + $0x5e0] sm:$0xff]  ;;  %v435_v9 = vld [vmem:[%s4052_s2 + $0xc18] sm:$0xff] }
  0x98   :  { %v1963_v12 = vpack.c.bf16 %v435_v9, %v433_v8  ;;  %v465_v60 = vld [vmem:[%s4052_s2 + $0xd08] sm:$0xff]  ;;  %v467_v61 = vld [vmem:[%s4052_s2 + $0xd18] sm:$0xff] }
  0x99   :  { %1730 = vmatpush1.bf16.msra.mxu1 %v1729_v20  ;;  %v222_v20 = vld [vmem:[%s4052_s2 + $0x570] sm:$0xff]  ;;  %v473_v8 = vld [vmem:[%s4052_s2 + $0xd48] sm:$0xff]  ;;  %v475_v9 = vld [vmem:[%s4052_s2 + $0xd58] sm:$0xff] }
  0x9a   :  { %1922 = vmatpush1.bf16.msra.mxu0 %v1921_v21  ;;  %1732 = vmatprep.subr.bf16.mxu1 %v1731_v22  ;;  %v412_v21 = vld [vmem:[%s4052_s2 + $0xb60] sm:$0xff]  ;;  %v1943_v22 = vpack.c.bf16 %v415_v15, %v413_v14  ;;  %v1753_v28 = vpack.c.bf16 %v222_v20, %v220_v19  ;;  %v434_v14 = vld [vmem:[%s4052_s2 + $0xc10] sm:$0xff]  ;;  %v437_v15 = vld [vmem:[%s4052_s2 + $0xc28] sm:$0xff] }
  0x9b   :  { %1924 = vmatprep.subr.bf16.mxu0 %v1923_v26  ;;  %v417_v26 = vld [vmem:[%s4052_s2 + $0xb88] sm:$0xff]  ;;  %v1945_v29 = vpack.c.bf16 %v414_v23, %v412_v21  ;;  %v1965_v19 = vpack.c.bf16 %v434_v14, %v432_v13  ;;  %v436_v21 = vld [vmem:[%s4052_s2 + $0xc20] sm:$0xff]  ;;  %v474_v13 = vld [vmem:[%s4052_s2 + $0xd50] sm:$0xff] }
  0x9c   :  { %v45_v23 = vld [vmem:[%s4053_s0 + $0x68] sm:$0xff] }
  0x9d   :  { %1734 = vmatpush1.bf16.msra.mxu1 %v1733_v32  ;;  %v226_v32 = vld [vmem:[%s4052_s2 + $0x590] sm:$0xff]  ;;  %v477_v14 = vld [vmem:[%s4052_s2 + $0xd68] sm:$0xff] }
  0x9e   :  { %1926 = vmatpush1.bf16.msra.mxu0 %v1925_v33  ;;  %1736 = vmatprep.subr.bf16.mxu1 %v1735_v34  ;;  %v416_v33 = vld [vmem:[%s4052_s2 + $0xb80] sm:$0xff]  ;;  %v1947_v34 = vpack.c.bf16 %v419_v27, %v417_v26  ;;  %v1757_v40 = vpack.c.bf16 %v226_v32, %v224_v31  ;;  %v1971_v27 = vpack.c.bf16 %v443_v25, %v441_v24  ;;  %v447_v31 = vld [vmem:[%s4052_s2 + $0xc78] sm:$0xff]  ;;  %v482_v25 = vld [vmem:[%s4052_s2 + $0xd90] sm:$0xff] }
  0x9f   :  { %1928 = vmatprep.subr.bf16.mxu0 %v1927_v38  ;;  %v421_v38 = vld [vmem:[%s4052_s2 + $0xba8] sm:$0xff]  ;;  %v1949_v41 = vpack.c.bf16 %v418_v35, %v416_v33  ;;  %v446_v35 = vld [vmem:[%s4052_s2 + $0xc70] sm:$0xff]  ;;  %v480_v24 = vld [vmem:[%s4052_s2 + $0xd80] sm:$0xff] }
  0xa1   :  { %1738 = vmatpush1.bf16.msra.mxu1 %v1737_v44  ;;  %v230_v44 = vld [vmem:[%s4052_s2 + $0x5b0] sm:$0xff] }
  0xa2   :  { %1930 = vmatpush1.bf16.msra.mxu0 %v1929_v45  ;;  %1740 = vmatprep.subr.bf16.mxu1 %v1739_v46  ;;  %v420_v45 = vld [vmem:[%s4052_s2 + $0xba0] sm:$0xff]  ;;  %v1951_v46 = vpack.c.bf16 %v423_v39, %v421_v38  ;;  %v1761_v52 = vpack.c.bf16 %v230_v44, %v228_v43  ;;  %v1979_v39 = vpack.c.bf16 %v451_v37, %v449_v36  ;;  %v455_v43 = vld [vmem:[%s4052_s2 + $0xcb8] sm:$0xff]  ;;  %v490_v37 = vld [vmem:[%s4052_s2 + $0xdd0] sm:$0xff] }
  0xa3   :  { %1932 = vmatprep.subr.bf16.mxu0 %v1931_v50  ;;  %v425_v50 = vld [vmem:[%s4052_s2 + $0xbc8] sm:$0xff]  ;;  %v1953_v53 = vpack.c.bf16 %v422_v47, %v420_v45  ;;  %v454_v47 = vld [vmem:[%s4052_s2 + $0xcb0] sm:$0xff]  ;;  %v488_v36 = vld [vmem:[%s4052_s2 + $0xdc0] sm:$0xff] }
  0xa5   :  { %1742 = vmatpush1.bf16.msra.mxu1 %v1741_v56  ;;  %v234_v56 = vld [vmem:[%s4052_s2 + $0x5d0] sm:$0xff] }
  0xa6   :  { %1934 = vmatpush1.bf16.msra.mxu0 %v1933_v57  ;;  %1744 = vmatprep.subr.bf16.mxu1 %v1743_v58  ;;  %v424_v57 = vld [vmem:[%s4052_s2 + $0xbc0] sm:$0xff]  ;;  %v1955_v58 = vpack.c.bf16 %v427_v51, %v425_v50  ;;  %v1765_v0 = vpack.c.bf16 %v234_v56, %v232_v55  ;;  %v1987_v51 = vpack.c.bf16 %v459_v49, %v457_v48  ;;  %v463_v55 = vld [vmem:[%s4052_s2 + $0xcf8] sm:$0xff]  ;;  %v498_v49 = vld [vmem:[%s4052_s2 + $0xe10] sm:$0xff] }
  0xa7   :  { %1936 = vmatprep.subr.bf16.mxu0 %v1935_v62  ;;  %v429_v62 = vld [vmem:[%s4052_s2 + $0xbe8] sm:$0xff]  ;;  %v1957_v1 = vpack.c.bf16 %v426_v59, %v424_v57  ;;  %v462_v59 = vld [vmem:[%s4052_s2 + $0xcf0] sm:$0xff]  ;;  %v496_v48 = vld [vmem:[%s4052_s2 + $0xe00] sm:$0xff] }
  0xa9   :  { %1746 = vmatpush1.bf16.msra.mxu1 %v1745_v4  ;;  %v238_v4 = vld [vmem:[%s4052_s2 + $0x5f0] sm:$0xff] }
  0xaa   :  { %1938 = vmatpush1.bf16.msra.mxu0 %v1937_v5  ;;  %1748 = vmatprep.subr.bf16.mxu1 %v1747_v6  ;;  %v1959_v5 = vpack.c.bf16 %v431_v63, %v429_v62  ;;  %v428_v6 = vld [vmem:[%s4052_s2 + $0xbe0] sm:$0xff]  ;;  %v1995_v63 = vpack.c.bf16 %v467_v61, %v465_v60 }
  0xab   :  { %1940 = vmatprep.subr.bf16.mxu0 %v1939_v10  ;;  %v1769_v10 = vpack.c.bf16 %v238_v4, %v236_v3  ;;  %v1961_v11 = vpack.c.bf16 %v430_v7, %v428_v6  ;;  %v471_v3 = vld [vmem:[%s4052_s2 + $0xd38] sm:$0xff]  ;;  %v468_v6 = vld [vmem:[%s4052_s2 + $0xd20] sm:$0xff]  ;;  %v470_v7 = vld [vmem:[%s4052_s2 + $0xd30] sm:$0xff] }
  0xad   :  { %1750 = vmatpush1.bf16.msra.mxu1 %v1749_v16  ;;  %v439_v16 = vld [vmem:[%s4052_s2 + $0xc38] sm:$0xff] }
  0xae   :  { %1942 = vmatpush1.bf16.msra.mxu0 %v1941_v17  ;;  %1752 = vmatprep.subr.bf16.mxu1 %v1751_v18  ;;  %v36_v17 = vld [vmem:[%s4053_s0 + $0x20] sm:$0xff]  ;;  %v42_v18 = vld [vmem:[%s4053_s0 + $0x50] sm:$0xff]  ;;  %v1967_v20 = vpack.c.bf16 %v439_v16, %v437_v15  ;;  %v479_v15 = vld [vmem:[%s4052_s2 + $0xd78] sm:$0xff] }
  0xaf   :  { %1944 = vmatprep.subr.bf16.mxu0 %v1943_v22  ;;  %v438_v22 = vld [vmem:[%s4052_s2 + $0xc30] sm:$0xff] }
  0xb0   :  { %v1969_v26 = vpack.c.bf16 %v438_v22, %v436_v21  ;;  %v483_v21 = vld [vmem:[%s4052_s2 + $0xd98] sm:$0xff] }
  0xb1   :  { %1754 = vmatpush1.bf16.msra.mxu1 %v1753_v28  ;;  %v440_v28 = vld [vmem:[%s4052_s2 + $0xc40] sm:$0xff] }
  0xb2   :  { %1946 = vmatpush1.bf16.msra.mxu0 %v1945_v29  ;;  %1756 = vmatprep.subr.bf16.mxu1 %v1755_v30  ;;  %v442_v29 = vld [vmem:[%s4052_s2 + $0xc50] sm:$0xff]  ;;  %v445_v30 = vld [vmem:[%s4052_s2 + $0xc68] sm:$0xff] }
  0xb3   :  { %1948 = vmatprep.subr.bf16.mxu0 %v1947_v34  ;;  %v1973_v32 = vpack.c.bf16 %v442_v29, %v440_v28  ;;  %v1975_v33 = vpack.c.bf16 %v447_v31, %v445_v30  ;;  %v444_v34 = vld [vmem:[%s4052_s2 + $0xc60] sm:$0xff]  ;;  %v2013_v28 = vpack.c.bf16 %v482_v25, %v480_v24  ;;  %v486_v31 = vld [vmem:[%s4052_s2 + $0xdb0] sm:$0xff]  ;;  %v525_v24 = vld [vmem:[%s4052_s2 + $0xee8] sm:$0xff] }
  0xb4   :  { %v1977_v38 = vpack.c.bf16 %v446_v35, %v444_v34  ;;  %v484_v30 = vld [vmem:[%s4052_s2 + $0xda0] sm:$0xff]  ;;  %v527_v25 = vld [vmem:[%s4052_s2 + $0xef8] sm:$0xff] }
  0xb5   :  { %1758 = vmatpush1.bf16.msra.mxu1 %v1757_v40  ;;  %v448_v40 = vld [vmem:[%s4052_s2 + $0xc80] sm:$0xff]  ;;  %v2017_v34 = vpack.c.bf16 %v486_v31, %v484_v30  ;;  %v531_v30 = vld [vmem:[%s4052_s2 + $0xf18] sm:$0xff] }
  0xb6   :  { %1950 = vmatpush1.bf16.msra.mxu0 %v1949_v41  ;;  %1760 = vmatprep.subr.bf16.mxu1 %v1759_v42  ;;  %v450_v41 = vld [vmem:[%s4052_s2 + $0xc90] sm:$0xff]  ;;  %v453_v42 = vld [vmem:[%s4052_s2 + $0xca8] sm:$0xff]  ;;  %v1158_v31 = vld [vmem:[%s4054_s4 + $0x80] sm:$0xff] }
  0xb7   :  { %1952 = vmatprep.subr.bf16.mxu0 %v1951_v46  ;;  %v1981_v44 = vpack.c.bf16 %v450_v41, %v448_v40  ;;  %v1983_v45 = vpack.c.bf16 %v455_v43, %v453_v42  ;;  %v452_v46 = vld [vmem:[%s4052_s2 + $0xca0] sm:$0xff]  ;;  %v2021_v40 = vpack.c.bf16 %v490_v37, %v488_v36  ;;  %v494_v43 = vld [vmem:[%s4052_s2 + $0xdf0] sm:$0xff]  ;;  %v1143_v36 = vld [vmem:[%s4054_s4 + $0x8] sm:$0xff] }
  0xb8   :  { %v1985_v50 = vpack.c.bf16 %v454_v47, %v452_v46  ;;  %v492_v42 = vld [vmem:[%s4052_s2 + $0xde0] sm:$0xff]  ;;  %v1160_v37 = vld [vmem:[%s4054_s4 + $0x90] sm:$0xff] }
  0xb9   :  { %1762 = vmatpush1.bf16.msra.mxu1 %v1761_v52  ;;  %v456_v52 = vld [vmem:[%s4052_s2 + $0xcc0] sm:$0xff]  ;;  %v2025_v46 = vpack.c.bf16 %v494_v43, %v492_v42  ;;  %v1145_v42 = vld [vmem:[%s4054_s4 + $0x18] sm:$0xff] }
  0xba   :  { %1954 = vmatpush1.bf16.msra.mxu0 %v1953_v53  ;;  %1764 = vmatprep.subr.bf16.mxu1 %v1763_v54  ;;  %v458_v53 = vld [vmem:[%s4052_s2 + $0xcd0] sm:$0xff]  ;;  %v461_v54 = vld [vmem:[%s4052_s2 + $0xce8] sm:$0xff]  ;;  %v1162_v43 = vld [vmem:[%s4054_s4 + $0xa0] sm:$0xff] }
  0xbb   :  { %1956 = vmatprep.subr.bf16.mxu0 %v1955_v58  ;;  %v1989_v56 = vpack.c.bf16 %v458_v53, %v456_v52  ;;  %v1991_v57 = vpack.c.bf16 %v463_v55, %v461_v54  ;;  %v460_v58 = vld [vmem:[%s4052_s2 + $0xce0] sm:$0xff]  ;;  %v2029_v53 = vpack.c.bf16 %v498_v49, %v496_v48 }
  0xbc   :  { %v1993_v62 = vpack.c.bf16 %v462_v59, %v460_v58  ;;  %v44_v52 = vld [vmem:[%s4053_s0 + $0x60] sm:$0xff]  ;;  %v505_v58 = vld [vmem:[%s4052_s2 + $0xe48] sm:$0xff]  ;;  %v507_v59 = vld [vmem:[%s4052_s2 + $0xe58] sm:$0xff] }
  0xbd   :  { %1766 = vmatpush1.bf16.msra.mxu1 %v1765_v0  ;;  %v464_v0 = vld [vmem:[%s4052_s2 + $0xd00] sm:$0xff]  ;;  %v2035_v61 = vpack.c.bf16 %v507_v59, %v505_v58  ;;  %v534_v59 = vld [vmem:[%s4052_s2 + $0xf30] sm:$0xff] }
  0xbe   :  { %1958 = vmatpush1.bf16.msra.mxu0 %v1957_v1  ;;  %1768 = vmatprep.subr.bf16.mxu1 %v1767_v2  ;;  %v466_v1 = vld [vmem:[%s4052_s2 + $0xd10] sm:$0xff]  ;;  %v469_v2 = vld [vmem:[%s4052_s2 + $0xd28] sm:$0xff]  ;;  %v500_v55 = vld [vmem:[%s4052_s2 + $0xe20] sm:$0xff] }
  0xbf   :  { %1960 = vmatprep.subr.bf16.mxu0 %v1959_v5  ;;  %v1997_v4 = vpack.c.bf16 %v466_v1, %v464_v0  ;;  %v1999_v5 = vpack.c.bf16 %v471_v3, %v469_v2  ;;  %v509_v0 = vld [vmem:[%s4052_s2 + $0xe68] sm:$0xff]  ;;  %v511_v1 = vld [vmem:[%s4052_s2 + $0xe78] sm:$0xff]  ;;  %v532_v58 = vld [vmem:[%s4052_s2 + $0xf20] sm:$0xff] }
  0xc0   :  { %v2039_v3 = vpack.c.bf16 %v511_v1, %v509_v0  ;;  %v1148_v0 = vld [vmem:[%s4054_s4 + $0x30] sm:$0xff]  ;;  %v1149_v1 = vld [vmem:[%s4054_s4 + $0x38] sm:$0xff] }
  0xc1   :  { %1770 = vmatpush1.bf16.msra.mxu1 %v1769_v10  ;;  %v2001_v10 = vpack.c.bf16 %v470_v7, %v468_v6  ;;  %v513_v6 = vld [vmem:[%s4052_s2 + $0xe88] sm:$0xff]  ;;  %v515_v7 = vld [vmem:[%s4052_s2 + $0xe98] sm:$0xff] }
  0xc2   :  { %1962 = vmatpush1.bf16.msra.mxu0 %v1961_v11  ;;  %v2003_v11 = vpack.c.bf16 %v475_v9, %v473_v8  ;;  %v2043_v9 = vpack.c.bf16 %v515_v7, %v513_v6  ;;  %v536_v6 = vld [vmem:[%s4052_s2 + $0xf40] sm:$0xff]  ;;  %v538_v7 = vld [vmem:[%s4052_s2 + $0xf50] sm:$0xff] }
  0xc3   :  { %1964 = vmatprep.subr.bf16.mxu0 %v1963_v12  ;;  %v472_v12 = vld [vmem:[%s4052_s2 + $0xd40] sm:$0xff] }
  0xc4   :  { %779 = vmatmul.mubr.f32.vlgmr.msra.gmra.mrb[0].mxu1 %v36_v17  ;;  %v2005_v16 = vpack.c.bf16 %v474_v13, %v472_v12  ;;  %v2007_v17 = vpack.c.bf16 %v479_v15, %v477_v14  ;;  %v517_v12 = vld [vmem:[%s4052_s2 + $0xea8] sm:$0xff]  ;;  %v519_v13 = vld [vmem:[%s4052_s2 + $0xeb8] sm:$0xff] }
  0xc5   :  { %992 = vmatmul.mubr.f32.vlgmr.msra.gmra.mrb[0].mxu0 %v42_v18  ;;  %v476_v18 = vld [vmem:[%s4052_s2 + $0xd60] sm:$0xff]  ;;  %v2047_v15 = vpack.c.bf16 %v519_v13, %v517_v12  ;;  %v1151_v13 = vld [vmem:[%s4054_s4 + $0x48] sm:$0xff] }
  0xc6   :  { %1966 = vmatpush1.bf16.msra.mxu0 %v1965_v19  ;;  %1062 = vmatprep.mubr.f32.mxu0 %v45_v23  ;;  %v478_v19 = vld [vmem:[%s4052_s2 + $0xd70] sm:$0xff]  ;;  %v1150_v12 = vld [vmem:[%s4054_s4 + $0x40] sm:$0xff] }
  0xc7   :  { %1968 = vmatprep.subr.bf16.mxu0 %v1967_v20  ;;  %v481_v20 = vld [vmem:[%s4052_s2 + $0xd88] sm:$0xff]  ;;  %v2009_v22 = vpack.c.bf16 %v478_v19, %v476_v18  ;;  %v523_v19 = vld [vmem:[%s4052_s2 + $0xed8] sm:$0xff] }
  0xc8   :  { %v2011_v23 = vpack.c.bf16 %v483_v21, %v481_v20  ;;  %v521_v18 = vld [vmem:[%s4052_s2 + $0xec8] sm:$0xff] }
  0xc9   :  { %v2051_v21 = vpack.c.bf16 %v523_v19, %v521_v18  ;;  %v540_v18 = vld [vmem:[%s4052_s2 + $0xf60] sm:$0xff]  ;;  %v542_v19 = vld [vmem:[%s4052_s2 + $0xf70] sm:$0xff] }
  0xca   :  { %1970 = vmatpush1.bf16.msra.mxu0 %v1969_v26  ;;  %v485_v26 = vld [vmem:[%s4052_s2 + $0xda8] sm:$0xff] }
  0xcb   :  { %1972 = vmatprep.subr.bf16.mxu0 %v1971_v27  ;;  %v487_v27 = vld [vmem:[%s4052_s2 + $0xdb8] sm:$0xff] }
  0xcc   :  { %v2015_v29 = vpack.c.bf16 %v487_v27, %v485_v26  ;;  %v524_v26 = vld [vmem:[%s4052_s2 + $0xee0] sm:$0xff]  ;;  %v526_v27 = vld [vmem:[%s4052_s2 + $0xef0] sm:$0xff] }
  0xce   :  { %1974 = vmatpush1.bf16.msra.mxu0 %v1973_v32  ;;  %v489_v32 = vld [vmem:[%s4052_s2 + $0xdc8] sm:$0xff] }
  0xcf   :  { %1976 = vmatprep.subr.bf16.mxu0 %v1975_v33  ;;  %v491_v33 = vld [vmem:[%s4052_s2 + $0xdd8] sm:$0xff] }
  0xd0   :  { %v2019_v35 = vpack.c.bf16 %v491_v33, %v489_v32  ;;  %v1159_v32 = vld [vmem:[%s4054_s4 + $0x88] sm:$0xff]  ;;  %v1142_v33 = vld [vmem:[%s4054_s4] sm:$0xff] }
  0xd2   :  { %1978 = vmatpush1.bf16.msra.mxu0 %v1977_v38  ;;  %v493_v38 = vld [vmem:[%s4052_s2 + $0xde8] sm:$0xff] }
  0xd3   :  { %1980 = vmatprep.subr.bf16.mxu0 %v1979_v39  ;;  %v495_v39 = vld [vmem:[%s4052_s2 + $0xdf8] sm:$0xff] }
  0xd4   :  { %v2023_v41 = vpack.c.bf16 %v495_v39, %v493_v38  ;;  %v1161_v38 = vld [vmem:[%s4054_s4 + $0x98] sm:$0xff]  ;;  %v2093_v39 = vpack.c.bf16 %v1143_v36, %v1142_v33  ;;  %v546_v33 = vld [vmem:[%s4052_s2 + $0xf90] sm:$0xff] }
  0xd5   :  { %v551_v36 = vld [vmem:[%s4052_s2 + $0xfb8] sm:$0xff] }
  0xd6   :  { %1982 = vmatpush1.bf16.msra.mxu0 %v1981_v44  ;;  %v497_v44 = vld [vmem:[%s4052_s2 + $0xe08] sm:$0xff] }
  0xd7   :  { %1984 = vmatprep.subr.bf16.mxu0 %v1983_v45  ;;  %v499_v45 = vld [vmem:[%s4052_s2 + $0xe18] sm:$0xff] }
  0xd8   :  { %v2027_v47 = vpack.c.bf16 %v499_v45, %v497_v44  ;;  %v1163_v44 = vld [vmem:[%s4054_s4 + $0xa8] sm:$0xff]  ;;  %v2057_v45 = vpack.c.bf16 %v526_v27, %v524_v26  ;;  %v547_v26 = vld [vmem:[%s4052_s2 + $0xf98] sm:$0xff]  ;;  %v1170_v27 = vld [vmem:[%s4054_s4 + $0xe0] sm:$0xff] }
  0xda   :  { %1986 = vmatpush1.bf16.msra.mxu0 %v1985_v50  ;;  %v501_v50 = vld [vmem:[%s4052_s2 + $0xe28] sm:$0xff] }
  0xdb   :  { %1988 = vmatprep.subr.bf16.mxu0 %v1987_v51  ;;  %v503_v51 = vld [vmem:[%s4052_s2 + $0xe38] sm:$0xff] }
  0xdc   :  { %v2031_v54 = vpack.c.bf16 %v503_v51, %v501_v50  ;;  %v533_v50 = vld [vmem:[%s4052_s2 + $0xf28] sm:$0xff]  ;;  %v2099_v51 = vpack.c.bf16 %v1163_v44, %v1162_v43 }
  0xde   :  { %1990 = vmatpush1.bf16.msra.mxu0 %v1989_v56  ;;  %v502_v56 = vld [vmem:[%s4052_s2 + $0xe30] sm:$0xff] }
  0xdf   :  { %1992 = vmatprep.subr.bf16.mxu0 %v1991_v57  ;;  %v47_v57 = vld [vmem:[%s4053_s0 + $0x78] sm:$0xff]  ;;  %v2033_v60 = vpack.c.bf16 %v502_v56, %v500_v55  ;;  %v1164_v55 = vld [vmem:[%s4054_s4 + $0xb0] sm:$0xff] }
  0xe0   :  { %v1165_v56 = vld [vmem:[%s4054_s4 + $0xb8] sm:$0xff] }
  0xe2   :  { %1994 = vmatpush1.bf16.msra.mxu0 %v1993_v62  ;;  %v504_v62 = vld [vmem:[%s4052_s2 + $0xe40] sm:$0xff] }
  0xe3   :  { %1996 = vmatprep.subr.bf16.mxu0 %v1995_v63  ;;  %v506_v63 = vld [vmem:[%s4052_s2 + $0xe50] sm:$0xff] }
  0xe4   :  { %v2037_v2 = vpack.c.bf16 %v506_v63, %v504_v62  ;;  %v537_v62 = vld [vmem:[%s4052_s2 + $0xf48] sm:$0xff]  ;;  %v2103_v63 = vpack.c.bf16 %v1165_v56, %v1164_v55  ;;  %v1154_v55 = vld [vmem:[%s4054_s4 + $0x60] sm:$0xff] }
  0xe5   :  { %v1155_v56 = vld [vmem:[%s4054_s4 + $0x68] sm:$0xff] }
  0xe6   :  { %1998 = vmatpush1.bf16.msra.mxu0 %v1997_v4  ;;  %v508_v4 = vld [vmem:[%s4052_s2 + $0xe60] sm:$0xff] }
  0xe7   :  { %2000 = vmatprep.subr.bf16.mxu0 %v1999_v5  ;;  %v510_v5 = vld [vmem:[%s4052_s2 + $0xe70] sm:$0xff] }
  0xe8   :  { %v2041_v8 = vpack.c.bf16 %v510_v5, %v508_v4  ;;  %v1167_v4 = vld [vmem:[%s4054_s4 + $0xc8] sm:$0xff]  ;;  %v2065_v5 = vpack.c.bf16 %v534_v59, %v532_v58 }
  0xea   :  { %2002 = vmatpush1.bf16.msra.mxu0 %v2001_v10  ;;  %v512_v10 = vld [vmem:[%s4052_s2 + $0xe80] sm:$0xff] }
  0xeb   :  { %2004 = vmatprep.subr.bf16.mxu0 %v2003_v11  ;;  %v514_v11 = vld [vmem:[%s4052_s2 + $0xe90] sm:$0xff] }
  0xec   :  { %v2045_v14 = vpack.c.bf16 %v514_v11, %v512_v10  ;;  %v541_v10 = vld [vmem:[%s4052_s2 + $0xf68] sm:$0xff] }
  0xee   :  { %2006 = vmatpush1.bf16.msra.mxu0 %v2005_v16  ;;  %v516_v16 = vld [vmem:[%s4052_s2 + $0xea0] sm:$0xff] }
  0xef   :  { %2008 = vmatprep.subr.bf16.mxu0 %v2007_v17  ;;  %v518_v17 = vld [vmem:[%s4052_s2 + $0xeb0] sm:$0xff] }
  0xf0   :  { %v2049_v20 = vpack.c.bf16 %v518_v17, %v516_v16  ;;  %v1169_v16 = vld [vmem:[%s4054_s4 + $0xd8] sm:$0xff]  ;;  %v2069_v17 = vpack.c.bf16 %v538_v7, %v536_v6  ;;  %v560_v6 = vld [vmem:[%s4055_s3] sm:$0x3] }
  0xf2   :  { %2010 = vmatpush1.bf16.msra.mxu0 %v2009_v22  ;;  %v520_v22 = vld [vmem:[%s4052_s2 + $0xec0] sm:$0xff] }
  0xf3   :  { %2012 = vmatprep.subr.bf16.mxu0 %v2011_v23  ;;  %v522_v23 = vld [vmem:[%s4052_s2 + $0xed0] sm:$0xff] }
  0xf6   :  { %2014 = vmatpush1.bf16.msra.mxu0 %v2013_v28  ;;  %v2053_v28 = vpack.c.bf16 %v522_v23, %v520_v22  ;;  %v545_v22 = vld [vmem:[%s4052_s2 + $0xf88] sm:$0xff] }
  0xf7   :  { %2016 = vmatprep.subr.bf16.mxu0 %v2015_v29  ;;  %v529_v29 = vld [vmem:[%s4052_s2 + $0xf08] sm:$0xff] }
  0xf8   :  { %v2059_v49 = vpack.c.bf16 %v531_v30, %v529_v29  ;;  %v2073_v29 = vpack.c.bf16 %v542_v19, %v540_v18 }
  0xfa   :  { %2018 = vmatpush1.bf16.msra.mxu0 %v2017_v34  ;;  %v2055_v34 = vpack.c.bf16 %v527_v25, %v525_v24  ;;  %v1152_v24 = vld [vmem:[%s4054_s4 + $0x50] sm:$0xff]  ;;  %v1153_v25 = vld [vmem:[%s4054_s4 + $0x58] sm:$0xff] }
  0xfb   :  { %2020 = vmatprep.subr.bf16.mxu0 %v2019_v35  ;;  %v2091_v35 = vpack.c.bf16 %v1159_v32, %v1158_v31  ;;  %v2113_v30 = vpack.c.bf16 %v1153_v25, %v1152_v24  ;;  %v2075_v31 = vpack.c.bf16 %v547_v26, %v545_v22  ;;  %v544_v32 = vld [vmem:[%s4052_s2 + $0xf80] sm:$0xff]  ;;  %v1272_v22 = vld [vmem:[%s4056_s7 + $0x18] sm:$0xff]  ;;  %v2192_v24 = vmov 0.0   ;;  %v1274_v26 = vld [vmem:[%s4056_s7 + $0x28] sm:$0xff] }
  0xfc   :  { %v1273_v25 = vld [vmem:[%s4056_s7 + $0x20] sm:$0xff] }
  0xfd   :  { %2092 = vmatprep.subr.bf16.mxu1 %v2091_v35  ;;  %v549_v35 = vld [vmem:[%s4052_s2 + $0xfa8] sm:$0xff] }
  0xfe   :  { %2022 = vmatpush1.bf16.msra.mxu0 %v2021_v40  ;;  %v2095_v40 = vpack.c.bf16 %v1161_v38, %v1160_v37  ;;  %2094 = vmatpush3.bf16.msra.mxu1 %v2093_v39  ;;  %v2077_v37 = vpack.c.bf16 %v546_v33, %v544_v32  ;;  %v2079_v38 = vpack.c.bf16 %v551_v36, %v549_v35  ;;  %v548_v39 = vld [vmem:[%s4052_s2 + $0xfa0] sm:$0xff]  ;;  %v1278_v32 = vld [vmem:[%s4056_s7 + $0x48] sm:$0xff]  ;;  %v1280_v35 = vld [vmem:[%s4056_s7 + $0x58] sm:$0xff] }
  0xff   :  { %2024 = vmatprep.subr.bf16.mxu0 %v2023_v41  ;;  %v1144_v41 = vld [vmem:[%s4054_s4 + $0x10] sm:$0xff] }
 0x100   :  { %v2097_v48 = vpack.c.bf16 %v1145_v42, %v1144_v41  ;;  %2096 = vmatprep.subr.bf16.mxu1 %v2095_v40  ;;  %v550_v40 = vld [vmem:[%s4052_s2 + $0xfb0] sm:$0xff]  ;;  %v553_v41 = vld [vmem:[%s4052_s2 + $0xfc8] sm:$0xff]  ;;  %v555_v42 = vld [vmem:[%s4052_s2 + $0xfd8] sm:$0xff] }
 0x101   :  { %v2081_v43 = vpack.c.bf16 %v550_v40, %v548_v39  ;;  %v2083_v44 = vpack.c.bf16 %v555_v42, %v553_v41  ;;  %v1283_v40 = vld [vmem:[%s4056_s7 + $0x70] sm:$0xff]  ;;  %v1284_v41 = vld [vmem:[%s4056_s7 + $0x78] sm:$0xff] }
 0x102   :  { %2026 = vmatpush1.bf16.msra.mxu0 %v2025_v46  ;;  %v528_v46 = vld [vmem:[%s4052_s2 + $0xf00] sm:$0xff]  ;;  %2098 = vmatpush3.bf16.msra.mxu1 %v2097_v48  ;;  %v559_v48 = vld [vmem:[%s4052_s2 + $0xff8] sm:$0xff]  ;;  %v2145_v42 = vpack.c.bf16 %v1284_v41, %v1283_v40 }
 0x103   :  { %2028 = vmatprep.subr.bf16.mxu0 %v2027_v47  ;;  %v530_v47 = vld [vmem:[%s4052_s2 + $0xf10] sm:$0xff]  ;;  %2100 = vmatprep.subr.bf16.mxu1 %v2099_v51  ;;  %v556_v51 = vld [vmem:[%s4052_s2 + $0xfe0] sm:$0xff] }
 0x105   :  { %1063 = vmatmul.mubr.f32.vlgmr.msra.gmra.mrb[0].mxu0 %v44_v52  ;;  %v1146_v52 = vld [vmem:[%s4054_s4 + $0x20] sm:$0xff] }
 0x106   :  { %2030 = vmatpush1.bf16.msra.mxu0 %v2029_v53  ;;  %1133 = vmatprep.mubr.f32.mxu0 %v47_v57  ;;  %v1147_v53 = vld [vmem:[%s4054_s4 + $0x28] sm:$0xff]  ;;  %v2061_v57 = vpack.c.bf16 %v530_v47, %v528_v46  ;;  %v554_v46 = vld [vmem:[%s4052_s2 + $0xfd0] sm:$0xff] }
 0x107   :  { %2032 = vmatprep.subr.bf16.mxu0 %v2031_v54  ;;  %v535_v54 = vld [vmem:[%s4052_s2 + $0xf38] sm:$0xff]  ;;  %v557_v47 = vld [vmem:[%s4052_s2 + $0xfe8] sm:$0xff] }
 0x10a   :  { %2034 = vmatpush1.bf16.msra.mxu0 %v2033_v60  ;;  %v2101_v60 = vpack.c.bf16 %v1147_v53, %v1146_v52  ;;  %v558_v52 = vld [vmem:[%s4052_s2 + $0xff0] sm:$0xff] }
 0x10b   :  { %2036 = vmatprep.subr.bf16.mxu0 %v2035_v61  ;;  %v2063_v61 = vpack.c.bf16 %v535_v54, %v533_v50  ;;  %v2087_v50 = vpack.c.bf16 %v559_v48, %v557_v47  ;;  %v2089_v53 = vpack.c.bf16 %v558_v52, %v556_v51  ;;  %v46_v54 = vld [vmem:[%s4053_s0 + $0x70] sm:$0xff]  ;;  %v1255_v48 = vld [vmem:[%s4057_s6 + $0x18] sm:$0xff]  ;;  %v1257_v51 = vld [vmem:[%s4057_s6 + $0x28] sm:$0xff] }
 0x10c   :  { %2102 = vmatpush3.bf16.msra.mxu1 %v2101_v60  ;;  %v1172_v60 = vld [vmem:[%s4054_s4 + $0xf0] sm:$0xff] }
 0x10d   :  { %2104 = vmatprep.subr.bf16.mxu1 %v2103_v63  ;;  %v1156_v63 = vld [vmem:[%s4054_s4 + $0x70] sm:$0xff] }
 0x10e   :  { %2038 = vmatpush1.bf16.msra.mxu0 %v2037_v2  ;;  %v539_v2 = vld [vmem:[%s4052_s2 + $0xf58] sm:$0xff]  ;;  %v1254_v47 = vld [vmem:[%s4057_s6 + $0x10] sm:$0xff] }
 0x10f   :  { %2040 = vmatprep.subr.bf16.mxu0 %v2039_v3  ;;  %v1166_v3 = vld [vmem:[%s4054_s4 + $0xc0] sm:$0xff] }
 0x110   :  { %v2107_v11 = vpack.c.bf16 %v1167_v4, %v1166_v3  ;;  %v562_v3 = vlaneseq }
 0x112   :  { %2042 = vmatpush1.bf16.msra.mxu0 %v2041_v8  ;;  %v2105_v8 = vpack.c.bf16 %v1149_v1, %v1148_v0  ;;  %v1157_v0 = vld [vmem:[%s4054_s4 + $0x78] sm:$0xff]  ;;  %v563_v4 = vshrl.u32 %v562_v3, 7 }
 0x113   :  { %2044 = vmatprep.subr.bf16.mxu0 %v2043_v9  ;;  %v2067_v9 = vpack.c.bf16 %v539_v2, %v537_v62  ;;  %v2121_v1 = vpack.c.bf16 %v1157_v0, %v1156_v63  ;;  %v2190_v2 = vmov 0.0|0.0   ;;  %v1265_v63 = vld [vmem:[%s4057_s6 + $0x68] sm:$0xff]  ;;  %v1267_v3 = vld [vmem:[%s4057_s6 + $0x78] sm:$0xff] }
 0x114   :  { %2106 = vmatpush3.bf16.msra.mxu1 %v2105_v8  ;;  %v568_v7 = vsub.s32 1, %v563_v4 }
 0x115   :  { %2108 = vmatprep.subr.bf16.mxu1 %v2107_v11 }
 0x116   :  { %2046 = vmatpush1.bf16.msra.mxu0 %v2045_v14  ;;  %v543_v14 = vld [vmem:[%s4052_s2 + $0xf78] sm:$0xff] }
 0x117   :  { %2048 = vmatprep.subr.bf16.mxu0 %v2047_v15  ;;  %v1168_v15 = vld [vmem:[%s4054_s4 + $0xd0] sm:$0xff] }
 0x118   :  { %v2111_v23 = vpack.c.bf16 %v1169_v16, %v1168_v15  ;;  %v1269_v15 = vld [vmem:[%s4056_s7] sm:$0xff]  ;;  %v1270_v16 = vld [vmem:[%s4056_s7 + $0x8] sm:$0xff] }
 0x119   :  { %v2124_v19 = vpack.c.bf16 %v1270_v16, %v1269_v15 }
 0x11a   :  { %2050 = vmatpush1.bf16.msra.mxu0 %v2049_v20  ;;  %v2109_v20 = vpack.c.bf16 %v1151_v13, %v1150_v12 }
 0x11b   :  { %2052 = vmatprep.subr.bf16.mxu0 %v2051_v21  ;;  %v2071_v21 = vpack.c.bf16 %v543_v14, %v541_v10 }
 0x11c   :  { %2110 = vmatpush3.bf16.msra.mxu1 %v2109_v20 }
 0x11d   :  { %2112 = vmatprep.subr.bf16.mxu1 %v2111_v23 }
 0x11e   :  { %2054 = vmatpush1.bf16.msra.mxu0 %v2053_v28  ;;  %v1171_v28 = vld [vmem:[%s4054_s4 + $0xe8] sm:$0xff] }
 0x11f   :  { %2056 = vmatprep.subr.bf16.mxu0 %v2055_v34  ;;  %v2115_v34 = vpack.c.bf16 %v1171_v28, %v1170_v27  ;;  %v2130_v27 = vpack.c.bf16 %v1274_v26, %v1273_v25  ;;  %v1275_v28 = vld [vmem:[%s4056_s7 + $0x30] sm:$0xff] }
 0x120   :  { %2114 = vmatpush3.bf16.msra.mxu1 %v2113_v30 }
 0x121   :  { %2116 = vmatprep.subr.bf16.mxu1 %v2115_v34  ;;  %v1279_v34 = vld [vmem:[%s4056_s7 + $0x50] sm:$0xff] }
 0x122   :  { %2058 = vmatpush1.bf16.msra.mxu0 %v2057_v45  ;;  %v552_v45 = vld [vmem:[%s4052_s2 + $0xfc0] sm:$0xff]  ;;  %v2139_v36 = vpack.c.bf16 %v1280_v35, %v1279_v34 }
 0x123   :  { %2060 = vmatprep.subr.bf16.mxu0 %v2059_v49  ;;  %v2085_v49 = vpack.c.bf16 %v554_v46, %v552_v45  ;;  %v1268_v45 = vld [vmem:[%s4058_s1] sm:$0xff] }
 0x126   :  { %2062 = vmatpush1.bf16.msra.mxu0 %v2061_v57  ;;  %v2117_v57 = vpack.c.bf16 %v1155_v56, %v1154_v55  ;;  %v1260_v56 = vld [vmem:[%s4057_s6 + $0x40] sm:$0xff] }
 0x127   :  { %2064 = vmatprep.subr.bf16.mxu0 %v2063_v61  ;;  %v1173_v61 = vld [vmem:[%s4054_s4 + $0xf8] sm:$0xff] }
 0x128   :  { %2118 = vmatpush3.bf16.msra.mxu1 %v2117_v57  ;;  %v2119_v62 = vpack.c.bf16 %v1173_v61, %v1172_v60  ;;  %v1261_v57 = vld [vmem:[%s4057_s6 + $0x48] sm:$0xff]  ;;  %v1263_v60 = vld [vmem:[%s4057_s6 + $0x58] sm:$0xff] }
 0x12a   :  { %2066 = vmatpush1.bf16.msra.mxu0 %v2065_v5  ;;  %2120 = vmatprep.subr.bf16.mxu1 %v2119_v62  ;;  %v564_v5 = vsub.s32 0, %v563_v4  ;;  %v1264_v62 = vld [vmem:[%s4057_s6 + $0x60] sm:$0xff] }
 0x12b   :  { %2068 = vmatprep.subr.bf16.mxu0 %v2067_v9  ;;  %v569_v9 = vrot.slane %v560_v6, %v568_v7  ;;  %v2166_v0 = vpack.c.bf16 %v1265_v63, %v1264_v62 }
 0x12c   :  { %2122 = vmatpush3.bf16.msra.mxu1 %v2121_v1  ;;  %v565_v8 = vrot.slane %v560_v6, %v564_v5  ;;  %v1266_v1 = vld [vmem:[%s4057_s6 + $0x70] sm:$0xff]  ;;  %v1438_v6 = vld [vmem:[%s4059_s5] ss:$0 sm:$0xff] }
 0x12d   :  { %2123 = vmatprep.subr.bf16.mxu1 %v2190_v2  ;;  %v2169_v4 = vpack.c.bf16 %v1267_v3, %v1266_v1 }
 0x12e   :  { %2070 = vmatpush1.bf16.msra.mxu0 %v2069_v17 }
 0x12f   :  { %2072 = vmatprep.subr.bf16.mxu0 %v2071_v21  ;;  %v1271_v21 = vld [vmem:[%s4056_s7 + $0x10] sm:$0xff] }
 0x130   :  { %v2127_v23 = vpack.c.bf16 %v1272_v22, %v1271_v21 }
 0x132   :  { %2074 = vmatpush1.bf16.msra.mxu0 %v2073_v29  ;;  %v1276_v29 = vld [vmem:[%s4056_s7 + $0x38] sm:$0xff] }
 0x133   :  { %2076 = vmatprep.subr.bf16.mxu0 %v2075_v31  ;;  %v2133_v30 = vpack.c.bf16 %v1276_v29, %v1275_v28  ;;  %v1277_v31 = vld [vmem:[%s4056_s7 + $0x40] sm:$0xff] }
 0x134   :  { %v2136_v33 = vpack.c.bf16 %v1278_v32, %v1277_v31 }
 0x136   :  { %2078 = vmatpush1.bf16.msra.mxu0 %v2077_v37  ;;  %v1281_v37 = vld [vmem:[%s4056_s7 + $0x60] sm:$0xff] }
 0x137   :  { %2080 = vmatprep.subr.bf16.mxu0 %v2079_v38  ;;  %v1282_v38 = vld [vmem:[%s4056_s7 + $0x68] sm:$0xff] }
 0x138   :  { %v2142_v39 = vpack.c.bf16 %v1282_v38, %v1281_v37 }
 0x13a   :  { %2082 = vmatpush1.bf16.msra.mxu0 %v2081_v43  ;;  %v1252_v43 = vld [vmem:[%s4057_s6] sm:$0xff] }
 0x13b   :  { %2084 = vmatprep.subr.bf16.mxu0 %v2083_v44  ;;  %v1253_v44 = vld [vmem:[%s4057_s6 + $0x8] sm:$0xff] }
 0x13c   :  { %v2148_v46 = vpack.c.bf16 %v1253_v44, %v1252_v43 }
 0x13e   :  { %2086 = vmatpush1.bf16.msra.mxu0 %v2085_v49  ;;  %v2151_v49 = vpack.c.bf16 %v1255_v48, %v1254_v47 }
 0x13f   :  { %2088 = vmatprep.subr.bf16.mxu0 %v2087_v50  ;;  %v1256_v50 = vld [vmem:[%s4057_s6 + $0x20] sm:$0xff] }
 0x140   :  { %v2154_v52 = vpack.c.bf16 %v1257_v51, %v1256_v50 }
 0x142   :  { %2090 = vmatpush1.bf16.msra.mxu0 %v2089_v53  ;;  %v1258_v53 = vld [vmem:[%s4057_s6 + $0x30] sm:$0xff] }
 0x145   :  { %1134 = vmatmul.mubr.f32.vlgmr.msra.gmra.mrb[0].mxu0 %v46_v54  ;;  %v1259_v54 = vld [vmem:[%s4057_s6 + $0x38] sm:$0xff] }
 0x146   :  { %v2157_v55 = vpack.c.bf16 %v1259_v54, %v1258_v53 }
 0x197   :  { %v780_v58 = vpop.f32.mrb[0].mxu1 }
 0x198   :  { %v782_v59 = vpop.f32.mrb[1].mxu1  ;;  %v2171_v10 = vadd.f32 %v780_v58, %v565_v8  ;;  %v2160_v58 = vpack.c.bf16 %v1261_v57, %v1260_v56 }
 0x199   :  { %v2173_v11 = vadd.f32 %v782_v59, %v569_v9  ;;  %v1262_v59 = vld [vmem:[%s4057_s6 + $0x50] sm:$0xff] }
 0x19a   :  { %v2163_v61 = vpack.c.bf16 %v1263_v60, %v1262_v59 }
 0x218   :  { %v1135_v12 = vpop.f32.mrb[0].mxu0 }
 0x219   :  { %v2172_v13 = vadd.f32 %v2171_v10, %v1135_v12  ;;  %v1137_v14 = vpop.f32.mrb[1].mxu0 }
 0x21a   :  { %v2174_v17 = vadd.f32 %v2173_v11, %v1137_v14 }
 0x21b   :  { %v1140_v20 = vmax.f32 %v2172_v13, 0.0  ;;  %v1439_v13 = vld [vmem:[%s4060_s8] ss:$0 sm:$0xff] }
 0x21c   :  { %v1141_v18 = vmax.f32 %v2174_v17, 0.0 }
 0x21e   :  { %1245 = vmatprep.mubr.f32.mxu1 %v1141_v18 }
 0x21f   :  { %1246 = vmatmul.mubr.f32.vlgmr.msra.gmra.mrb[2].mxu1 %v1140_v20 }
 0x220   :  { %2125 = vmatpush3.bf16.msra.mxu1 %v2124_v19  ;;  %1541 = vmatprep.mubr.msk.f32.mxu1 %vm2191_vm0, %v2192_v24 }
 0x221   :  { %2126 = vmatprep.subr.bf16.mxu1 %v2190_v2 }
 0x224   :  { %2128 = vmatpush3.bf16.msra.mxu1 %v2127_v23 }
 0x225   :  { %2129 = vmatprep.subr.bf16.mxu1 %v2190_v2 }
 0x228   :  { %2131 = vmatpush3.bf16.msra.mxu1 %v2130_v27 }
 0x229   :  { %2132 = vmatprep.subr.bf16.mxu1 %v2190_v2 }
 0x22c   :  { %2134 = vmatpush3.bf16.msra.mxu1 %v2133_v30 }
 0x22d   :  { %2135 = vmatprep.subr.bf16.mxu1 %v2190_v2 }
 0x230   :  { %2137 = vmatpush3.bf16.msra.mxu1 %v2136_v33 }
 0x231   :  { %2138 = vmatprep.subr.bf16.mxu1 %v2190_v2 }
 0x234   :  { %2140 = vmatpush3.bf16.msra.mxu1 %v2139_v36 }
 0x235   :  { %2141 = vmatprep.subr.bf16.mxu1 %v2190_v2 }
 0x238   :  { %2143 = vmatpush3.bf16.msra.mxu1 %v2142_v39 }
 0x239   :  { %2144 = vmatprep.subr.bf16.mxu1 %v2190_v2 }
 0x23c   :  { %2146 = vmatpush3.bf16.msra.mxu1 %v2145_v42 }
 0x23d   :  { %2147 = vmatprep.subr.bf16.mxu1 %v2190_v2 }
 0x23f   :  { %1542 = vmatmul.mubr.f32.vlgmr.msra.gmra.mrb[4].mxu1 %v1268_v45 }
 0x240   :  { %2149 = vmatpush3.bf16.msra.mxu1 %v2148_v46  ;;  %1576 = vmatprep.mubr.msk.f32.mxu1 %vm2191_vm0, %v2192_v24 }
 0x241   :  { %2150 = vmatprep.subr.bf16.mxu1 %v2190_v2 }
 0x244   :  { %2152 = vmatpush3.bf16.msra.mxu1 %v2151_v49 }
 0x245   :  { %2153 = vmatprep.subr.bf16.mxu1 %v2190_v2 }
 0x248   :  { %2155 = vmatpush3.bf16.msra.mxu1 %v2154_v52 }
 0x249   :  { %2156 = vmatprep.subr.bf16.mxu1 %v2190_v2 }
 0x24c   :  { %2158 = vmatpush3.bf16.msra.mxu1 %v2157_v55 }
 0x24d   :  { %2159 = vmatprep.subr.bf16.mxu1 %v2190_v2 }
 0x250   :  { %2161 = vmatpush3.bf16.msra.mxu1 %v2160_v58 }
 0x251   :  { %2162 = vmatprep.subr.bf16.mxu1 %v2190_v2 }
 0x254   :  { %2164 = vmatpush3.bf16.msra.mxu1 %v2163_v61 }
 0x255   :  { %2165 = vmatprep.subr.bf16.mxu1 %v2190_v2 }
 0x258   :  { %2167 = vmatpush3.bf16.msra.mxu1 %v2166_v0 }
 0x259   :  { %2168 = vmatprep.subr.bf16.mxu1 %v2190_v2 }
 0x25c   :  { %2170 = vmatpush3.bf16.msra.mxu1 %v2169_v4 }
 0x2f2   :  { %v1472_v5 = vpop.f32.mrb[2].mxu1 }
 0x2f3   :  { %v1473_v7 = vpop.f32.mrb[3].mxu1 }
 0x2f4   :  { %v1474_v8 = vadd.f32 %v1473_v7, %v1472_v5 }
 0x2f6   :  { %v1248_v9 = vadd.f32 %v1474_v8, %v1438_v6 }
 0x2f8   :  { %v1251_v10 = vmax.f32 %v1248_v9, 0.0 }
 0x2fa   :  { %1577 = vmatmul.mubr.f32.vlgmr.msra.gmra.mrb[6].mxu1 %v1251_v10 }
 0x312   :  { %v1351_v2 = vpop.f32.mrb[4].mxu1 }
 0x313   :  { %v1543_v11 = vpop.f32.mrb[5].mxu1 }
 0x3cd   :  { %v1421_v12 = vpop.f32.mrb[6].mxu1 }
 0x3ce   :  { %v1422_v14 = vadd.f32 %v1421_v12, %v1351_v2  ;;  %v1578_v15 = vpop.f32.mrb[7].mxu1 }
 0x3d0   :  { %v1432_v16 = vadd.f32 %v1439_v13, %v1422_v14 }
 0x3d2   :  { %1433 = vst [vmem:[%s4061_s9] sm:$0xff] %v1432_v16 }

// kernel: ddpg_value2_forward.2
= control target key start
LH: loop header
LB: loop body
LE: loop exit
PB: predicated region body
PF: predicated region fallthrough
CT: control target
= control target key end

     0   :  { %s10998_s0 = inlined_call_operand.vmem [shape: bf16[8,22528], index: 0, kind: input, shape index: {}]   ;;  %s10999_s1 = inlined_call_operand.hbm [shape: bf16[22528,2048], index: 1, kind: input, shape index: {}]   ;;  %s11000_s2 = inlined_call_operand.hbm [shape: f32[1,2048], index: 2, kind: input, shape index: {}]   ;;  %s11001_s3 = inlined_call_operand.vmem [shape: f32[8,2048], index: 3, kind: output, shape index: {}]  }
   0x1   :  { %11007 = sst [smem:[#allocation9_spill]] %s10999_s1 }
   0x2   :  { %8 = vsyncpa [#allocation3], 0 }
   0x3   :  { %10 = vsyncpa [#allocation3 + $0x1], 0 }
   0x4   :  { %11 = vsyncpa [#allocation5], 0 }
   0x5   :  { %13 = vsyncpa [#allocation5 + $0x1], 0  ;;  %s9446_s12 = smov 0   ;;  %s9448_s13 = smov 0  }
   0x6   :  { %s9450_s14 = smov 0   ;;  %s9452_s15 = smov 0  }
   0x7   :  { %s9454_s16 = smov 0   ;;  %s9456_s17 = smov 0  }
   0x8   :  { %s9458_s18 = smov 0   ;;  %s9460_s19 = smov 0  }
   0x9   :  { %s9462_s20 = smov 0   ;;  %s9464_s21 = smov 0  }
   0xa   :  { %s9466_s22 = smov 0  }
   0xb LB: > { %s31_s23 = sadd.s32 1, %s9410_s20  ;;  %s75_s24 = sadd.s32 1, %s9398_s17  ;;  %s9418_s22 = sphi %s9466_s22, %s19_s22   ;;  %s9414_s21 = sphi %s9464_s21, %s11033_s21   ;;  %s9410_s20 = sphi %s9462_s20, %s11032_s20   ;;  %s9406_s19 = sphi %s9460_s19, %s11031_s19   ;;  %s9402_s18 = sphi %s9458_s18, %s11030_s18   ;;  %s9398_s17 = sphi %s9456_s17, %s11029_s17   ;;  %s9394_s16 = sphi %s9454_s16, %s11028_s16   ;;  %s9390_s15 = sphi %s9452_s15, %s11027_s15   ;;  %s9386_s14 = sphi %s9450_s14, %s11026_s14   ;;  %s9382_s13 = sphi %s9448_s13, %s11025_s13   ;;  %s9378_s12 = sphi %s9446_s12, %s11024_s12  }
   0xc   : > { %p9503_p0 = scmp.ge.s32.totalorder %s31_s23, 11  ;;  %p82_p1 = scmp.ne.s32.totalorder %s9398_s17, %s9394_s16 }
   0xd   : > { %p11003_p2 = scmp.eq.s32.totalorder %s9418_s22, 0  ;;  %p11002_p4 = scmp.lt.s32.totalorder %s9418_s22, 22 }
   0xe   : > { %s11035_s23 = smov (%p9503_p0, %s31_s23), 0  ;;  %s179_s27 = sand.u32 1, %s9398_s17  }
   0xf   : > { %p84_p3 = por %p11003_p2, %p82_p1  ;;  %s70_s26 = ssub.s32 %s9410_s20, %s11035_s23 }
  0x10   : > { %s8083_s28 = sshll.u32 %s179_s27, 13  ;;  %s8085_s29 = sshll.u32 %s9414_s21, 3 }
  0x11   : > { %s9142_s30 = sshll.u32 %s9410_s20, 12  ;;  %s183_s4 = scalar_lea.vmem [#allocation2], %s8083_s28 }
  0x12   : > { %s193_s5 = sshll.u32 %s183_s4, 4  ;;  %s190_s6 = sadd.s32 %s9142_s30, %s8085_s29  ;;  %s9522_s5 = int_to_ptr.vmem [resolvable:$true] %s193_s5 }
  0x13   : > { %s8087_s7 = sshll.u32 %s190_s6, 6  ;;  %p9526_p5 = pnand %p11002_p4, %p84_p3 }
  0x14   : > { %s11010_s1 = sld [smem:[#allocation9_spill]]  ;;  %s9536_s28 = scalar_lea.sflag [#allocation3], %s179_s27 }
  0x15   : > { %p9266_p8 = pneg %p9526_p5 }
  0x1a   : > { %s9533_s11 = scalar_lea.hbm %s11010_s1, %s8087_s7  ;;  %s9269_s6 = scalar_lea.hbm %s11010_s1, 2883584 }
  0x1b   : > { %s9264_s29 = scalar_lea.hbm %s9533_s11, 131072  ;;  %p9270_p11 = scmp.lt.u32.totalorder %s9533_s11, %s11010_s1 }
  0x1c   : > { %p9265_p7 = scmp.ne.s32.totalorder %s9533_s11, %s9264_s29  ;;  %p9271_p12 = scmp.lt.u32.totalorder %s9269_s6, %s9264_s29 }
  0x1d   : > { %p9273_p1 = scmp.lt.u32.totalorder %s9264_s29, %s9533_s11 }
  0x1e   : > { %p9267_p9 = pnand %p9266_p8, %p9265_p7  ;;  %p9272_p13 = por %p9271_p12, %p9270_p11 }
  0x20   : > { %p9268_p10 = pneg %p9267_p9  ;;  %p9274_p3 = por %p9273_p1, %p9272_p13 }
  0x22   : > { %p9275_p4 = pnand %p9274_p3, %p9268_p10 }
  0x24   : > { %9278 = shalt.err (!%p9275_p4)
}
  0x25   : > { %s9279_s27 = scalar_lea.vmem %s9522_s5, 131072  ;;  %s9420_s10 = smov [#allocation2]  }
  0x26   : > { %p9280_p7 = scmp.ne.s32.totalorder %s9522_s5, %s9279_s27  ;;  %s9284_s30 = sshll.u32 %s9420_s10, 4  ;;  %s9285_s30 = int_to_ptr.vmem [resolvable:$false] %s9284_s30 }
  0x27   : > { %s9286_s4 = scalar_lea.vmem %s9285_s30, 262144  ;;  %p9287_p6 = scmp.lt.s32.totalorder %s9522_s5, %s9285_s30 }
  0x28   : > { %p9282_p9 = pnand %p9280_p7, %p9266_p8  ;;  %p9288_p11 = scmp.lt.s32.totalorder %s9286_s4, %s9279_s27 }
  0x2a   : > { %p9283_p2 = pneg %p9282_p9  ;;  %p9289_p12 = por %p9288_p11, %p9287_p6 }
  0x2c   : > { %p9290_p13 = pnand %p9289_p12, %p9283_p2 }
  0x2e   : > { %9293 = shalt.err (!%p9290_p13)
}
  0x2f   : > { %s9421_s29 = smov 1024   ;;  %s9422_s6 = smov 512  }
  0x30   : > { %s9423_s7 = smov 32   ;;  %p220_p2 = scmp.lt.s32.totalorder %s9418_s22, 23 }
  0x31   : > { %9151 = dma.hbm_to_vmem [thread:$0]  (!%p9526_p5), %s9533_s11, 131072, %s9522_s5, %s9536_s28, %s9421_s29, %s9422_s6, %s9423_s7  }
  0x32   : > { %p11011_p4 = scmp.ge.s32.totalorder %s9418_s22, 1  ;;  %s8079_s27 = sadd.s32 4294967295, %s9418_s22  }
  0x33   : > { %s34_s10 = sadd.s32 1, %s9414_s21  ;;  %p88_p8 = scmp.ne.s32.totalorder %s9394_s16, %s9390_s15 }
  0x34   : > { %p9567_p6 = pnand %p11011_p4, %p220_p2  ;;  %s11037_s10 = smov (!%p9503_p0, %s34_s10), %s9414_s21 }
  0x35   : > { %p9578_p10 = scmp.eq.s32.totalorder %s8079_s27, 0  ;;  %p36_p5 = scmp.ge.s32.totalorder %s11037_s10, 2 }
  0x36   : > { %s101_s5 = sadd.s32 1, %s9386_s14  ;;  %p108_p3 = scmp.ne.s32.totalorder %s9386_s14, %s9382_s13 }
  0x37   : > { %p9585_p1 = por %p9578_p10, %p88_p8  ;;  %s11039_s10 = smov (%p36_p5, %s11037_s10), 0 }
  0x38   : > { %11015 = sst [smem:[#allocation8_spill]] %s11039_s10  ;;  %p11016_p0 = scmp.eq.s32.totalorder %s9418_s22, 0 }
  0x39   : > { %s11014_s11 = scalar_select %p9585_p1, 1, 0 }
  0x3a   : > { %p9595_p7 = por %p108_p3, %p11016_p0  ;;  %p114_p9 = scmp.ne.s32.totalorder %s9382_s13, %s9378_s12 }
  0x3b   : > { %s71_s25 = ssub.s32 %s9414_s21, %s11039_s10  ;;  %s203_s28 = sand.u32 1, %s9386_s14  }
  0x3c   : > { %s72_s30 = sor.u32 %s71_s25, %s70_s26  ;;  %p99_p11 = scmp.eq.s32.totalorder %s71_s25, 0 }
  0x3d   : > { %p73_p12 = scmp.eq.s32.totalorder %s72_s30, 0  ;;  %p9609_p13 = por %p114_p9, %p9578_p10 }
  0x3e   : > { %s9614_s29 = scalar_select %p99_p11, %s9386_s14, %s101_s5  }
  0x3f   : > { %s11018_s4 = scalar_select %p9609_p13, 1, 0 }
  0x40   : > { %s9619_s6 = scalar_select %p73_p12, %s9398_s17, %s75_s24  }
  0x41   : > { %s8088_s7 = sshll.u32 %s203_s28, 3  ;;  %s9143_s27 = sshll.u32 %s9414_s21, 7 }
  0x42   : > { %s9625_s10 = scalar_lea.hbm %s11000_s2, %s9143_s27  ;;  %s207_s26 = scalar_lea.vmem [#allocation4], %s8088_s7 }
  0x43   : > { %s215_s8 = sshll.u32 %s207_s26, 4  ;;  %p11019_p2 = scmp.lt.s32.totalorder %s9418_s22, 22  ;;  %s9627_s8 = int_to_ptr.vmem [resolvable:$true] %s215_s8 }
  0x44   : > { %s204_s5 = scalar_lea.sflag [#allocation5], %s203_s28  ;;  %s9294_s1 = scalar_lea.hbm %s9625_s10, 128 }
  0x45   : > { %p9633_p4 = pnand %p11019_p2, %p9595_p7  ;;  %p9295_p8 = scmp.ne.s32.totalorder %s9625_s10, %s9294_s1 }
  0x46   : > { %s9299_s15 = scalar_lea.hbm %s11000_s2, 256  ;;  %p9300_p0 = scmp.lt.u32.totalorder %s9625_s10, %s11000_s2 }
  0x47   : > { %p9296_p10 = pneg %p9633_p4  ;;  %p9301_p7 = scmp.lt.u32.totalorder %s9299_s15, %s9294_s1 }
  0x48   : > { %p9303_p11 = scmp.lt.u32.totalorder %s9294_s1, %s9625_s10 }
  0x49   : > { %p9297_p5 = pnand %p9296_p10, %p9295_p8  ;;  %p9302_p9 = por %p9301_p7, %p9300_p0 }
  0x4b   : > { %p9298_p3 = pneg %p9297_p5  ;;  %p9304_p12 = por %p9303_p11, %p9302_p9 }
  0x4d   : > { %p9305_p2 = pnand %p9304_p12, %p9298_p3 }
  0x4f   : > { %9308 = shalt.err (!%p9305_p2)
}
  0x50   : > { %s9309_s28 = scalar_lea.vmem %s9627_s8, 128  ;;  %s9424_s12 = smov [#allocation4]  }
  0x51   : > { %p9310_p8 = scmp.ne.s32.totalorder %s9627_s8, %s9309_s28  ;;  %s9314_s26 = sshll.u32 %s9424_s12, 4  ;;  %s9315_s26 = int_to_ptr.vmem [resolvable:$false] %s9314_s26 }
  0x52   : > { %s9316_s25 = scalar_lea.vmem %s9315_s26, 256  ;;  %p9317_p1 = scmp.lt.s32.totalorder %s9627_s8, %s9315_s26 }
  0x53   : > { %p9312_p5 = pnand %p9310_p8, %p9296_p10  ;;  %p9318_p0 = scmp.lt.s32.totalorder %s9316_s25, %s9309_s28 }
  0x55   : > { %p9313_p13 = pneg %p9312_p5  ;;  %p9319_p7 = por %p9318_p0, %p9317_p1 }
  0x57   : > { %p9320_p9 = pnand %p9319_p7, %p9313_p13 }
  0x59   : > { %9323 = shalt.err (!%p9320_p9)
}
  0x5a   : > { %9154 = dma.hbm_to_vmem [thread:$0]  (!%p9633_p4), %s9625_s10, 128, %s9627_s8, %s204_s5  }
  0x5b   : > { %224 = sbr.rel (%p9567_p6) target bundleno = 1378 (0x562), region = 32  ;;  %s226_s1 = sand.u32 (!%p9567_p6), 1, %s9394_s16  }
  0x5c   : > { %s8092_s30 = sshll.u32 (!%p9567_p6), %s226_s1, 13  ;;  %s227_s15 = scalar_lea.sflag (!%p9567_p6), [#allocation3], %s226_s1 }
  0x5d   : > { %s9665_s7 = scalar_lea.vmem (!%p9567_p6), [#allocation2], %s8092_s30  ;;  %p11021_p10 = scmp.ne.s32.totalorder (!%p9567_p6), %s11014_s11, 0 }
  0x62   : > { %9369 = dma.done.wait (%p11021_p10), %s227_s15, 131072  }
  0x63   : > { %9371 = vsyncadd (%p11021_p10), %s227_s15, 4294836224  ;;  %s235_s24 = sand.u32 1, %s9382_s13   ;;  %p11022_p6 = scmp.ne.s32.totalorder %s11018_s4, 0 }
  0x64   : > { %s9672_s27 = sshll.u32 %s235_s24, 3  ;;  %s236_s9 = scalar_lea.sflag [#allocation5], %s235_s24 }
  0x65   : > { %s239_s10 = scalar_lea.vmem [#allocation4], %s9672_s27 }
  0x66   : > { %9373 = dma.done.wait (%p11022_p6), %s236_s9, 128  }
  0x67   : > { %9375 = vsyncadd (%p11022_p6), %s236_s9, 4294967168  ;;  %s8094_s8 = sshll.u32 %s9402_s18, 4  ;;  %s8096_s5 = sshll.u32 %s9406_s19, 3 }
  0x68   : > { %p283_p1 = scmp.lt.s32.totalorder %s8094_s8, 175  ;;  %p296_p13 = scmp.lt.s32.totalorder %s8096_s5, 15 }
  0x69   : > { %p8098_p4 = scmp.ne.s32.totalorder %s9402_s18, 0 }
  0x6a   : > { %s11041_s8 = smov (!%p283_p1, %s8094_s8), 175  ;;  %s11043_s5 = smov (!%p296_p13, %s8096_s5), 15 }
  0x6b   : > { %s8095_s11 = sshll.u32 %s11041_s8, 2  ;;  %s8097_s25 = sshll.u32 %s11043_s5, 3  ;;  %v9425_v0 = vmov (!%p8098_p4), 0.0  }
  0x6c   : > { %s9684_s26 = scalar_lea.vmem %s10998_s0, %s8095_s11  ;;  %s9689_s4 = scalar_lea.vmem %s11001_s3, %s8097_s25 }
  0x6d   : > { %306 = sbr.rel (%p8098_p4) target bundleno = 116 (0x74), region = 44  ;;  %307 = vst [vmem:[%s9689_s4] sm:$0xff] (!%p8098_p4), %v9425_v0  ;;  %308 = vst [vmem:[%s9689_s4 + $0x8] sm:$0xff] (!%p8098_p4), %v9425_v0 }
  0x6e   : > { %309 = vst [vmem:[%s9689_s4 + $0x10] sm:$0xff] (!%p8098_p4), %v9425_v0  ;;  %310 = vst [vmem:[%s9689_s4 + $0x18] sm:$0xff] (!%p8098_p4), %v9425_v0 }
  0x6f   : > { %311 = vst [vmem:[%s9689_s4 + $0x20] sm:$0xff] (!%p8098_p4), %v9425_v0  ;;  %312 = vst [vmem:[%s9689_s4 + $0x28] sm:$0xff] (!%p8098_p4), %v9425_v0 }
  0x70   : > { %313 = vst [vmem:[%s9689_s4 + $0x30] sm:$0xff] (!%p8098_p4), %v9425_v0  ;;  %314 = vst [vmem:[%s9689_s4 + $0x38] sm:$0xff] (!%p8098_p4), %v9425_v0 }
  0x74 PF: > { %v331_v1 = vld [vmem:[%s9665_s7] sm:$0xff]  ;;  %v9732_v55 = vld [vmem:[%s9684_s26 + $0x8] sm:$0xff]  ;;  %p9139_p3 = scmp.ne.s32.totalorder %s9402_s18, 10 }
  0x75   : > { %v335_v2 = vld [vmem:[%s9665_s7 + $0x20] sm:$0xff]  ;;  %v9742_v60 = vcombine.high %v9732_v55, %v9732_v55 }
  0x76   : > { %v459_v3 = vld [vmem:[%s9665_s7 + $0x400] sm:$0xff]  ;;  %v8116_v4 = vcombine.high %v331_v1, %v335_v2  ;;  %v8115_v6 = vcombine.low %v331_v1, %v335_v2 }
  0x77   : > { %v463_v5 = vld [vmem:[%s9665_s7 + $0x420] sm:$0xff]  ;;  %6604 = vmatprep.mubr.bf16.mxu1 %v9742_v60 }
  0x78   : > { %v339_v7 = vld [vmem:[%s9665_s7 + $0x40] sm:$0xff]  ;;  %v8244_v9 = vcombine.high %v459_v3, %v463_v5  ;;  %v8243_v10 = vcombine.low %v459_v3, %v463_v5  ;;  %6531 = vmatprep.subr.bf16.mxu0 %v8116_v4 }
  0x79   : > { %v343_v8 = vld [vmem:[%s9665_s7 + $0x60] sm:$0xff]  ;;  %6532 = vmatpush1.bf16.msra.mxu0 %v8115_v6 }
  0x7a   : > { %v8124_v11 = vcombine.high %v339_v7, %v343_v8  ;;  %v467_v12 = vld [vmem:[%s9665_s7 + $0x440] sm:$0xff]  ;;  %6572 = vmatprep.subr.bf16.mxu1 %v8244_v9  ;;  %v8123_v19 = vcombine.low %v339_v7, %v343_v8 }
  0x7b   : > { %v471_v13 = vld [vmem:[%s9665_s7 + $0x460] sm:$0xff]  ;;  %6573 = vmatpush1.bf16.msra.mxu1 %v8243_v10 }
  0x7c   : > { %v347_v14 = vld [vmem:[%s9665_s7 + $0x80] sm:$0xff]  ;;  %v8252_v15 = vcombine.high %v467_v12, %v471_v13  ;;  %6533 = vmatprep.subr.bf16.mxu0 %v8124_v11  ;;  %v8251_v20 = vcombine.low %v467_v12, %v471_v13 }
  0x7d   : > { %v351_v16 = vld [vmem:[%s9665_s7 + $0xa0] sm:$0xff]  ;;  %6534 = vmatpush1.bf16.msra.mxu0 %v8123_v19 }
  0x7e   : > { %v475_v17 = vld [vmem:[%s9665_s7 + $0x480] sm:$0xff]  ;;  %v8132_v21 = vcombine.high %v347_v14, %v351_v16  ;;  %6574 = vmatprep.subr.bf16.mxu1 %v8252_v15  ;;  %v8131_v27 = vcombine.low %v347_v14, %v351_v16 }
  0x7f   : > { %v479_v18 = vld [vmem:[%s9665_s7 + $0x4a0] sm:$0xff]  ;;  %6575 = vmatpush1.bf16.msra.mxu1 %v8251_v20 }
  0x80   : > { %v8260_v22 = vcombine.high %v475_v17, %v479_v18  ;;  %v355_v23 = vld [vmem:[%s9665_s7 + $0xc0] sm:$0xff]  ;;  %6535 = vmatprep.subr.bf16.mxu0 %v8132_v21  ;;  %v8259_v28 = vcombine.low %v475_v17, %v479_v18 }
  0x81   : > { %v359_v24 = vld [vmem:[%s9665_s7 + $0xe0] sm:$0xff]  ;;  %6536 = vmatpush1.bf16.msra.mxu0 %v8131_v27 }
  0x82   : > { %v483_v25 = vld [vmem:[%s9665_s7 + $0x4c0] sm:$0xff]  ;;  %v8140_v29 = vcombine.high %v355_v23, %v359_v24  ;;  %6576 = vmatprep.subr.bf16.mxu1 %v8260_v22  ;;  %v8139_v35 = vcombine.low %v355_v23, %v359_v24 }
  0x83   : > { %v487_v26 = vld [vmem:[%s9665_s7 + $0x4e0] sm:$0xff]  ;;  %6577 = vmatpush1.bf16.msra.mxu1 %v8259_v28 }
  0x84   : > { %v8268_v30 = vcombine.high %v483_v25, %v487_v26  ;;  %v363_v31 = vld [vmem:[%s9665_s7 + $0x100] sm:$0xff]  ;;  %6537 = vmatprep.subr.bf16.mxu0 %v8140_v29  ;;  %v8267_v36 = vcombine.low %v483_v25, %v487_v26 }
  0x85   : > { %v367_v32 = vld [vmem:[%s9665_s7 + $0x120] sm:$0xff]  ;;  %6538 = vmatpush1.bf16.msra.mxu0 %v8139_v35 }
  0x86   : > { %v491_v33 = vld [vmem:[%s9665_s7 + $0x500] sm:$0xff]  ;;  %v8148_v37 = vcombine.high %v363_v31, %v367_v32  ;;  %6578 = vmatprep.subr.bf16.mxu1 %v8268_v30  ;;  %v8147_v43 = vcombine.low %v363_v31, %v367_v32 }
  0x87   : > { %v495_v34 = vld [vmem:[%s9665_s7 + $0x520] sm:$0xff]  ;;  %6579 = vmatpush1.bf16.msra.mxu1 %v8267_v36 }
  0x88   : > { %v8276_v38 = vcombine.high %v491_v33, %v495_v34  ;;  %v371_v39 = vld [vmem:[%s9665_s7 + $0x140] sm:$0xff]  ;;  %6539 = vmatprep.subr.bf16.mxu0 %v8148_v37  ;;  %v8275_v44 = vcombine.low %v491_v33, %v495_v34 }
  0x89   : > { %v375_v40 = vld [vmem:[%s9665_s7 + $0x160] sm:$0xff]  ;;  %6540 = vmatpush1.bf16.msra.mxu0 %v8147_v43 }
  0x8a   : > { %v499_v41 = vld [vmem:[%s9665_s7 + $0x540] sm:$0xff]  ;;  %v8156_v45 = vcombine.high %v371_v39, %v375_v40  ;;  %6580 = vmatprep.subr.bf16.mxu1 %v8276_v38  ;;  %v8155_v51 = vcombine.low %v371_v39, %v375_v40 }
  0x8b   : > { %v503_v42 = vld [vmem:[%s9665_s7 + $0x560] sm:$0xff]  ;;  %6581 = vmatpush1.bf16.msra.mxu1 %v8275_v44 }
  0x8c   : > { %v8284_v46 = vcombine.high %v499_v41, %v503_v42  ;;  %v379_v47 = vld [vmem:[%s9665_s7 + $0x180] sm:$0xff]  ;;  %6541 = vmatprep.subr.bf16.mxu0 %v8156_v45  ;;  %v8283_v52 = vcombine.low %v499_v41, %v503_v42 }
  0x8d   : > { %v383_v48 = vld [vmem:[%s9665_s7 + $0x1a0] sm:$0xff]  ;;  %6542 = vmatpush1.bf16.msra.mxu0 %v8155_v51 }
  0x8e   : > { %v507_v49 = vld [vmem:[%s9665_s7 + $0x580] sm:$0xff]  ;;  %v8164_v53 = vcombine.high %v379_v47, %v383_v48  ;;  %6582 = vmatprep.subr.bf16.mxu1 %v8284_v46  ;;  %v8163_v63 = vcombine.low %v379_v47, %v383_v48 }
  0x8f   : > { %v511_v50 = vld [vmem:[%s9665_s7 + $0x5a0] sm:$0xff]  ;;  %6583 = vmatpush1.bf16.msra.mxu1 %v8283_v52 }
  0x90   : > { %v9729_v54 = vld [vmem:[%s9684_s26] sm:$0xff]  ;;  %v8292_v56 = vcombine.high %v507_v49, %v511_v50  ;;  %6543 = vmatprep.subr.bf16.mxu0 %v8164_v53  ;;  %v8291_v0 = vcombine.low %v507_v49, %v511_v50 }
  0x91   : > { %v387_v57 = vld [vmem:[%s9665_s7 + $0x1c0] sm:$0xff]  ;;  %v9738_v59 = vcombine.high %v9729_v54, %v9729_v54  ;;  %6544 = vmatpush1.bf16.msra.mxu0 %v8163_v63 }
  0x92   : > { %v391_v58 = vld [vmem:[%s9665_s7 + $0x1e0] sm:$0xff]  ;;  %6584 = vmatprep.subr.bf16.mxu1 %v8292_v56 }
  0x93   : > { %v515_v61 = vld [vmem:[%s9665_s7 + $0x5c0] sm:$0xff]  ;;  %6563 = vmatprep.mubr.bf16.mxu0 %v9738_v59  ;;  %v8172_v1 = vcombine.high %v387_v57, %v391_v58  ;;  %v8171_v7 = vcombine.low %v387_v57, %v391_v58  ;;  %6585 = vmatpush1.bf16.msra.mxu1 %v8291_v0 }
  0x94   : > { %v519_v62 = vld [vmem:[%s9665_s7 + $0x5e0] sm:$0xff] }
  0x95   : > { %v8300_v2 = vcombine.high %v515_v61, %v519_v62  ;;  %v395_v3 = vld [vmem:[%s9665_s7 + $0x200] sm:$0xff]  ;;  %6545 = vmatprep.subr.bf16.mxu0 %v8172_v1  ;;  %v8299_v8 = vcombine.low %v515_v61, %v519_v62 }
  0x96   : > { %v399_v4 = vld [vmem:[%s9665_s7 + $0x220] sm:$0xff]  ;;  %6546 = vmatpush1.bf16.msra.mxu0 %v8171_v7 }
  0x97   : > { %v523_v5 = vld [vmem:[%s9665_s7 + $0x600] sm:$0xff]  ;;  %v8180_v9 = vcombine.high %v395_v3, %v399_v4  ;;  %6586 = vmatprep.subr.bf16.mxu1 %v8300_v2  ;;  %v8179_v15 = vcombine.low %v395_v3, %v399_v4 }
  0x98   : > { %v527_v6 = vld [vmem:[%s9665_s7 + $0x620] sm:$0xff]  ;;  %6587 = vmatpush1.bf16.msra.mxu1 %v8299_v8 }
  0x99   : > { %v8308_v10 = vcombine.high %v523_v5, %v527_v6  ;;  %v403_v11 = vld [vmem:[%s9665_s7 + $0x240] sm:$0xff]  ;;  %6547 = vmatprep.subr.bf16.mxu0 %v8180_v9  ;;  %v8307_v16 = vcombine.low %v523_v5, %v527_v6 }
  0x9a   : > { %v407_v12 = vld [vmem:[%s9665_s7 + $0x260] sm:$0xff]  ;;  %6548 = vmatpush1.bf16.msra.mxu0 %v8179_v15 }
  0x9b   : > { %v531_v13 = vld [vmem:[%s9665_s7 + $0x640] sm:$0xff]  ;;  %v8188_v17 = vcombine.high %v403_v11, %v407_v12  ;;  %6588 = vmatprep.subr.bf16.mxu1 %v8308_v10  ;;  %v8187_v23 = vcombine.low %v403_v11, %v407_v12 }
  0x9c   : > { %v535_v14 = vld [vmem:[%s9665_s7 + $0x660] sm:$0xff]  ;;  %6589 = vmatpush1.bf16.msra.mxu1 %v8307_v16 }
  0x9d   : > { %v8316_v18 = vcombine.high %v531_v13, %v535_v14  ;;  %v411_v19 = vld [vmem:[%s9665_s7 + $0x280] sm:$0xff]  ;;  %6549 = vmatprep.subr.bf16.mxu0 %v8188_v17  ;;  %v8315_v24 = vcombine.low %v531_v13, %v535_v14  ;;  %v9788_v17 = vcombine.low %v9729_v54, %v9729_v54 }
  0x9e   : > { %v415_v20 = vld [vmem:[%s9665_s7 + $0x2a0] sm:$0xff]  ;;  %6550 = vmatpush1.bf16.msra.mxu0 %v8187_v23  ;;  %v9800_v23 = vld [vmem:[%s9684_s26 + $0x18] sm:$0xff] }
  0x9f   : > { %v539_v21 = vld [vmem:[%s9665_s7 + $0x680] sm:$0xff]  ;;  %v8196_v25 = vcombine.high %v411_v19, %v415_v20  ;;  %6590 = vmatprep.subr.bf16.mxu1 %v8316_v18  ;;  %v8195_v31 = vcombine.low %v411_v19, %v415_v20  ;;  %v9793_v20 = vld [vmem:[%s9684_s26 + $0x10] sm:$0xff] }
  0xa0   : > { %v543_v22 = vld [vmem:[%s9665_s7 + $0x6a0] sm:$0xff]  ;;  %6591 = vmatpush1.bf16.msra.mxu1 %v8315_v24 }
  0xa1   : > { %v8324_v26 = vcombine.high %v539_v21, %v543_v22  ;;  %v419_v27 = vld [vmem:[%s9665_s7 + $0x2c0] sm:$0xff]  ;;  %6551 = vmatprep.subr.bf16.mxu0 %v8196_v25  ;;  %v8323_v32 = vcombine.low %v539_v21, %v543_v22  ;;  %v9797_v21 = vcombine.low %v9732_v55, %v9732_v55 }
  0xa2   : > { %v423_v28 = vld [vmem:[%s9665_s7 + $0x2e0] sm:$0xff]  ;;  %6552 = vmatpush1.bf16.msra.mxu0 %v8195_v31 }
  0xa3   : > { %v547_v29 = vld [vmem:[%s9665_s7 + $0x6c0] sm:$0xff]  ;;  %v8204_v33 = vcombine.high %v419_v27, %v423_v28  ;;  %6592 = vmatprep.subr.bf16.mxu1 %v8324_v26  ;;  %v8203_v39 = vcombine.low %v419_v27, %v423_v28  ;;  %v9806_v28 = vcombine.high %v9793_v20, %v9793_v20 }
  0xa4   : > { %v551_v30 = vld [vmem:[%s9665_s7 + $0x6e0] sm:$0xff]  ;;  %6593 = vmatpush1.bf16.msra.mxu1 %v8323_v32 }
  0xa5   : > { %v8332_v34 = vcombine.high %v547_v29, %v551_v30  ;;  %v427_v35 = vld [vmem:[%s9665_s7 + $0x300] sm:$0xff]  ;;  %6553 = vmatprep.subr.bf16.mxu0 %v8204_v33  ;;  %v8331_v40 = vcombine.low %v547_v29, %v551_v30  ;;  %v9813_v30 = vcombine.high %v9800_v23, %v9800_v23 }
  0xa6   : > { %v431_v36 = vld [vmem:[%s9665_s7 + $0x320] sm:$0xff]  ;;  %6554 = vmatpush1.bf16.msra.mxu0 %v8203_v39 }
  0xa7   : > { %v555_v37 = vld [vmem:[%s9665_s7 + $0x700] sm:$0xff]  ;;  %v8212_v41 = vcombine.high %v427_v35, %v431_v36  ;;  %6594 = vmatprep.subr.bf16.mxu1 %v8332_v34  ;;  %v8211_v47 = vcombine.low %v427_v35, %v431_v36 }
  0xa8   : > { %v559_v38 = vld [vmem:[%s9665_s7 + $0x720] sm:$0xff]  ;;  %6595 = vmatpush1.bf16.msra.mxu1 %v8331_v40 }
  0xa9   : > { %v8340_v42 = vcombine.high %v555_v37, %v559_v38  ;;  %v435_v43 = vld [vmem:[%s9665_s7 + $0x340] sm:$0xff]  ;;  %6555 = vmatprep.subr.bf16.mxu0 %v8212_v41  ;;  %v8339_v48 = vcombine.low %v555_v37, %v559_v38 }
  0xaa   : > { %v439_v44 = vld [vmem:[%s9665_s7 + $0x360] sm:$0xff]  ;;  %6556 = vmatpush1.bf16.msra.mxu0 %v8211_v47 }
  0xab   : > { %v563_v45 = vld [vmem:[%s9665_s7 + $0x740] sm:$0xff]  ;;  %v8220_v49 = vcombine.high %v435_v43, %v439_v44  ;;  %6596 = vmatprep.subr.bf16.mxu1 %v8340_v42  ;;  %v8219_v57 = vcombine.low %v435_v43, %v439_v44 }
  0xac   : > { %v567_v46 = vld [vmem:[%s9665_s7 + $0x760] sm:$0xff]  ;;  %6597 = vmatpush1.bf16.msra.mxu1 %v8339_v48 }
  0xad   : > { %v8348_v50 = vcombine.high %v563_v45, %v567_v46  ;;  %v443_v51 = vld [vmem:[%s9665_s7 + $0x380] sm:$0xff]  ;;  %6557 = vmatprep.subr.bf16.mxu0 %v8220_v49  ;;  %v8347_v58 = vcombine.low %v563_v45, %v567_v46 }
  0xae   : > { %v447_v52 = vld [vmem:[%s9665_s7 + $0x3a0] sm:$0xff]  ;;  %6558 = vmatpush1.bf16.msra.mxu0 %v8219_v57 }
  0xaf   : > { %v571_v53 = vld [vmem:[%s9665_s7 + $0x780] sm:$0xff]  ;;  %v8228_v61 = vcombine.high %v443_v51, %v447_v52  ;;  %6598 = vmatprep.subr.bf16.mxu1 %v8348_v50  ;;  %v8227_v3 = vcombine.low %v443_v51, %v447_v52 }
  0xb0   : > { %v575_v56 = vld [vmem:[%s9665_s7 + $0x7a0] sm:$0xff]  ;;  %6599 = vmatpush1.bf16.msra.mxu1 %v8347_v58 }
  0xb1   : > { %v8356_v62 = vcombine.high %v571_v53, %v575_v56  ;;  %v451_v63 = vld [vmem:[%s9665_s7 + $0x3c0] sm:$0xff]  ;;  %6559 = vmatprep.subr.bf16.mxu0 %v8228_v61  ;;  %v8355_v4 = vcombine.low %v571_v53, %v575_v56 }
  0xb2   : > { %v455_v0 = vld [vmem:[%s9665_s7 + $0x3e0] sm:$0xff]  ;;  %6560 = vmatpush1.bf16.msra.mxu0 %v8227_v3 }
  0xb3   : > { %v579_v1 = vld [vmem:[%s9665_s7 + $0x7c0] sm:$0xff]  ;;  %v8236_v5 = vcombine.high %v451_v63, %v455_v0  ;;  %6600 = vmatprep.subr.bf16.mxu1 %v8356_v62  ;;  %v8235_v11 = vcombine.low %v451_v63, %v455_v0 }
  0xb4   : > { %v583_v2 = vld [vmem:[%s9665_s7 + $0x7e0] sm:$0xff]  ;;  %6601 = vmatpush1.bf16.msra.mxu1 %v8355_v4 }
  0xb5   : > { %v8364_v6 = vcombine.high %v579_v1, %v583_v2  ;;  %v587_v7 = vld [vmem:[%s9665_s7 + $0x800] sm:$0xff]  ;;  %6561 = vmatprep.subr.bf16.mxu0 %v8236_v5  ;;  %v8363_v12 = vcombine.low %v579_v1, %v583_v2 }
  0xb6   : > { %v591_v8 = vld [vmem:[%s9665_s7 + $0x820] sm:$0xff]  ;;  %6562 = vmatpush1.bf16.msra.mxu0 %v8235_v11 }
  0xb7   : > { %v715_v9 = vld [vmem:[%s9665_s7 + $0xc00] sm:$0xff]  ;;  %v8372_v13 = vcombine.high %v587_v7, %v591_v8  ;;  %6602 = vmatprep.subr.bf16.mxu1 %v8364_v6  ;;  %v8371_v22 = vcombine.low %v587_v7, %v591_v8 }
  0xb8   : > { %v719_v10 = vld [vmem:[%s9665_s7 + $0xc20] sm:$0xff]  ;;  %6603 = vmatpush1.bf16.msra.mxu1 %v8363_v12 }
  0xb9   : > { %v8500_v14 = vcombine.high %v715_v9, %v719_v10  ;;  %v595_v15 = vld [vmem:[%s9665_s7 + $0x840] sm:$0xff]  ;;  %6613 = vmatprep.subr.bf16.mxu0 %v8372_v13  ;;  %v8499_v24 = vcombine.low %v715_v9, %v719_v10  ;;  %6564 = vmatmul.mubr.bf16.vlgmr.msra.gmra.mrb[0].mxu0 %v9788_v17 }
  0xba   : > { %v599_v16 = vld [vmem:[%s9665_s7 + $0x860] sm:$0xff]  ;;  %6614 = vmatpush1.bf16.msra.mxu0 %v8371_v22  ;;  %6645 = vmatprep.mubr.bf16.mxu0 %v9806_v28 }
  0xbb   : > { %v723_v18 = vld [vmem:[%s9665_s7 + $0xc40] sm:$0xff]  ;;  %v8380_v25 = vcombine.high %v595_v15, %v599_v16  ;;  %6654 = vmatprep.subr.bf16.mxu1 %v8500_v14  ;;  %6605 = vmatmul.mubr.bf16.vlgmr.msra.gmra.mrb[0].mxu1 %v9797_v21  ;;  %v8379_v31 = vcombine.low %v595_v15, %v599_v16 }
  0xbc   : > { %v727_v19 = vld [vmem:[%s9665_s7 + $0xc60] sm:$0xff]  ;;  %6655 = vmatpush1.bf16.msra.mxu1 %v8499_v24  ;;  %6686 = vmatprep.mubr.bf16.mxu1 %v9813_v30 }
  0xbd   : > { %v8508_v54 = vcombine.high %v723_v18, %v727_v19  ;;  %v603_v26 = vld [vmem:[%s9665_s7 + $0x880] sm:$0xff]  ;;  %6615 = vmatprep.subr.bf16.mxu0 %v8380_v25  ;;  %v8507_v32 = vcombine.low %v723_v18, %v727_v19 }
  0xbe   : > { %v607_v27 = vld [vmem:[%s9665_s7 + $0x8a0] sm:$0xff]  ;;  %6616 = vmatpush1.bf16.msra.mxu0 %v8379_v31 }
  0xbf   : > { %v731_v55 = vld [vmem:[%s9665_s7 + $0xc80] sm:$0xff]  ;;  %v8388_v33 = vcombine.high %v603_v26, %v607_v27  ;;  %6656 = vmatprep.subr.bf16.mxu1 %v8508_v54  ;;  %v8387_v39 = vcombine.low %v603_v26, %v607_v27 }
  0xc0   : > { %v735_v29 = vld [vmem:[%s9665_s7 + $0xca0] sm:$0xff]  ;;  %6657 = vmatpush1.bf16.msra.mxu1 %v8507_v32 }
  0xc1   : > { %v8516_v34 = vcombine.high %v731_v55, %v735_v29  ;;  %v611_v35 = vld [vmem:[%s9665_s7 + $0x8c0] sm:$0xff]  ;;  %6617 = vmatprep.subr.bf16.mxu0 %v8388_v33  ;;  %v8515_v40 = vcombine.low %v731_v55, %v735_v29 }
  0xc2   : > { %v615_v36 = vld [vmem:[%s9665_s7 + $0x8e0] sm:$0xff]  ;;  %6618 = vmatpush1.bf16.msra.mxu0 %v8387_v39 }
  0xc3   : > { %v739_v37 = vld [vmem:[%s9665_s7 + $0xcc0] sm:$0xff]  ;;  %v8396_v41 = vcombine.high %v611_v35, %v615_v36  ;;  %6658 = vmatprep.subr.bf16.mxu1 %v8516_v34  ;;  %v8395_v47 = vcombine.low %v611_v35, %v615_v36 }
  0xc4   : > { %v743_v38 = vld [vmem:[%s9665_s7 + $0xce0] sm:$0xff]  ;;  %6659 = vmatpush1.bf16.msra.mxu1 %v8515_v40 }
  0xc5   : > { %v8524_v42 = vcombine.high %v739_v37, %v743_v38  ;;  %v619_v43 = vld [vmem:[%s9665_s7 + $0x900] sm:$0xff]  ;;  %6619 = vmatprep.subr.bf16.mxu0 %v8396_v41  ;;  %v8523_v48 = vcombine.low %v739_v37, %v743_v38 }
  0xc6   : > { %v623_v44 = vld [vmem:[%s9665_s7 + $0x920] sm:$0xff]  ;;  %6620 = vmatpush1.bf16.msra.mxu0 %v8395_v47 }
  0xc7   : > { %v747_v45 = vld [vmem:[%s9665_s7 + $0xd00] sm:$0xff]  ;;  %v8404_v49 = vcombine.high %v619_v43, %v623_v44  ;;  %6660 = vmatprep.subr.bf16.mxu1 %v8524_v42  ;;  %v8403_v57 = vcombine.low %v619_v43, %v623_v44 }
  0xc8   : > { %v751_v46 = vld [vmem:[%s9665_s7 + $0xd20] sm:$0xff]  ;;  %6661 = vmatpush1.bf16.msra.mxu1 %v8523_v48 }
  0xc9   : > { %v8532_v50 = vcombine.high %v747_v45, %v751_v46  ;;  %v627_v51 = vld [vmem:[%s9665_s7 + $0x940] sm:$0xff]  ;;  %6621 = vmatprep.subr.bf16.mxu0 %v8404_v49  ;;  %v8531_v58 = vcombine.low %v747_v45, %v751_v46 }
  0xca   : > { %v631_v52 = vld [vmem:[%s9665_s7 + $0x960] sm:$0xff]  ;;  %6622 = vmatpush1.bf16.msra.mxu0 %v8403_v57 }
  0xcb   : > { %v755_v53 = vld [vmem:[%s9665_s7 + $0xd40] sm:$0xff]  ;;  %v8412_v61 = vcombine.high %v627_v51, %v631_v52  ;;  %6662 = vmatprep.subr.bf16.mxu1 %v8532_v50  ;;  %v8411_v3 = vcombine.low %v627_v51, %v631_v52 }
  0xcc   : > { %v759_v56 = vld [vmem:[%s9665_s7 + $0xd60] sm:$0xff]  ;;  %6663 = vmatpush1.bf16.msra.mxu1 %v8531_v58 }
  0xcd   : > { %v8540_v62 = vcombine.high %v755_v53, %v759_v56  ;;  %v635_v63 = vld [vmem:[%s9665_s7 + $0x980] sm:$0xff]  ;;  %6623 = vmatprep.subr.bf16.mxu0 %v8412_v61  ;;  %v8539_v4 = vcombine.low %v755_v53, %v759_v56 }
  0xce   : > { %v639_v0 = vld [vmem:[%s9665_s7 + $0x9a0] sm:$0xff]  ;;  %6624 = vmatpush1.bf16.msra.mxu0 %v8411_v3 }
  0xcf   : > { %v763_v1 = vld [vmem:[%s9665_s7 + $0xd80] sm:$0xff]  ;;  %v8420_v5 = vcombine.high %v635_v63, %v639_v0  ;;  %6664 = vmatprep.subr.bf16.mxu1 %v8540_v62  ;;  %v8419_v11 = vcombine.low %v635_v63, %v639_v0 }
  0xd0   : > { %v767_v2 = vld [vmem:[%s9665_s7 + $0xda0] sm:$0xff]  ;;  %6665 = vmatpush1.bf16.msra.mxu1 %v8539_v4 }
  0xd1   : > { %v8548_v6 = vcombine.high %v763_v1, %v767_v2  ;;  %v643_v7 = vld [vmem:[%s9665_s7 + $0x9c0] sm:$0xff]  ;;  %6625 = vmatprep.subr.bf16.mxu0 %v8420_v5  ;;  %v8547_v12 = vcombine.low %v763_v1, %v767_v2 }
  0xd2   : > { %v647_v8 = vld [vmem:[%s9665_s7 + $0x9e0] sm:$0xff]  ;;  %6626 = vmatpush1.bf16.msra.mxu0 %v8419_v11 }
  0xd3   : > { %v771_v9 = vld [vmem:[%s9665_s7 + $0xdc0] sm:$0xff]  ;;  %v8428_v13 = vcombine.high %v643_v7, %v647_v8  ;;  %6666 = vmatprep.subr.bf16.mxu1 %v8548_v6  ;;  %v8427_v22 = vcombine.low %v643_v7, %v647_v8 }
  0xd4   : > { %v775_v10 = vld [vmem:[%s9665_s7 + $0xde0] sm:$0xff]  ;;  %6667 = vmatpush1.bf16.msra.mxu1 %v8547_v12 }
  0xd5   : > { %v8556_v14 = vcombine.high %v771_v9, %v775_v10  ;;  %v651_v15 = vld [vmem:[%s9665_s7 + $0xa00] sm:$0xff]  ;;  %6627 = vmatprep.subr.bf16.mxu0 %v8428_v13  ;;  %v8555_v24 = vcombine.low %v771_v9, %v775_v10 }
  0xd6   : > { %v655_v16 = vld [vmem:[%s9665_s7 + $0xa20] sm:$0xff]  ;;  %6628 = vmatpush1.bf16.msra.mxu0 %v8427_v22 }
  0xd7   : > { %v779_v18 = vld [vmem:[%s9665_s7 + $0xe00] sm:$0xff]  ;;  %v8436_v25 = vcombine.high %v651_v15, %v655_v16  ;;  %6668 = vmatprep.subr.bf16.mxu1 %v8556_v14  ;;  %v8435_v31 = vcombine.low %v651_v15, %v655_v16 }
  0xd8   : > { %v783_v19 = vld [vmem:[%s9665_s7 + $0xe20] sm:$0xff]  ;;  %6669 = vmatpush1.bf16.msra.mxu1 %v8555_v24 }
  0xd9   : > { %v8564_v54 = vcombine.high %v779_v18, %v783_v19  ;;  %v659_v26 = vld [vmem:[%s9665_s7 + $0xa40] sm:$0xff]  ;;  %6629 = vmatprep.subr.bf16.mxu0 %v8436_v25  ;;  %v8563_v32 = vcombine.low %v779_v18, %v783_v19 }
  0xda   : > { %v663_v27 = vld [vmem:[%s9665_s7 + $0xa60] sm:$0xff]  ;;  %6630 = vmatpush1.bf16.msra.mxu0 %v8435_v31 }
  0xdb   : > { %v787_v55 = vld [vmem:[%s9665_s7 + $0xe40] sm:$0xff]  ;;  %v8444_v33 = vcombine.high %v659_v26, %v663_v27  ;;  %6670 = vmatprep.subr.bf16.mxu1 %v8564_v54  ;;  %v8443_v39 = vcombine.low %v659_v26, %v663_v27 }
  0xdc   : > { %v791_v29 = vld [vmem:[%s9665_s7 + $0xe60] sm:$0xff]  ;;  %6671 = vmatpush1.bf16.msra.mxu1 %v8563_v32 }
  0xdd   : > { %v8572_v34 = vcombine.high %v787_v55, %v791_v29  ;;  %v667_v35 = vld [vmem:[%s9665_s7 + $0xa80] sm:$0xff]  ;;  %6631 = vmatprep.subr.bf16.mxu0 %v8444_v33  ;;  %v8571_v40 = vcombine.low %v787_v55, %v791_v29 }
  0xde   : > { %v671_v36 = vld [vmem:[%s9665_s7 + $0xaa0] sm:$0xff]  ;;  %6632 = vmatpush1.bf16.msra.mxu0 %v8443_v39 }
  0xdf   : > { %v795_v37 = vld [vmem:[%s9665_s7 + $0xe80] sm:$0xff]  ;;  %v8452_v41 = vcombine.high %v667_v35, %v671_v36  ;;  %6672 = vmatprep.subr.bf16.mxu1 %v8572_v34  ;;  %v8451_v47 = vcombine.low %v667_v35, %v671_v36 }
  0xe0   : > { %v799_v38 = vld [vmem:[%s9665_s7 + $0xea0] sm:$0xff]  ;;  %6673 = vmatpush1.bf16.msra.mxu1 %v8571_v40 }
  0xe1   : > { %v8580_v42 = vcombine.high %v795_v37, %v799_v38  ;;  %v675_v43 = vld [vmem:[%s9665_s7 + $0xac0] sm:$0xff]  ;;  %6633 = vmatprep.subr.bf16.mxu0 %v8452_v41  ;;  %v8579_v48 = vcombine.low %v795_v37, %v799_v38  ;;  %v9878_v37 = vcombine.low %v9793_v20, %v9793_v20  ;;  %v9887_v41 = vcombine.low %v9800_v23, %v9800_v23 }
  0xe2   : > { %v679_v44 = vld [vmem:[%s9665_s7 + $0xae0] sm:$0xff]  ;;  %6634 = vmatpush1.bf16.msra.mxu0 %v8451_v47 }
  0xe3   : > { %v803_v45 = vld [vmem:[%s9665_s7 + $0xec0] sm:$0xff]  ;;  %v8460_v49 = vcombine.high %v675_v43, %v679_v44  ;;  %6674 = vmatprep.subr.bf16.mxu1 %v8580_v42  ;;  %v8459_v57 = vcombine.low %v675_v43, %v679_v44  ;;  %v9890_v43 = vld [vmem:[%s9684_s26 + $0x28] sm:$0xff] }
  0xe4   : > { %v807_v46 = vld [vmem:[%s9665_s7 + $0xee0] sm:$0xff]  ;;  %6675 = vmatpush1.bf16.msra.mxu1 %v8579_v48 }
  0xe5   : > { %v8588_v50 = vcombine.high %v803_v45, %v807_v46  ;;  %v683_v51 = vld [vmem:[%s9665_s7 + $0xb00] sm:$0xff]  ;;  %6635 = vmatprep.subr.bf16.mxu0 %v8460_v49  ;;  %v8587_v58 = vcombine.low %v803_v45, %v807_v46 }
  0xe6   : > { %v687_v52 = vld [vmem:[%s9665_s7 + $0xb20] sm:$0xff]  ;;  %6636 = vmatpush1.bf16.msra.mxu0 %v8459_v57 }
  0xe7   : > { %v811_v53 = vld [vmem:[%s9665_s7 + $0xf00] sm:$0xff]  ;;  %v8468_v61 = vcombine.high %v683_v51, %v687_v52  ;;  %6676 = vmatprep.subr.bf16.mxu1 %v8588_v50  ;;  %v8467_v3 = vcombine.low %v683_v51, %v687_v52  ;;  %v9903_v50 = vcombine.high %v9890_v43, %v9890_v43 }
  0xe8   : > { %v815_v56 = vld [vmem:[%s9665_s7 + $0xf20] sm:$0xff]  ;;  %6677 = vmatpush1.bf16.msra.mxu1 %v8587_v58 }
  0xe9   : > { %v8596_v62 = vcombine.high %v811_v53, %v815_v56  ;;  %v691_v63 = vld [vmem:[%s9665_s7 + $0xb40] sm:$0xff]  ;;  %6637 = vmatprep.subr.bf16.mxu0 %v8468_v61  ;;  %v8595_v4 = vcombine.low %v811_v53, %v815_v56 }
  0xea   : > { %v695_v0 = vld [vmem:[%s9665_s7 + $0xb60] sm:$0xff]  ;;  %6638 = vmatpush1.bf16.msra.mxu0 %v8467_v3 }
  0xeb   : > { %v819_v1 = vld [vmem:[%s9665_s7 + $0xf40] sm:$0xff]  ;;  %v8476_v5 = vcombine.high %v691_v63, %v695_v0  ;;  %6678 = vmatprep.subr.bf16.mxu1 %v8596_v62  ;;  %v8475_v11 = vcombine.low %v691_v63, %v695_v0 }
  0xec   : > { %v823_v2 = vld [vmem:[%s9665_s7 + $0xf60] sm:$0xff]  ;;  %6679 = vmatpush1.bf16.msra.mxu1 %v8595_v4 }
  0xed   : > { %v8604_v6 = vcombine.high %v819_v1, %v823_v2  ;;  %v699_v7 = vld [vmem:[%s9665_s7 + $0xb80] sm:$0xff]  ;;  %6639 = vmatprep.subr.bf16.mxu0 %v8476_v5  ;;  %v8603_v12 = vcombine.low %v819_v1, %v823_v2 }
  0xee   : > { %v703_v8 = vld [vmem:[%s9665_s7 + $0xba0] sm:$0xff]  ;;  %6640 = vmatpush1.bf16.msra.mxu0 %v8475_v11 }
  0xef   : > { %v827_v9 = vld [vmem:[%s9665_s7 + $0xf80] sm:$0xff]  ;;  %v8484_v13 = vcombine.high %v699_v7, %v703_v8  ;;  %6680 = vmatprep.subr.bf16.mxu1 %v8604_v6  ;;  %v8483_v22 = vcombine.low %v699_v7, %v703_v8 }
  0xf0   : > { %v831_v10 = vld [vmem:[%s9665_s7 + $0xfa0] sm:$0xff]  ;;  %6681 = vmatpush1.bf16.msra.mxu1 %v8603_v12 }
  0xf1   : > { %v8612_v14 = vcombine.high %v827_v9, %v831_v10  ;;  %v707_v15 = vld [vmem:[%s9665_s7 + $0xbc0] sm:$0xff]  ;;  %6641 = vmatprep.subr.bf16.mxu0 %v8484_v13  ;;  %v8611_v24 = vcombine.low %v827_v9, %v831_v10 }
  0xf2   : > { %v711_v16 = vld [vmem:[%s9665_s7 + $0xbe0] sm:$0xff]  ;;  %6642 = vmatpush1.bf16.msra.mxu0 %v8483_v22 }
  0xf3   : > { %v835_v18 = vld [vmem:[%s9665_s7 + $0xfc0] sm:$0xff]  ;;  %v8492_v25 = vcombine.high %v707_v15, %v711_v16  ;;  %6682 = vmatprep.subr.bf16.mxu1 %v8612_v14  ;;  %v8491_v31 = vcombine.low %v707_v15, %v711_v16 }
  0xf4   : > { %v839_v19 = vld [vmem:[%s9665_s7 + $0xfe0] sm:$0xff]  ;;  %6683 = vmatpush1.bf16.msra.mxu1 %v8611_v24 }
  0xf5   : > { %v8620_v54 = vcombine.high %v835_v18, %v839_v19  ;;  %v843_v26 = vld [vmem:[%s9665_s7 + $0x1000] sm:$0xff]  ;;  %6643 = vmatprep.subr.bf16.mxu0 %v8492_v25  ;;  %v8619_v32 = vcombine.low %v835_v18, %v839_v19 }
  0xf6   : > { %v847_v27 = vld [vmem:[%s9665_s7 + $0x1020] sm:$0xff]  ;;  %6644 = vmatpush1.bf16.msra.mxu0 %v8491_v31 }
  0xf7   : > { %v971_v55 = vld [vmem:[%s9665_s7 + $0x1400] sm:$0xff]  ;;  %v8628_v33 = vcombine.high %v843_v26, %v847_v27  ;;  %6684 = vmatprep.subr.bf16.mxu1 %v8620_v54  ;;  %v8627_v42 = vcombine.low %v843_v26, %v847_v27 }
  0xf8   : > { %v975_v29 = vld [vmem:[%s9665_s7 + $0x1420] sm:$0xff]  ;;  %6685 = vmatpush1.bf16.msra.mxu1 %v8619_v32 }
  0xf9   : > { %v8756_v34 = vcombine.high %v971_v55, %v975_v29  ;;  %v851_v35 = vld [vmem:[%s9665_s7 + $0x1040] sm:$0xff]  ;;  %6695 = vmatprep.subr.bf16.mxu0 %v8628_v33  ;;  %v8755_v44 = vcombine.low %v971_v55, %v975_v29  ;;  %6646 = vmatmul.mubr.bf16.vlgmr.msra.gmra.mrb[4].mxu0 %v9878_v37 }
  0xfa   : > { %v855_v36 = vld [vmem:[%s9665_s7 + $0x1060] sm:$0xff]  ;;  %6696 = vmatpush1.bf16.msra.mxu0 %v8627_v42 }
  0xfb   : > { %v979_v38 = vld [vmem:[%s9665_s7 + $0x1440] sm:$0xff]  ;;  %v8636_v45 = vcombine.high %v851_v35, %v855_v36  ;;  %6736 = vmatprep.subr.bf16.mxu1 %v8756_v34  ;;  %6687 = vmatmul.mubr.bf16.vlgmr.msra.gmra.mrb[4].mxu1 %v9887_v41  ;;  %v8635_v51 = vcombine.low %v851_v35, %v855_v36 }
  0xfc   : > { %v983_v39 = vld [vmem:[%s9665_s7 + $0x1460] sm:$0xff]  ;;  %6737 = vmatpush1.bf16.msra.mxu1 %v8755_v44  ;;  %6768 = vmatprep.mubr.bf16.mxu1 %v9903_v50 }
  0xfd   : > { %v9883_v40 = vld [vmem:[%s9684_s26 + $0x20] sm:$0xff]  ;;  %v8764_v20 = vcombine.high %v979_v38, %v983_v39  ;;  %6697 = vmatprep.subr.bf16.mxu0 %v8636_v45  ;;  %v8763_v52 = vcombine.low %v979_v38, %v983_v39 }
  0xfe   : > { %v859_v46 = vld [vmem:[%s9665_s7 + $0x1080] sm:$0xff]  ;;  %v9896_v48 = vcombine.high %v9883_v40, %v9883_v40  ;;  %6698 = vmatpush1.bf16.msra.mxu0 %v8635_v51 }
  0xff   : > { %v863_v47 = vld [vmem:[%s9665_s7 + $0x10a0] sm:$0xff]  ;;  %6738 = vmatprep.subr.bf16.mxu1 %v8764_v20 }
 0x100   : > { %v987_v23 = vld [vmem:[%s9665_s7 + $0x1480] sm:$0xff]  ;;  %v8644_v53 = vcombine.high %v859_v46, %v863_v47  ;;  %6727 = vmatprep.mubr.bf16.mxu0 %v9896_v48  ;;  %v8643_v63 = vcombine.low %v859_v46, %v863_v47  ;;  %6739 = vmatpush1.bf16.msra.mxu1 %v8763_v52 }
 0x101   : > { %v991_v49 = vld [vmem:[%s9665_s7 + $0x14a0] sm:$0xff] }
 0x102   : > { %v8772_v56 = vcombine.high %v987_v23, %v991_v49  ;;  %v867_v57 = vld [vmem:[%s9665_s7 + $0x10c0] sm:$0xff]  ;;  %6699 = vmatprep.subr.bf16.mxu0 %v8644_v53  ;;  %v8771_v0 = vcombine.low %v987_v23, %v991_v49 }
 0x103   : > { %v871_v58 = vld [vmem:[%s9665_s7 + $0x10e0] sm:$0xff]  ;;  %6700 = vmatpush1.bf16.msra.mxu0 %v8643_v63 }
 0x104   : > { %v995_v61 = vld [vmem:[%s9665_s7 + $0x14c0] sm:$0xff]  ;;  %v8652_v1 = vcombine.high %v867_v57, %v871_v58  ;;  %6740 = vmatprep.subr.bf16.mxu1 %v8772_v56  ;;  %v8651_v7 = vcombine.low %v867_v57, %v871_v58 }
 0x105   : > { %v999_v62 = vld [vmem:[%s9665_s7 + $0x14e0] sm:$0xff]  ;;  %6741 = vmatpush1.bf16.msra.mxu1 %v8771_v0 }
 0x106   : > { %v8780_v2 = vcombine.high %v995_v61, %v999_v62  ;;  %v875_v3 = vld [vmem:[%s9665_s7 + $0x1100] sm:$0xff]  ;;  %6701 = vmatprep.subr.bf16.mxu0 %v8652_v1  ;;  %v8779_v8 = vcombine.low %v995_v61, %v999_v62 }
 0x107   : > { %v879_v4 = vld [vmem:[%s9665_s7 + $0x1120] sm:$0xff]  ;;  %6702 = vmatpush1.bf16.msra.mxu0 %v8651_v7 }
 0x108   : > { %v1003_v5 = vld [vmem:[%s9665_s7 + $0x1500] sm:$0xff]  ;;  %v8660_v9 = vcombine.high %v875_v3, %v879_v4  ;;  %6742 = vmatprep.subr.bf16.mxu1 %v8780_v2  ;;  %v8659_v15 = vcombine.low %v875_v3, %v879_v4 }
 0x109   : > { %v1007_v6 = vld [vmem:[%s9665_s7 + $0x1520] sm:$0xff]  ;;  %6743 = vmatpush1.bf16.msra.mxu1 %v8779_v8 }
 0x10a   : > { %v8788_v10 = vcombine.high %v1003_v5, %v1007_v6  ;;  %v883_v11 = vld [vmem:[%s9665_s7 + $0x1140] sm:$0xff]  ;;  %6703 = vmatprep.subr.bf16.mxu0 %v8660_v9  ;;  %v8787_v16 = vcombine.low %v1003_v5, %v1007_v6 }
 0x10b   : > { %v887_v12 = vld [vmem:[%s9665_s7 + $0x1160] sm:$0xff]  ;;  %6704 = vmatpush1.bf16.msra.mxu0 %v8659_v15 }
 0x10c   : > { %v1011_v13 = vld [vmem:[%s9665_s7 + $0x1540] sm:$0xff]  ;;  %v8668_v18 = vcombine.high %v883_v11, %v887_v12  ;;  %6744 = vmatprep.subr.bf16.mxu1 %v8788_v10  ;;  %v8667_v26 = vcombine.low %v883_v11, %v887_v12 }
 0x10d   : > { %v1015_v14 = vld [vmem:[%s9665_s7 + $0x1560] sm:$0xff]  ;;  %6745 = vmatpush1.bf16.msra.mxu1 %v8787_v16 }
 0x10e   : > { %v8796_v19 = vcombine.high %v1011_v13, %v1015_v14  ;;  %v891_v22 = vld [vmem:[%s9665_s7 + $0x1180] sm:$0xff]  ;;  %6705 = vmatprep.subr.bf16.mxu0 %v8668_v18  ;;  %v8795_v27 = vcombine.low %v1011_v13, %v1015_v14 }
 0x10f   : > { %v895_v24 = vld [vmem:[%s9665_s7 + $0x11a0] sm:$0xff]  ;;  %6706 = vmatpush1.bf16.msra.mxu0 %v8667_v26 }
 0x110   : > { %v1019_v25 = vld [vmem:[%s9665_s7 + $0x1580] sm:$0xff]  ;;  %v8676_v55 = vcombine.high %v891_v22, %v895_v24  ;;  %6746 = vmatprep.subr.bf16.mxu1 %v8796_v19  ;;  %v8675_v35 = vcombine.low %v891_v22, %v895_v24 }
 0x111   : > { %v1023_v54 = vld [vmem:[%s9665_s7 + $0x15a0] sm:$0xff]  ;;  %6747 = vmatpush1.bf16.msra.mxu1 %v8795_v27 }
 0x112   : > { %v8804_v29 = vcombine.high %v1019_v25, %v1023_v54  ;;  %v899_v31 = vld [vmem:[%s9665_s7 + $0x11c0] sm:$0xff]  ;;  %6707 = vmatprep.subr.bf16.mxu0 %v8676_v55  ;;  %v8803_v36 = vcombine.low %v1019_v25, %v1023_v54 }
 0x113   : > { %v903_v32 = vld [vmem:[%s9665_s7 + $0x11e0] sm:$0xff]  ;;  %6708 = vmatpush1.bf16.msra.mxu0 %v8675_v35 }
 0x114   : > { %v1027_v33 = vld [vmem:[%s9665_s7 + $0x15c0] sm:$0xff]  ;;  %v8684_v38 = vcombine.high %v899_v31, %v903_v32  ;;  %6748 = vmatprep.subr.bf16.mxu1 %v8804_v29  ;;  %v8683_v46 = vcombine.low %v899_v31, %v903_v32 }
 0x115   : > { %v1031_v34 = vld [vmem:[%s9665_s7 + $0x15e0] sm:$0xff]  ;;  %6749 = vmatpush1.bf16.msra.mxu1 %v8803_v36 }
 0x116   : > { %v8812_v39 = vcombine.high %v1027_v33, %v1031_v34  ;;  %v907_v42 = vld [vmem:[%s9665_s7 + $0x1200] sm:$0xff]  ;;  %6709 = vmatprep.subr.bf16.mxu0 %v8684_v38  ;;  %v8811_v47 = vcombine.low %v1027_v33, %v1031_v34 }
 0x117   : > { %v911_v44 = vld [vmem:[%s9665_s7 + $0x1220] sm:$0xff]  ;;  %6710 = vmatpush1.bf16.msra.mxu0 %v8683_v46 }
 0x118   : > { %v1035_v45 = vld [vmem:[%s9665_s7 + $0x1600] sm:$0xff]  ;;  %v8692_v23 = vcombine.high %v907_v42, %v911_v44  ;;  %6750 = vmatprep.subr.bf16.mxu1 %v8812_v39  ;;  %v8691_v57 = vcombine.low %v907_v42, %v911_v44 }
 0x119   : > { %v1039_v20 = vld [vmem:[%s9665_s7 + $0x1620] sm:$0xff]  ;;  %6751 = vmatpush1.bf16.msra.mxu1 %v8811_v47 }
 0x11a   : > { %v8820_v49 = vcombine.high %v1035_v45, %v1039_v20  ;;  %v915_v51 = vld [vmem:[%s9665_s7 + $0x1240] sm:$0xff]  ;;  %6711 = vmatprep.subr.bf16.mxu0 %v8692_v23  ;;  %v8819_v58 = vcombine.low %v1035_v45, %v1039_v20 }
 0x11b   : > { %v919_v52 = vld [vmem:[%s9665_s7 + $0x1260] sm:$0xff]  ;;  %6712 = vmatpush1.bf16.msra.mxu0 %v8691_v57 }
 0x11c   : > { %v1043_v53 = vld [vmem:[%s9665_s7 + $0x1640] sm:$0xff]  ;;  %v8700_v61 = vcombine.high %v915_v51, %v919_v52  ;;  %6752 = vmatprep.subr.bf16.mxu1 %v8820_v49  ;;  %v8699_v3 = vcombine.low %v915_v51, %v919_v52 }
 0x11d   : > { %v1047_v56 = vld [vmem:[%s9665_s7 + $0x1660] sm:$0xff]  ;;  %6753 = vmatpush1.bf16.msra.mxu1 %v8819_v58 }
 0x11e   : > { %v8828_v62 = vcombine.high %v1043_v53, %v1047_v56  ;;  %v923_v63 = vld [vmem:[%s9665_s7 + $0x1280] sm:$0xff]  ;;  %6713 = vmatprep.subr.bf16.mxu0 %v8700_v61  ;;  %v8827_v4 = vcombine.low %v1043_v53, %v1047_v56 }
 0x11f   : > { %v927_v0 = vld [vmem:[%s9665_s7 + $0x12a0] sm:$0xff]  ;;  %6714 = vmatpush1.bf16.msra.mxu0 %v8699_v3 }
 0x120   : > { %v1051_v1 = vld [vmem:[%s9665_s7 + $0x1680] sm:$0xff]  ;;  %v8708_v5 = vcombine.high %v923_v63, %v927_v0  ;;  %6754 = vmatprep.subr.bf16.mxu1 %v8828_v62  ;;  %v8707_v11 = vcombine.low %v923_v63, %v927_v0 }
 0x121   : > { %v1055_v2 = vld [vmem:[%s9665_s7 + $0x16a0] sm:$0xff]  ;;  %6755 = vmatpush1.bf16.msra.mxu1 %v8827_v4 }
 0x122   : > { %v8836_v6 = vcombine.high %v1051_v1, %v1055_v2  ;;  %v931_v7 = vld [vmem:[%s9665_s7 + $0x12c0] sm:$0xff]  ;;  %6715 = vmatprep.subr.bf16.mxu0 %v8708_v5  ;;  %v8835_v12 = vcombine.low %v1051_v1, %v1055_v2  ;;  %v9968_v5 = vcombine.low %v9883_v40, %v9883_v40 }
 0x123   : > { %v935_v8 = vld [vmem:[%s9665_s7 + $0x12e0] sm:$0xff]  ;;  %6716 = vmatpush1.bf16.msra.mxu0 %v8707_v11  ;;  %v9980_v11 = vld [vmem:[%s9684_s26 + $0x38] sm:$0xff] }
 0x124   : > { %v1059_v9 = vld [vmem:[%s9665_s7 + $0x16c0] sm:$0xff]  ;;  %v8716_v13 = vcombine.high %v931_v7, %v935_v8  ;;  %6756 = vmatprep.subr.bf16.mxu1 %v8836_v6  ;;  %v8715_v22 = vcombine.low %v931_v7, %v935_v8  ;;  %v9973_v8 = vld [vmem:[%s9684_s26 + $0x30] sm:$0xff] }
 0x125   : > { %v1063_v10 = vld [vmem:[%s9665_s7 + $0x16e0] sm:$0xff]  ;;  %6757 = vmatpush1.bf16.msra.mxu1 %v8835_v12 }
 0x126   : > { %v8844_v14 = vcombine.high %v1059_v9, %v1063_v10  ;;  %v939_v15 = vld [vmem:[%s9665_s7 + $0x1300] sm:$0xff]  ;;  %6717 = vmatprep.subr.bf16.mxu0 %v8716_v13  ;;  %v8843_v24 = vcombine.low %v1059_v9, %v1063_v10  ;;  %v9977_v9 = vcombine.low %v9890_v43, %v9890_v43 }
 0x127   : > { %v943_v16 = vld [vmem:[%s9665_s7 + $0x1320] sm:$0xff]  ;;  %6718 = vmatpush1.bf16.msra.mxu0 %v8715_v22 }
 0x128   : > { %v1067_v18 = vld [vmem:[%s9665_s7 + $0x1700] sm:$0xff]  ;;  %v8724_v25 = vcombine.high %v939_v15, %v943_v16  ;;  %6758 = vmatprep.subr.bf16.mxu1 %v8844_v14  ;;  %v8723_v31 = vcombine.low %v939_v15, %v943_v16  ;;  %v9986_v16 = vcombine.high %v9973_v8, %v9973_v8 }
 0x129   : > { %v1071_v19 = vld [vmem:[%s9665_s7 + $0x1720] sm:$0xff]  ;;  %6759 = vmatpush1.bf16.msra.mxu1 %v8843_v24 }
 0x12a   : > { %v8852_v54 = vcombine.high %v1067_v18, %v1071_v19  ;;  %v947_v26 = vld [vmem:[%s9665_s7 + $0x1340] sm:$0xff]  ;;  %6719 = vmatprep.subr.bf16.mxu0 %v8724_v25  ;;  %v8851_v32 = vcombine.low %v1067_v18, %v1071_v19  ;;  %v9993_v19 = vcombine.high %v9980_v11, %v9980_v11 }
 0x12b   : > { %v951_v27 = vld [vmem:[%s9665_s7 + $0x1360] sm:$0xff]  ;;  %6720 = vmatpush1.bf16.msra.mxu0 %v8723_v31 }
 0x12c   : > { %v1075_v55 = vld [vmem:[%s9665_s7 + $0x1740] sm:$0xff]  ;;  %v8732_v33 = vcombine.high %v947_v26, %v951_v27  ;;  %6760 = vmatprep.subr.bf16.mxu1 %v8852_v54  ;;  %v8731_v42 = vcombine.low %v947_v26, %v951_v27 }
 0x12d   : > { %v1079_v29 = vld [vmem:[%s9665_s7 + $0x1760] sm:$0xff]  ;;  %6761 = vmatpush1.bf16.msra.mxu1 %v8851_v32 }
 0x12e   : > { %v8860_v34 = vcombine.high %v1075_v55, %v1079_v29  ;;  %v955_v35 = vld [vmem:[%s9665_s7 + $0x1380] sm:$0xff]  ;;  %6721 = vmatprep.subr.bf16.mxu0 %v8732_v33  ;;  %v8859_v44 = vcombine.low %v1075_v55, %v1079_v29 }
 0x12f   : > { %v959_v36 = vld [vmem:[%s9665_s7 + $0x13a0] sm:$0xff]  ;;  %6722 = vmatpush1.bf16.msra.mxu0 %v8731_v42 }
 0x130   : > { %v1083_v38 = vld [vmem:[%s9665_s7 + $0x1780] sm:$0xff]  ;;  %v8740_v45 = vcombine.high %v955_v35, %v959_v36  ;;  %6762 = vmatprep.subr.bf16.mxu1 %v8860_v34  ;;  %v8739_v51 = vcombine.low %v955_v35, %v959_v36 }
 0x131   : > { %v1087_v39 = vld [vmem:[%s9665_s7 + $0x17a0] sm:$0xff]  ;;  %6763 = vmatpush1.bf16.msra.mxu1 %v8859_v44 }
 0x132   : > { %v8868_v20 = vcombine.high %v1083_v38, %v1087_v39  ;;  %v963_v46 = vld [vmem:[%s9665_s7 + $0x13c0] sm:$0xff]  ;;  %6723 = vmatprep.subr.bf16.mxu0 %v8740_v45  ;;  %v8867_v52 = vcombine.low %v1083_v38, %v1087_v39 }
 0x133   : > { %v967_v47 = vld [vmem:[%s9665_s7 + $0x13e0] sm:$0xff]  ;;  %6724 = vmatpush1.bf16.msra.mxu0 %v8739_v51 }
 0x134   : > { %v1091_v23 = vld [vmem:[%s9665_s7 + $0x17c0] sm:$0xff]  ;;  %v8748_v53 = vcombine.high %v963_v46, %v967_v47  ;;  %6764 = vmatprep.subr.bf16.mxu1 %v8868_v20  ;;  %v8747_v63 = vcombine.low %v963_v46, %v967_v47 }
 0x135   : > { %v1095_v49 = vld [vmem:[%s9665_s7 + $0x17e0] sm:$0xff]  ;;  %6765 = vmatpush1.bf16.msra.mxu1 %v8867_v52 }
 0x136   : > { %v8876_v56 = vcombine.high %v1091_v23, %v1095_v49  ;;  %v1099_v57 = vld [vmem:[%s9665_s7 + $0x1800] sm:$0xff]  ;;  %6725 = vmatprep.subr.bf16.mxu0 %v8748_v53  ;;  %v8875_v0 = vcombine.low %v1091_v23, %v1095_v49 }
 0x137   : > { %v1103_v58 = vld [vmem:[%s9665_s7 + $0x1820] sm:$0xff]  ;;  %6726 = vmatpush1.bf16.msra.mxu0 %v8747_v63 }
 0x138   : > { %v1227_v61 = vld [vmem:[%s9665_s7 + $0x1c00] sm:$0xff]  ;;  %v8884_v1 = vcombine.high %v1099_v57, %v1103_v58  ;;  %6766 = vmatprep.subr.bf16.mxu1 %v8876_v56  ;;  %v8883_v10 = vcombine.low %v1099_v57, %v1103_v58 }
 0x139   : > { %v1231_v62 = vld [vmem:[%s9665_s7 + $0x1c20] sm:$0xff]  ;;  %6767 = vmatpush1.bf16.msra.mxu1 %v8875_v0 }
 0x13a   : > { %v9012_v2 = vcombine.high %v1227_v61, %v1231_v62  ;;  %v1107_v3 = vld [vmem:[%s9665_s7 + $0x1840] sm:$0xff]  ;;  %6777 = vmatprep.subr.bf16.mxu0 %v8884_v1  ;;  %v9011_v12 = vcombine.low %v1227_v61, %v1231_v62  ;;  %6728 = vmatmul.mubr.bf16.vlgmr.msra.gmra.mrb[8].mxu0 %v9968_v5 }
 0x13b   : > { %v1111_v4 = vld [vmem:[%s9665_s7 + $0x1860] sm:$0xff]  ;;  %6778 = vmatpush1.bf16.msra.mxu0 %v8883_v10  ;;  %6809 = vmatprep.mubr.bf16.mxu0 %v9986_v16 }
 0x13c   : > { %v1235_v6 = vld [vmem:[%s9665_s7 + $0x1c40] sm:$0xff]  ;;  %v8892_v13 = vcombine.high %v1107_v3, %v1111_v4  ;;  %6818 = vmatprep.subr.bf16.mxu1 %v9012_v2  ;;  %6769 = vmatmul.mubr.bf16.vlgmr.msra.gmra.mrb[8].mxu1 %v9977_v9  ;;  %v8891_v22 = vcombine.low %v1107_v3, %v1111_v4 }
 0x13d   : > { %v1239_v7 = vld [vmem:[%s9665_s7 + $0x1c60] sm:$0xff]  ;;  %6819 = vmatpush1.bf16.msra.mxu1 %v9011_v12  ;;  %6850 = vmatprep.mubr.bf16.mxu1 %v9993_v19 }
 0x13e   : > { %v9020_v40 = vcombine.high %v1235_v6, %v1239_v7  ;;  %v1115_v14 = vld [vmem:[%s9665_s7 + $0x1880] sm:$0xff]  ;;  %6779 = vmatprep.subr.bf16.mxu0 %v8892_v13  ;;  %v9019_v24 = vcombine.low %v1235_v6, %v1239_v7 }
 0x13f   : > { %v1119_v15 = vld [vmem:[%s9665_s7 + $0x18a0] sm:$0xff]  ;;  %6780 = vmatpush1.bf16.msra.mxu0 %v8891_v22 }
 0x140   : > { %v1243_v43 = vld [vmem:[%s9665_s7 + $0x1c80] sm:$0xff]  ;;  %v8900_v25 = vcombine.high %v1115_v14, %v1119_v15  ;;  %6820 = vmatprep.subr.bf16.mxu1 %v9020_v40  ;;  %v8899_v31 = vcombine.low %v1115_v14, %v1119_v15 }
 0x141   : > { %v1247_v18 = vld [vmem:[%s9665_s7 + $0x1ca0] sm:$0xff]  ;;  %6821 = vmatpush1.bf16.msra.mxu1 %v9019_v24 }
 0x142   : > { %v9028_v54 = vcombine.high %v1243_v43, %v1247_v18  ;;  %v1123_v26 = vld [vmem:[%s9665_s7 + $0x18c0] sm:$0xff]  ;;  %6781 = vmatprep.subr.bf16.mxu0 %v8900_v25  ;;  %v9027_v32 = vcombine.low %v1243_v43, %v1247_v18 }
 0x143   : > { %v1127_v27 = vld [vmem:[%s9665_s7 + $0x18e0] sm:$0xff]  ;;  %6782 = vmatpush1.bf16.msra.mxu0 %v8899_v31 }
 0x144   : > { %v1251_v55 = vld [vmem:[%s9665_s7 + $0x1cc0] sm:$0xff]  ;;  %v8908_v33 = vcombine.high %v1123_v26, %v1127_v27  ;;  %6822 = vmatprep.subr.bf16.mxu1 %v9028_v54  ;;  %v8907_v42 = vcombine.low %v1123_v26, %v1127_v27 }
 0x145   : > { %v1255_v29 = vld [vmem:[%s9665_s7 + $0x1ce0] sm:$0xff]  ;;  %6823 = vmatpush1.bf16.msra.mxu1 %v9027_v32 }
 0x146   : > { %v9036_v34 = vcombine.high %v1251_v55, %v1255_v29  ;;  %v1131_v35 = vld [vmem:[%s9665_s7 + $0x1900] sm:$0xff]  ;;  %6783 = vmatprep.subr.bf16.mxu0 %v8908_v33  ;;  %v9035_v44 = vcombine.low %v1251_v55, %v1255_v29 }
 0x147   : > { %v1135_v36 = vld [vmem:[%s9665_s7 + $0x1920] sm:$0xff]  ;;  %6784 = vmatpush1.bf16.msra.mxu0 %v8907_v42 }
 0x148   : > { %v1259_v38 = vld [vmem:[%s9665_s7 + $0x1d00] sm:$0xff]  ;;  %v8916_v45 = vcombine.high %v1131_v35, %v1135_v36  ;;  %6824 = vmatprep.subr.bf16.mxu1 %v9036_v34  ;;  %v8915_v51 = vcombine.low %v1131_v35, %v1135_v36 }
 0x149   : > { %v1263_v39 = vld [vmem:[%s9665_s7 + $0x1d20] sm:$0xff]  ;;  %6825 = vmatpush1.bf16.msra.mxu1 %v9035_v44 }
 0x14a   : > { %v9044_v20 = vcombine.high %v1259_v38, %v1263_v39  ;;  %v1139_v46 = vld [vmem:[%s9665_s7 + $0x1940] sm:$0xff]  ;;  %6785 = vmatprep.subr.bf16.mxu0 %v8916_v45  ;;  %v9043_v52 = vcombine.low %v1259_v38, %v1263_v39 }
 0x14b   : > { %v1143_v47 = vld [vmem:[%s9665_s7 + $0x1960] sm:$0xff]  ;;  %6786 = vmatpush1.bf16.msra.mxu0 %v8915_v51 }
 0x14c   : > { %v1267_v23 = vld [vmem:[%s9665_s7 + $0x1d40] sm:$0xff]  ;;  %v8924_v53 = vcombine.high %v1139_v46, %v1143_v47  ;;  %6826 = vmatprep.subr.bf16.mxu1 %v9044_v20  ;;  %v8923_v63 = vcombine.low %v1139_v46, %v1143_v47 }
 0x14d   : > { %v1271_v49 = vld [vmem:[%s9665_s7 + $0x1d60] sm:$0xff]  ;;  %6827 = vmatpush1.bf16.msra.mxu1 %v9043_v52 }
 0x14e   : > { %v9052_v56 = vcombine.high %v1267_v23, %v1271_v49  ;;  %v1147_v57 = vld [vmem:[%s9665_s7 + $0x1980] sm:$0xff]  ;;  %6787 = vmatprep.subr.bf16.mxu0 %v8924_v53  ;;  %v9051_v0 = vcombine.low %v1267_v23, %v1271_v49 }
 0x14f   : > { %v1151_v58 = vld [vmem:[%s9665_s7 + $0x19a0] sm:$0xff]  ;;  %6788 = vmatpush1.bf16.msra.mxu0 %v8923_v63 }
 0x150   : > { %v1275_v61 = vld [vmem:[%s9665_s7 + $0x1d80] sm:$0xff]  ;;  %v8932_v1 = vcombine.high %v1147_v57, %v1151_v58  ;;  %6828 = vmatprep.subr.bf16.mxu1 %v9052_v56  ;;  %v8931_v10 = vcombine.low %v1147_v57, %v1151_v58 }
 0x151   : > { %v1279_v62 = vld [vmem:[%s9665_s7 + $0x1da0] sm:$0xff]  ;;  %6829 = vmatpush1.bf16.msra.mxu1 %v9051_v0 }
 0x152   : > { %v9060_v2 = vcombine.high %v1275_v61, %v1279_v62  ;;  %v1155_v3 = vld [vmem:[%s9665_s7 + $0x19c0] sm:$0xff]  ;;  %6789 = vmatprep.subr.bf16.mxu0 %v8932_v1  ;;  %v9059_v12 = vcombine.low %v1275_v61, %v1279_v62 }
 0x153   : > { %v1159_v4 = vld [vmem:[%s9665_s7 + $0x19e0] sm:$0xff]  ;;  %6790 = vmatpush1.bf16.msra.mxu0 %v8931_v10 }
 0x154   : > { %v1283_v6 = vld [vmem:[%s9665_s7 + $0x1dc0] sm:$0xff]  ;;  %v8940_v13 = vcombine.high %v1155_v3, %v1159_v4  ;;  %6830 = vmatprep.subr.bf16.mxu1 %v9060_v2  ;;  %v8939_v22 = vcombine.low %v1155_v3, %v1159_v4 }
 0x155   : > { %v1287_v7 = vld [vmem:[%s9665_s7 + $0x1de0] sm:$0xff]  ;;  %6831 = vmatpush1.bf16.msra.mxu1 %v9059_v12 }
 0x156   : > { %v9068_v40 = vcombine.high %v1283_v6, %v1287_v7  ;;  %v1163_v14 = vld [vmem:[%s9665_s7 + $0x1a00] sm:$0xff]  ;;  %6791 = vmatprep.subr.bf16.mxu0 %v8940_v13  ;;  %v9067_v24 = vcombine.low %v1283_v6, %v1287_v7 }
 0x157   : > { %v1167_v15 = vld [vmem:[%s9665_s7 + $0x1a20] sm:$0xff]  ;;  %6792 = vmatpush1.bf16.msra.mxu0 %v8939_v22 }
 0x158   : > { %v1291_v43 = vld [vmem:[%s9665_s7 + $0x1e00] sm:$0xff]  ;;  %v8948_v25 = vcombine.high %v1163_v14, %v1167_v15  ;;  %6832 = vmatprep.subr.bf16.mxu1 %v9068_v40  ;;  %v8947_v31 = vcombine.low %v1163_v14, %v1167_v15 }
 0x159   : > { %v1295_v18 = vld [vmem:[%s9665_s7 + $0x1e20] sm:$0xff]  ;;  %6833 = vmatpush1.bf16.msra.mxu1 %v9067_v24 }
 0x15a   : > { %v9076_v54 = vcombine.high %v1291_v43, %v1295_v18  ;;  %v1171_v26 = vld [vmem:[%s9665_s7 + $0x1a40] sm:$0xff]  ;;  %6793 = vmatprep.subr.bf16.mxu0 %v8948_v25  ;;  %v9075_v32 = vcombine.low %v1291_v43, %v1295_v18 }
 0x15b   : > { %v1175_v27 = vld [vmem:[%s9665_s7 + $0x1a60] sm:$0xff]  ;;  %6794 = vmatpush1.bf16.msra.mxu0 %v8947_v31 }
 0x15c   : > { %v1299_v55 = vld [vmem:[%s9665_s7 + $0x1e40] sm:$0xff]  ;;  %v8956_v33 = vcombine.high %v1171_v26, %v1175_v27  ;;  %6834 = vmatprep.subr.bf16.mxu1 %v9076_v54  ;;  %v8955_v42 = vcombine.low %v1171_v26, %v1175_v27 }
 0x15d   : > { %v1303_v29 = vld [vmem:[%s9665_s7 + $0x1e60] sm:$0xff]  ;;  %6835 = vmatpush1.bf16.msra.mxu1 %v9075_v32 }
 0x15e   : > { %v9084_v34 = vcombine.high %v1299_v55, %v1303_v29  ;;  %v1179_v35 = vld [vmem:[%s9665_s7 + $0x1a80] sm:$0xff]  ;;  %6795 = vmatprep.subr.bf16.mxu0 %v8956_v33  ;;  %v9083_v44 = vcombine.low %v1299_v55, %v1303_v29 }
 0x15f   : > { %v1183_v36 = vld [vmem:[%s9665_s7 + $0x1aa0] sm:$0xff]  ;;  %6796 = vmatpush1.bf16.msra.mxu0 %v8955_v42 }
 0x160   : > { %v1307_v38 = vld [vmem:[%s9665_s7 + $0x1e80] sm:$0xff]  ;;  %v8964_v45 = vcombine.high %v1179_v35, %v1183_v36  ;;  %6836 = vmatprep.subr.bf16.mxu1 %v9084_v34  ;;  %v8963_v51 = vcombine.low %v1179_v35, %v1183_v36  ;;  %v332_v35 = vld [vmem:[%s9665_s7 + $0x8] sm:$0xff] }
 0x161   : > { %v1311_v39 = vld [vmem:[%s9665_s7 + $0x1ea0] sm:$0xff]  ;;  %6837 = vmatpush1.bf16.msra.mxu1 %v9083_v44  ;;  %v336_v36 = vld [vmem:[%s9665_s7 + $0x28] sm:$0xff] }
 0x162   : > { %v9092_v20 = vcombine.high %v1307_v38, %v1311_v39  ;;  %v1187_v46 = vld [vmem:[%s9665_s7 + $0x1ac0] sm:$0xff]  ;;  %6797 = vmatprep.subr.bf16.mxu0 %v8964_v45  ;;  %v9091_v52 = vcombine.low %v1307_v38, %v1311_v39  ;;  %v460_v38 = vld [vmem:[%s9665_s7 + $0x408] sm:$0xff]  ;;  %v8118_v45 = vcombine.high %v332_v35, %v336_v36 }
 0x163   : > { %v1191_v47 = vld [vmem:[%s9665_s7 + $0x1ae0] sm:$0xff]  ;;  %6798 = vmatpush1.bf16.msra.mxu0 %v8963_v51  ;;  %v464_v39 = vld [vmem:[%s9665_s7 + $0x428] sm:$0xff] }
 0x164   : > { %v1315_v23 = vld [vmem:[%s9665_s7 + $0x1ec0] sm:$0xff]  ;;  %v8972_v53 = vcombine.high %v1187_v46, %v1191_v47  ;;  %6838 = vmatprep.subr.bf16.mxu1 %v9092_v20  ;;  %v8971_v63 = vcombine.low %v1187_v46, %v1191_v47  ;;  %v8246_v20 = vcombine.high %v460_v38, %v464_v39  ;;  %v340_v46 = vld [vmem:[%s9665_s7 + $0x48] sm:$0xff] }
 0x165   : > { %v1319_v49 = vld [vmem:[%s9665_s7 + $0x1ee0] sm:$0xff]  ;;  %6839 = vmatpush1.bf16.msra.mxu1 %v9091_v52  ;;  %v344_v47 = vld [vmem:[%s9665_s7 + $0x68] sm:$0xff]  ;;  %v10064_v52 = vcombine.low %v9980_v11, %v9980_v11 }
 0x166   : > { %v9100_v56 = vcombine.high %v1315_v23, %v1319_v49  ;;  %v1195_v57 = vld [vmem:[%s9665_s7 + $0x1b00] sm:$0xff]  ;;  %6799 = vmatprep.subr.bf16.mxu0 %v8972_v53  ;;  %v9099_v0 = vcombine.low %v1315_v23, %v1319_v49  ;;  %v10058_v23 = vcombine.low %v9973_v8, %v9973_v8  ;;  %v468_v49 = vld [vmem:[%s9665_s7 + $0x448] sm:$0xff]  ;;  %v8117_v53 = vcombine.low %v332_v35, %v336_v36 }
 0x167   : > { %v1199_v58 = vld [vmem:[%s9665_s7 + $0x1b20] sm:$0xff]  ;;  %6800 = vmatpush1.bf16.msra.mxu0 %v8971_v63  ;;  %v472_v51 = vld [vmem:[%s9665_s7 + $0x468] sm:$0xff]  ;;  %v8125_v11 = vcombine.low %v340_v46, %v344_v47 }
 0x168   : > { %v1323_v61 = vld [vmem:[%s9665_s7 + $0x1f00] sm:$0xff]  ;;  %v8980_v1 = vcombine.high %v1195_v57, %v1199_v58  ;;  %6840 = vmatprep.subr.bf16.mxu1 %v9100_v56  ;;  %v8979_v10 = vcombine.low %v1195_v57, %v1199_v58  ;;  %v8245_v56 = vcombine.low %v460_v38, %v464_v39  ;;  %v8126_v57 = vcombine.high %v340_v46, %v344_v47  ;;  %v352_v8 = vld [vmem:[%s9665_s7 + $0xa8] sm:$0xff] }
 0x169   : > { %v1327_v62 = vld [vmem:[%s9665_s7 + $0x1f20] sm:$0xff]  ;;  %6841 = vmatpush1.bf16.msra.mxu1 %v9099_v0  ;;  %v8254_v58 = vcombine.high %v468_v49, %v472_v51  ;;  %v480_v63 = vld [vmem:[%s9665_s7 + $0x4a8] sm:$0xff]  ;;  %v8253_v0 = vcombine.low %v468_v49, %v472_v51 }
 0x16a   : > { %v9108_v2 = vcombine.high %v1323_v61, %v1327_v62  ;;  %v1203_v3 = vld [vmem:[%s9665_s7 + $0x1b40] sm:$0xff]  ;;  %6801 = vmatprep.subr.bf16.mxu0 %v8980_v1  ;;  %v9107_v12 = vcombine.low %v1323_v61, %v1327_v62  ;;  %v348_v61 = vld [vmem:[%s9665_s7 + $0x88] sm:$0xff] }
 0x16b   : > { %v1207_v4 = vld [vmem:[%s9665_s7 + $0x1b60] sm:$0xff]  ;;  %6802 = vmatpush1.bf16.msra.mxu0 %v8979_v10  ;;  %v476_v62 = vld [vmem:[%s9665_s7 + $0x488] sm:$0xff]  ;;  %v8134_v1 = vcombine.high %v348_v61, %v352_v8  ;;  %v8133_v10 = vcombine.low %v348_v61, %v352_v8 }
 0x16c   : > { %v1331_v6 = vld [vmem:[%s9665_s7 + $0x1f40] sm:$0xff]  ;;  %v8988_v13 = vcombine.high %v1203_v3, %v1207_v4  ;;  %6842 = vmatprep.subr.bf16.mxu1 %v9108_v2  ;;  %v8987_v22 = vcombine.low %v1203_v3, %v1207_v4  ;;  %v8262_v2 = vcombine.high %v476_v62, %v480_v63  ;;  %v356_v3 = vld [vmem:[%s9665_s7 + $0xc8] sm:$0xff] }
 0x16d   : > { %v1335_v7 = vld [vmem:[%s9665_s7 + $0x1f60] sm:$0xff]  ;;  %6843 = vmatpush1.bf16.msra.mxu1 %v9107_v12  ;;  %v360_v4 = vld [vmem:[%s9665_s7 + $0xe8] sm:$0xff]  ;;  %v8261_v12 = vcombine.low %v476_v62, %v480_v63 }
 0x16e   : > { %v9116_v40 = vcombine.high %v1331_v6, %v1335_v7  ;;  %v1211_v14 = vld [vmem:[%s9665_s7 + $0x1b80] sm:$0xff]  ;;  %6803 = vmatprep.subr.bf16.mxu0 %v8988_v13  ;;  %v9115_v24 = vcombine.low %v1331_v6, %v1335_v7  ;;  %v484_v6 = vld [vmem:[%s9665_s7 + $0x4c8] sm:$0xff]  ;;  %v8142_v13 = vcombine.high %v356_v3, %v360_v4 }
 0x16f   : > { %v1215_v15 = vld [vmem:[%s9665_s7 + $0x1ba0] sm:$0xff]  ;;  %6804 = vmatpush1.bf16.msra.mxu0 %v8987_v22  ;;  %v488_v7 = vld [vmem:[%s9665_s7 + $0x4e8] sm:$0xff]  ;;  %v8141_v22 = vcombine.low %v356_v3, %v360_v4 }
 0x170   : > { %v1339_v43 = vld [vmem:[%s9665_s7 + $0x1f80] sm:$0xff]  ;;  %v8996_v25 = vcombine.high %v1211_v14, %v1215_v15  ;;  %6844 = vmatprep.subr.bf16.mxu1 %v9116_v40  ;;  %v8995_v31 = vcombine.low %v1211_v14, %v1215_v15  ;;  %v8270_v40 = vcombine.high %v484_v6, %v488_v7  ;;  %v364_v14 = vld [vmem:[%s9665_s7 + $0x108] sm:$0xff] }
 0x171   : > { %v1343_v18 = vld [vmem:[%s9665_s7 + $0x1fa0] sm:$0xff]  ;;  %6845 = vmatpush1.bf16.msra.mxu1 %v9115_v24  ;;  %v368_v15 = vld [vmem:[%s9665_s7 + $0x128] sm:$0xff]  ;;  %v8269_v24 = vcombine.low %v484_v6, %v488_v7 }
 0x172   : > { %v9124_v54 = vcombine.high %v1339_v43, %v1343_v18  ;;  %v1219_v26 = vld [vmem:[%s9665_s7 + $0x1bc0] sm:$0xff]  ;;  %6805 = vmatprep.subr.bf16.mxu0 %v8996_v25  ;;  %v9123_v32 = vcombine.low %v1339_v43, %v1343_v18  ;;  %v492_v43 = vld [vmem:[%s9665_s7 + $0x508] sm:$0xff]  ;;  %v8150_v25 = vcombine.high %v364_v14, %v368_v15 }
 0x173   : > { %v1223_v27 = vld [vmem:[%s9665_s7 + $0x1be0] sm:$0xff]  ;;  %6806 = vmatpush1.bf16.msra.mxu0 %v8995_v31  ;;  %v496_v18 = vld [vmem:[%s9665_s7 + $0x528] sm:$0xff]  ;;  %v8149_v31 = vcombine.low %v364_v14, %v368_v15 }
 0x174   : > { %v1347_v55 = vld [vmem:[%s9665_s7 + $0x1fc0] sm:$0xff]  ;;  %v9004_v33 = vcombine.high %v1219_v26, %v1223_v27  ;;  %6846 = vmatprep.subr.bf16.mxu1 %v9124_v54  ;;  %v9003_v42 = vcombine.low %v1219_v26, %v1223_v27  ;;  %v8278_v54 = vcombine.high %v492_v43, %v496_v18  ;;  %v372_v26 = vld [vmem:[%s9665_s7 + $0x148] sm:$0xff] }
 0x175   : > { %v1351_v29 = vld [vmem:[%s9665_s7 + $0x1fe0] sm:$0xff]  ;;  %6847 = vmatpush1.bf16.msra.mxu1 %v9123_v32  ;;  %v376_v27 = vld [vmem:[%s9665_s7 + $0x168] sm:$0xff]  ;;  %v8277_v32 = vcombine.low %v492_v43, %v496_v18 }
 0x176   : > { %v9132_v34 = vcombine.high %v1347_v55, %v1351_v29  ;;  %6807 = vmatprep.subr.bf16.mxu0 %v9004_v33  ;;  %v9131_v44 = vcombine.low %v1347_v55, %v1351_v29  ;;  %v500_v55 = vld [vmem:[%s9665_s7 + $0x548] sm:$0xff]  ;;  %v8158_v33 = vcombine.high %v372_v26, %v376_v27 }
 0x177   : > { %6808 = vmatpush1.bf16.msra.mxu0 %v9003_v42  ;;  %v504_v29 = vld [vmem:[%s9665_s7 + $0x568] sm:$0xff]  ;;  %v8157_v42 = vcombine.low %v372_v26, %v376_v27 }
 0x178   : > { %6848 = vmatprep.subr.bf16.mxu1 %v9132_v34  ;;  %6859 = vmatprep.subr.bf16.mxu0 %v8118_v45  ;;  %v8286_v34 = vcombine.high %v500_v55, %v504_v29  ;;  %v380_v35 = vld [vmem:[%s9665_s7 + $0x188] sm:$0xff] }
 0x179   : > { %6849 = vmatpush1.bf16.msra.mxu1 %v9131_v44  ;;  %v384_v36 = vld [vmem:[%s9665_s7 + $0x1a8] sm:$0xff]  ;;  %v8285_v44 = vcombine.low %v500_v55, %v504_v29 }
 0x17a   : > { %6900 = vmatprep.subr.bf16.mxu1 %v8246_v20  ;;  %6810 = vmatmul.mubr.bf16.vlgmr.msra.gmra.mrb[12].mxu0 %v10058_v23  ;;  %v508_v38 = vld [vmem:[%s9665_s7 + $0x588] sm:$0xff]  ;;  %v8166_v45 = vcombine.high %v380_v35, %v384_v36  ;;  %v8165_v62 = vcombine.low %v380_v35, %v384_v36 }
 0x17b   : > { %6860 = vmatpush1.bf16.msra.mxu0 %v8117_v53  ;;  %6891 = vmatprep.mubr.bf16.mxu0 %v9738_v59  ;;  %v512_v39 = vld [vmem:[%s9665_s7 + $0x5a8] sm:$0xff] }
 0x17c   : > { %6851 = vmatmul.mubr.bf16.vlgmr.msra.gmra.mrb[12].mxu1 %v10064_v52  ;;  %6861 = vmatprep.subr.bf16.mxu0 %v8126_v57  ;;  %v8294_v46 = vcombine.high %v508_v38, %v512_v39  ;;  %v388_v47 = vld [vmem:[%s9665_s7 + $0x1c8] sm:$0xff] }
 0x17d   : > { %6901 = vmatpush1.bf16.msra.mxu1 %v8245_v56  ;;  %6932 = vmatprep.mubr.bf16.mxu1 %v9742_v60  ;;  %v392_v49 = vld [vmem:[%s9665_s7 + $0x1e8] sm:$0xff] }
 0x17e   : > { %6902 = vmatprep.subr.bf16.mxu1 %v8254_v58  ;;  %v516_v56 = vld [vmem:[%s9665_s7 + $0x5c8] sm:$0xff] }
 0x17f   : > { %6862 = vmatpush1.bf16.msra.mxu0 %v8125_v11  ;;  %v520_v57 = vld [vmem:[%s9665_s7 + $0x5e8] sm:$0xff] }
 0x180   : > { %6863 = vmatprep.subr.bf16.mxu0 %v8134_v1  ;;  %v8293_v1 = vcombine.low %v508_v38, %v512_v39  ;;  %v8302_v4 = vcombine.high %v516_v56, %v520_v57  ;;  %v396_v6 = vld [vmem:[%s9665_s7 + $0x208] sm:$0xff] }
 0x181   : > { %6903 = vmatpush1.bf16.msra.mxu1 %v8253_v0  ;;  %v400_v7 = vld [vmem:[%s9665_s7 + $0x228] sm:$0xff] }
 0x182   : > { %6904 = vmatprep.subr.bf16.mxu1 %v8262_v2  ;;  %v8174_v2 = vcombine.high %v388_v47, %v392_v49  ;;  %v8182_v14 = vcombine.high %v396_v6, %v400_v7  ;;  %v404_v43 = vld [vmem:[%s9665_s7 + $0x248] sm:$0xff] }
 0x183   : > { %6864 = vmatpush1.bf16.msra.mxu0 %v8133_v10  ;;  %v524_v10 = vld [vmem:[%s9665_s7 + $0x608] sm:$0xff] }
 0x184   : > { %6865 = vmatprep.subr.bf16.mxu0 %v8142_v13  ;;  %v8173_v13 = vcombine.low %v388_v47, %v392_v49  ;;  %v408_v18 = vld [vmem:[%s9665_s7 + $0x268] sm:$0xff] }
 0x185   : > { %6905 = vmatpush1.bf16.msra.mxu1 %v8261_v12  ;;  %v528_v12 = vld [vmem:[%s9665_s7 + $0x628] sm:$0xff]  ;;  %v8190_v26 = vcombine.high %v404_v43, %v408_v18 }
 0x186   : > { %6906 = vmatprep.subr.bf16.mxu1 %v8270_v40  ;;  %v8301_v40 = vcombine.low %v516_v56, %v520_v57  ;;  %v8310_v15 = vcombine.high %v524_v10, %v528_v12  ;;  %v412_v55 = vld [vmem:[%s9665_s7 + $0x288] sm:$0xff] }
 0x187   : > { %6866 = vmatpush1.bf16.msra.mxu0 %v8141_v22  ;;  %v532_v22 = vld [vmem:[%s9665_s7 + $0x648] sm:$0xff] }
 0x188   : > { %6867 = vmatprep.subr.bf16.mxu0 %v8150_v25  ;;  %v8181_v25 = vcombine.low %v396_v6, %v400_v7  ;;  %v416_v29 = vld [vmem:[%s9665_s7 + $0x2a8] sm:$0xff] }
 0x189   : > { %6907 = vmatpush1.bf16.msra.mxu1 %v8269_v24  ;;  %v536_v24 = vld [vmem:[%s9665_s7 + $0x668] sm:$0xff]  ;;  %v8198_v35 = vcombine.high %v412_v55, %v416_v29 }
 0x18a   : > { %6908 = vmatprep.subr.bf16.mxu1 %v8278_v54  ;;  %v8309_v54 = vcombine.low %v524_v10, %v528_v12  ;;  %v8318_v27 = vcombine.high %v532_v22, %v536_v24  ;;  %v420_v38 = vld [vmem:[%s9665_s7 + $0x2c8] sm:$0xff] }
 0x18b   : > { %6868 = vmatpush1.bf16.msra.mxu0 %v8149_v31  ;;  %v540_v31 = vld [vmem:[%s9665_s7 + $0x688] sm:$0xff] }
 0x18c   : > { %6869 = vmatprep.subr.bf16.mxu0 %v8158_v33  ;;  %v6565_v20 = vpop.f32.mrb[0].mxu0  ;;  %v8189_v33 = vcombine.low %v404_v43, %v408_v18  ;;  %v424_v39 = vld [vmem:[%s9665_s7 + $0x2e8] sm:$0xff] }
 0x18d   : > { %6909 = vmatpush1.bf16.msra.mxu1 %v8277_v32  ;;  %v6567_v53 = vpop.f32.mrb[1].mxu0  ;;  %v544_v32 = vld [vmem:[%s9665_s7 + $0x6a8] sm:$0xff]  ;;  %v8205_v57 = vcombine.low %v420_v38, %v424_v39 }
 0x18e   : > { %6910 = vmatprep.subr.bf16.mxu1 %v8286_v34  ;;  %v6606_v51 = vpop.f32.mrb[0].mxu1  ;;  %v6569_v8 = vpop.f32.mrb[2].mxu0  ;;  %v8317_v34 = vcombine.low %v532_v22, %v536_v24  ;;  %v8326_v36 = vcombine.high %v540_v31, %v544_v32  ;;  %v428_v49 = vld [vmem:[%s9665_s7 + $0x308] sm:$0xff] }
 0x18f   : > { %v10094_v58 = vadd.f32 %v6606_v51, %v6565_v20  ;;  %v6608_v61 = vpop.f32.mrb[1].mxu1  ;;  %6870 = vmatpush1.bf16.msra.mxu0 %v8157_v42  ;;  %v6570_v0 = vpop.f32.mrb[3].mxu0  ;;  %v548_v42 = vld [vmem:[%s9665_s7 + $0x6c8] sm:$0xff]  ;;  %v8325_v20 = vcombine.low %v540_v31, %v544_v32 }
 0x190   : > { %v10096_v63 = vadd.f32 %v6608_v61, %v6567_v53  ;;  %v6610_v11 = vpop.f32.mrb[2].mxu1  ;;  %6871 = vmatprep.subr.bf16.mxu0 %v8166_v45  ;;  %v8197_v45 = vcombine.low %v412_v55, %v416_v29  ;;  %v432_v51 = vld [vmem:[%s9665_s7 + $0x328] sm:$0xff] }
 0x191   : > { %6911 = vmatpush1.bf16.msra.mxu1 %v8285_v44  ;;  %v6611_v3 = vpop.f32.mrb[3].mxu1  ;;  %v552_v44 = vld [vmem:[%s9665_s7 + $0x6e8] sm:$0xff]  ;;  %v8214_v8 = vcombine.high %v428_v49, %v432_v51 }
 0x192   : > { %6912 = vmatprep.subr.bf16.mxu1 %v8294_v46  ;;  %v8206_v46 = vcombine.high %v420_v38, %v424_v39  ;;  %v8334_v47 = vcombine.high %v548_v42, %v552_v44  ;;  %v556_v53 = vld [vmem:[%s9665_s7 + $0x708] sm:$0xff]  ;;  %v8333_v61 = vcombine.low %v548_v42, %v552_v44  ;;  %v8213_v3 = vcombine.low %v428_v49, %v432_v51 }
 0x193   : > { %6872 = vmatpush1.bf16.msra.mxu0 %v8165_v62  ;;  %v560_v56 = vld [vmem:[%s9665_s7 + $0x728] sm:$0xff] }
 0x194   : > { %6873 = vmatprep.subr.bf16.mxu0 %v8174_v2  ;;  %v8342_v62 = vcombine.high %v556_v53, %v560_v56  ;;  %v436_v11 = vld [vmem:[%s9665_s7 + $0x348] sm:$0xff] }
 0x195   : > { %6913 = vmatpush1.bf16.msra.mxu1 %v8293_v1  ;;  %v440_v0 = vld [vmem:[%s9665_s7 + $0x368] sm:$0xff] }
 0x196   : > { %6914 = vmatprep.subr.bf16.mxu1 %v8302_v4  ;;  %v564_v1 = vld [vmem:[%s9665_s7 + $0x748] sm:$0xff]  ;;  %v8341_v4 = vcombine.low %v556_v53, %v560_v56  ;;  %v8222_v6 = vcombine.high %v436_v11, %v440_v0 }
 0x197   : > { %6874 = vmatpush1.bf16.msra.mxu0 %v8173_v13  ;;  %v568_v2 = vld [vmem:[%s9665_s7 + $0x768] sm:$0xff] }
 0x198   : > { %6875 = vmatprep.subr.bf16.mxu0 %v8182_v14  ;;  %v8350_v7 = vcombine.high %v564_v1, %v568_v2  ;;  %v444_v10 = vld [vmem:[%s9665_s7 + $0x388] sm:$0xff]  ;;  %v8221_v14 = vcombine.low %v436_v11, %v440_v0 }
 0x199   : > { %6915 = vmatpush1.bf16.msra.mxu1 %v8301_v40  ;;  %v448_v12 = vld [vmem:[%s9665_s7 + $0x3a8] sm:$0xff] }
 0x19a   : > { %6916 = vmatprep.subr.bf16.mxu1 %v8310_v15  ;;  %v572_v13 = vld [vmem:[%s9665_s7 + $0x788] sm:$0xff]  ;;  %v8349_v15 = vcombine.low %v564_v1, %v568_v2  ;;  %v8230_v43 = vcombine.high %v444_v10, %v448_v12 }
 0x19b   : > { %6876 = vmatpush1.bf16.msra.mxu0 %v8181_v25  ;;  %v576_v40 = vld [vmem:[%s9665_s7 + $0x7a8] sm:$0xff] }
 0x19c   : > { %6877 = vmatprep.subr.bf16.mxu0 %v8190_v26  ;;  %v8358_v18 = vcombine.high %v572_v13, %v576_v40  ;;  %v452_v22 = vld [vmem:[%s9665_s7 + $0x3c8] sm:$0xff]  ;;  %v8229_v26 = vcombine.low %v444_v10, %v448_v12 }
 0x19d   : > { %6917 = vmatpush1.bf16.msra.mxu1 %v8309_v54  ;;  %v456_v24 = vld [vmem:[%s9665_s7 + $0x3e8] sm:$0xff] }
 0x19e   : > { %6918 = vmatprep.subr.bf16.mxu1 %v8318_v27  ;;  %v580_v25 = vld [vmem:[%s9665_s7 + $0x7c8] sm:$0xff]  ;;  %v8357_v27 = vcombine.low %v572_v13, %v576_v40  ;;  %v8238_v55 = vcombine.high %v452_v22, %v456_v24 }
 0x19f   : > { %6878 = vmatpush1.bf16.msra.mxu0 %v8189_v33  ;;  %v584_v54 = vld [vmem:[%s9665_s7 + $0x7e8] sm:$0xff] }
 0x1a0   : > { %6879 = vmatprep.subr.bf16.mxu0 %v8198_v35  ;;  %v8366_v29 = vcombine.high %v580_v25, %v584_v54  ;;  %v588_v31 = vld [vmem:[%s9665_s7 + $0x808] sm:$0xff]  ;;  %v8237_v35 = vcombine.low %v452_v22, %v456_v24 }
 0x1a1   : > { %6919 = vmatpush1.bf16.msra.mxu1 %v8317_v34  ;;  %v592_v32 = vld [vmem:[%s9665_s7 + $0x828] sm:$0xff] }
 0x1a2   : > { %6920 = vmatprep.subr.bf16.mxu1 %v8326_v36  ;;  %v716_v33 = vld [vmem:[%s9665_s7 + $0xc08] sm:$0xff]  ;;  %v8365_v36 = vcombine.low %v580_v25, %v584_v54  ;;  %v8374_v38 = vcombine.high %v588_v31, %v592_v32 }
 0x1a3   : > { %6880 = vmatpush1.bf16.msra.mxu0 %v8197_v45  ;;  %v720_v34 = vld [vmem:[%s9665_s7 + $0xc28] sm:$0xff] }
 0x1a4   : > { %6881 = vmatprep.subr.bf16.mxu0 %v8206_v46  ;;  %v8502_v39 = vcombine.high %v716_v33, %v720_v34  ;;  %v596_v42 = vld [vmem:[%s9665_s7 + $0x848] sm:$0xff]  ;;  %v8373_v46 = vcombine.low %v588_v31, %v592_v32 }
 0x1a5   : > { %6921 = vmatpush1.bf16.msra.mxu1 %v8325_v20  ;;  %v600_v44 = vld [vmem:[%s9665_s7 + $0x868] sm:$0xff] }
 0x1a6   : > { %6922 = vmatprep.subr.bf16.mxu1 %v8334_v47  ;;  %v724_v45 = vld [vmem:[%s9665_s7 + $0xc48] sm:$0xff]  ;;  %v8501_v47 = vcombine.low %v716_v33, %v720_v34  ;;  %v8382_v49 = vcombine.high %v596_v42, %v600_v44 }
 0x1a7   : > { %6882 = vmatpush1.bf16.msra.mxu0 %v8205_v57  ;;  %v728_v20 = vld [vmem:[%s9665_s7 + $0xc68] sm:$0xff] }
 0x1a8   : > { %6883 = vmatprep.subr.bf16.mxu0 %v8214_v8  ;;  %v8510_v51 = vcombine.high %v724_v45, %v728_v20  ;;  %v604_v53 = vld [vmem:[%s9665_s7 + $0x888] sm:$0xff]  ;;  %v8381_v8 = vcombine.low %v596_v42, %v600_v44 }
 0x1a9   : > { %6923 = vmatpush1.bf16.msra.mxu1 %v8333_v61  ;;  %v608_v56 = vld [vmem:[%s9665_s7 + $0x8a8] sm:$0xff] }
 0x1aa   : > { %6924 = vmatprep.subr.bf16.mxu1 %v8342_v62  ;;  %v732_v57 = vld [vmem:[%s9665_s7 + $0xc88] sm:$0xff]  ;;  %v8509_v62 = vcombine.low %v724_v45, %v728_v20  ;;  %v8390_v11 = vcombine.high %v604_v53, %v608_v56 }
 0x1ab   : > { %6884 = vmatpush1.bf16.msra.mxu0 %v8213_v3  ;;  %v736_v61 = vld [vmem:[%s9665_s7 + $0xca8] sm:$0xff] }
 0x1ac   : > { %6885 = vmatprep.subr.bf16.mxu0 %v8222_v6  ;;  %v8518_v0 = vcombine.high %v732_v57, %v736_v61  ;;  %v612_v1 = vld [vmem:[%s9665_s7 + $0x8c8] sm:$0xff]  ;;  %v8389_v6 = vcombine.low %v604_v53, %v608_v56 }
 0x1ad   : > { %6925 = vmatpush1.bf16.msra.mxu1 %v8341_v4  ;;  %v616_v2 = vld [vmem:[%s9665_s7 + $0x8e8] sm:$0xff] }
 0x1ae   : > { %6926 = vmatprep.subr.bf16.mxu1 %v8350_v7  ;;  %v740_v3 = vld [vmem:[%s9665_s7 + $0xcc8] sm:$0xff]  ;;  %v8517_v7 = vcombine.low %v732_v57, %v736_v61  ;;  %v8398_v10 = vcombine.high %v612_v1, %v616_v2 }
 0x1af   : > { %6886 = vmatpush1.bf16.msra.mxu0 %v8221_v14  ;;  %v744_v4 = vld [vmem:[%s9665_s7 + $0xce8] sm:$0xff] }
 0x1b0   : > { %6887 = vmatprep.subr.bf16.mxu0 %v8230_v43  ;;  %v8526_v12 = vcombine.high %v740_v3, %v744_v4  ;;  %v620_v13 = vld [vmem:[%s9665_s7 + $0x908] sm:$0xff]  ;;  %v8397_v43 = vcombine.low %v612_v1, %v616_v2 }
 0x1b1   : > { %6927 = vmatpush1.bf16.msra.mxu1 %v8349_v15  ;;  %v624_v40 = vld [vmem:[%s9665_s7 + $0x928] sm:$0xff] }
 0x1b2   : > { %6928 = vmatprep.subr.bf16.mxu1 %v8358_v18  ;;  %v748_v14 = vld [vmem:[%s9665_s7 + $0xd08] sm:$0xff]  ;;  %v8525_v18 = vcombine.low %v740_v3, %v744_v4  ;;  %v8406_v22 = vcombine.high %v620_v13, %v624_v40 }
 0x1b3   : > { %6888 = vmatpush1.bf16.msra.mxu0 %v8229_v26  ;;  %v752_v15 = vld [vmem:[%s9665_s7 + $0xd28] sm:$0xff] }
 0x1b4   : > { %6889 = vmatprep.subr.bf16.mxu0 %v8238_v55  ;;  %v8534_v24 = vcombine.high %v748_v14, %v752_v15  ;;  %v628_v25 = vld [vmem:[%s9665_s7 + $0x948] sm:$0xff]  ;;  %v8405_v55 = vcombine.low %v620_v13, %v624_v40 }
 0x1b5   : > { %6929 = vmatpush1.bf16.msra.mxu1 %v8357_v27  ;;  %v632_v54 = vld [vmem:[%s9665_s7 + $0x968] sm:$0xff] }
 0x1b6   : > { %6930 = vmatprep.subr.bf16.mxu1 %v8366_v29  ;;  %v756_v26 = vld [vmem:[%s9665_s7 + $0xd48] sm:$0xff]  ;;  %v8533_v29 = vcombine.low %v748_v14, %v752_v15  ;;  %v8414_v31 = vcombine.high %v628_v25, %v632_v54 }
 0x1b7   : > { %6890 = vmatpush1.bf16.msra.mxu0 %v8237_v35  ;;  %v760_v27 = vld [vmem:[%s9665_s7 + $0xd68] sm:$0xff] }
 0x1b8   : > { %6941 = vmatprep.subr.bf16.mxu0 %v8374_v38  ;;  %v8542_v32 = vcombine.high %v756_v26, %v760_v27  ;;  %v636_v33 = vld [vmem:[%s9665_s7 + $0x988] sm:$0xff]  ;;  %v8413_v38 = vcombine.low %v628_v25, %v632_v54 }
 0x1b9   : > { %6931 = vmatpush1.bf16.msra.mxu1 %v8365_v36  ;;  %v640_v34 = vld [vmem:[%s9665_s7 + $0x9a8] sm:$0xff] }
 0x1ba   : > { %6982 = vmatprep.subr.bf16.mxu1 %v8502_v39  ;;  %6892 = vmatmul.mubr.bf16.vlgmr.msra.gmra.mrb[16].mxu0 %v9788_v17  ;;  %v764_v35 = vld [vmem:[%s9665_s7 + $0xd88] sm:$0xff]  ;;  %v8541_v39 = vcombine.low %v756_v26, %v760_v27  ;;  %v8422_v42 = vcombine.high %v636_v33, %v640_v34 }
 0x1bb   : > { %6942 = vmatpush1.bf16.msra.mxu0 %v8373_v46  ;;  %6973 = vmatprep.mubr.bf16.mxu0 %v9806_v28  ;;  %v768_v36 = vld [vmem:[%s9665_s7 + $0xda8] sm:$0xff] }
 0x1bc   : > { %6933 = vmatmul.mubr.bf16.vlgmr.msra.gmra.mrb[16].mxu1 %v9797_v21  ;;  %6943 = vmatprep.subr.bf16.mxu0 %v8382_v49  ;;  %v8550_v45 = vcombine.high %v764_v35, %v768_v36  ;;  %v644_v20 = vld [vmem:[%s9665_s7 + $0x9c8] sm:$0xff] }
 0x1bd   : > { %6983 = vmatpush1.bf16.msra.mxu1 %v8501_v47  ;;  %7014 = vmatprep.mubr.bf16.mxu1 %v9813_v30  ;;  %v648_v46 = vld [vmem:[%s9665_s7 + $0x9e8] sm:$0xff] }
 0x1be   : > { %6984 = vmatprep.subr.bf16.mxu1 %v8510_v51  ;;  %v772_v53 = vld [vmem:[%s9665_s7 + $0xdc8] sm:$0xff]  ;;  %v8430_v2 = vcombine.high %v644_v20, %v648_v46  ;;  %v8429_v13 = vcombine.low %v644_v20, %v648_v46 }
 0x1bf   : > { %6944 = vmatpush1.bf16.msra.mxu0 %v8381_v8  ;;  %v776_v56 = vld [vmem:[%s9665_s7 + $0xde8] sm:$0xff] }
 0x1c0   : > { %6945 = vmatprep.subr.bf16.mxu0 %v8390_v11  ;;  %v8558_v4 = vcombine.high %v772_v53, %v776_v56  ;;  %v8557_v40 = vcombine.low %v772_v53, %v776_v56  ;;  %v812_v53 = vld [vmem:[%s9665_s7 + $0xf08] sm:$0xff] }
 0x1c1   : > { %6985 = vmatpush1.bf16.msra.mxu1 %v8509_v62  ;;  %v8421_v62 = vcombine.low %v636_v33, %v640_v34  ;;  %v816_v56 = vld [vmem:[%s9665_s7 + $0xf28] sm:$0xff] }
 0x1c2   : > { %6986 = vmatprep.subr.bf16.mxu1 %v8518_v0 }
 0x1c3   : > { %6946 = vmatpush1.bf16.msra.mxu0 %v8389_v6  ;;  %v652_v6 = vld [vmem:[%s9665_s7 + $0xa08] sm:$0xff] }
 0x1c4   : > { %6947 = vmatprep.subr.bf16.mxu0 %v8398_v10  ;;  %v780_v10 = vld [vmem:[%s9665_s7 + $0xe08] sm:$0xff] }
 0x1c5   : > { %6987 = vmatpush1.bf16.msra.mxu1 %v8517_v7  ;;  %v656_v7 = vld [vmem:[%s9665_s7 + $0xa28] sm:$0xff] }
 0x1c6   : > { %6988 = vmatprep.subr.bf16.mxu1 %v8526_v12  ;;  %v784_v12 = vld [vmem:[%s9665_s7 + $0xe28] sm:$0xff]  ;;  %v8438_v14 = vcombine.high %v652_v6, %v656_v7  ;;  %v8437_v25 = vcombine.low %v652_v6, %v656_v7 }
 0x1c7   : > { %6948 = vmatpush1.bf16.msra.mxu0 %v8397_v43  ;;  %v8566_v15 = vcombine.high %v780_v10, %v784_v12  ;;  %v660_v43 = vld [vmem:[%s9665_s7 + $0xa48] sm:$0xff]  ;;  %v8565_v54 = vcombine.low %v780_v10, %v784_v12 }
 0x1c8   : > { %6949 = vmatprep.subr.bf16.mxu0 %v8406_v22  ;;  %v788_v22 = vld [vmem:[%s9665_s7 + $0xe48] sm:$0xff] }
 0x1c9   : > { %6989 = vmatpush1.bf16.msra.mxu1 %v8525_v18  ;;  %v664_v18 = vld [vmem:[%s9665_s7 + $0xa68] sm:$0xff] }
 0x1ca   : > { %6990 = vmatprep.subr.bf16.mxu1 %v8534_v24  ;;  %v792_v24 = vld [vmem:[%s9665_s7 + $0xe68] sm:$0xff]  ;;  %v8446_v26 = vcombine.high %v660_v43, %v664_v18  ;;  %v8445_v33 = vcombine.low %v660_v43, %v664_v18 }
 0x1cb   : > { %6950 = vmatpush1.bf16.msra.mxu0 %v8405_v55  ;;  %v8574_v27 = vcombine.high %v788_v22, %v792_v24  ;;  %v668_v55 = vld [vmem:[%s9665_s7 + $0xa88] sm:$0xff]  ;;  %v8573_v34 = vcombine.low %v788_v22, %v792_v24 }
 0x1cc   : > { %6951 = vmatprep.subr.bf16.mxu0 %v8414_v31  ;;  %v6647_v44 = vpop.f32.mrb[4].mxu0  ;;  %v796_v31 = vld [vmem:[%s9665_s7 + $0xe88] sm:$0xff] }
 0x1cd   : > { %6991 = vmatpush1.bf16.msra.mxu1 %v8533_v29  ;;  %v6648_v47 = vadd.f32 %v6647_v44, %v10094_v58  ;;  %v6649_v51 = vpop.f32.mrb[5].mxu0  ;;  %v8549_v58 = vcombine.low %v764_v35, %v768_v36  ;;  %v672_v29 = vld [vmem:[%s9665_s7 + $0xaa8] sm:$0xff] }
 0x1ce   : > { %6992 = vmatprep.subr.bf16.mxu1 %v8542_v32  ;;  %v6688_v49 = vpop.f32.mrb[4].mxu1  ;;  %v6650_v57 = vadd.f32 %v6649_v51, %v10096_v63  ;;  %v6651_v8 = vpop.f32.mrb[6].mxu0  ;;  %v800_v32 = vld [vmem:[%s9665_s7 + $0xea8] sm:$0xff]  ;;  %v8454_v35 = vcombine.high %v668_v55, %v672_v29 }
 0x1cf   : > { %v6690_v61 = vpop.f32.mrb[5].mxu1  ;;  %6952 = vmatpush1.bf16.msra.mxu0 %v8413_v38  ;;  %v10168_v11 = vadd.f32 %v6688_v49, %v6648_v47  ;;  %v6652_v1 = vpop.f32.mrb[7].mxu0  ;;  %v8582_v36 = vcombine.high %v796_v31, %v800_v32  ;;  %v676_v38 = vld [vmem:[%s9665_s7 + $0xac8] sm:$0xff]  ;;  %v8581_v20 = vcombine.low %v796_v31, %v800_v32 }
 0x1d0   : > { %v6692_v0 = vpop.f32.mrb[6].mxu1  ;;  %6953 = vmatprep.subr.bf16.mxu0 %v8422_v42  ;;  %v10170_v3 = vadd.f32 %v6690_v61, %v6650_v57  ;;  %v804_v42 = vld [vmem:[%s9665_s7 + $0xec8] sm:$0xff] }
 0x1d1   : > { %6993 = vmatpush1.bf16.msra.mxu1 %v8541_v39  ;;  %v6693_v63 = vpop.f32.mrb[7].mxu1  ;;  %v680_v39 = vld [vmem:[%s9665_s7 + $0xae8] sm:$0xff] }
 0x1d2   : > { %6994 = vmatprep.subr.bf16.mxu1 %v8550_v45  ;;  %v808_v44 = vld [vmem:[%s9665_s7 + $0xee8] sm:$0xff]  ;;  %v8453_v45 = vcombine.low %v668_v55, %v672_v29  ;;  %v8462_v46 = vcombine.high %v676_v38, %v680_v39  ;;  %v8461_v57 = vcombine.low %v676_v38, %v680_v39 }
 0x1d3   : > { %6954 = vmatpush1.bf16.msra.mxu0 %v8421_v62  ;;  %v8590_v47 = vcombine.high %v804_v42, %v808_v44  ;;  %v684_v49 = vld [vmem:[%s9665_s7 + $0xb08] sm:$0xff]  ;;  %v8589_v61 = vcombine.low %v804_v42, %v808_v44  ;;  %v8598_v62 = vcombine.high %v812_v53, %v816_v56 }
 0x1d4   : > { %6955 = vmatprep.subr.bf16.mxu0 %v8430_v2  ;;  %v688_v51 = vld [vmem:[%s9665_s7 + $0xb28] sm:$0xff] }
 0x1d5   : > { %6995 = vmatpush1.bf16.msra.mxu1 %v8549_v58  ;;  %v8470_v8 = vcombine.high %v684_v49, %v688_v51  ;;  %v692_v0 = vld [vmem:[%s9665_s7 + $0xb48] sm:$0xff]  ;;  %v8469_v63 = vcombine.low %v684_v49, %v688_v51 }
 0x1d6   : > { %6996 = vmatprep.subr.bf16.mxu1 %v8558_v4  ;;  %v696_v1 = vld [vmem:[%s9665_s7 + $0xb68] sm:$0xff]  ;;  %v8597_v4 = vcombine.low %v812_v53, %v816_v56 }
 0x1d7   : > { %6956 = vmatpush1.bf16.msra.mxu0 %v8429_v13  ;;  %v820_v58 = vld [vmem:[%s9665_s7 + $0xf48] sm:$0xff]  ;;  %v8478_v6 = vcombine.high %v692_v0, %v696_v1 }
 0x1d8   : > { %6957 = vmatprep.subr.bf16.mxu0 %v8438_v14  ;;  %v824_v2 = vld [vmem:[%s9665_s7 + $0xf68] sm:$0xff]  ;;  %v8477_v14 = vcombine.low %v692_v0, %v696_v1 }
 0x1d9   : > { %6997 = vmatpush1.bf16.msra.mxu1 %v8557_v40  ;;  %v8606_v7 = vcombine.high %v820_v58, %v824_v2  ;;  %v700_v10 = vld [vmem:[%s9665_s7 + $0xb88] sm:$0xff] }
 0x1da   : > { %6998 = vmatprep.subr.bf16.mxu1 %v8566_v15  ;;  %v704_v12 = vld [vmem:[%s9665_s7 + $0xba8] sm:$0xff]  ;;  %v8605_v15 = vcombine.low %v820_v58, %v824_v2 }
 0x1db   : > { %6958 = vmatpush1.bf16.msra.mxu0 %v8437_v25  ;;  %v828_v13 = vld [vmem:[%s9665_s7 + $0xf88] sm:$0xff]  ;;  %v8486_v43 = vcombine.high %v700_v10, %v704_v12 }
 0x1dc   : > { %6959 = vmatprep.subr.bf16.mxu0 %v8446_v26  ;;  %v832_v40 = vld [vmem:[%s9665_s7 + $0xfa8] sm:$0xff]  ;;  %v8485_v26 = vcombine.low %v700_v10, %v704_v12 }
 0x1dd   : > { %6999 = vmatpush1.bf16.msra.mxu1 %v8565_v54  ;;  %v8614_v18 = vcombine.high %v828_v13, %v832_v40  ;;  %v708_v22 = vld [vmem:[%s9665_s7 + $0xbc8] sm:$0xff] }
 0x1de   : > { %7000 = vmatprep.subr.bf16.mxu1 %v8574_v27  ;;  %v712_v24 = vld [vmem:[%s9665_s7 + $0xbe8] sm:$0xff]  ;;  %v8613_v27 = vcombine.low %v828_v13, %v832_v40 }
 0x1df   : > { %6960 = vmatpush1.bf16.msra.mxu0 %v8445_v33  ;;  %v836_v25 = vld [vmem:[%s9665_s7 + $0xfc8] sm:$0xff]  ;;  %v8494_v55 = vcombine.high %v708_v22, %v712_v24 }
 0x1e0   : > { %6961 = vmatprep.subr.bf16.mxu0 %v8454_v35  ;;  %v840_v54 = vld [vmem:[%s9665_s7 + $0xfe8] sm:$0xff]  ;;  %v8493_v35 = vcombine.low %v708_v22, %v712_v24 }
 0x1e1   : > { %7001 = vmatpush1.bf16.msra.mxu1 %v8573_v34  ;;  %v8622_v29 = vcombine.high %v836_v25, %v840_v54  ;;  %v844_v31 = vld [vmem:[%s9665_s7 + $0x1008] sm:$0xff] }
 0x1e2   : > { %7002 = vmatprep.subr.bf16.mxu1 %v8582_v36  ;;  %v848_v32 = vld [vmem:[%s9665_s7 + $0x1028] sm:$0xff]  ;;  %v8621_v36 = vcombine.low %v836_v25, %v840_v54 }
 0x1e3   : > { %6962 = vmatpush1.bf16.msra.mxu0 %v8453_v45  ;;  %v972_v33 = vld [vmem:[%s9665_s7 + $0x1408] sm:$0xff]  ;;  %v8630_v38 = vcombine.high %v844_v31, %v848_v32 }
 0x1e4   : > { %6963 = vmatprep.subr.bf16.mxu0 %v8462_v46  ;;  %v976_v34 = vld [vmem:[%s9665_s7 + $0x1428] sm:$0xff]  ;;  %v8629_v46 = vcombine.low %v844_v31, %v848_v32 }
 0x1e5   : > { %7003 = vmatpush1.bf16.msra.mxu1 %v8581_v20  ;;  %v8758_v39 = vcombine.high %v972_v33, %v976_v34  ;;  %v852_v42 = vld [vmem:[%s9665_s7 + $0x1048] sm:$0xff] }
 0x1e6   : > { %7004 = vmatprep.subr.bf16.mxu1 %v8590_v47  ;;  %v856_v44 = vld [vmem:[%s9665_s7 + $0x1068] sm:$0xff]  ;;  %v8757_v47 = vcombine.low %v972_v33, %v976_v34 }
 0x1e7   : > { %6964 = vmatpush1.bf16.msra.mxu0 %v8461_v57  ;;  %v980_v45 = vld [vmem:[%s9665_s7 + $0x1448] sm:$0xff]  ;;  %v8638_v49 = vcombine.high %v852_v42, %v856_v44 }
 0x1e8   : > { %6965 = vmatprep.subr.bf16.mxu0 %v8470_v8  ;;  %v984_v20 = vld [vmem:[%s9665_s7 + $0x1468] sm:$0xff]  ;;  %v8637_v8 = vcombine.low %v852_v42, %v856_v44 }
 0x1e9   : > { %7005 = vmatpush1.bf16.msra.mxu1 %v8589_v61  ;;  %v8766_v51 = vcombine.high %v980_v45, %v984_v20  ;;  %v860_v53 = vld [vmem:[%s9665_s7 + $0x1088] sm:$0xff] }
 0x1ea   : > { %7006 = vmatprep.subr.bf16.mxu1 %v8598_v62  ;;  %v864_v56 = vld [vmem:[%s9665_s7 + $0x10a8] sm:$0xff]  ;;  %v8765_v62 = vcombine.low %v980_v45, %v984_v20 }
 0x1eb   : > { %6966 = vmatpush1.bf16.msra.mxu0 %v8469_v63  ;;  %v988_v57 = vld [vmem:[%s9665_s7 + $0x1488] sm:$0xff]  ;;  %v8646_v0 = vcombine.high %v860_v53, %v864_v56 }
 0x1ec   : > { %6967 = vmatprep.subr.bf16.mxu0 %v8478_v6  ;;  %v992_v61 = vld [vmem:[%s9665_s7 + $0x14a8] sm:$0xff]  ;;  %v8645_v6 = vcombine.low %v860_v53, %v864_v56 }
 0x1ed   : > { %7007 = vmatpush1.bf16.msra.mxu1 %v8597_v4  ;;  %v8774_v1 = vcombine.high %v988_v57, %v992_v61  ;;  %v868_v58 = vld [vmem:[%s9665_s7 + $0x10c8] sm:$0xff] }
 0x1ee   : > { %7008 = vmatprep.subr.bf16.mxu1 %v8606_v7  ;;  %v872_v2 = vld [vmem:[%s9665_s7 + $0x10e8] sm:$0xff]  ;;  %v8773_v7 = vcombine.low %v988_v57, %v992_v61 }
 0x1ef   : > { %6968 = vmatpush1.bf16.msra.mxu0 %v8477_v14  ;;  %v996_v63 = vld [vmem:[%s9665_s7 + $0x14c8] sm:$0xff]  ;;  %v8654_v10 = vcombine.high %v868_v58, %v872_v2 }
 0x1f0   : > { %6969 = vmatprep.subr.bf16.mxu0 %v8486_v43  ;;  %v1000_v4 = vld [vmem:[%s9665_s7 + $0x14e8] sm:$0xff]  ;;  %v8653_v43 = vcombine.low %v868_v58, %v872_v2 }
 0x1f1   : > { %7009 = vmatpush1.bf16.msra.mxu1 %v8605_v15  ;;  %v8782_v12 = vcombine.high %v996_v63, %v1000_v4  ;;  %v876_v13 = vld [vmem:[%s9665_s7 + $0x1108] sm:$0xff] }
 0x1f2   : > { %7010 = vmatprep.subr.bf16.mxu1 %v8614_v18  ;;  %v880_v40 = vld [vmem:[%s9665_s7 + $0x1128] sm:$0xff]  ;;  %v8781_v18 = vcombine.low %v996_v63, %v1000_v4 }
 0x1f3   : > { %6970 = vmatpush1.bf16.msra.mxu0 %v8485_v26  ;;  %v1004_v14 = vld [vmem:[%s9665_s7 + $0x1508] sm:$0xff]  ;;  %v8662_v22 = vcombine.high %v876_v13, %v880_v40 }
 0x1f4   : > { %6971 = vmatprep.subr.bf16.mxu0 %v8494_v55  ;;  %v1008_v15 = vld [vmem:[%s9665_s7 + $0x1528] sm:$0xff]  ;;  %v8661_v55 = vcombine.low %v876_v13, %v880_v40 }
 0x1f5   : > { %7011 = vmatpush1.bf16.msra.mxu1 %v8613_v27  ;;  %v8790_v24 = vcombine.high %v1004_v14, %v1008_v15  ;;  %v884_v25 = vld [vmem:[%s9665_s7 + $0x1148] sm:$0xff] }
 0x1f6   : > { %7012 = vmatprep.subr.bf16.mxu1 %v8622_v29  ;;  %v888_v54 = vld [vmem:[%s9665_s7 + $0x1168] sm:$0xff]  ;;  %v8789_v29 = vcombine.low %v1004_v14, %v1008_v15 }
 0x1f7   : > { %6972 = vmatpush1.bf16.msra.mxu0 %v8493_v35  ;;  %v1012_v26 = vld [vmem:[%s9665_s7 + $0x1548] sm:$0xff]  ;;  %v8670_v31 = vcombine.high %v884_v25, %v888_v54 }
 0x1f8   : > { %7023 = vmatprep.subr.bf16.mxu0 %v8630_v38  ;;  %v1016_v27 = vld [vmem:[%s9665_s7 + $0x1568] sm:$0xff]  ;;  %v8669_v38 = vcombine.low %v884_v25, %v888_v54 }
 0x1f9   : > { %7013 = vmatpush1.bf16.msra.mxu1 %v8621_v36  ;;  %v8798_v32 = vcombine.high %v1012_v26, %v1016_v27  ;;  %v892_v33 = vld [vmem:[%s9665_s7 + $0x1188] sm:$0xff] }
 0x1fa   : > { %7064 = vmatprep.subr.bf16.mxu1 %v8758_v39  ;;  %6974 = vmatmul.mubr.bf16.vlgmr.msra.gmra.mrb[20].mxu0 %v9878_v37  ;;  %v896_v34 = vld [vmem:[%s9665_s7 + $0x11a8] sm:$0xff]  ;;  %v8797_v39 = vcombine.low %v1012_v26, %v1016_v27 }
 0x1fb   : > { %7024 = vmatpush1.bf16.msra.mxu0 %v8629_v46  ;;  %7055 = vmatprep.mubr.bf16.mxu0 %v9896_v48  ;;  %v1020_v35 = vld [vmem:[%s9665_s7 + $0x1588] sm:$0xff]  ;;  %v8678_v42 = vcombine.high %v892_v33, %v896_v34 }
 0x1fc   : > { %7015 = vmatmul.mubr.bf16.vlgmr.msra.gmra.mrb[20].mxu1 %v9887_v41  ;;  %7025 = vmatprep.subr.bf16.mxu0 %v8638_v49  ;;  %v1024_v36 = vld [vmem:[%s9665_s7 + $0x15a8] sm:$0xff] }
 0x1fd   : > { %7065 = vmatpush1.bf16.msra.mxu1 %v8757_v47  ;;  %7096 = vmatprep.mubr.bf16.mxu1 %v9903_v50  ;;  %v8806_v45 = vcombine.high %v1020_v35, %v1024_v36  ;;  %v900_v20 = vld [vmem:[%s9665_s7 + $0x11c8] sm:$0xff] }
 0x1fe   : > { %7066 = vmatprep.subr.bf16.mxu1 %v8766_v51  ;;  %v904_v46 = vld [vmem:[%s9665_s7 + $0x11e8] sm:$0xff] }
 0x1ff   : > { %7026 = vmatpush1.bf16.msra.mxu0 %v8637_v8  ;;  %v1028_v53 = vld [vmem:[%s9665_s7 + $0x15c8] sm:$0xff]  ;;  %v8686_v2 = vcombine.high %v900_v20, %v904_v46  ;;  %v8685_v13 = vcombine.low %v900_v20, %v904_v46 }
 0x200   : > { %7027 = vmatprep.subr.bf16.mxu0 %v8646_v0  ;;  %v1032_v56 = vld [vmem:[%s9665_s7 + $0x15e8] sm:$0xff] }
 0x201   : > { %7067 = vmatpush1.bf16.msra.mxu1 %v8765_v62  ;;  %v8677_v62 = vcombine.low %v892_v33, %v896_v34  ;;  %v8814_v4 = vcombine.high %v1028_v53, %v1032_v56  ;;  %v8813_v40 = vcombine.low %v1028_v53, %v1032_v56  ;;  %v1068_v53 = vld [vmem:[%s9665_s7 + $0x1708] sm:$0xff] }
 0x202   : > { %7068 = vmatprep.subr.bf16.mxu1 %v8774_v1  ;;  %v1072_v56 = vld [vmem:[%s9665_s7 + $0x1728] sm:$0xff] }
 0x203   : > { %7028 = vmatpush1.bf16.msra.mxu0 %v8645_v6  ;;  %v908_v6 = vld [vmem:[%s9665_s7 + $0x1208] sm:$0xff] }
 0x204   : > { %7029 = vmatprep.subr.bf16.mxu0 %v8654_v10  ;;  %v1036_v10 = vld [vmem:[%s9665_s7 + $0x1608] sm:$0xff] }
 0x205   : > { %7069 = vmatpush1.bf16.msra.mxu1 %v8773_v7  ;;  %v912_v7 = vld [vmem:[%s9665_s7 + $0x1228] sm:$0xff] }
 0x206   : > { %7070 = vmatprep.subr.bf16.mxu1 %v8782_v12  ;;  %v1040_v12 = vld [vmem:[%s9665_s7 + $0x1628] sm:$0xff]  ;;  %v8694_v14 = vcombine.high %v908_v6, %v912_v7  ;;  %v8693_v25 = vcombine.low %v908_v6, %v912_v7 }
 0x207   : > { %7030 = vmatpush1.bf16.msra.mxu0 %v8653_v43  ;;  %v8822_v15 = vcombine.high %v1036_v10, %v1040_v12  ;;  %v916_v43 = vld [vmem:[%s9665_s7 + $0x1248] sm:$0xff]  ;;  %v8821_v54 = vcombine.low %v1036_v10, %v1040_v12 }
 0x208   : > { %7031 = vmatprep.subr.bf16.mxu0 %v8662_v22  ;;  %v1044_v22 = vld [vmem:[%s9665_s7 + $0x1648] sm:$0xff] }
 0x209   : > { %7071 = vmatpush1.bf16.msra.mxu1 %v8781_v18  ;;  %v920_v18 = vld [vmem:[%s9665_s7 + $0x1268] sm:$0xff] }
 0x20a   : > { %7072 = vmatprep.subr.bf16.mxu1 %v8790_v24  ;;  %v1048_v24 = vld [vmem:[%s9665_s7 + $0x1668] sm:$0xff]  ;;  %v8702_v26 = vcombine.high %v916_v43, %v920_v18  ;;  %v8701_v33 = vcombine.low %v916_v43, %v920_v18 }
 0x20b   : > { %7032 = vmatpush1.bf16.msra.mxu0 %v8661_v55  ;;  %v8830_v27 = vcombine.high %v1044_v22, %v1048_v24  ;;  %v924_v55 = vld [vmem:[%s9665_s7 + $0x1288] sm:$0xff]  ;;  %v8829_v34 = vcombine.low %v1044_v22, %v1048_v24 }
 0x20c   : > { %7033 = vmatprep.subr.bf16.mxu0 %v8670_v31  ;;  %v1052_v31 = vld [vmem:[%s9665_s7 + $0x1688] sm:$0xff] }
 0x20d   : > { %7073 = vmatpush1.bf16.msra.mxu1 %v8789_v29  ;;  %v6729_v44 = vpop.f32.mrb[8].mxu0  ;;  %v928_v29 = vld [vmem:[%s9665_s7 + $0x12a8] sm:$0xff] }
 0x20e   : > { %7074 = vmatprep.subr.bf16.mxu1 %v8798_v32  ;;  %v6730_v47 = vadd.f32 %v6729_v44, %v10168_v11  ;;  %v6731_v51 = vpop.f32.mrb[9].mxu0  ;;  %v8805_v11 = vcombine.low %v1020_v35, %v1024_v36  ;;  %v1056_v32 = vld [vmem:[%s9665_s7 + $0x16a8] sm:$0xff]  ;;  %v8710_v35 = vcombine.high %v924_v55, %v928_v29 }
 0x20f   : > { %v6770_v49 = vpop.f32.mrb[8].mxu1  ;;  %v6732_v57 = vadd.f32 %v6731_v51, %v10170_v3  ;;  %v6733_v8 = vpop.f32.mrb[10].mxu0  ;;  %7034 = vmatpush1.bf16.msra.mxu0 %v8669_v38  ;;  %v8838_v36 = vcombine.high %v1052_v31, %v1056_v32  ;;  %v932_v38 = vld [vmem:[%s9665_s7 + $0x12c8] sm:$0xff]  ;;  %v8837_v20 = vcombine.low %v1052_v31, %v1056_v32 }
 0x210   : > { %v6772_v61 = vpop.f32.mrb[9].mxu1  ;;  %v10242_v0 = vadd.f32 %v6770_v49, %v6730_v47  ;;  %v6734_v58 = vpop.f32.mrb[11].mxu0  ;;  %7035 = vmatprep.subr.bf16.mxu0 %v8678_v42  ;;  %v1060_v42 = vld [vmem:[%s9665_s7 + $0x16c8] sm:$0xff] }
 0x211   : > { %v6774_v1 = vpop.f32.mrb[10].mxu1  ;;  %7075 = vmatpush1.bf16.msra.mxu1 %v8797_v39  ;;  %v10244_v63 = vadd.f32 %v6772_v61, %v6732_v57  ;;  %v936_v39 = vld [vmem:[%s9665_s7 + $0x12e8] sm:$0xff] }
 0x212   : > { %v6775_v3 = vpop.f32.mrb[11].mxu1  ;;  %7076 = vmatprep.subr.bf16.mxu1 %v8806_v45  ;;  %v1064_v44 = vld [vmem:[%s9665_s7 + $0x16e8] sm:$0xff]  ;;  %v8709_v45 = vcombine.low %v924_v55, %v928_v29  ;;  %v8718_v46 = vcombine.high %v932_v38, %v936_v39  ;;  %v8717_v57 = vcombine.low %v932_v38, %v936_v39 }
 0x213   : > { %7036 = vmatpush1.bf16.msra.mxu0 %v8677_v62  ;;  %v8846_v47 = vcombine.high %v1060_v42, %v1064_v44  ;;  %v940_v49 = vld [vmem:[%s9665_s7 + $0x1308] sm:$0xff]  ;;  %v8845_v61 = vcombine.low %v1060_v42, %v1064_v44  ;;  %v8854_v62 = vcombine.high %v1068_v53, %v1072_v56 }
 0x214   : > { %7037 = vmatprep.subr.bf16.mxu0 %v8686_v2  ;;  %v944_v51 = vld [vmem:[%s9665_s7 + $0x1328] sm:$0xff] }
 0x215   : > { %7077 = vmatpush1.bf16.msra.mxu1 %v8805_v11  ;;  %v8726_v8 = vcombine.high %v940_v49, %v944_v51  ;;  %v948_v1 = vld [vmem:[%s9665_s7 + $0x1348] sm:$0xff]  ;;  %v8725_v3 = vcombine.low %v940_v49, %v944_v51 }
 0x216   : > { %7078 = vmatprep.subr.bf16.mxu1 %v8814_v4  ;;  %v952_v58 = vld [vmem:[%s9665_s7 + $0x1368] sm:$0xff]  ;;  %v8853_v4 = vcombine.low %v1068_v53, %v1072_v56 }
 0x217   : > { %7038 = vmatpush1.bf16.msra.mxu0 %v8685_v13  ;;  %v1076_v11 = vld [vmem:[%s9665_s7 + $0x1748] sm:$0xff]  ;;  %v8734_v6 = vcombine.high %v948_v1, %v952_v58 }
 0x218   : > { %7039 = vmatprep.subr.bf16.mxu0 %v8694_v14  ;;  %v1080_v2 = vld [vmem:[%s9665_s7 + $0x1768] sm:$0xff]  ;;  %v8733_v14 = vcombine.low %v948_v1, %v952_v58 }
 0x219   : > { %7079 = vmatpush1.bf16.msra.mxu1 %v8813_v40  ;;  %v8862_v7 = vcombine.high %v1076_v11, %v1080_v2  ;;  %v956_v10 = vld [vmem:[%s9665_s7 + $0x1388] sm:$0xff] }
 0x21a   : > { %7080 = vmatprep.subr.bf16.mxu1 %v8822_v15  ;;  %v960_v12 = vld [vmem:[%s9665_s7 + $0x13a8] sm:$0xff]  ;;  %v8861_v15 = vcombine.low %v1076_v11, %v1080_v2 }
 0x21b   : > { %7040 = vmatpush1.bf16.msra.mxu0 %v8693_v25  ;;  %v1084_v13 = vld [vmem:[%s9665_s7 + $0x1788] sm:$0xff]  ;;  %v8742_v43 = vcombine.high %v956_v10, %v960_v12 }
 0x21c   : > { %7041 = vmatprep.subr.bf16.mxu0 %v8702_v26  ;;  %v1088_v40 = vld [vmem:[%s9665_s7 + $0x17a8] sm:$0xff]  ;;  %v8741_v26 = vcombine.low %v956_v10, %v960_v12 }
 0x21d   : > { %7081 = vmatpush1.bf16.msra.mxu1 %v8821_v54  ;;  %v8870_v18 = vcombine.high %v1084_v13, %v1088_v40  ;;  %v964_v22 = vld [vmem:[%s9665_s7 + $0x13c8] sm:$0xff] }
 0x21e   : > { %7082 = vmatprep.subr.bf16.mxu1 %v8830_v27  ;;  %v968_v24 = vld [vmem:[%s9665_s7 + $0x13e8] sm:$0xff]  ;;  %v8869_v27 = vcombine.low %v1084_v13, %v1088_v40 }
 0x21f   : > { %7042 = vmatpush1.bf16.msra.mxu0 %v8701_v33  ;;  %v1092_v25 = vld [vmem:[%s9665_s7 + $0x17c8] sm:$0xff]  ;;  %v8750_v55 = vcombine.high %v964_v22, %v968_v24 }
 0x220   : > { %7043 = vmatprep.subr.bf16.mxu0 %v8710_v35  ;;  %v1096_v54 = vld [vmem:[%s9665_s7 + $0x17e8] sm:$0xff]  ;;  %v8749_v35 = vcombine.low %v964_v22, %v968_v24 }
 0x221   : > { %7083 = vmatpush1.bf16.msra.mxu1 %v8829_v34  ;;  %v8878_v29 = vcombine.high %v1092_v25, %v1096_v54  ;;  %v1100_v31 = vld [vmem:[%s9665_s7 + $0x1808] sm:$0xff] }
 0x222   : > { %7084 = vmatprep.subr.bf16.mxu1 %v8838_v36  ;;  %v1104_v32 = vld [vmem:[%s9665_s7 + $0x1828] sm:$0xff]  ;;  %v8877_v36 = vcombine.low %v1092_v25, %v1096_v54 }
 0x223   : > { %7044 = vmatpush1.bf16.msra.mxu0 %v8709_v45  ;;  %v1228_v33 = vld [vmem:[%s9665_s7 + $0x1c08] sm:$0xff]  ;;  %v8886_v38 = vcombine.high %v1100_v31, %v1104_v32 }
 0x224   : > { %7045 = vmatprep.subr.bf16.mxu0 %v8718_v46  ;;  %v1232_v34 = vld [vmem:[%s9665_s7 + $0x1c28] sm:$0xff]  ;;  %v8885_v46 = vcombine.low %v1100_v31, %v1104_v32 }
 0x225   : > { %7085 = vmatpush1.bf16.msra.mxu1 %v8837_v20  ;;  %v9014_v39 = vcombine.high %v1228_v33, %v1232_v34  ;;  %v1108_v42 = vld [vmem:[%s9665_s7 + $0x1848] sm:$0xff] }
 0x226   : > { %7086 = vmatprep.subr.bf16.mxu1 %v8846_v47  ;;  %v1112_v44 = vld [vmem:[%s9665_s7 + $0x1868] sm:$0xff]  ;;  %v9013_v47 = vcombine.low %v1228_v33, %v1232_v34 }
 0x227   : > { %7046 = vmatpush1.bf16.msra.mxu0 %v8717_v57  ;;  %v1236_v45 = vld [vmem:[%s9665_s7 + $0x1c48] sm:$0xff]  ;;  %v8894_v49 = vcombine.high %v1108_v42, %v1112_v44 }
 0x228   : > { %7047 = vmatprep.subr.bf16.mxu0 %v8726_v8  ;;  %v1240_v20 = vld [vmem:[%s9665_s7 + $0x1c68] sm:$0xff]  ;;  %v8893_v8 = vcombine.low %v1108_v42, %v1112_v44 }
 0x229   : > { %7087 = vmatpush1.bf16.msra.mxu1 %v8845_v61  ;;  %v9022_v51 = vcombine.high %v1236_v45, %v1240_v20  ;;  %v1116_v53 = vld [vmem:[%s9665_s7 + $0x1888] sm:$0xff] }
 0x22a   : > { %7088 = vmatprep.subr.bf16.mxu1 %v8854_v62  ;;  %v1120_v56 = vld [vmem:[%s9665_s7 + $0x18a8] sm:$0xff]  ;;  %v9021_v62 = vcombine.low %v1236_v45, %v1240_v20 }
 0x22b   : > { %7048 = vmatpush1.bf16.msra.mxu0 %v8725_v3  ;;  %v1244_v57 = vld [vmem:[%s9665_s7 + $0x1c88] sm:$0xff]  ;;  %v8902_v1 = vcombine.high %v1116_v53, %v1120_v56 }
 0x22c   : > { %7049 = vmatprep.subr.bf16.mxu0 %v8734_v6  ;;  %v1248_v61 = vld [vmem:[%s9665_s7 + $0x1ca8] sm:$0xff]  ;;  %v8901_v6 = vcombine.low %v1116_v53, %v1120_v56 }
 0x22d   : > { %7089 = vmatpush1.bf16.msra.mxu1 %v8853_v4  ;;  %v9030_v58 = vcombine.high %v1244_v57, %v1248_v61  ;;  %v1124_v11 = vld [vmem:[%s9665_s7 + $0x18c8] sm:$0xff] }
 0x22e   : > { %7090 = vmatprep.subr.bf16.mxu1 %v8862_v7  ;;  %v1128_v2 = vld [vmem:[%s9665_s7 + $0x18e8] sm:$0xff]  ;;  %v9029_v7 = vcombine.low %v1244_v57, %v1248_v61  ;;  %v315_v57 = vld [vmem:[%s9689_s4] sm:$0xff] }
 0x22f   : > { %7050 = vmatpush1.bf16.msra.mxu0 %v8733_v14  ;;  %v1252_v3 = vld [vmem:[%s9665_s7 + $0x1cc8] sm:$0xff]  ;;  %v8910_v10 = vcombine.high %v1124_v11, %v1128_v2 }
 0x230   : > { %7051 = vmatprep.subr.bf16.mxu0 %v8742_v43  ;;  %v1256_v4 = vld [vmem:[%s9665_s7 + $0x1ce8] sm:$0xff]  ;;  %v8909_v43 = vcombine.low %v1124_v11, %v1128_v2 }
 0x231   : > { %7091 = vmatpush1.bf16.msra.mxu1 %v8861_v15  ;;  %v9038_v12 = vcombine.high %v1252_v3, %v1256_v4  ;;  %v1132_v13 = vld [vmem:[%s9665_s7 + $0x1908] sm:$0xff] }
 0x232   : > { %7092 = vmatprep.subr.bf16.mxu1 %v8870_v18  ;;  %v1136_v40 = vld [vmem:[%s9665_s7 + $0x1928] sm:$0xff]  ;;  %v9037_v18 = vcombine.low %v1252_v3, %v1256_v4 }
 0x233   : > { %7052 = vmatpush1.bf16.msra.mxu0 %v8741_v26  ;;  %v1260_v14 = vld [vmem:[%s9665_s7 + $0x1d08] sm:$0xff]  ;;  %v8918_v22 = vcombine.high %v1132_v13, %v1136_v40 }
 0x234   : > { %7053 = vmatprep.subr.bf16.mxu0 %v8750_v55  ;;  %v1264_v15 = vld [vmem:[%s9665_s7 + $0x1d28] sm:$0xff]  ;;  %v8917_v55 = vcombine.low %v1132_v13, %v1136_v40 }
 0x235   : > { %7093 = vmatpush1.bf16.msra.mxu1 %v8869_v27  ;;  %v9046_v24 = vcombine.high %v1260_v14, %v1264_v15  ;;  %v1140_v25 = vld [vmem:[%s9665_s7 + $0x1948] sm:$0xff] }
 0x236   : > { %7094 = vmatprep.subr.bf16.mxu1 %v8878_v29  ;;  %v1144_v54 = vld [vmem:[%s9665_s7 + $0x1968] sm:$0xff]  ;;  %v9045_v29 = vcombine.low %v1260_v14, %v1264_v15 }
 0x237   : > { %7054 = vmatpush1.bf16.msra.mxu0 %v8749_v35  ;;  %v1268_v26 = vld [vmem:[%s9665_s7 + $0x1d48] sm:$0xff]  ;;  %v8926_v31 = vcombine.high %v1140_v25, %v1144_v54 }
 0x238   : > { %7105 = vmatprep.subr.bf16.mxu0 %v8886_v38  ;;  %v1272_v27 = vld [vmem:[%s9665_s7 + $0x1d68] sm:$0xff]  ;;  %v8925_v38 = vcombine.low %v1140_v25, %v1144_v54 }
 0x239   : > { %7095 = vmatpush1.bf16.msra.mxu1 %v8877_v36  ;;  %v9054_v32 = vcombine.high %v1268_v26, %v1272_v27  ;;  %v1148_v33 = vld [vmem:[%s9665_s7 + $0x1988] sm:$0xff] }
 0x23a   : > { %7146 = vmatprep.subr.bf16.mxu1 %v9014_v39  ;;  %7056 = vmatmul.mubr.bf16.vlgmr.msra.gmra.mrb[24].mxu0 %v9968_v5  ;;  %v1152_v34 = vld [vmem:[%s9665_s7 + $0x19a8] sm:$0xff]  ;;  %v9053_v39 = vcombine.low %v1268_v26, %v1272_v27 }
 0x23b   : > { %7106 = vmatpush1.bf16.msra.mxu0 %v8885_v46  ;;  %7137 = vmatprep.mubr.bf16.mxu0 %v9986_v16  ;;  %v1276_v35 = vld [vmem:[%s9665_s7 + $0x1d88] sm:$0xff]  ;;  %v8934_v42 = vcombine.high %v1148_v33, %v1152_v34 }
 0x23c   : > { %7097 = vmatmul.mubr.bf16.vlgmr.msra.gmra.mrb[24].mxu1 %v9977_v9  ;;  %7107 = vmatprep.subr.bf16.mxu0 %v8894_v49  ;;  %v1280_v36 = vld [vmem:[%s9665_s7 + $0x1da8] sm:$0xff] }
 0x23d   : > { %7147 = vmatpush1.bf16.msra.mxu1 %v9013_v47  ;;  %7178 = vmatprep.mubr.bf16.mxu1 %v9993_v19  ;;  %v9062_v45 = vcombine.high %v1276_v35, %v1280_v36  ;;  %v1156_v20 = vld [vmem:[%s9665_s7 + $0x19c8] sm:$0xff]  ;;  %v9061_v3 = vcombine.low %v1276_v35, %v1280_v36 }
 0x23e   : > { %7148 = vmatprep.subr.bf16.mxu1 %v9022_v51  ;;  %v1160_v46 = vld [vmem:[%s9665_s7 + $0x19e8] sm:$0xff] }
 0x23f   : > { %7108 = vmatpush1.bf16.msra.mxu0 %v8893_v8  ;;  %v1284_v53 = vld [vmem:[%s9665_s7 + $0x1dc8] sm:$0xff]  ;;  %v8942_v4 = vcombine.high %v1156_v20, %v1160_v46 }
 0x240   : > { %7109 = vmatprep.subr.bf16.mxu0 %v8902_v1  ;;  %v1288_v56 = vld [vmem:[%s9665_s7 + $0x1de8] sm:$0xff]  ;;  %v8933_v1 = vcombine.low %v1148_v33, %v1152_v34 }
 0x241   : > { %7149 = vmatpush1.bf16.msra.mxu1 %v9021_v62  ;;  %v316_v11 = vld [vmem:[%s9689_s4 + $0x8] sm:$0xff] }
 0x242   : > { %7150 = vmatprep.subr.bf16.mxu1 %v9030_v58  ;;  %v1292_v40 = vld [vmem:[%s9665_s7 + $0x1e08] sm:$0xff] }
 0x243   : > { %7110 = vmatpush1.bf16.msra.mxu0 %v8901_v6  ;;  %v1296_v14 = vld [vmem:[%s9665_s7 + $0x1e28] sm:$0xff] }
 0x244   : > { %7111 = vmatprep.subr.bf16.mxu0 %v8910_v10  ;;  %v1164_v10 = vld [vmem:[%s9665_s7 + $0x1a08] sm:$0xff] }
 0x245   : > { %7151 = vmatpush1.bf16.msra.mxu1 %v9029_v7  ;;  %v1172_v25 = vld [vmem:[%s9665_s7 + $0x1a48] sm:$0xff] }
 0x246   : > { %7152 = vmatprep.subr.bf16.mxu1 %v9038_v12  ;;  %v1168_v12 = vld [vmem:[%s9665_s7 + $0x1a28] sm:$0xff] }
 0x247   : > { %7112 = vmatpush1.bf16.msra.mxu0 %v8909_v43  ;;  %v8941_v43 = vcombine.low %v1156_v20, %v1160_v46  ;;  %v1176_v54 = vld [vmem:[%s9665_s7 + $0x1a68] sm:$0xff] }
 0x248   : > { %7113 = vmatprep.subr.bf16.mxu0 %v8918_v22  ;;  %v8950_v22 = vcombine.high %v1164_v10, %v1168_v12  ;;  %v1300_v26 = vld [vmem:[%s9665_s7 + $0x1e48] sm:$0xff] }
 0x249   : > { %7153 = vmatpush1.bf16.msra.mxu1 %v9037_v18  ;;  %v9069_v18 = vcombine.low %v1284_v53, %v1288_v56  ;;  %v1304_v27 = vld [vmem:[%s9665_s7 + $0x1e68] sm:$0xff] }
 0x24a   : > { %7154 = vmatprep.subr.bf16.mxu1 %v9046_v24  ;;  %v9078_v24 = vcombine.high %v1292_v40, %v1296_v14  ;;  %v1180_v33 = vld [vmem:[%s9665_s7 + $0x1a88] sm:$0xff] }
 0x24b   : > { %7114 = vmatpush1.bf16.msra.mxu0 %v8917_v55  ;;  %v8949_v55 = vcombine.low %v1164_v10, %v1168_v12  ;;  %v1184_v34 = vld [vmem:[%s9665_s7 + $0x1aa8] sm:$0xff] }
 0x24c   : > { %7115 = vmatprep.subr.bf16.mxu0 %v8926_v31  ;;  %v8958_v31 = vcombine.high %v1172_v25, %v1176_v54  ;;  %v1308_v35 = vld [vmem:[%s9665_s7 + $0x1e88] sm:$0xff] }
 0x24d   : > { %7155 = vmatpush1.bf16.msra.mxu1 %v9045_v29  ;;  %v6811_v44 = vpop.f32.mrb[12].mxu0  ;;  %v9077_v29 = vcombine.low %v1292_v40, %v1296_v14  ;;  %v1312_v36 = vld [vmem:[%s9665_s7 + $0x1ea8] sm:$0xff] }
 0x24e   : > { %7156 = vmatprep.subr.bf16.mxu1 %v9054_v32  ;;  %v6812_v47 = vadd.f32 %v6811_v44, %v10242_v0  ;;  %v6813_v51 = vpop.f32.mrb[13].mxu0  ;;  %v9086_v32 = vcombine.high %v1300_v26, %v1304_v27  ;;  %v9094_v44 = vcombine.high %v1308_v35, %v1312_v36  ;;  %v1192_v20 = vld [vmem:[%s9665_s7 + $0x1ae8] sm:$0xff] }
 0x24f   : > { %v6852_v49 = vpop.f32.mrb[12].mxu1  ;;  %v6814_v61 = vadd.f32 %v6813_v51, %v10244_v63  ;;  %v6815_v62 = vpop.f32.mrb[14].mxu0  ;;  %7116 = vmatpush1.bf16.msra.mxu0 %v8925_v38  ;;  %v9070_v63 = vcombine.high %v1284_v53, %v1288_v56  ;;  %v8957_v38 = vcombine.low %v1172_v25, %v1176_v54  ;;  %v1316_v46 = vld [vmem:[%s9665_s7 + $0x1ec8] sm:$0xff]  ;;  %v9093_v51 = vcombine.low %v1308_v35, %v1312_v36  ;;  %v461_v35 = vld [vmem:[%s9665_s7 + $0x410] sm:$0xff] }
 0x250   : > { %v6854_v8 = vpop.f32.mrb[13].mxu1  ;;  %v6853_v58 = vadd.f32 %v6852_v49, %v6812_v47  ;;  %v6816_v0 = vpop.f32.mrb[15].mxu0  ;;  %7117 = vmatprep.subr.bf16.mxu0 %v8934_v42  ;;  %v8966_v42 = vcombine.high %v1180_v33, %v1184_v34  ;;  %v1320_v47 = vld [vmem:[%s9665_s7 + $0x1ee8] sm:$0xff]  ;;  %v8965_v49 = vcombine.low %v1180_v33, %v1184_v34  ;;  %v333_v33 = vld [vmem:[%s9665_s7 + $0x10] sm:$0xff] }
 0x251   : > { %v6856_v2 = vpop.f32.mrb[14].mxu1  ;;  %7157 = vmatpush1.bf16.msra.mxu1 %v9053_v39  ;;  %v6855_v6 = vadd.f32 %v6854_v8, %v6814_v61  ;;  %v9085_v39 = vcombine.low %v1300_v26, %v1304_v27  ;;  %v9102_v56 = vcombine.high %v1316_v46, %v1320_v47  ;;  %v1200_v61 = vld [vmem:[%s9665_s7 + $0x1b28] sm:$0xff]  ;;  %v337_v34 = vld [vmem:[%s9665_s7 + $0x30] sm:$0xff] }
 0x252   : > { %v6857_v7 = vpop.f32.mrb[15].mxu1  ;;  %7158 = vmatprep.subr.bf16.mxu1 %v9062_v45  ;;  %v7843_v13 = vadd.f32 %v6853_v58, %v315_v57  ;;  %v1188_v45 = vld [vmem:[%s9665_s7 + $0x1ac8] sm:$0xff]  ;;  %v9101_v58 = vcombine.low %v1316_v46, %v1320_v47  ;;  %v465_v36 = vld [vmem:[%s9665_s7 + $0x430] sm:$0xff] }
 0x253   : > { %v7844_v15 = vadd.f32 %v6855_v6, %v316_v11  ;;  %7118 = vmatpush1.bf16.msra.mxu0 %v8933_v1  ;;  %v8974_v53 = vcombine.high %v1188_v45, %v1192_v20  ;;  %v1196_v57 = vld [vmem:[%s9665_s7 + $0x1b08] sm:$0xff]  ;;  %v8973_v1 = vcombine.low %v1188_v45, %v1192_v20  ;;  %v341_v45 = vld [vmem:[%s9665_s7 + $0x50] sm:$0xff] }
 0x254   : > { %7851 = vst [vmem:[%s9689_s4] sm:$0xff] %v7843_v13  ;;  %7119 = vmatprep.subr.bf16.mxu0 %v8942_v4  ;;  %v1324_v8 = vld [vmem:[%s9665_s7 + $0x1f08] sm:$0xff]  ;;  %v8982_v11 = vcombine.high %v1196_v57, %v1200_v61  ;;  %v8981_v7 = vcombine.low %v1196_v57, %v1200_v61  ;;  %v345_v20 = vld [vmem:[%s9665_s7 + $0x70] sm:$0xff] }
 0x255   : > { %7159 = vmatpush1.bf16.msra.mxu1 %v9061_v3  ;;  %7852 = vst [vmem:[%s9689_s4 + $0x8] sm:$0xff] %v7844_v15  ;;  %v1328_v62 = vld [vmem:[%s9665_s7 + $0x1f28] sm:$0xff]  ;;  %v469_v46 = vld [vmem:[%s9665_s7 + $0x450] sm:$0xff] }
 0x256   : > { %7160 = vmatprep.subr.bf16.mxu1 %v9070_v63  ;;  %v9110_v2 = vcombine.high %v1324_v8, %v1328_v62  ;;  %v1204_v0 = vld [vmem:[%s9665_s7 + $0x1b48] sm:$0xff]  ;;  %v9109_v63 = vcombine.low %v1324_v8, %v1328_v62  ;;  %v473_v47 = vld [vmem:[%s9665_s7 + $0x470] sm:$0xff] }
 0x257   : > { %7120 = vmatpush1.bf16.msra.mxu0 %v8941_v43  ;;  %v1208_v3 = vld [vmem:[%s9665_s7 + $0x1b68] sm:$0xff]  ;;  %v349_v57 = vld [vmem:[%s9665_s7 + $0x90] sm:$0xff] }
 0x258   : > { %7121 = vmatprep.subr.bf16.mxu0 %v8950_v22  ;;  %v1332_v4 = vld [vmem:[%s9665_s7 + $0x1f48] sm:$0xff]  ;;  %v8990_v10 = vcombine.high %v1204_v0, %v1208_v3  ;;  %v8989_v43 = vcombine.low %v1204_v0, %v1208_v3  ;;  %v353_v61 = vld [vmem:[%s9665_s7 + $0xb0] sm:$0xff] }
 0x259   : > { %7161 = vmatpush1.bf16.msra.mxu1 %v9069_v18  ;;  %v1336_v6 = vld [vmem:[%s9665_s7 + $0x1f68] sm:$0xff]  ;;  %v477_v8 = vld [vmem:[%s9665_s7 + $0x490] sm:$0xff] }
 0x25a   : > { %7162 = vmatprep.subr.bf16.mxu1 %v9078_v24  ;;  %v9118_v12 = vcombine.high %v1332_v4, %v1336_v6  ;;  %v1212_v13 = vld [vmem:[%s9665_s7 + $0x1b88] sm:$0xff]  ;;  %v9117_v18 = vcombine.low %v1332_v4, %v1336_v6  ;;  %v481_v62 = vld [vmem:[%s9665_s7 + $0x4b0] sm:$0xff] }
 0x25b   : > { %7122 = vmatpush1.bf16.msra.mxu0 %v8949_v55  ;;  %v1216_v40 = vld [vmem:[%s9665_s7 + $0x1ba8] sm:$0xff]  ;;  %v357_v0 = vld [vmem:[%s9665_s7 + $0xd0] sm:$0xff] }
 0x25c   : > { %7123 = vmatprep.subr.bf16.mxu0 %v8958_v31  ;;  %v1340_v14 = vld [vmem:[%s9665_s7 + $0x1f88] sm:$0xff]  ;;  %v8998_v22 = vcombine.high %v1212_v13, %v1216_v40  ;;  %v8997_v55 = vcombine.low %v1212_v13, %v1216_v40  ;;  %v361_v3 = vld [vmem:[%s9665_s7 + $0xf0] sm:$0xff] }
 0x25d   : > { %7163 = vmatpush1.bf16.msra.mxu1 %v9077_v29  ;;  %v1344_v15 = vld [vmem:[%s9665_s7 + $0x1fa8] sm:$0xff]  ;;  %v485_v4 = vld [vmem:[%s9665_s7 + $0x4d0] sm:$0xff] }
 0x25e   : > { %7164 = vmatprep.subr.bf16.mxu1 %v9086_v32  ;;  %v9126_v24 = vcombine.high %v1340_v14, %v1344_v15  ;;  %v1220_v25 = vld [vmem:[%s9665_s7 + $0x1bc8] sm:$0xff]  ;;  %v9125_v29 = vcombine.low %v1340_v14, %v1344_v15  ;;  %v489_v6 = vld [vmem:[%s9665_s7 + $0x4f0] sm:$0xff] }
 0x25f   : > { %7124 = vmatpush1.bf16.msra.mxu0 %v8957_v38  ;;  %v1224_v54 = vld [vmem:[%s9665_s7 + $0x1be8] sm:$0xff]  ;;  %v365_v13 = vld [vmem:[%s9665_s7 + $0x110] sm:$0xff] }
 0x260   : > { %7125 = vmatprep.subr.bf16.mxu0 %v8966_v42  ;;  %v1348_v26 = vld [vmem:[%s9665_s7 + $0x1fc8] sm:$0xff]  ;;  %v9006_v31 = vcombine.high %v1220_v25, %v1224_v54  ;;  %v9005_v38 = vcombine.low %v1220_v25, %v1224_v54  ;;  %v8120_v42 = vcombine.high %v333_v33, %v337_v34  ;;  %v369_v40 = vld [vmem:[%s9665_s7 + $0x130] sm:$0xff] }
 0x261   : > { %7165 = vmatpush1.bf16.msra.mxu1 %v9085_v39  ;;  %v1352_v27 = vld [vmem:[%s9665_s7 + $0x1fe8] sm:$0xff]  ;;  %v493_v14 = vld [vmem:[%s9665_s7 + $0x510] sm:$0xff] }
 0x262   : > { %7166 = vmatprep.subr.bf16.mxu1 %v9094_v44  ;;  %v9134_v32 = vcombine.high %v1348_v26, %v1352_v27  ;;  %v9133_v39 = vcombine.low %v1348_v26, %v1352_v27  ;;  %v8248_v44 = vcombine.high %v461_v35, %v465_v36  ;;  %v497_v15 = vld [vmem:[%s9665_s7 + $0x530] sm:$0xff] }
 0x263   : > { %7126 = vmatpush1.bf16.msra.mxu0 %v8965_v49  ;;  %v8119_v49 = vcombine.low %v333_v33, %v337_v34  ;;  %v373_v25 = vld [vmem:[%s9665_s7 + $0x150] sm:$0xff] }
 0x264   : > { %7127 = vmatprep.subr.bf16.mxu0 %v8974_v53  ;;  %v8128_v53 = vcombine.high %v341_v45, %v345_v20  ;;  %v377_v54 = vld [vmem:[%s9665_s7 + $0x170] sm:$0xff] }
 0x265   : > { %7167 = vmatpush1.bf16.msra.mxu1 %v9093_v51  ;;  %v8247_v51 = vcombine.low %v461_v35, %v465_v36  ;;  %v501_v26 = vld [vmem:[%s9665_s7 + $0x550] sm:$0xff] }
 0x266   : > { %7168 = vmatprep.subr.bf16.mxu1 %v9102_v56  ;;  %v8256_v56 = vcombine.high %v469_v46, %v473_v47  ;;  %v505_v27 = vld [vmem:[%s9665_s7 + $0x570] sm:$0xff] }
 0x267   : > { %7128 = vmatpush1.bf16.msra.mxu0 %v8973_v1  ;;  %v8127_v1 = vcombine.low %v341_v45, %v345_v20  ;;  %v381_v33 = vld [vmem:[%s9665_s7 + $0x190] sm:$0xff] }
 0x268   : > { %7129 = vmatprep.subr.bf16.mxu0 %v8982_v11  ;;  %v8136_v11 = vcombine.high %v349_v57, %v353_v61  ;;  %v385_v34 = vld [vmem:[%s9665_s7 + $0x1b0] sm:$0xff] }
 0x269   : > { %7169 = vmatpush1.bf16.msra.mxu1 %v9101_v58  ;;  %v8255_v58 = vcombine.low %v469_v46, %v473_v47  ;;  %v509_v35 = vld [vmem:[%s9665_s7 + $0x590] sm:$0xff] }
 0x26a   : > { %7170 = vmatprep.subr.bf16.mxu1 %v9110_v2  ;;  %v8264_v2 = vcombine.high %v477_v8, %v481_v62  ;;  %v513_v36 = vld [vmem:[%s9665_s7 + $0x5b0] sm:$0xff] }
 0x26b   : > { %7130 = vmatpush1.bf16.msra.mxu0 %v8981_v7  ;;  %v8135_v7 = vcombine.low %v349_v57, %v353_v61  ;;  %v8296_v45 = vcombine.high %v509_v35, %v513_v36  ;;  %v389_v20 = vld [vmem:[%s9665_s7 + $0x1d0] sm:$0xff] }
 0x26c   : > { %7131 = vmatprep.subr.bf16.mxu0 %v8990_v10  ;;  %v8144_v10 = vcombine.high %v357_v0, %v361_v3  ;;  %v393_v46 = vld [vmem:[%s9665_s7 + $0x1f0] sm:$0xff] }
 0x26d   : > { %7171 = vmatpush1.bf16.msra.mxu1 %v9109_v63  ;;  %v8263_v63 = vcombine.low %v477_v8, %v481_v62  ;;  %v8167_v8 = vcombine.low %v381_v33, %v385_v34 }
 0x26e   : > { %7172 = vmatprep.subr.bf16.mxu1 %v9118_v12  ;;  %v8272_v12 = vcombine.high %v485_v4, %v489_v6 }
 0x26f   : > { %7132 = vmatpush1.bf16.msra.mxu0 %v8989_v43  ;;  %v8143_v43 = vcombine.low %v357_v0, %v361_v3 }
 0x270   : > { %7133 = vmatprep.subr.bf16.mxu0 %v8998_v22  ;;  %v8152_v22 = vcombine.high %v365_v13, %v369_v40 }
 0x271   : > { %7173 = vmatpush1.bf16.msra.mxu1 %v9117_v18  ;;  %v8271_v18 = vcombine.low %v485_v4, %v489_v6  ;;  %v397_v4 = vld [vmem:[%s9665_s7 + $0x210] sm:$0xff] }
 0x272   : > { %7174 = vmatprep.subr.bf16.mxu1 %v9126_v24  ;;  %v8280_v24 = vcombine.high %v493_v14, %v497_v15  ;;  %v401_v6 = vld [vmem:[%s9665_s7 + $0x230] sm:$0xff] }
 0x273   : > { %7134 = vmatpush1.bf16.msra.mxu0 %v8997_v55  ;;  %v8151_v55 = vcombine.low %v365_v13, %v369_v40  ;;  %v8184_v13 = vcombine.high %v397_v4, %v401_v6 }
 0x274   : > { %7135 = vmatprep.subr.bf16.mxu0 %v9006_v31  ;;  %v8160_v31 = vcombine.high %v373_v25, %v377_v54 }
 0x275   : > { %7175 = vmatpush1.bf16.msra.mxu1 %v9125_v29  ;;  %v8279_v29 = vcombine.low %v493_v14, %v497_v15  ;;  %v405_v14 = vld [vmem:[%s9665_s7 + $0x250] sm:$0xff] }
 0x276   : > { %7176 = vmatprep.subr.bf16.mxu1 %v9134_v32  ;;  %v8288_v32 = vcombine.high %v501_v26, %v505_v27  ;;  %v409_v15 = vld [vmem:[%s9665_s7 + $0x270] sm:$0xff] }
 0x277   : > { %7136 = vmatpush1.bf16.msra.mxu0 %v9005_v38  ;;  %v8159_v38 = vcombine.low %v373_v25, %v377_v54  ;;  %v8192_v25 = vcombine.high %v405_v14, %v409_v15 }
 0x278   : > { %7187 = vmatprep.subr.bf16.mxu0 %v8120_v42  ;;  %v8168_v42 = vcombine.high %v381_v33, %v385_v34 }
 0x279   : > { %7177 = vmatpush1.bf16.msra.mxu1 %v9133_v39  ;;  %v8287_v39 = vcombine.low %v501_v26, %v505_v27  ;;  %v413_v26 = vld [vmem:[%s9665_s7 + $0x290] sm:$0xff] }
 0x27a   : > { %7228 = vmatprep.subr.bf16.mxu1 %v8248_v44  ;;  %7138 = vmatmul.mubr.bf16.vlgmr.msra.gmra.mrb[28].mxu0 %v10058_v23  ;;  %v417_v27 = vld [vmem:[%s9665_s7 + $0x2b0] sm:$0xff] }
 0x27b   : > { %7188 = vmatpush1.bf16.msra.mxu0 %v8119_v49  ;;  %7219 = vmatprep.mubr.bf16.mxu0 %v9738_v59  ;;  %v8200_v33 = vcombine.high %v413_v26, %v417_v27 }
 0x27c   : > { %7179 = vmatmul.mubr.bf16.vlgmr.msra.gmra.mrb[28].mxu1 %v10064_v52  ;;  %7189 = vmatprep.subr.bf16.mxu0 %v8128_v53  ;;  %v521_v53 = vld [vmem:[%s9665_s7 + $0x5f0] sm:$0xff] }
 0x27d   : > { %7229 = vmatpush1.bf16.msra.mxu1 %v8247_v51  ;;  %7260 = vmatprep.mubr.bf16.mxu1 %v9742_v60  ;;  %v517_v51 = vld [vmem:[%s9665_s7 + $0x5d0] sm:$0xff] }
 0x27e   : > { %7230 = vmatprep.subr.bf16.mxu1 %v8256_v56  ;;  %v8304_v3 = vcombine.high %v517_v51, %v521_v53 }
 0x27f   : > { %7190 = vmatpush1.bf16.msra.mxu0 %v8127_v1 }
 0x280   : > { %7191 = vmatprep.subr.bf16.mxu0 %v8136_v11  ;;  %v8295_v11 = vcombine.low %v509_v35, %v513_v36  ;;  %v421_v35 = vld [vmem:[%s9665_s7 + $0x2d0] sm:$0xff] }
 0x281   : > { %7231 = vmatpush1.bf16.msra.mxu1 %v8255_v58  ;;  %v425_v36 = vld [vmem:[%s9665_s7 + $0x2f0] sm:$0xff] }
 0x282   : > { %7232 = vmatprep.subr.bf16.mxu1 %v8264_v2  ;;  %v8176_v2 = vcombine.high %v389_v20, %v393_v46 }
 0x283   : > { %7192 = vmatpush1.bf16.msra.mxu0 %v8135_v7  ;;  %v525_v7 = vld [vmem:[%s9665_s7 + $0x610] sm:$0xff] }
 0x284   : > { %7193 = vmatprep.subr.bf16.mxu0 %v8144_v10  ;;  %v8175_v10 = vcombine.low %v389_v20, %v393_v46  ;;  %v429_v46 = vld [vmem:[%s9665_s7 + $0x310] sm:$0xff] }
 0x285   : > { %7233 = vmatpush1.bf16.msra.mxu1 %v8263_v63  ;;  %v529_v63 = vld [vmem:[%s9665_s7 + $0x630] sm:$0xff] }
 0x286   : > { %7234 = vmatprep.subr.bf16.mxu1 %v8272_v12  ;;  %v8303_v12 = vcombine.low %v517_v51, %v521_v53  ;;  %v8312_v40 = vcombine.high %v525_v7, %v529_v63  ;;  %v561_v51 = vld [vmem:[%s9665_s7 + $0x730] sm:$0xff]  ;;  %v8207_v53 = vcombine.low %v421_v35, %v425_v36 }
 0x287   : > { %7194 = vmatpush1.bf16.msra.mxu0 %v8143_v43  ;;  %v533_v43 = vld [vmem:[%s9665_s7 + $0x650] sm:$0xff] }
 0x288   : > { %7195 = vmatprep.subr.bf16.mxu0 %v8152_v22  ;;  %v8183_v22 = vcombine.low %v397_v4, %v401_v6 }
 0x289   : > { %7235 = vmatpush1.bf16.msra.mxu1 %v8271_v18  ;;  %v537_v18 = vld [vmem:[%s9665_s7 + $0x670] sm:$0xff] }
 0x28a   : > { %7236 = vmatprep.subr.bf16.mxu1 %v8280_v24  ;;  %v8311_v24 = vcombine.low %v525_v7, %v529_v63  ;;  %v8320_v54 = vcombine.high %v533_v43, %v537_v18  ;;  %v445_v7 = vld [vmem:[%s9665_s7 + $0x390] sm:$0xff] }
 0x28b   : > { %7196 = vmatpush1.bf16.msra.mxu0 %v8151_v55  ;;  %v541_v55 = vld [vmem:[%s9665_s7 + $0x690] sm:$0xff] }
 0x28c   : > { %7197 = vmatprep.subr.bf16.mxu0 %v8160_v31  ;;  %v8191_v31 = vcombine.low %v405_v14, %v409_v15  ;;  %v449_v63 = vld [vmem:[%s9665_s7 + $0x3b0] sm:$0xff] }
 0x28d   : > { %7237 = vmatpush1.bf16.msra.mxu1 %v8279_v29  ;;  %v6893_v44 = vpop.f32.mrb[16].mxu0  ;;  %v545_v29 = vld [vmem:[%s9665_s7 + $0x6b0] sm:$0xff]  ;;  %v8232_v14 = vcombine.high %v445_v7, %v449_v63 }
 0x28e   : > { %7238 = vmatprep.subr.bf16.mxu1 %v8288_v32  ;;  %v6895_v49 = vpop.f32.mrb[17].mxu0  ;;  %v8319_v32 = vcombine.low %v533_v43, %v537_v18  ;;  %v8328_v34 = vcombine.high %v541_v55, %v545_v29  ;;  %v453_v43 = vld [vmem:[%s9665_s7 + $0x3d0] sm:$0xff] }
 0x28f   : > { %v6934_v47 = vpop.f32.mrb[16].mxu1  ;;  %v6897_v61 = vpop.f32.mrb[18].mxu0  ;;  %7198 = vmatpush1.bf16.msra.mxu0 %v8159_v38  ;;  %v549_v38 = vld [vmem:[%s9665_s7 + $0x6d0] sm:$0xff] }
 0x290   : > { %v10388_v56 = vadd.f32 %v6934_v47, %v6893_v44  ;;  %v6936_v57 = vpop.f32.mrb[17].mxu1  ;;  %v6898_v58 = vpop.f32.mrb[19].mxu0  ;;  %7199 = vmatprep.subr.bf16.mxu0 %v8168_v42  ;;  %v8199_v42 = vcombine.low %v413_v26, %v417_v27  ;;  %v8327_v44 = vcombine.low %v541_v55, %v545_v29  ;;  %v433_v47 = vld [vmem:[%s9665_s7 + $0x330] sm:$0xff] }
 0x291   : > { %v10390_v62 = vadd.f32 %v6936_v57, %v6895_v49  ;;  %v6938_v1 = vpop.f32.mrb[18].mxu1  ;;  %7239 = vmatpush1.bf16.msra.mxu1 %v8287_v39  ;;  %v553_v39 = vld [vmem:[%s9665_s7 + $0x6f0] sm:$0xff]  ;;  %v8216_v61 = vcombine.high %v429_v46, %v433_v47 }
 0x292   : > { %v6939_v0 = vpop.f32.mrb[19].mxu1  ;;  %7240 = vmatprep.subr.bf16.mxu1 %v8296_v45  ;;  %v8208_v45 = vcombine.high %v421_v35, %v425_v36  ;;  %v8336_v20 = vcombine.high %v549_v38, %v553_v39  ;;  %v557_v49 = vld [vmem:[%s9665_s7 + $0x710] sm:$0xff]  ;;  %v8335_v57 = vcombine.low %v549_v38, %v553_v39 }
 0x293   : > { %7200 = vmatpush1.bf16.msra.mxu0 %v8167_v8  ;;  %v8344_v8 = vcombine.high %v557_v49, %v561_v51  ;;  %v437_v1 = vld [vmem:[%s9665_s7 + $0x350] sm:$0xff]  ;;  %v8215_v0 = vcombine.low %v429_v46, %v433_v47 }
 0x294   : > { %7201 = vmatprep.subr.bf16.mxu0 %v8176_v2  ;;  %v441_v58 = vld [vmem:[%s9665_s7 + $0x370] sm:$0xff] }
 0x295   : > { %7241 = vmatpush1.bf16.msra.mxu1 %v8295_v11  ;;  %v565_v11 = vld [vmem:[%s9665_s7 + $0x750] sm:$0xff]  ;;  %v8224_v4 = vcombine.high %v437_v1, %v441_v58 }
 0x296   : > { %7242 = vmatprep.subr.bf16.mxu1 %v8304_v3  ;;  %v569_v2 = vld [vmem:[%s9665_s7 + $0x770] sm:$0xff]  ;;  %v8343_v3 = vcombine.low %v557_v49, %v561_v51 }
 0x297   : > { %7202 = vmatpush1.bf16.msra.mxu0 %v8175_v10  ;;  %v8352_v6 = vcombine.high %v565_v11, %v569_v2  ;;  %v573_v10 = vld [vmem:[%s9665_s7 + $0x790] sm:$0xff] }
 0x298   : > { %7203 = vmatprep.subr.bf16.mxu0 %v8184_v13  ;;  %v8223_v13 = vcombine.low %v437_v1, %v441_v58  ;;  %v457_v18 = vld [vmem:[%s9665_s7 + $0x3f0] sm:$0xff] }
 0x299   : > { %7243 = vmatpush1.bf16.msra.mxu1 %v8303_v12  ;;  %v577_v12 = vld [vmem:[%s9665_s7 + $0x7b0] sm:$0xff]  ;;  %v8240_v26 = vcombine.high %v453_v43, %v457_v18 }
 0x29a   : > { %7244 = vmatprep.subr.bf16.mxu1 %v8312_v40  ;;  %v8351_v40 = vcombine.low %v565_v11, %v569_v2  ;;  %v8360_v15 = vcombine.high %v573_v10, %v577_v12  ;;  %v589_v55 = vld [vmem:[%s9665_s7 + $0x810] sm:$0xff] }
 0x29b   : > { %7204 = vmatpush1.bf16.msra.mxu0 %v8183_v22  ;;  %v581_v22 = vld [vmem:[%s9665_s7 + $0x7d0] sm:$0xff] }
 0x29c   : > { %7205 = vmatprep.subr.bf16.mxu0 %v8192_v25  ;;  %v8231_v25 = vcombine.low %v445_v7, %v449_v63  ;;  %v593_v29 = vld [vmem:[%s9665_s7 + $0x830] sm:$0xff] }
 0x29d   : > { %7245 = vmatpush1.bf16.msra.mxu1 %v8311_v24  ;;  %v585_v24 = vld [vmem:[%s9665_s7 + $0x7f0] sm:$0xff]  ;;  %v8376_v35 = vcombine.high %v589_v55, %v593_v29 }
 0x29e   : > { %7246 = vmatprep.subr.bf16.mxu1 %v8320_v54  ;;  %v8359_v54 = vcombine.low %v573_v10, %v577_v12  ;;  %v8368_v27 = vcombine.high %v581_v22, %v585_v24  ;;  %v597_v38 = vld [vmem:[%s9665_s7 + $0x850] sm:$0xff] }
 0x29f   : > { %7206 = vmatpush1.bf16.msra.mxu0 %v8191_v31  ;;  %v717_v31 = vld [vmem:[%s9665_s7 + $0xc10] sm:$0xff] }
 0x2a0   : > { %7207 = vmatprep.subr.bf16.mxu0 %v8200_v33  ;;  %v8239_v33 = vcombine.low %v453_v43, %v457_v18  ;;  %v601_v39 = vld [vmem:[%s9665_s7 + $0x870] sm:$0xff] }
 0x2a1   : > { %7247 = vmatpush1.bf16.msra.mxu1 %v8319_v32  ;;  %v721_v32 = vld [vmem:[%s9665_s7 + $0xc30] sm:$0xff]  ;;  %v8384_v46 = vcombine.high %v597_v38, %v601_v39 }
 0x2a2   : > { %7248 = vmatprep.subr.bf16.mxu1 %v8328_v34  ;;  %v8367_v34 = vcombine.low %v581_v22, %v585_v24  ;;  %v8504_v36 = vcombine.high %v717_v31, %v721_v32  ;;  %v605_v49 = vld [vmem:[%s9665_s7 + $0x890] sm:$0xff] }
 0x2a3   : > { %7208 = vmatpush1.bf16.msra.mxu0 %v8199_v42  ;;  %v725_v42 = vld [vmem:[%s9665_s7 + $0xc50] sm:$0xff] }
 0x2a4   : > { %7209 = vmatprep.subr.bf16.mxu0 %v8208_v45  ;;  %v8375_v45 = vcombine.low %v589_v55, %v593_v29  ;;  %v609_v51 = vld [vmem:[%s9665_s7 + $0x8b0] sm:$0xff] }
 0x2a5   : > { %7249 = vmatpush1.bf16.msra.mxu1 %v8327_v44  ;;  %v729_v44 = vld [vmem:[%s9665_s7 + $0xc70] sm:$0xff]  ;;  %v8392_v1 = vcombine.high %v605_v49, %v609_v51 }
 0x2a6   : > { %7250 = vmatprep.subr.bf16.mxu1 %v8336_v20  ;;  %v8503_v20 = vcombine.low %v717_v31, %v721_v32  ;;  %v8512_v47 = vcombine.high %v725_v42, %v729_v44  ;;  %v613_v11 = vld [vmem:[%s9665_s7 + $0x8d0] sm:$0xff] }
 0x2a7   : > { %7210 = vmatpush1.bf16.msra.mxu0 %v8207_v53  ;;  %v733_v53 = vld [vmem:[%s9665_s7 + $0xc90] sm:$0xff] }
 0x2a8   : > { %7211 = vmatprep.subr.bf16.mxu0 %v8216_v61  ;;  %v8383_v61 = vcombine.low %v597_v38, %v601_v39  ;;  %v617_v2 = vld [vmem:[%s9665_s7 + $0x8f0] sm:$0xff] }
 0x2a9   : > { %7251 = vmatpush1.bf16.msra.mxu1 %v8335_v57  ;;  %v737_v57 = vld [vmem:[%s9665_s7 + $0xcb0] sm:$0xff]  ;;  %v8400_v7 = vcombine.high %v613_v11, %v617_v2 }
 0x2aa   : > { %7252 = vmatprep.subr.bf16.mxu1 %v8344_v8  ;;  %v8511_v8 = vcombine.low %v725_v42, %v729_v44  ;;  %v8520_v58 = vcombine.high %v733_v53, %v737_v57  ;;  %v621_v10 = vld [vmem:[%s9665_s7 + $0x910] sm:$0xff] }
 0x2ab   : > { %7212 = vmatpush1.bf16.msra.mxu0 %v8215_v0  ;;  %v741_v0 = vld [vmem:[%s9665_s7 + $0xcd0] sm:$0xff] }
 0x2ac   : > { %7213 = vmatprep.subr.bf16.mxu0 %v8224_v4  ;;  %v8391_v4 = vcombine.low %v605_v49, %v609_v51  ;;  %v625_v12 = vld [vmem:[%s9665_s7 + $0x930] sm:$0xff] }
 0x2ad   : > { %7253 = vmatpush1.bf16.msra.mxu1 %v8343_v3  ;;  %v745_v3 = vld [vmem:[%s9665_s7 + $0xcf0] sm:$0xff]  ;;  %v8408_v43 = vcombine.high %v621_v10, %v625_v12 }
 0x2ae   : > { %7254 = vmatprep.subr.bf16.mxu1 %v8352_v6  ;;  %v8519_v6 = vcombine.low %v733_v53, %v737_v57  ;;  %v8528_v63 = vcombine.high %v741_v0, %v745_v3  ;;  %v629_v22 = vld [vmem:[%s9665_s7 + $0x950] sm:$0xff] }
 0x2af   : > { %7214 = vmatpush1.bf16.msra.mxu0 %v8223_v13  ;;  %v749_v13 = vld [vmem:[%s9665_s7 + $0xd10] sm:$0xff] }
 0x2b0   : > { %7215 = vmatprep.subr.bf16.mxu0 %v8232_v14  ;;  %v8399_v14 = vcombine.low %v613_v11, %v617_v2  ;;  %v633_v24 = vld [vmem:[%s9665_s7 + $0x970] sm:$0xff] }
 0x2b1   : > { %7255 = vmatpush1.bf16.msra.mxu1 %v8351_v40  ;;  %v753_v40 = vld [vmem:[%s9665_s7 + $0xd30] sm:$0xff]  ;;  %v8416_v55 = vcombine.high %v629_v22, %v633_v24 }
 0x2b2   : > { %7256 = vmatprep.subr.bf16.mxu1 %v8360_v15  ;;  %v8527_v15 = vcombine.low %v741_v0, %v745_v3  ;;  %v8536_v18 = vcombine.high %v749_v13, %v753_v40  ;;  %v637_v31 = vld [vmem:[%s9665_s7 + $0x990] sm:$0xff] }
 0x2b3   : > { %7216 = vmatpush1.bf16.msra.mxu0 %v8231_v25  ;;  %v757_v25 = vld [vmem:[%s9665_s7 + $0xd50] sm:$0xff] }
 0x2b4   : > { %7217 = vmatprep.subr.bf16.mxu0 %v8240_v26  ;;  %v8407_v26 = vcombine.low %v621_v10, %v625_v12  ;;  %v641_v32 = vld [vmem:[%s9665_s7 + $0x9b0] sm:$0xff] }
 0x2b5   : > { %7257 = vmatpush1.bf16.msra.mxu1 %v8359_v54  ;;  %v761_v54 = vld [vmem:[%s9665_s7 + $0xd70] sm:$0xff]  ;;  %v8424_v38 = vcombine.high %v637_v31, %v641_v32 }
 0x2b6   : > { %7258 = vmatprep.subr.bf16.mxu1 %v8368_v27  ;;  %v8535_v27 = vcombine.low %v749_v13, %v753_v40  ;;  %v8544_v29 = vcombine.high %v757_v25, %v761_v54  ;;  %v645_v44 = vld [vmem:[%s9665_s7 + $0x9d0] sm:$0xff] }
 0x2b7   : > { %7218 = vmatpush1.bf16.msra.mxu0 %v8239_v33  ;;  %v765_v33 = vld [vmem:[%s9665_s7 + $0xd90] sm:$0xff] }
 0x2b8   : > { %7269 = vmatprep.subr.bf16.mxu0 %v8376_v35  ;;  %v8415_v35 = vcombine.low %v629_v22, %v633_v24  ;;  %v773_v49 = vld [vmem:[%s9665_s7 + $0xdd0] sm:$0xff] }
 0x2b9   : > { %7259 = vmatpush1.bf16.msra.mxu1 %v8367_v34  ;;  %v769_v34 = vld [vmem:[%s9665_s7 + $0xdb0] sm:$0xff] }
 0x2ba   : > { %7310 = vmatprep.subr.bf16.mxu1 %v8504_v36  ;;  %7220 = vmatmul.mubr.bf16.vlgmr.msra.gmra.mrb[32].mxu0 %v9788_v17  ;;  %v8543_v36 = vcombine.low %v757_v25, %v761_v54  ;;  %v8552_v42 = vcombine.high %v765_v33, %v769_v34  ;;  %v777_v51 = vld [vmem:[%s9665_s7 + $0xdf0] sm:$0xff] }
 0x2bb   : > { %7270 = vmatpush1.bf16.msra.mxu0 %v8375_v45  ;;  %7301 = vmatprep.mubr.bf16.mxu0 %v9806_v28  ;;  %v649_v45 = vld [vmem:[%s9665_s7 + $0x9f0] sm:$0xff]  ;;  %v8560_v3 = vcombine.high %v773_v49, %v777_v51  ;;  %v8559_v12 = vcombine.low %v773_v49, %v777_v51 }
 0x2bc   : > { %7261 = vmatmul.mubr.bf16.vlgmr.msra.gmra.mrb[32].mxu1 %v9797_v21  ;;  %7271 = vmatprep.subr.bf16.mxu0 %v8384_v46  ;;  %v8432_v2 = vcombine.high %v645_v44, %v649_v45  ;;  %v8431_v10 = vcombine.low %v645_v44, %v649_v45  ;;  %v813_v49 = vld [vmem:[%s9665_s7 + $0xf10] sm:$0xff] }
 0x2bd   : > { %7311 = vmatpush1.bf16.msra.mxu1 %v8503_v20  ;;  %7342 = vmatprep.mubr.bf16.mxu1 %v9813_v30  ;;  %v817_v51 = vld [vmem:[%s9665_s7 + $0xf30] sm:$0xff] }
 0x2be   : > { %7312 = vmatprep.subr.bf16.mxu1 %v8512_v47 }
 0x2bf   : > { %7272 = vmatpush1.bf16.msra.mxu0 %v8383_v61 }
 0x2c0   : > { %7273 = vmatprep.subr.bf16.mxu0 %v8392_v1 }
 0x2c1   : > { %7313 = vmatpush1.bf16.msra.mxu1 %v8511_v8  ;;  %v8423_v8 = vcombine.low %v637_v31, %v641_v32 }
 0x2c2   : > { %7314 = vmatprep.subr.bf16.mxu1 %v8520_v58 }
 0x2c3   : > { %7274 = vmatpush1.bf16.msra.mxu0 %v8391_v4  ;;  %v653_v4 = vld [vmem:[%s9665_s7 + $0xa10] sm:$0xff] }
 0x2c4   : > { %7275 = vmatprep.subr.bf16.mxu0 %v8400_v7  ;;  %v781_v7 = vld [vmem:[%s9665_s7 + $0xe10] sm:$0xff] }
 0x2c5   : > { %7315 = vmatpush1.bf16.msra.mxu1 %v8519_v6  ;;  %v657_v6 = vld [vmem:[%s9665_s7 + $0xa30] sm:$0xff] }
 0x2c6   : > { %7316 = vmatprep.subr.bf16.mxu1 %v8528_v63  ;;  %v785_v63 = vld [vmem:[%s9665_s7 + $0xe30] sm:$0xff]  ;;  %v8440_v13 = vcombine.high %v653_v4, %v657_v6  ;;  %v8439_v22 = vcombine.low %v653_v4, %v657_v6 }
 0x2c7   : > { %7276 = vmatpush1.bf16.msra.mxu0 %v8399_v14  ;;  %v8568_v40 = vcombine.high %v781_v7, %v785_v63  ;;  %v661_v14 = vld [vmem:[%s9665_s7 + $0xa50] sm:$0xff]  ;;  %v8567_v24 = vcombine.low %v781_v7, %v785_v63 }
 0x2c8   : > { %7277 = vmatprep.subr.bf16.mxu0 %v8408_v43  ;;  %v789_v43 = vld [vmem:[%s9665_s7 + $0xe50] sm:$0xff] }
 0x2c9   : > { %7317 = vmatpush1.bf16.msra.mxu1 %v8527_v15  ;;  %v665_v15 = vld [vmem:[%s9665_s7 + $0xa70] sm:$0xff] }
 0x2ca   : > { %7318 = vmatprep.subr.bf16.mxu1 %v8536_v18  ;;  %v793_v18 = vld [vmem:[%s9665_s7 + $0xe70] sm:$0xff]  ;;  %v8448_v25 = vcombine.high %v661_v14, %v665_v15  ;;  %v8447_v31 = vcombine.low %v661_v14, %v665_v15 }
 0x2cb   : > { %7278 = vmatpush1.bf16.msra.mxu0 %v8407_v26  ;;  %v8576_v54 = vcombine.high %v789_v43, %v793_v18  ;;  %v669_v26 = vld [vmem:[%s9665_s7 + $0xa90] sm:$0xff]  ;;  %v8575_v32 = vcombine.low %v789_v43, %v793_v18 }
 0x2cc   : > { %7279 = vmatprep.subr.bf16.mxu0 %v8416_v55  ;;  %v797_v55 = vld [vmem:[%s9665_s7 + $0xe90] sm:$0xff] }
 0x2cd   : > { %7319 = vmatpush1.bf16.msra.mxu1 %v8535_v27  ;;  %v6975_v39 = vpop.f32.mrb[20].mxu0  ;;  %v673_v27 = vld [vmem:[%s9665_s7 + $0xab0] sm:$0xff] }
 0x2ce   : > { %7320 = vmatprep.subr.bf16.mxu1 %v8544_v29  ;;  %v6976_v20 = vadd.f32 %v6975_v39, %v10388_v56  ;;  %v6977_v47 = vpop.f32.mrb[21].mxu0  ;;  %v8551_v56 = vcombine.low %v765_v33, %v769_v34  ;;  %v801_v29 = vld [vmem:[%s9665_s7 + $0xeb0] sm:$0xff]  ;;  %v8456_v33 = vcombine.high %v669_v26, %v673_v27 }
 0x2cf   : > { %v7016_v46 = vpop.f32.mrb[20].mxu1  ;;  %v6978_v53 = vadd.f32 %v6977_v47, %v10390_v62  ;;  %v6979_v61 = vpop.f32.mrb[22].mxu0  ;;  %7280 = vmatpush1.bf16.msra.mxu0 %v8415_v35  ;;  %v8584_v34 = vcombine.high %v797_v55, %v801_v29  ;;  %v677_v35 = vld [vmem:[%s9665_s7 + $0xad0] sm:$0xff]  ;;  %v8583_v44 = vcombine.low %v797_v55, %v801_v29 }
 0x2d0   : > { %v7018_v57 = vpop.f32.mrb[21].mxu1  ;;  %v10462_v1 = vadd.f32 %v7016_v46, %v6976_v20  ;;  %v6980_v11 = vpop.f32.mrb[23].mxu0  ;;  %7281 = vmatprep.subr.bf16.mxu0 %v8424_v38  ;;  %v805_v38 = vld [vmem:[%s9665_s7 + $0xed0] sm:$0xff] }
 0x2d1   : > { %v7020_v58 = vpop.f32.mrb[22].mxu1  ;;  %7321 = vmatpush1.bf16.msra.mxu1 %v8543_v36  ;;  %v10464_v0 = vadd.f32 %v7018_v57, %v6978_v53  ;;  %v681_v36 = vld [vmem:[%s9665_s7 + $0xaf0] sm:$0xff] }
 0x2d2   : > { %v7021_v62 = vpop.f32.mrb[23].mxu1  ;;  %7322 = vmatprep.subr.bf16.mxu1 %v8552_v42  ;;  %v809_v39 = vld [vmem:[%s9665_s7 + $0xef0] sm:$0xff]  ;;  %v8455_v42 = vcombine.low %v669_v26, %v673_v27  ;;  %v8464_v45 = vcombine.high %v677_v35, %v681_v36  ;;  %v8463_v53 = vcombine.low %v677_v35, %v681_v36 }
 0x2d3   : > { %7282 = vmatpush1.bf16.msra.mxu0 %v8423_v8  ;;  %v8592_v20 = vcombine.high %v805_v38, %v809_v39  ;;  %v685_v46 = vld [vmem:[%s9665_s7 + $0xb10] sm:$0xff]  ;;  %v8591_v57 = vcombine.low %v805_v38, %v809_v39  ;;  %v8600_v8 = vcombine.high %v813_v49, %v817_v51 }
 0x2d4   : > { %7283 = vmatprep.subr.bf16.mxu0 %v8432_v2  ;;  %v689_v47 = vld [vmem:[%s9665_s7 + $0xb30] sm:$0xff] }
 0x2d5   : > { %7323 = vmatpush1.bf16.msra.mxu1 %v8551_v56  ;;  %v8472_v61 = vcombine.high %v685_v46, %v689_v47  ;;  %v693_v58 = vld [vmem:[%s9665_s7 + $0xb50] sm:$0xff]  ;;  %v8471_v62 = vcombine.low %v685_v46, %v689_v47 }
 0x2d6   : > { %7324 = vmatprep.subr.bf16.mxu1 %v8560_v3  ;;  %v697_v11 = vld [vmem:[%s9665_s7 + $0xb70] sm:$0xff]  ;;  %v8599_v3 = vcombine.low %v813_v49, %v817_v51 }
 0x2d7   : > { %7284 = vmatpush1.bf16.msra.mxu0 %v8431_v10  ;;  %v821_v56 = vld [vmem:[%s9665_s7 + $0xf50] sm:$0xff]  ;;  %v8480_v4 = vcombine.high %v693_v58, %v697_v11 }
 0x2d8   : > { %7285 = vmatprep.subr.bf16.mxu0 %v8440_v13  ;;  %v825_v2 = vld [vmem:[%s9665_s7 + $0xf70] sm:$0xff]  ;;  %v8479_v13 = vcombine.low %v693_v58, %v697_v11 }
 0x2d9   : > { %7325 = vmatpush1.bf16.msra.mxu1 %v8559_v12  ;;  %v8608_v6 = vcombine.high %v821_v56, %v825_v2  ;;  %v701_v7 = vld [vmem:[%s9665_s7 + $0xb90] sm:$0xff] }
 0x2da   : > { %7326 = vmatprep.subr.bf16.mxu1 %v8568_v40  ;;  %v705_v63 = vld [vmem:[%s9665_s7 + $0xbb0] sm:$0xff]  ;;  %v8607_v40 = vcombine.low %v821_v56, %v825_v2 }
 0x2db   : > { %7286 = vmatpush1.bf16.msra.mxu0 %v8439_v22  ;;  %v829_v10 = vld [vmem:[%s9665_s7 + $0xf90] sm:$0xff]  ;;  %v8488_v14 = vcombine.high %v701_v7, %v705_v63 }
 0x2dc   : > { %7287 = vmatprep.subr.bf16.mxu0 %v8448_v25  ;;  %v833_v12 = vld [vmem:[%s9665_s7 + $0xfb0] sm:$0xff]  ;;  %v8487_v25 = vcombine.low %v701_v7, %v705_v63 }
 0x2dd   : > { %7327 = vmatpush1.bf16.msra.mxu1 %v8567_v24  ;;  %v8616_v15 = vcombine.high %v829_v10, %v833_v12  ;;  %v709_v43 = vld [vmem:[%s9665_s7 + $0xbd0] sm:$0xff] }
 0x2de   : > { %7328 = vmatprep.subr.bf16.mxu1 %v8576_v54  ;;  %v713_v18 = vld [vmem:[%s9665_s7 + $0xbf0] sm:$0xff]  ;;  %v8615_v54 = vcombine.low %v829_v10, %v833_v12 }
 0x2df   : > { %7288 = vmatpush1.bf16.msra.mxu0 %v8447_v31  ;;  %v837_v22 = vld [vmem:[%s9665_s7 + $0xfd0] sm:$0xff]  ;;  %v8496_v26 = vcombine.high %v709_v43, %v713_v18 }
 0x2e0   : > { %7289 = vmatprep.subr.bf16.mxu0 %v8456_v33  ;;  %v841_v24 = vld [vmem:[%s9665_s7 + $0xff0] sm:$0xff]  ;;  %v8495_v33 = vcombine.low %v709_v43, %v713_v18 }
 0x2e1   : > { %7329 = vmatpush1.bf16.msra.mxu1 %v8575_v32  ;;  %v8624_v27 = vcombine.high %v837_v22, %v841_v24  ;;  %v845_v55 = vld [vmem:[%s9665_s7 + $0x1010] sm:$0xff] }
 0x2e2   : > { %7330 = vmatprep.subr.bf16.mxu1 %v8584_v34  ;;  %v849_v29 = vld [vmem:[%s9665_s7 + $0x1030] sm:$0xff]  ;;  %v8623_v34 = vcombine.low %v837_v22, %v841_v24 }
 0x2e3   : > { %7290 = vmatpush1.bf16.msra.mxu0 %v8455_v42  ;;  %v973_v31 = vld [vmem:[%s9665_s7 + $0x1410] sm:$0xff]  ;;  %v8632_v35 = vcombine.high %v845_v55, %v849_v29 }
 0x2e4   : > { %7291 = vmatprep.subr.bf16.mxu0 %v8464_v45  ;;  %v977_v32 = vld [vmem:[%s9665_s7 + $0x1430] sm:$0xff]  ;;  %v8631_v45 = vcombine.low %v845_v55, %v849_v29 }
 0x2e5   : > { %7331 = vmatpush1.bf16.msra.mxu1 %v8583_v44  ;;  %v8760_v36 = vcombine.high %v973_v31, %v977_v32  ;;  %v853_v38 = vld [vmem:[%s9665_s7 + $0x1050] sm:$0xff] }
 0x2e6   : > { %7332 = vmatprep.subr.bf16.mxu1 %v8592_v20  ;;  %v857_v39 = vld [vmem:[%s9665_s7 + $0x1070] sm:$0xff]  ;;  %v8759_v20 = vcombine.low %v973_v31, %v977_v32 }
 0x2e7   : > { %7292 = vmatpush1.bf16.msra.mxu0 %v8463_v53  ;;  %v981_v42 = vld [vmem:[%s9665_s7 + $0x1450] sm:$0xff]  ;;  %v8640_v46 = vcombine.high %v853_v38, %v857_v39 }
 0x2e8   : > { %7293 = vmatprep.subr.bf16.mxu0 %v8472_v61  ;;  %v985_v44 = vld [vmem:[%s9665_s7 + $0x1470] sm:$0xff]  ;;  %v8639_v61 = vcombine.low %v853_v38, %v857_v39 }
 0x2e9   : > { %7333 = vmatpush1.bf16.msra.mxu1 %v8591_v57  ;;  %v8768_v47 = vcombine.high %v981_v42, %v985_v44  ;;  %v861_v49 = vld [vmem:[%s9665_s7 + $0x1090] sm:$0xff] }
 0x2ea   : > { %7334 = vmatprep.subr.bf16.mxu1 %v8600_v8  ;;  %v865_v51 = vld [vmem:[%s9665_s7 + $0x10b0] sm:$0xff]  ;;  %v8767_v8 = vcombine.low %v981_v42, %v985_v44 }
 0x2eb   : > { %7294 = vmatpush1.bf16.msra.mxu0 %v8471_v62  ;;  %v989_v53 = vld [vmem:[%s9665_s7 + $0x1490] sm:$0xff]  ;;  %v8648_v58 = vcombine.high %v861_v49, %v865_v51 }
 0x2ec   : > { %7295 = vmatprep.subr.bf16.mxu0 %v8480_v4  ;;  %v993_v57 = vld [vmem:[%s9665_s7 + $0x14b0] sm:$0xff]  ;;  %v8647_v4 = vcombine.low %v861_v49, %v865_v51 }
 0x2ed   : > { %7335 = vmatpush1.bf16.msra.mxu1 %v8599_v3  ;;  %v8776_v11 = vcombine.high %v989_v53, %v993_v57  ;;  %v869_v56 = vld [vmem:[%s9665_s7 + $0x10d0] sm:$0xff] }
 0x2ee   : > { %7336 = vmatprep.subr.bf16.mxu1 %v8608_v6  ;;  %v873_v2 = vld [vmem:[%s9665_s7 + $0x10f0] sm:$0xff]  ;;  %v8775_v6 = vcombine.low %v989_v53, %v993_v57 }
 0x2ef   : > { %7296 = vmatpush1.bf16.msra.mxu0 %v8479_v13  ;;  %v997_v62 = vld [vmem:[%s9665_s7 + $0x14d0] sm:$0xff]  ;;  %v8656_v7 = vcombine.high %v869_v56, %v873_v2 }
 0x2f0   : > { %7297 = vmatprep.subr.bf16.mxu0 %v8488_v14  ;;  %v1001_v3 = vld [vmem:[%s9665_s7 + $0x14f0] sm:$0xff]  ;;  %v8655_v14 = vcombine.low %v869_v56, %v873_v2 }
 0x2f1   : > { %7337 = vmatpush1.bf16.msra.mxu1 %v8607_v40  ;;  %v8784_v63 = vcombine.high %v997_v62, %v1001_v3  ;;  %v877_v10 = vld [vmem:[%s9665_s7 + $0x1110] sm:$0xff] }
 0x2f2   : > { %7338 = vmatprep.subr.bf16.mxu1 %v8616_v15  ;;  %v881_v12 = vld [vmem:[%s9665_s7 + $0x1130] sm:$0xff]  ;;  %v8783_v15 = vcombine.low %v997_v62, %v1001_v3 }
 0x2f3   : > { %7298 = vmatpush1.bf16.msra.mxu0 %v8487_v25  ;;  %v1005_v13 = vld [vmem:[%s9665_s7 + $0x1510] sm:$0xff]  ;;  %v8664_v43 = vcombine.high %v877_v10, %v881_v12 }
 0x2f4   : > { %7299 = vmatprep.subr.bf16.mxu0 %v8496_v26  ;;  %v1009_v40 = vld [vmem:[%s9665_s7 + $0x1530] sm:$0xff]  ;;  %v8663_v26 = vcombine.low %v877_v10, %v881_v12 }
 0x2f5   : > { %7339 = vmatpush1.bf16.msra.mxu1 %v8615_v54  ;;  %v8792_v18 = vcombine.high %v1005_v13, %v1009_v40  ;;  %v885_v22 = vld [vmem:[%s9665_s7 + $0x1150] sm:$0xff] }
 0x2f6   : > { %7340 = vmatprep.subr.bf16.mxu1 %v8624_v27  ;;  %v889_v24 = vld [vmem:[%s9665_s7 + $0x1170] sm:$0xff]  ;;  %v8791_v27 = vcombine.low %v1005_v13, %v1009_v40 }
 0x2f7   : > { %7300 = vmatpush1.bf16.msra.mxu0 %v8495_v33  ;;  %v1013_v25 = vld [vmem:[%s9665_s7 + $0x1550] sm:$0xff]  ;;  %v8672_v55 = vcombine.high %v885_v22, %v889_v24 }
 0x2f8   : > { %7351 = vmatprep.subr.bf16.mxu0 %v8632_v35  ;;  %v1017_v54 = vld [vmem:[%s9665_s7 + $0x1570] sm:$0xff]  ;;  %v8671_v35 = vcombine.low %v885_v22, %v889_v24 }
 0x2f9   : > { %7341 = vmatpush1.bf16.msra.mxu1 %v8623_v34  ;;  %v8800_v29 = vcombine.high %v1013_v25, %v1017_v54  ;;  %v893_v31 = vld [vmem:[%s9665_s7 + $0x1190] sm:$0xff] }
 0x2fa   : > { %7392 = vmatprep.subr.bf16.mxu1 %v8760_v36  ;;  %7302 = vmatmul.mubr.bf16.vlgmr.msra.gmra.mrb[36].mxu0 %v9878_v37  ;;  %v897_v32 = vld [vmem:[%s9665_s7 + $0x11b0] sm:$0xff]  ;;  %v8799_v36 = vcombine.low %v1013_v25, %v1017_v54 }
 0x2fb   : > { %7352 = vmatpush1.bf16.msra.mxu0 %v8631_v45  ;;  %7383 = vmatprep.mubr.bf16.mxu0 %v9896_v48  ;;  %v1021_v33 = vld [vmem:[%s9665_s7 + $0x1590] sm:$0xff]  ;;  %v8680_v38 = vcombine.high %v893_v31, %v897_v32 }
 0x2fc   : > { %7343 = vmatmul.mubr.bf16.vlgmr.msra.gmra.mrb[36].mxu1 %v9887_v41  ;;  %7353 = vmatprep.subr.bf16.mxu0 %v8640_v46  ;;  %v1025_v34 = vld [vmem:[%s9665_s7 + $0x15b0] sm:$0xff] }
 0x2fd   : > { %7393 = vmatpush1.bf16.msra.mxu1 %v8759_v20  ;;  %7424 = vmatprep.mubr.bf16.mxu1 %v9903_v50  ;;  %v8808_v42 = vcombine.high %v1021_v33, %v1025_v34  ;;  %v901_v44 = vld [vmem:[%s9665_s7 + $0x11d0] sm:$0xff] }
 0x2fe   : > { %7394 = vmatprep.subr.bf16.mxu1 %v8768_v47  ;;  %v905_v45 = vld [vmem:[%s9665_s7 + $0x11f0] sm:$0xff] }
 0x2ff   : > { %7354 = vmatpush1.bf16.msra.mxu0 %v8639_v61  ;;  %v1029_v49 = vld [vmem:[%s9665_s7 + $0x15d0] sm:$0xff]  ;;  %v8688_v2 = vcombine.high %v901_v44, %v905_v45  ;;  %v8687_v10 = vcombine.low %v901_v44, %v905_v45 }
 0x300   : > { %7355 = vmatprep.subr.bf16.mxu0 %v8648_v58  ;;  %v1033_v51 = vld [vmem:[%s9665_s7 + $0x15f0] sm:$0xff] }
 0x301   : > { %7395 = vmatpush1.bf16.msra.mxu1 %v8767_v8  ;;  %v8679_v8 = vcombine.low %v893_v31, %v897_v32  ;;  %v8816_v3 = vcombine.high %v1029_v49, %v1033_v51  ;;  %v8815_v12 = vcombine.low %v1029_v49, %v1033_v51  ;;  %v1069_v49 = vld [vmem:[%s9665_s7 + $0x1710] sm:$0xff] }
 0x302   : > { %7396 = vmatprep.subr.bf16.mxu1 %v8776_v11  ;;  %v1073_v51 = vld [vmem:[%s9665_s7 + $0x1730] sm:$0xff] }
 0x303   : > { %7356 = vmatpush1.bf16.msra.mxu0 %v8647_v4  ;;  %v909_v4 = vld [vmem:[%s9665_s7 + $0x1210] sm:$0xff] }
 0x304   : > { %7357 = vmatprep.subr.bf16.mxu0 %v8656_v7  ;;  %v1037_v7 = vld [vmem:[%s9665_s7 + $0x1610] sm:$0xff] }
 0x305   : > { %7397 = vmatpush1.bf16.msra.mxu1 %v8775_v6  ;;  %v913_v6 = vld [vmem:[%s9665_s7 + $0x1230] sm:$0xff] }
 0x306   : > { %7398 = vmatprep.subr.bf16.mxu1 %v8784_v63  ;;  %v1041_v63 = vld [vmem:[%s9665_s7 + $0x1630] sm:$0xff]  ;;  %v8696_v13 = vcombine.high %v909_v4, %v913_v6  ;;  %v8695_v22 = vcombine.low %v909_v4, %v913_v6 }
 0x307   : > { %7358 = vmatpush1.bf16.msra.mxu0 %v8655_v14  ;;  %v8824_v40 = vcombine.high %v1037_v7, %v1041_v63  ;;  %v917_v14 = vld [vmem:[%s9665_s7 + $0x1250] sm:$0xff]  ;;  %v8823_v24 = vcombine.low %v1037_v7, %v1041_v63 }
 0x308   : > { %7359 = vmatprep.subr.bf16.mxu0 %v8664_v43  ;;  %v1045_v43 = vld [vmem:[%s9665_s7 + $0x1650] sm:$0xff] }
 0x309   : > { %7399 = vmatpush1.bf16.msra.mxu1 %v8783_v15  ;;  %v921_v15 = vld [vmem:[%s9665_s7 + $0x1270] sm:$0xff] }
 0x30a   : > { %7400 = vmatprep.subr.bf16.mxu1 %v8792_v18  ;;  %v1049_v18 = vld [vmem:[%s9665_s7 + $0x1670] sm:$0xff]  ;;  %v8704_v25 = vcombine.high %v917_v14, %v921_v15  ;;  %v8703_v31 = vcombine.low %v917_v14, %v921_v15 }
 0x30b   : > { %7360 = vmatpush1.bf16.msra.mxu0 %v8663_v26  ;;  %v8832_v54 = vcombine.high %v1045_v43, %v1049_v18  ;;  %v925_v26 = vld [vmem:[%s9665_s7 + $0x1290] sm:$0xff]  ;;  %v8831_v32 = vcombine.low %v1045_v43, %v1049_v18 }
 0x30c   : > { %7361 = vmatprep.subr.bf16.mxu0 %v8672_v55  ;;  %v1053_v55 = vld [vmem:[%s9665_s7 + $0x1690] sm:$0xff] }
 0x30d   : > { %7401 = vmatpush1.bf16.msra.mxu1 %v8791_v27  ;;  %v7057_v39 = vpop.f32.mrb[24].mxu0  ;;  %v929_v27 = vld [vmem:[%s9665_s7 + $0x12b0] sm:$0xff] }
 0x30e   : > { %7402 = vmatprep.subr.bf16.mxu1 %v8800_v29  ;;  %v7058_v20 = vadd.f32 %v7057_v39, %v10462_v1  ;;  %v7059_v47 = vpop.f32.mrb[25].mxu0  ;;  %v8807_v1 = vcombine.low %v1021_v33, %v1025_v34  ;;  %v1057_v29 = vld [vmem:[%s9665_s7 + $0x16b0] sm:$0xff]  ;;  %v8712_v33 = vcombine.high %v925_v26, %v929_v27 }
 0x30f   : > { %v7098_v46 = vpop.f32.mrb[24].mxu1  ;;  %v7060_v53 = vadd.f32 %v7059_v47, %v10464_v0  ;;  %v7061_v61 = vpop.f32.mrb[26].mxu0  ;;  %7362 = vmatpush1.bf16.msra.mxu0 %v8671_v35  ;;  %v8840_v34 = vcombine.high %v1053_v55, %v1057_v29  ;;  %v933_v35 = vld [vmem:[%s9665_s7 + $0x12d0] sm:$0xff]  ;;  %v8839_v44 = vcombine.low %v1053_v55, %v1057_v29 }
 0x310   : > { %v7100_v57 = vpop.f32.mrb[25].mxu1  ;;  %v10536_v58 = vadd.f32 %v7098_v46, %v7058_v20  ;;  %v7062_v56 = vpop.f32.mrb[27].mxu0  ;;  %7363 = vmatprep.subr.bf16.mxu0 %v8680_v38  ;;  %v1061_v38 = vld [vmem:[%s9665_s7 + $0x16d0] sm:$0xff] }
 0x311   : > { %v7102_v11 = vpop.f32.mrb[26].mxu1  ;;  %7403 = vmatpush1.bf16.msra.mxu1 %v8799_v36  ;;  %v10538_v62 = vadd.f32 %v7100_v57, %v7060_v53  ;;  %v937_v36 = vld [vmem:[%s9665_s7 + $0x12f0] sm:$0xff] }
 0x312   : > { %v7103_v0 = vpop.f32.mrb[27].mxu1  ;;  %7404 = vmatprep.subr.bf16.mxu1 %v8808_v42  ;;  %v1065_v39 = vld [vmem:[%s9665_s7 + $0x16f0] sm:$0xff]  ;;  %v8711_v42 = vcombine.low %v925_v26, %v929_v27  ;;  %v8720_v45 = vcombine.high %v933_v35, %v937_v36  ;;  %v8719_v53 = vcombine.low %v933_v35, %v937_v36 }
 0x313   : > { %7364 = vmatpush1.bf16.msra.mxu0 %v8679_v8  ;;  %v8848_v20 = vcombine.high %v1061_v38, %v1065_v39  ;;  %v941_v46 = vld [vmem:[%s9665_s7 + $0x1310] sm:$0xff]  ;;  %v8847_v57 = vcombine.low %v1061_v38, %v1065_v39  ;;  %v8856_v8 = vcombine.high %v1069_v49, %v1073_v51 }
 0x314   : > { %7365 = vmatprep.subr.bf16.mxu0 %v8688_v2  ;;  %v945_v47 = vld [vmem:[%s9665_s7 + $0x1330] sm:$0xff] }
 0x315   : > { %7405 = vmatpush1.bf16.msra.mxu1 %v8807_v1  ;;  %v8728_v61 = vcombine.high %v941_v46, %v945_v47  ;;  %v949_v11 = vld [vmem:[%s9665_s7 + $0x1350] sm:$0xff]  ;;  %v8727_v0 = vcombine.low %v941_v46, %v945_v47 }
 0x316   : > { %7406 = vmatprep.subr.bf16.mxu1 %v8816_v3  ;;  %v953_v56 = vld [vmem:[%s9665_s7 + $0x1370] sm:$0xff]  ;;  %v8855_v3 = vcombine.low %v1069_v49, %v1073_v51 }
 0x317   : > { %7366 = vmatpush1.bf16.msra.mxu0 %v8687_v10  ;;  %v1077_v1 = vld [vmem:[%s9665_s7 + $0x1750] sm:$0xff]  ;;  %v8736_v4 = vcombine.high %v949_v11, %v953_v56 }
 0x318   : > { %7367 = vmatprep.subr.bf16.mxu0 %v8696_v13  ;;  %v1081_v2 = vld [vmem:[%s9665_s7 + $0x1770] sm:$0xff]  ;;  %v8735_v13 = vcombine.low %v949_v11, %v953_v56 }
 0x319   : > { %7407 = vmatpush1.bf16.msra.mxu1 %v8815_v12  ;;  %v8864_v6 = vcombine.high %v1077_v1, %v1081_v2  ;;  %v957_v7 = vld [vmem:[%s9665_s7 + $0x1390] sm:$0xff] }
 0x31a   : > { %7408 = vmatprep.subr.bf16.mxu1 %v8824_v40  ;;  %v961_v63 = vld [vmem:[%s9665_s7 + $0x13b0] sm:$0xff]  ;;  %v8863_v40 = vcombine.low %v1077_v1, %v1081_v2 }
 0x31b   : > { %7368 = vmatpush1.bf16.msra.mxu0 %v8695_v22  ;;  %v1085_v10 = vld [vmem:[%s9665_s7 + $0x1790] sm:$0xff]  ;;  %v8744_v14 = vcombine.high %v957_v7, %v961_v63 }
 0x31c   : > { %7369 = vmatprep.subr.bf16.mxu0 %v8704_v25  ;;  %v1089_v12 = vld [vmem:[%s9665_s7 + $0x17b0] sm:$0xff]  ;;  %v8743_v25 = vcombine.low %v957_v7, %v961_v63 }
 0x31d   : > { %7409 = vmatpush1.bf16.msra.mxu1 %v8823_v24  ;;  %v8872_v15 = vcombine.high %v1085_v10, %v1089_v12  ;;  %v965_v43 = vld [vmem:[%s9665_s7 + $0x13d0] sm:$0xff] }
 0x31e   : > { %7410 = vmatprep.subr.bf16.mxu1 %v8832_v54  ;;  %v969_v18 = vld [vmem:[%s9665_s7 + $0x13f0] sm:$0xff]  ;;  %v8871_v54 = vcombine.low %v1085_v10, %v1089_v12 }
 0x31f   : > { %7370 = vmatpush1.bf16.msra.mxu0 %v8703_v31  ;;  %v1093_v22 = vld [vmem:[%s9665_s7 + $0x17d0] sm:$0xff]  ;;  %v8752_v26 = vcombine.high %v965_v43, %v969_v18 }
 0x320   : > { %7371 = vmatprep.subr.bf16.mxu0 %v8712_v33  ;;  %v1097_v24 = vld [vmem:[%s9665_s7 + $0x17f0] sm:$0xff]  ;;  %v8751_v33 = vcombine.low %v965_v43, %v969_v18 }
 0x321   : > { %7411 = vmatpush1.bf16.msra.mxu1 %v8831_v32  ;;  %v8880_v27 = vcombine.high %v1093_v22, %v1097_v24  ;;  %v1101_v55 = vld [vmem:[%s9665_s7 + $0x1810] sm:$0xff] }
 0x322   : > { %7412 = vmatprep.subr.bf16.mxu1 %v8840_v34  ;;  %v1105_v29 = vld [vmem:[%s9665_s7 + $0x1830] sm:$0xff]  ;;  %v8879_v34 = vcombine.low %v1093_v22, %v1097_v24 }
 0x323   : > { %7372 = vmatpush1.bf16.msra.mxu0 %v8711_v42  ;;  %v1229_v31 = vld [vmem:[%s9665_s7 + $0x1c10] sm:$0xff]  ;;  %v8888_v35 = vcombine.high %v1101_v55, %v1105_v29 }
 0x324   : > { %7373 = vmatprep.subr.bf16.mxu0 %v8720_v45  ;;  %v1233_v32 = vld [vmem:[%s9665_s7 + $0x1c30] sm:$0xff]  ;;  %v8887_v45 = vcombine.low %v1101_v55, %v1105_v29 }
 0x325   : > { %7413 = vmatpush1.bf16.msra.mxu1 %v8839_v44  ;;  %v9016_v36 = vcombine.high %v1229_v31, %v1233_v32  ;;  %v1109_v38 = vld [vmem:[%s9665_s7 + $0x1850] sm:$0xff] }
 0x326   : > { %7414 = vmatprep.subr.bf16.mxu1 %v8848_v20  ;;  %v1113_v39 = vld [vmem:[%s9665_s7 + $0x1870] sm:$0xff]  ;;  %v9015_v20 = vcombine.low %v1229_v31, %v1233_v32 }
 0x327   : > { %7374 = vmatpush1.bf16.msra.mxu0 %v8719_v53  ;;  %v1237_v42 = vld [vmem:[%s9665_s7 + $0x1c50] sm:$0xff]  ;;  %v8896_v46 = vcombine.high %v1109_v38, %v1113_v39 }
 0x328   : > { %7375 = vmatprep.subr.bf16.mxu0 %v8728_v61  ;;  %v1241_v44 = vld [vmem:[%s9665_s7 + $0x1c70] sm:$0xff]  ;;  %v8895_v61 = vcombine.low %v1109_v38, %v1113_v39 }
 0x329   : > { %7415 = vmatpush1.bf16.msra.mxu1 %v8847_v57  ;;  %v9024_v47 = vcombine.high %v1237_v42, %v1241_v44  ;;  %v1117_v49 = vld [vmem:[%s9665_s7 + $0x1890] sm:$0xff] }
 0x32a   : > { %7416 = vmatprep.subr.bf16.mxu1 %v8856_v8  ;;  %v1121_v51 = vld [vmem:[%s9665_s7 + $0x18b0] sm:$0xff]  ;;  %v9023_v8 = vcombine.low %v1237_v42, %v1241_v44 }
 0x32b   : > { %7376 = vmatpush1.bf16.msra.mxu0 %v8727_v0  ;;  %v1245_v53 = vld [vmem:[%s9665_s7 + $0x1c90] sm:$0xff]  ;;  %v8904_v11 = vcombine.high %v1117_v49, %v1121_v51 }
 0x32c   : > { %7377 = vmatprep.subr.bf16.mxu0 %v8736_v4  ;;  %v1249_v57 = vld [vmem:[%s9665_s7 + $0x1cb0] sm:$0xff]  ;;  %v8903_v4 = vcombine.low %v1117_v49, %v1121_v51 }
 0x32d   : > { %7417 = vmatpush1.bf16.msra.mxu1 %v8855_v3  ;;  %v9032_v56 = vcombine.high %v1245_v53, %v1249_v57  ;;  %v1125_v1 = vld [vmem:[%s9665_s7 + $0x18d0] sm:$0xff] }
 0x32e   : > { %7418 = vmatprep.subr.bf16.mxu1 %v8864_v6  ;;  %v1129_v2 = vld [vmem:[%s9665_s7 + $0x18f0] sm:$0xff]  ;;  %v9031_v6 = vcombine.low %v1245_v53, %v1249_v57 }
 0x32f   : > { %7378 = vmatpush1.bf16.msra.mxu0 %v8735_v13  ;;  %v1253_v0 = vld [vmem:[%s9665_s7 + $0x1cd0] sm:$0xff]  ;;  %v8912_v7 = vcombine.high %v1125_v1, %v1129_v2 }
 0x330   : > { %7379 = vmatprep.subr.bf16.mxu0 %v8744_v14  ;;  %v1257_v3 = vld [vmem:[%s9665_s7 + $0x1cf0] sm:$0xff]  ;;  %v8911_v14 = vcombine.low %v1125_v1, %v1129_v2  ;;  %v318_v1 = vld [vmem:[%s9689_s4 + $0x18] sm:$0xff] }
 0x331   : > { %7419 = vmatpush1.bf16.msra.mxu1 %v8863_v40  ;;  %v9040_v63 = vcombine.high %v1253_v0, %v1257_v3  ;;  %v1133_v10 = vld [vmem:[%s9665_s7 + $0x1910] sm:$0xff] }
 0x332   : > { %7420 = vmatprep.subr.bf16.mxu1 %v8872_v15  ;;  %v1137_v12 = vld [vmem:[%s9665_s7 + $0x1930] sm:$0xff]  ;;  %v9039_v15 = vcombine.low %v1253_v0, %v1257_v3 }
 0x333   : > { %7380 = vmatpush1.bf16.msra.mxu0 %v8743_v25  ;;  %v1261_v13 = vld [vmem:[%s9665_s7 + $0x1d10] sm:$0xff]  ;;  %v8920_v43 = vcombine.high %v1133_v10, %v1137_v12 }
 0x334   : > { %7381 = vmatprep.subr.bf16.mxu0 %v8752_v26  ;;  %v1265_v40 = vld [vmem:[%s9665_s7 + $0x1d30] sm:$0xff]  ;;  %v8919_v26 = vcombine.low %v1133_v10, %v1137_v12 }
 0x335   : > { %7421 = vmatpush1.bf16.msra.mxu1 %v8871_v54  ;;  %v9048_v18 = vcombine.high %v1261_v13, %v1265_v40  ;;  %v1141_v22 = vld [vmem:[%s9665_s7 + $0x1950] sm:$0xff] }
 0x336   : > { %7422 = vmatprep.subr.bf16.mxu1 %v8880_v27  ;;  %v1145_v24 = vld [vmem:[%s9665_s7 + $0x1970] sm:$0xff]  ;;  %v9047_v27 = vcombine.low %v1261_v13, %v1265_v40 }
 0x337   : > { %7382 = vmatpush1.bf16.msra.mxu0 %v8751_v33  ;;  %v1269_v25 = vld [vmem:[%s9665_s7 + $0x1d50] sm:$0xff]  ;;  %v8928_v55 = vcombine.high %v1141_v22, %v1145_v24 }
 0x338   : > { %7433 = vmatprep.subr.bf16.mxu0 %v8888_v35  ;;  %v1273_v54 = vld [vmem:[%s9665_s7 + $0x1d70] sm:$0xff]  ;;  %v8927_v35 = vcombine.low %v1141_v22, %v1145_v24 }
 0x339   : > { %7423 = vmatpush1.bf16.msra.mxu1 %v8879_v34  ;;  %v9056_v29 = vcombine.high %v1269_v25, %v1273_v54  ;;  %v1149_v31 = vld [vmem:[%s9665_s7 + $0x1990] sm:$0xff] }
 0x33a   : > { %7474 = vmatprep.subr.bf16.mxu1 %v9016_v36  ;;  %7384 = vmatmul.mubr.bf16.vlgmr.msra.gmra.mrb[40].mxu0 %v9968_v5  ;;  %v1153_v32 = vld [vmem:[%s9665_s7 + $0x19b0] sm:$0xff]  ;;  %v9055_v36 = vcombine.low %v1269_v25, %v1273_v54 }
 0x33b   : > { %7434 = vmatpush1.bf16.msra.mxu0 %v8887_v45  ;;  %7465 = vmatprep.mubr.bf16.mxu0 %v9986_v16  ;;  %v1277_v33 = vld [vmem:[%s9665_s7 + $0x1d90] sm:$0xff]  ;;  %v8936_v38 = vcombine.high %v1149_v31, %v1153_v32 }
 0x33c   : > { %7425 = vmatmul.mubr.bf16.vlgmr.msra.gmra.mrb[40].mxu1 %v9977_v9  ;;  %7435 = vmatprep.subr.bf16.mxu0 %v8896_v46  ;;  %v1281_v34 = vld [vmem:[%s9665_s7 + $0x1db0] sm:$0xff] }
 0x33d   : > { %7475 = vmatpush1.bf16.msra.mxu1 %v9015_v20  ;;  %7506 = vmatprep.mubr.bf16.mxu1 %v9993_v19  ;;  %v9064_v42 = vcombine.high %v1277_v33, %v1281_v34  ;;  %v1157_v44 = vld [vmem:[%s9665_s7 + $0x19d0] sm:$0xff]  ;;  %v9063_v0 = vcombine.low %v1277_v33, %v1281_v34 }
 0x33e   : > { %7476 = vmatprep.subr.bf16.mxu1 %v9024_v47  ;;  %v1161_v45 = vld [vmem:[%s9665_s7 + $0x19f0] sm:$0xff] }
 0x33f   : > { %7436 = vmatpush1.bf16.msra.mxu0 %v8895_v61  ;;  %v1285_v49 = vld [vmem:[%s9665_s7 + $0x1dd0] sm:$0xff]  ;;  %v8944_v3 = vcombine.high %v1157_v44, %v1161_v45 }
 0x340   : > { %7437 = vmatprep.subr.bf16.mxu0 %v8904_v11  ;;  %v1289_v51 = vld [vmem:[%s9665_s7 + $0x1df0] sm:$0xff]  ;;  %v8935_v11 = vcombine.low %v1149_v31, %v1153_v32 }
 0x341   : > { %7477 = vmatpush1.bf16.msra.mxu1 %v9023_v8  ;;  %v317_v53 = vld [vmem:[%s9689_s4 + $0x10] sm:$0xff] }
 0x342   : > { %7478 = vmatprep.subr.bf16.mxu1 %v9032_v56  ;;  %v1293_v12 = vld [vmem:[%s9665_s7 + $0x1e10] sm:$0xff] }
 0x343   : > { %7438 = vmatpush1.bf16.msra.mxu0 %v8903_v4  ;;  %v1297_v13 = vld [vmem:[%s9665_s7 + $0x1e30] sm:$0xff] }
 0x344   : > { %7439 = vmatprep.subr.bf16.mxu0 %v8912_v7  ;;  %v1165_v7 = vld [vmem:[%s9665_s7 + $0x1a10] sm:$0xff] }
 0x345   : > { %7479 = vmatpush1.bf16.msra.mxu1 %v9031_v6  ;;  %v1173_v22 = vld [vmem:[%s9665_s7 + $0x1a50] sm:$0xff] }
 0x346   : > { %7480 = vmatprep.subr.bf16.mxu1 %v9040_v63  ;;  %v1169_v63 = vld [vmem:[%s9665_s7 + $0x1a30] sm:$0xff] }
 0x347   : > { %7440 = vmatpush1.bf16.msra.mxu0 %v8911_v14  ;;  %v8943_v14 = vcombine.low %v1157_v44, %v1161_v45  ;;  %v1177_v24 = vld [vmem:[%s9665_s7 + $0x1a70] sm:$0xff] }
 0x348   : > { %7441 = vmatprep.subr.bf16.mxu0 %v8920_v43  ;;  %v8952_v43 = vcombine.high %v1165_v7, %v1169_v63  ;;  %v1301_v25 = vld [vmem:[%s9665_s7 + $0x1e50] sm:$0xff] }
 0x349   : > { %7481 = vmatpush1.bf16.msra.mxu1 %v9039_v15  ;;  %v9071_v15 = vcombine.low %v1285_v49, %v1289_v51  ;;  %v1305_v54 = vld [vmem:[%s9665_s7 + $0x1e70] sm:$0xff] }
 0x34a   : > { %7482 = vmatprep.subr.bf16.mxu1 %v9048_v18  ;;  %v9080_v18 = vcombine.high %v1293_v12, %v1297_v13  ;;  %v1181_v31 = vld [vmem:[%s9665_s7 + $0x1a90] sm:$0xff] }
 0x34b   : > { %7442 = vmatpush1.bf16.msra.mxu0 %v8919_v26  ;;  %v8951_v26 = vcombine.low %v1165_v7, %v1169_v63  ;;  %v1185_v32 = vld [vmem:[%s9665_s7 + $0x1ab0] sm:$0xff] }
 0x34c   : > { %7443 = vmatprep.subr.bf16.mxu0 %v8928_v55  ;;  %v8960_v55 = vcombine.high %v1173_v22, %v1177_v24  ;;  %v1309_v33 = vld [vmem:[%s9665_s7 + $0x1e90] sm:$0xff] }
 0x34d   : > { %7483 = vmatpush1.bf16.msra.mxu1 %v9047_v27  ;;  %v7139_v39 = vpop.f32.mrb[28].mxu0  ;;  %v9079_v27 = vcombine.low %v1293_v12, %v1297_v13  ;;  %v1313_v34 = vld [vmem:[%s9665_s7 + $0x1eb0] sm:$0xff] }
 0x34e   : > { %7484 = vmatprep.subr.bf16.mxu1 %v9056_v29  ;;  %v7140_v20 = vadd.f32 %v7139_v39, %v10536_v58  ;;  %v7141_v47 = vpop.f32.mrb[29].mxu0  ;;  %v9088_v29 = vcombine.high %v1301_v25, %v1305_v54  ;;  %v9096_v39 = vcombine.high %v1309_v33, %v1313_v34  ;;  %v1193_v44 = vld [vmem:[%s9665_s7 + $0x1af0] sm:$0xff] }
 0x34f   : > { %v7180_v46 = vpop.f32.mrb[28].mxu1  ;;  %v7142_v57 = vadd.f32 %v7141_v47, %v10538_v62  ;;  %v7143_v8 = vpop.f32.mrb[30].mxu0  ;;  %7444 = vmatpush1.bf16.msra.mxu0 %v8927_v35  ;;  %v9072_v62 = vcombine.high %v1285_v49, %v1289_v51  ;;  %v8959_v35 = vcombine.low %v1173_v22, %v1177_v24  ;;  %v1317_v45 = vld [vmem:[%s9665_s7 + $0x1ed0] sm:$0xff]  ;;  %v9095_v47 = vcombine.low %v1309_v33, %v1313_v34  ;;  %v462_v33 = vld [vmem:[%s9665_s7 + $0x418] sm:$0xff] }
 0x350   : > { %v7182_v61 = vpop.f32.mrb[29].mxu1  ;;  %v7181_v56 = vadd.f32 %v7180_v46, %v7140_v20  ;;  %v7144_v58 = vpop.f32.mrb[31].mxu0  ;;  %7445 = vmatprep.subr.bf16.mxu0 %v8936_v38  ;;  %v8968_v38 = vcombine.high %v1181_v31, %v1185_v32  ;;  %v1321_v20 = vld [vmem:[%s9665_s7 + $0x1ef0] sm:$0xff]  ;;  %v8967_v46 = vcombine.low %v1181_v31, %v1185_v32  ;;  %v334_v31 = vld [vmem:[%s9665_s7 + $0x18] sm:$0xff] }
 0x351   : > { %v7184_v2 = vpop.f32.mrb[30].mxu1  ;;  %7485 = vmatpush1.bf16.msra.mxu1 %v9055_v36  ;;  %v7183_v4 = vadd.f32 %v7182_v61, %v7142_v57  ;;  %v9087_v36 = vcombine.low %v1301_v25, %v1305_v54  ;;  %v9104_v51 = vcombine.high %v1317_v45, %v1321_v20  ;;  %v1201_v57 = vld [vmem:[%s9665_s7 + $0x1b30] sm:$0xff]  ;;  %v338_v32 = vld [vmem:[%s9665_s7 + $0x38] sm:$0xff] }
 0x352   : > { %v7185_v6 = vpop.f32.mrb[31].mxu1  ;;  %7486 = vmatprep.subr.bf16.mxu1 %v9064_v42  ;;  %v7845_v10 = vadd.f32 %v7181_v56, %v317_v53  ;;  %v1189_v42 = vld [vmem:[%s9665_s7 + $0x1ad0] sm:$0xff]  ;;  %v9103_v56 = vcombine.low %v1317_v45, %v1321_v20  ;;  %v466_v34 = vld [vmem:[%s9665_s7 + $0x438] sm:$0xff] }
 0x353   : > { %v7846_v40 = vadd.f32 %v7183_v4, %v318_v1  ;;  %7446 = vmatpush1.bf16.msra.mxu0 %v8935_v11  ;;  %v8976_v49 = vcombine.high %v1189_v42, %v1193_v44  ;;  %v1197_v53 = vld [vmem:[%s9665_s7 + $0x1b10] sm:$0xff]  ;;  %v8975_v11 = vcombine.low %v1189_v42, %v1193_v44  ;;  %v342_v42 = vld [vmem:[%s9665_s7 + $0x58] sm:$0xff] }
 0x354   : > { %7853 = vst [vmem:[%s9689_s4 + $0x10] sm:$0xff] %v7845_v10  ;;  %7447 = vmatprep.subr.bf16.mxu0 %v8944_v3  ;;  %v1325_v61 = vld [vmem:[%s9665_s7 + $0x1f10] sm:$0xff]  ;;  %v8984_v1 = vcombine.high %v1197_v53, %v1201_v57  ;;  %v8983_v6 = vcombine.low %v1197_v53, %v1201_v57  ;;  %v346_v44 = vld [vmem:[%s9665_s7 + $0x78] sm:$0xff] }
 0x355   : > { %7487 = vmatpush1.bf16.msra.mxu1 %v9063_v0  ;;  %7854 = vst [vmem:[%s9689_s4 + $0x18] sm:$0xff] %v7846_v40  ;;  %v1329_v8 = vld [vmem:[%s9665_s7 + $0x1f30] sm:$0xff]  ;;  %v470_v45 = vld [vmem:[%s9665_s7 + $0x458] sm:$0xff] }
 0x356   : > { %7488 = vmatprep.subr.bf16.mxu1 %v9072_v62  ;;  %v9112_v2 = vcombine.high %v1325_v61, %v1329_v8  ;;  %v1205_v58 = vld [vmem:[%s9665_s7 + $0x1b50] sm:$0xff]  ;;  %v9111_v62 = vcombine.low %v1325_v61, %v1329_v8  ;;  %v474_v20 = vld [vmem:[%s9665_s7 + $0x478] sm:$0xff] }
 0x357   : > { %7448 = vmatpush1.bf16.msra.mxu0 %v8943_v14  ;;  %v1209_v0 = vld [vmem:[%s9665_s7 + $0x1b70] sm:$0xff]  ;;  %v350_v53 = vld [vmem:[%s9665_s7 + $0x98] sm:$0xff] }
 0x358   : > { %7449 = vmatprep.subr.bf16.mxu0 %v8952_v43  ;;  %v1333_v3 = vld [vmem:[%s9665_s7 + $0x1f50] sm:$0xff]  ;;  %v8992_v7 = vcombine.high %v1205_v58, %v1209_v0  ;;  %v8991_v14 = vcombine.low %v1205_v58, %v1209_v0  ;;  %v354_v57 = vld [vmem:[%s9665_s7 + $0xb8] sm:$0xff] }
 0x359   : > { %7489 = vmatpush1.bf16.msra.mxu1 %v9071_v15  ;;  %v1337_v4 = vld [vmem:[%s9665_s7 + $0x1f70] sm:$0xff]  ;;  %v478_v61 = vld [vmem:[%s9665_s7 + $0x498] sm:$0xff] }
 0x35a   : > { %7490 = vmatprep.subr.bf16.mxu1 %v9080_v18  ;;  %v9120_v63 = vcombine.high %v1333_v3, %v1337_v4  ;;  %v1213_v10 = vld [vmem:[%s9665_s7 + $0x1b90] sm:$0xff]  ;;  %v9119_v15 = vcombine.low %v1333_v3, %v1337_v4  ;;  %v482_v8 = vld [vmem:[%s9665_s7 + $0x4b8] sm:$0xff] }
 0x35b   : > { %7450 = vmatpush1.bf16.msra.mxu0 %v8951_v26  ;;  %v1217_v12 = vld [vmem:[%s9665_s7 + $0x1bb0] sm:$0xff]  ;;  %v358_v58 = vld [vmem:[%s9665_s7 + $0xd8] sm:$0xff] }
 0x35c   : > { %7451 = vmatprep.subr.bf16.mxu0 %v8960_v55  ;;  %v1341_v13 = vld [vmem:[%s9665_s7 + $0x1f90] sm:$0xff]  ;;  %v9000_v43 = vcombine.high %v1213_v10, %v1217_v12  ;;  %v8999_v26 = vcombine.low %v1213_v10, %v1217_v12  ;;  %v362_v0 = vld [vmem:[%s9665_s7 + $0xf8] sm:$0xff] }
 0x35d   : > { %7491 = vmatpush1.bf16.msra.mxu1 %v9079_v27  ;;  %v1345_v40 = vld [vmem:[%s9665_s7 + $0x1fb0] sm:$0xff]  ;;  %v486_v3 = vld [vmem:[%s9665_s7 + $0x4d8] sm:$0xff] }
 0x35e   : > { %7492 = vmatprep.subr.bf16.mxu1 %v9088_v29  ;;  %v9128_v18 = vcombine.high %v1341_v13, %v1345_v40  ;;  %v1221_v22 = vld [vmem:[%s9665_s7 + $0x1bd0] sm:$0xff]  ;;  %v9127_v27 = vcombine.low %v1341_v13, %v1345_v40  ;;  %v490_v4 = vld [vmem:[%s9665_s7 + $0x4f8] sm:$0xff]  ;;  %v8145_v40 = vcombine.low %v358_v58, %v362_v0 }
 0x35f   : > { %7452 = vmatpush1.bf16.msra.mxu0 %v8959_v35  ;;  %v1225_v24 = vld [vmem:[%s9665_s7 + $0x1bf0] sm:$0xff]  ;;  %v366_v10 = vld [vmem:[%s9665_s7 + $0x118] sm:$0xff] }
 0x360   : > { %7453 = vmatprep.subr.bf16.mxu0 %v8968_v38  ;;  %v1349_v25 = vld [vmem:[%s9665_s7 + $0x1fd0] sm:$0xff]  ;;  %v9008_v55 = vcombine.high %v1221_v22, %v1225_v24  ;;  %v9007_v35 = vcombine.low %v1221_v22, %v1225_v24  ;;  %v8122_v38 = vcombine.high %v334_v31, %v338_v32  ;;  %v370_v12 = vld [vmem:[%s9665_s7 + $0x138] sm:$0xff] }
 0x361   : > { %7493 = vmatpush1.bf16.msra.mxu1 %v9087_v36  ;;  %v1353_v54 = vld [vmem:[%s9665_s7 + $0x1ff0] sm:$0xff]  ;;  %v494_v13 = vld [vmem:[%s9665_s7 + $0x518] sm:$0xff] }
 0x362   : > { %7494 = vmatprep.subr.bf16.mxu1 %v9096_v39  ;;  %v9136_v29 = vcombine.high %v1349_v25, %v1353_v54  ;;  %v9135_v36 = vcombine.low %v1349_v25, %v1353_v54  ;;  %v8250_v39 = vcombine.high %v462_v33, %v466_v34  ;;  %v502_v22 = vld [vmem:[%s9665_s7 + $0x558] sm:$0xff]  ;;  %v8153_v25 = vcombine.low %v366_v10, %v370_v12 }
 0x363   : > { %7454 = vmatpush1.bf16.msra.mxu0 %v8967_v46  ;;  %v8121_v46 = vcombine.low %v334_v31, %v338_v32  ;;  %v506_v24 = vld [vmem:[%s9665_s7 + $0x578] sm:$0xff] }
 0x364   : > { %7455 = vmatprep.subr.bf16.mxu0 %v8976_v49  ;;  %v8130_v49 = vcombine.high %v342_v42, %v346_v44  ;;  %v510_v31 = vld [vmem:[%s9665_s7 + $0x598] sm:$0xff] }
 0x365   : > { %7495 = vmatpush1.bf16.msra.mxu1 %v9095_v47  ;;  %v8249_v47 = vcombine.low %v462_v33, %v466_v34  ;;  %v514_v32 = vld [vmem:[%s9665_s7 + $0x5b8] sm:$0xff]  ;;  %v8289_v34 = vcombine.low %v502_v22, %v506_v24 }
 0x366   : > { %7496 = vmatprep.subr.bf16.mxu1 %v9104_v51  ;;  %v8258_v51 = vcombine.high %v470_v45, %v474_v20 }
 0x367   : > { %7456 = vmatpush1.bf16.msra.mxu0 %v8975_v11  ;;  %v8129_v11 = vcombine.low %v342_v42, %v346_v44  ;;  %v394_v42 = vld [vmem:[%s9665_s7 + $0x1f8] sm:$0xff] }
 0x368   : > { %7457 = vmatprep.subr.bf16.mxu0 %v8984_v1  ;;  %v8138_v1 = vcombine.high %v350_v53, %v354_v57 }
 0x369   : > { %7497 = vmatpush1.bf16.msra.mxu1 %v9103_v56  ;;  %v8257_v56 = vcombine.low %v470_v45, %v474_v20  ;;  %v518_v20 = vld [vmem:[%s9665_s7 + $0x5d8] sm:$0xff] }
 0x36a   : > { %7498 = vmatprep.subr.bf16.mxu1 %v9112_v2  ;;  %v8266_v2 = vcombine.high %v478_v61, %v482_v8 }
 0x36b   : > { %7458 = vmatpush1.bf16.msra.mxu0 %v8983_v6  ;;  %v8137_v6 = vcombine.low %v350_v53, %v354_v57 }
 0x36c   : > { %7459 = vmatprep.subr.bf16.mxu0 %v8992_v7  ;;  %v8146_v7 = vcombine.high %v358_v58, %v362_v0  ;;  %v398_v58 = vld [vmem:[%s9665_s7 + $0x218] sm:$0xff] }
 0x36d   : > { %7499 = vmatpush1.bf16.msra.mxu1 %v9111_v62  ;;  %v8265_v62 = vcombine.low %v478_v61, %v482_v8  ;;  %v402_v0 = vld [vmem:[%s9665_s7 + $0x238] sm:$0xff] }
 0x36e   : > { %7500 = vmatprep.subr.bf16.mxu1 %v9120_v63  ;;  %v8274_v63 = vcombine.high %v486_v3, %v490_v4 }
 0x36f   : > { %7460 = vmatpush1.bf16.msra.mxu0 %v8991_v14  ;;  %v8154_v14 = vcombine.high %v366_v10, %v370_v12  ;;  %v406_v10 = vld [vmem:[%s9665_s7 + $0x258] sm:$0xff] }
 0x370   : > { %7461 = vmatprep.subr.bf16.mxu0 %v9000_v43  ;;  %v374_v43 = vld [vmem:[%s9665_s7 + $0x158] sm:$0xff] }
 0x371   : > { %7501 = vmatpush1.bf16.msra.mxu1 %v9119_v15  ;;  %v410_v12 = vld [vmem:[%s9665_s7 + $0x278] sm:$0xff] }
 0x372   : > { %7502 = vmatprep.subr.bf16.mxu1 %v9128_v18  ;;  %v378_v18 = vld [vmem:[%s9665_s7 + $0x178] sm:$0xff] }
 0x373   : > { %7462 = vmatpush1.bf16.msra.mxu0 %v8999_v26  ;;  %v8162_v26 = vcombine.high %v374_v43, %v378_v18  ;;  %v8161_v33 = vcombine.low %v374_v43, %v378_v18  ;;  %v414_v43 = vld [vmem:[%s9665_s7 + $0x298] sm:$0xff] }
 0x374   : > { %7463 = vmatprep.subr.bf16.mxu0 %v9008_v55  ;;  %v382_v55 = vld [vmem:[%s9665_s7 + $0x198] sm:$0xff] }
 0x375   : > { %7503 = vmatpush1.bf16.msra.mxu1 %v9127_v27  ;;  %v8290_v27 = vcombine.high %v502_v22, %v506_v24  ;;  %v418_v18 = vld [vmem:[%s9665_s7 + $0x2b8] sm:$0xff] }
 0x376   : > { %7504 = vmatprep.subr.bf16.mxu1 %v9136_v29  ;;  %v386_v29 = vld [vmem:[%s9665_s7 + $0x1b8] sm:$0xff] }
 0x377   : > { %7464 = vmatpush1.bf16.msra.mxu0 %v9007_v35  ;;  %v8170_v35 = vcombine.high %v382_v55, %v386_v29  ;;  %v8169_v53 = vcombine.low %v382_v55, %v386_v29  ;;  %v542_v22 = vld [vmem:[%s9665_s7 + $0x698] sm:$0xff] }
 0x378   : > { %7515 = vmatprep.subr.bf16.mxu0 %v8122_v38  ;;  %v8298_v38 = vcombine.high %v510_v31, %v514_v32  ;;  %v546_v24 = vld [vmem:[%s9665_s7 + $0x6b8] sm:$0xff] }
 0x379   : > { %7505 = vmatpush1.bf16.msra.mxu1 %v9135_v36  ;;  %v422_v55 = vld [vmem:[%s9665_s7 + $0x2d8] sm:$0xff] }
 0x37a   : > { %7556 = vmatprep.subr.bf16.mxu1 %v8250_v39  ;;  %7466 = vmatmul.mubr.bf16.vlgmr.msra.gmra.mrb[44].mxu0 %v10058_v23  ;;  %v390_v39 = vld [vmem:[%s9665_s7 + $0x1d8] sm:$0xff] }
 0x37b   : > { %7516 = vmatpush1.bf16.msra.mxu0 %v8121_v46  ;;  %7547 = vmatprep.mubr.bf16.mxu0 %v9738_v59  ;;  %v498_v59 = vld [vmem:[%s9665_s7 + $0x538] sm:$0xff] }
 0x37c   : > { %7507 = vmatmul.mubr.bf16.vlgmr.msra.gmra.mrb[44].mxu1 %v10064_v52  ;;  %7517 = vmatprep.subr.bf16.mxu0 %v8130_v49  ;;  %v8282_v15 = vcombine.high %v494_v13, %v498_v59  ;;  %v8281_v54 = vcombine.low %v494_v13, %v498_v59  ;;  %v522_v46 = vld [vmem:[%s9665_s7 + $0x5f8] sm:$0xff] }
 0x37d   : > { %7557 = vmatpush1.bf16.msra.mxu1 %v8249_v47  ;;  %7588 = vmatprep.mubr.bf16.mxu1 %v9742_v60  ;;  %v8273_v60 = vcombine.low %v486_v3, %v490_v4  ;;  %v526_v3 = vld [vmem:[%s9665_s7 + $0x618] sm:$0xff] }
 0x37e   : > { %7558 = vmatprep.subr.bf16.mxu1 %v8258_v51  ;;  %v530_v4 = vld [vmem:[%s9665_s7 + $0x638] sm:$0xff] }
 0x37f   : > { %7518 = vmatpush1.bf16.msra.mxu0 %v8129_v11  ;;  %v8297_v11 = vcombine.low %v510_v31, %v514_v32  ;;  %v534_v13 = vld [vmem:[%s9665_s7 + $0x658] sm:$0xff] }
 0x380   : > { %7519 = vmatprep.subr.bf16.mxu0 %v8138_v1  ;;  %v538_v59 = vld [vmem:[%s9665_s7 + $0x678] sm:$0xff] }
 0x381   : > { %7559 = vmatpush1.bf16.msra.mxu1 %v8257_v56  ;;  %v8178_v56 = vcombine.high %v390_v39, %v394_v42  ;;  %v426_v29 = vld [vmem:[%s9665_s7 + $0x2f8] sm:$0xff] }
 0x382   : > { %7560 = vmatprep.subr.bf16.mxu1 %v8266_v2  ;;  %v8306_v2 = vcombine.high %v518_v20, %v522_v46  ;;  %v550_v31 = vld [vmem:[%s9665_s7 + $0x6d8] sm:$0xff] }
 0x383   : > { %7520 = vmatpush1.bf16.msra.mxu0 %v8137_v6  ;;  %v8177_v6 = vcombine.low %v390_v39, %v394_v42  ;;  %v554_v32 = vld [vmem:[%s9665_s7 + $0x6f8] sm:$0xff] }
 0x384   : > { %7521 = vmatprep.subr.bf16.mxu0 %v8146_v7  ;;  %v8186_v7 = vcombine.high %v398_v58, %v402_v0  ;;  %v434_v39 = vld [vmem:[%s9665_s7 + $0x338] sm:$0xff] }
 0x385   : > { %7561 = vmatpush1.bf16.msra.mxu1 %v8265_v62  ;;  %v8305_v62 = vcombine.low %v518_v20, %v522_v46  ;;  %v558_v42 = vld [vmem:[%s9665_s7 + $0x718] sm:$0xff]  ;;  %v8337_v20 = vcombine.low %v550_v31, %v554_v32 }
 0x386   : > { %7562 = vmatprep.subr.bf16.mxu1 %v8274_v63  ;;  %v8314_v63 = vcombine.high %v526_v3, %v530_v4 }
 0x387   : > { %7522 = vmatpush1.bf16.msra.mxu0 %v8145_v40  ;;  %v8185_v40 = vcombine.low %v398_v58, %v402_v0  ;;  %v446_v58 = vld [vmem:[%s9665_s7 + $0x398] sm:$0xff] }
 0x388   : > { %7523 = vmatprep.subr.bf16.mxu0 %v8154_v14  ;;  %v8194_v14 = vcombine.high %v406_v10, %v410_v12  ;;  %v450_v0 = vld [vmem:[%s9665_s7 + $0x3b8] sm:$0xff] }
 0x389   : > { %7563 = vmatpush1.bf16.msra.mxu1 %v8273_v60  ;;  %v8313_v60 = vcombine.low %v526_v3, %v530_v4  ;;  %v574_v3 = vld [vmem:[%s9665_s7 + $0x798] sm:$0xff] }
 0x38a   : > { %7564 = vmatprep.subr.bf16.mxu1 %v8282_v15  ;;  %v8322_v15 = vcombine.high %v534_v13, %v538_v59  ;;  %v578_v4 = vld [vmem:[%s9665_s7 + $0x7b8] sm:$0xff] }
 0x38b   : > { %7524 = vmatpush1.bf16.msra.mxu0 %v8153_v25  ;;  %v8193_v25 = vcombine.low %v406_v10, %v410_v12  ;;  %v454_v10 = vld [vmem:[%s9665_s7 + $0x3d8] sm:$0xff] }
 0x38c   : > { %7525 = vmatprep.subr.bf16.mxu0 %v8162_v26  ;;  %v8202_v26 = vcombine.high %v414_v43, %v418_v18  ;;  %v458_v12 = vld [vmem:[%s9665_s7 + $0x3f8] sm:$0xff] }
 0x38d   : > { %7565 = vmatpush1.bf16.msra.mxu1 %v8281_v54  ;;  %v7221_v36 = vpop.f32.mrb[32].mxu0  ;;  %v8321_v54 = vcombine.low %v534_v13, %v538_v59  ;;  %v582_v13 = vld [vmem:[%s9665_s7 + $0x7d8] sm:$0xff] }
 0x38e   : > { %7566 = vmatprep.subr.bf16.mxu1 %v8290_v27  ;;  %v7223_v45 = vpop.f32.mrb[33].mxu0  ;;  %v8330_v27 = vcombine.high %v542_v22, %v546_v24  ;;  %v586_v59 = vld [vmem:[%s9665_s7 + $0x7f8] sm:$0xff] }
 0x38f   : > { %v7262_v44 = vpop.f32.mrb[32].mxu1  ;;  %v7225_v51 = vpop.f32.mrb[34].mxu0  ;;  %7526 = vmatpush1.bf16.msra.mxu0 %v8161_v33  ;;  %v8201_v33 = vcombine.low %v414_v43, %v418_v18  ;;  %v590_v43 = vld [vmem:[%s9665_s7 + $0x818] sm:$0xff] }
 0x390   : > { %v10682_v47 = vadd.f32 %v7262_v44, %v7221_v36  ;;  %v7264_v49 = vpop.f32.mrb[33].mxu1  ;;  %v7226_v8 = vpop.f32.mrb[35].mxu0  ;;  %7527 = vmatprep.subr.bf16.mxu0 %v8170_v35  ;;  %v8210_v35 = vcombine.high %v422_v55, %v426_v29  ;;  %v8338_v36 = vcombine.high %v550_v31, %v554_v32  ;;  %v562_v44 = vld [vmem:[%s9665_s7 + $0x738] sm:$0xff] }
 0x391   : > { %v10684_v57 = vadd.f32 %v7264_v49, %v7223_v45  ;;  %v7266_v61 = vpop.f32.mrb[34].mxu1  ;;  %7567 = vmatpush1.bf16.msra.mxu1 %v8289_v34  ;;  %v8329_v34 = vcombine.low %v542_v22, %v546_v24  ;;  %v8209_v45 = vcombine.low %v422_v55, %v426_v29  ;;  %v8346_v49 = vcombine.high %v558_v42, %v562_v44  ;;  %v438_v51 = vld [vmem:[%s9665_s7 + $0x358] sm:$0xff] }
 0x392   : > { %v7267_v1 = vpop.f32.mrb[35].mxu1  ;;  %7568 = vmatprep.subr.bf16.mxu1 %v8298_v38  ;;  %v430_v38 = vld [vmem:[%s9665_s7 + $0x318] sm:$0xff] }
 0x393   : > { %7528 = vmatpush1.bf16.msra.mxu0 %v8169_v53  ;;  %v8218_v46 = vcombine.high %v430_v38, %v434_v39  ;;  %v442_v53 = vld [vmem:[%s9665_s7 + $0x378] sm:$0xff] }
 0x394   : > { %7529 = vmatprep.subr.bf16.mxu0 %v8178_v56  ;;  %v566_v61 = vld [vmem:[%s9665_s7 + $0x758] sm:$0xff]  ;;  %v8345_v56 = vcombine.low %v558_v42, %v562_v44  ;;  %v8226_v1 = vcombine.high %v438_v51, %v442_v53 }
 0x395   : > { %7569 = vmatpush1.bf16.msra.mxu1 %v8297_v11  ;;  %v570_v8 = vld [vmem:[%s9665_s7 + $0x778] sm:$0xff]  ;;  %v8217_v11 = vcombine.low %v430_v38, %v434_v39 }
 0x396   : > { %7570 = vmatprep.subr.bf16.mxu1 %v8306_v2  ;;  %v8354_v2 = vcombine.high %v566_v61, %v570_v8  ;;  %v594_v18 = vld [vmem:[%s9665_s7 + $0x838] sm:$0xff] }
 0x397   : > { %7530 = vmatpush1.bf16.msra.mxu0 %v8177_v6  ;;  %v8225_v6 = vcombine.low %v438_v51, %v442_v53  ;;  %v718_v22 = vld [vmem:[%s9665_s7 + $0xc18] sm:$0xff] }
 0x398   : > { %7531 = vmatprep.subr.bf16.mxu0 %v8186_v7  ;;  %v8234_v7 = vcombine.high %v446_v58, %v450_v0  ;;  %v722_v24 = vld [vmem:[%s9665_s7 + $0xc38] sm:$0xff] }
 0x399   : > { %7571 = vmatpush1.bf16.msra.mxu1 %v8305_v62  ;;  %v8353_v62 = vcombine.low %v566_v61, %v570_v8  ;;  %v598_v55 = vld [vmem:[%s9665_s7 + $0x858] sm:$0xff] }
 0x39a   : > { %7572 = vmatprep.subr.bf16.mxu1 %v8314_v63  ;;  %v8362_v63 = vcombine.high %v574_v3, %v578_v4  ;;  %v602_v29 = vld [vmem:[%s9665_s7 + $0x878] sm:$0xff] }
 0x39b   : > { %7532 = vmatpush1.bf16.msra.mxu0 %v8185_v40  ;;  %v8233_v40 = vcombine.low %v446_v58, %v450_v0  ;;  %v726_v31 = vld [vmem:[%s9665_s7 + $0xc58] sm:$0xff] }
 0x39c   : > { %7533 = vmatprep.subr.bf16.mxu0 %v8194_v14  ;;  %v8242_v14 = vcombine.high %v454_v10, %v458_v12  ;;  %v730_v32 = vld [vmem:[%s9665_s7 + $0xc78] sm:$0xff] }
 0x39d   : > { %7573 = vmatpush1.bf16.msra.mxu1 %v8313_v60  ;;  %v8361_v60 = vcombine.low %v574_v3, %v578_v4  ;;  %v606_v38 = vld [vmem:[%s9665_s7 + $0x898] sm:$0xff] }
 0x39e   : > { %7574 = vmatprep.subr.bf16.mxu1 %v8322_v15  ;;  %v8370_v15 = vcombine.high %v582_v13, %v586_v59  ;;  %v610_v39 = vld [vmem:[%s9665_s7 + $0x8b8] sm:$0xff] }
 0x39f   : > { %7534 = vmatpush1.bf16.msra.mxu0 %v8193_v25  ;;  %v8241_v25 = vcombine.low %v454_v10, %v458_v12  ;;  %v734_v42 = vld [vmem:[%s9665_s7 + $0xc98] sm:$0xff] }
 0x3a0   : > { %7535 = vmatprep.subr.bf16.mxu0 %v8202_v26  ;;  %v8378_v26 = vcombine.high %v590_v43, %v594_v18  ;;  %v738_v44 = vld [vmem:[%s9665_s7 + $0xcb8] sm:$0xff] }
 0x3a1   : > { %7575 = vmatpush1.bf16.msra.mxu1 %v8321_v54  ;;  %v8369_v54 = vcombine.low %v582_v13, %v586_v59  ;;  %v614_v51 = vld [vmem:[%s9665_s7 + $0x8d8] sm:$0xff]  ;;  %v8521_v8 = vcombine.low %v734_v42, %v738_v44 }
 0x3a2   : > { %7576 = vmatprep.subr.bf16.mxu1 %v8330_v27  ;;  %v8506_v27 = vcombine.high %v718_v22, %v722_v24  ;;  %v618_v53 = vld [vmem:[%s9665_s7 + $0x8f8] sm:$0xff] }
 0x3a3   : > { %7536 = vmatpush1.bf16.msra.mxu0 %v8201_v33  ;;  %v8377_v33 = vcombine.low %v590_v43, %v594_v18  ;;  %v746_v61 = vld [vmem:[%s9665_s7 + $0xcf8] sm:$0xff]  ;;  %v8401_v0 = vcombine.low %v614_v51, %v618_v53 }
 0x3a4   : > { %7537 = vmatprep.subr.bf16.mxu0 %v8210_v35  ;;  %v8386_v35 = vcombine.high %v598_v55, %v602_v29  ;;  %v750_v58 = vld [vmem:[%s9665_s7 + $0xd18] sm:$0xff] }
 0x3a5   : > { %7577 = vmatpush1.bf16.msra.mxu1 %v8329_v34  ;;  %v8505_v34 = vcombine.low %v718_v22, %v722_v24 }
 0x3a6   : > { %7578 = vmatprep.subr.bf16.mxu1 %v8338_v36  ;;  %v8514_v36 = vcombine.high %v726_v31, %v730_v32 }
 0x3a7   : > { %7538 = vmatpush1.bf16.msra.mxu0 %v8209_v45  ;;  %v8385_v45 = vcombine.low %v598_v55, %v602_v29 }
 0x3a8   : > { %7539 = vmatprep.subr.bf16.mxu0 %v8218_v46  ;;  %v8394_v46 = vcombine.high %v606_v38, %v610_v39 }
 0x3a9   : > { %7579 = vmatpush1.bf16.msra.mxu1 %v8337_v20  ;;  %v8513_v20 = vcombine.low %v726_v31, %v730_v32  ;;  %v774_v31 = vld [vmem:[%s9665_s7 + $0xdd8] sm:$0xff] }
 0x3aa   : > { %7580 = vmatprep.subr.bf16.mxu1 %v8346_v49  ;;  %v8522_v49 = vcombine.high %v734_v42, %v738_v44  ;;  %v778_v32 = vld [vmem:[%s9665_s7 + $0xdf8] sm:$0xff] }
 0x3ab   : > { %7540 = vmatpush1.bf16.msra.mxu0 %v8217_v11  ;;  %v8402_v11 = vcombine.high %v614_v51, %v618_v53  ;;  %v782_v51 = vld [vmem:[%s9665_s7 + $0xe18] sm:$0xff] }
 0x3ac   : > { %7541 = vmatprep.subr.bf16.mxu0 %v8226_v1  ;;  %v622_v1 = vld [vmem:[%s9665_s7 + $0x918] sm:$0xff] }
 0x3ad   : > { %7581 = vmatpush1.bf16.msra.mxu1 %v8345_v56  ;;  %v786_v53 = vld [vmem:[%s9665_s7 + $0xe38] sm:$0xff] }
 0x3ae   : > { %7582 = vmatprep.subr.bf16.mxu1 %v8354_v2  ;;  %v626_v2 = vld [vmem:[%s9665_s7 + $0x938] sm:$0xff] }
 0x3af   : > { %7542 = vmatpush1.bf16.msra.mxu0 %v8225_v6  ;;  %v8410_v3 = vcombine.high %v622_v1, %v626_v2  ;;  %v630_v6 = vld [vmem:[%s9665_s7 + $0x958] sm:$0xff]  ;;  %v8409_v10 = vcombine.low %v622_v1, %v626_v2 }
 0x3b0   : > { %7543 = vmatprep.subr.bf16.mxu0 %v8234_v7  ;;  %v758_v7 = vld [vmem:[%s9665_s7 + $0xd58] sm:$0xff] }
 0x3b1   : > { %7583 = vmatpush1.bf16.msra.mxu1 %v8353_v62  ;;  %v634_v62 = vld [vmem:[%s9665_s7 + $0x978] sm:$0xff] }
 0x3b2   : > { %7584 = vmatprep.subr.bf16.mxu1 %v8362_v63  ;;  %v762_v63 = vld [vmem:[%s9665_s7 + $0xd78] sm:$0xff]  ;;  %v8418_v13 = vcombine.high %v630_v6, %v634_v62  ;;  %v8417_v43 = vcombine.low %v630_v6, %v634_v62 }
 0x3b3   : > { %7544 = vmatpush1.bf16.msra.mxu0 %v8233_v40  ;;  %v8546_v59 = vcombine.high %v758_v7, %v762_v63  ;;  %v638_v40 = vld [vmem:[%s9665_s7 + $0x998] sm:$0xff]  ;;  %v8545_v18 = vcombine.low %v758_v7, %v762_v63 }
 0x3b4   : > { %7545 = vmatprep.subr.bf16.mxu0 %v8242_v14  ;;  %v766_v14 = vld [vmem:[%s9665_s7 + $0xd98] sm:$0xff] }
 0x3b5   : > { %7585 = vmatpush1.bf16.msra.mxu1 %v8361_v60  ;;  %v642_v60 = vld [vmem:[%s9665_s7 + $0x9b8] sm:$0xff] }
 0x3b6   : > { %7586 = vmatprep.subr.bf16.mxu1 %v8370_v15  ;;  %v770_v15 = vld [vmem:[%s9665_s7 + $0xdb8] sm:$0xff]  ;;  %v8426_v22 = vcombine.high %v638_v40, %v642_v60 }
 0x3b7   : > { %7546 = vmatpush1.bf16.msra.mxu0 %v8241_v25  ;;  %v8554_v25 = vcombine.high %v766_v14, %v770_v15  ;;  %v790_v1 = vld [vmem:[%s9665_s7 + $0xe58] sm:$0xff] }
 0x3b8   : > { %7597 = vmatprep.subr.bf16.mxu0 %v8378_v26  ;;  %v650_v26 = vld [vmem:[%s9665_s7 + $0x9f8] sm:$0xff] }
 0x3b9   : > { %7587 = vmatpush1.bf16.msra.mxu1 %v8369_v54  ;;  %v646_v54 = vld [vmem:[%s9665_s7 + $0x9d8] sm:$0xff] }
 0x3ba   : > { %7638 = vmatprep.subr.bf16.mxu1 %v8506_v27  ;;  %7548 = vmatmul.mubr.bf16.vlgmr.msra.gmra.mrb[48].mxu0 %v9788_v17  ;;  %v742_v17 = vld [vmem:[%s9665_s7 + $0xcd8] sm:$0xff]  ;;  %v8434_v44 = vcombine.high %v646_v54, %v650_v26 }
 0x3bb   : > { %7598 = vmatpush1.bf16.msra.mxu0 %v8377_v33  ;;  %7629 = vmatprep.mubr.bf16.mxu0 %v9806_v28  ;;  %v8530_v56 = vcombine.high %v742_v17, %v746_v61  ;;  %v754_v28 = vld [vmem:[%s9665_s7 + $0xd38] sm:$0xff] }
 0x3bc   : > { %7589 = vmatmul.mubr.bf16.vlgmr.msra.gmra.mrb[48].mxu1 %v9797_v21  ;;  %7599 = vmatprep.subr.bf16.mxu0 %v8386_v35  ;;  %v8393_v21 = vcombine.low %v606_v38, %v610_v39  ;;  %v8538_v4 = vcombine.high %v750_v58, %v754_v28  ;;  %v8537_v12 = vcombine.low %v750_v58, %v754_v28  ;;  %v794_v2 = vld [vmem:[%s9665_s7 + $0xe78] sm:$0xff] }
 0x3bd   : > { %7639 = vmatpush1.bf16.msra.mxu1 %v8505_v34  ;;  %7670 = vmatprep.mubr.bf16.mxu1 %v9813_v30  ;;  %v8529_v30 = vcombine.low %v742_v17, %v746_v61  ;;  %v8433_v17 = vcombine.low %v646_v54, %v650_v26  ;;  %v8561_v61 = vcombine.low %v774_v31, %v778_v32  ;;  %v798_v6 = vld [vmem:[%s9665_s7 + $0xe98] sm:$0xff] }
 0x3be   : > { %7640 = vmatprep.subr.bf16.mxu1 %v8514_v36  ;;  %v8425_v36 = vcombine.low %v638_v40, %v642_v60  ;;  %v8569_v28 = vcombine.low %v782_v51, %v786_v53  ;;  %v802_v62 = vld [vmem:[%s9665_s7 + $0xeb8] sm:$0xff]  ;;  %v8577_v63 = vcombine.low %v790_v1, %v794_v2 }
 0x3bf   : > { %7600 = vmatpush1.bf16.msra.mxu0 %v8385_v45  ;;  %v806_v40 = vld [vmem:[%s9665_s7 + $0xed8] sm:$0xff] }
 0x3c0   : > { %7601 = vmatprep.subr.bf16.mxu0 %v8394_v46  ;;  %v654_v46 = vld [vmem:[%s9665_s7 + $0xa18] sm:$0xff] }
 0x3c1   : > { %7641 = vmatpush1.bf16.msra.mxu1 %v8513_v20  ;;  %v8562_v20 = vcombine.high %v774_v31, %v778_v32  ;;  %v810_v60 = vld [vmem:[%s9665_s7 + $0xef8] sm:$0xff] }
 0x3c2   : > { %7642 = vmatprep.subr.bf16.mxu1 %v8522_v49  ;;  %v658_v49 = vld [vmem:[%s9665_s7 + $0xa38] sm:$0xff] }
 0x3c3   : > { %7602 = vmatpush1.bf16.msra.mxu0 %v8393_v21  ;;  %v8442_v21 = vcombine.high %v654_v46, %v658_v49  ;;  %v8441_v58 = vcombine.low %v654_v46, %v658_v49  ;;  %v818_v54 = vld [vmem:[%s9665_s7 + $0xf38] sm:$0xff] }
 0x3c4   : > { %7603 = vmatprep.subr.bf16.mxu0 %v8402_v11  ;;  %v662_v11 = vld [vmem:[%s9665_s7 + $0xa58] sm:$0xff] }
 0x3c5   : > { %7643 = vmatpush1.bf16.msra.mxu1 %v8521_v8  ;;  %v8570_v8 = vcombine.high %v782_v51, %v786_v53  ;;  %v694_v31 = vld [vmem:[%s9665_s7 + $0xb58] sm:$0xff] }
 0x3c6   : > { %7644 = vmatprep.subr.bf16.mxu1 %v8530_v56  ;;  %v666_v56 = vld [vmem:[%s9665_s7 + $0xa78] sm:$0xff] }
 0x3c7   : > { %7604 = vmatpush1.bf16.msra.mxu0 %v8401_v0  ;;  %v8450_v0 = vcombine.high %v662_v11, %v666_v56  ;;  %v8449_v7 = vcombine.low %v662_v11, %v666_v56  ;;  %v698_v32 = vld [vmem:[%s9665_s7 + $0xb78] sm:$0xff] }
 0x3c8   : > { %7605 = vmatprep.subr.bf16.mxu0 %v8410_v3  ;;  %v670_v3 = vld [vmem:[%s9665_s7 + $0xa98] sm:$0xff]  ;;  %v8481_v46 = vcombine.low %v694_v31, %v698_v32 }
 0x3c9   : > { %7645 = vmatpush1.bf16.msra.mxu1 %v8529_v30  ;;  %v8578_v30 = vcombine.high %v790_v1, %v794_v2 }
 0x3ca   : > { %7646 = vmatprep.subr.bf16.mxu1 %v8538_v4  ;;  %v674_v4 = vld [vmem:[%s9665_s7 + $0xab8] sm:$0xff] }
 0x3cb   : > { %7606 = vmatpush1.bf16.msra.mxu0 %v8409_v10  ;;  %v8458_v10 = vcombine.high %v670_v3, %v674_v4 }
 0x3cc   : > { %7607 = vmatprep.subr.bf16.mxu0 %v8418_v13  ;;  %v678_v13 = vld [vmem:[%s9665_s7 + $0xad8] sm:$0xff] }
 0x3cd   : > { %7647 = vmatpush1.bf16.msra.mxu1 %v8537_v12  ;;  %v7303_v24 = vpop.f32.mrb[36].mxu0  ;;  %v8586_v12 = vcombine.high %v798_v6, %v802_v62 }
 0x3ce   : > { %7648 = vmatprep.subr.bf16.mxu1 %v8546_v59  ;;  %v7304_v27 = vadd.f32 %v7303_v24, %v10682_v47  ;;  %v7305_v29 = vpop.f32.mrb[37].mxu0  ;;  %v8553_v47 = vcombine.low %v766_v14, %v770_v15  ;;  %v682_v59 = vld [vmem:[%s9665_s7 + $0xaf8] sm:$0xff]  ;;  %v8457_v14 = vcombine.low %v670_v3, %v674_v4  ;;  %v8585_v15 = vcombine.low %v798_v6, %v802_v62 }
 0x3cf   : > { %v7344_v55 = vpop.f32.mrb[36].mxu1  ;;  %v7306_v33 = vadd.f32 %v7305_v29, %v10684_v57  ;;  %v7307_v35 = vpop.f32.mrb[38].mxu0  ;;  %7608 = vmatpush1.bf16.msra.mxu0 %v8417_v43  ;;  %v8466_v43 = vcombine.high %v678_v13, %v682_v59  ;;  %v690_v24 = vld [vmem:[%s9665_s7 + $0xb38] sm:$0xff]  ;;  %v8465_v26 = vcombine.low %v678_v13, %v682_v59 }
 0x3d0   : > { %v7346_v34 = vpop.f32.mrb[37].mxu1  ;;  %v10756_v38 = vadd.f32 %v7344_v55, %v7304_v27  ;;  %v7308_v42 = vpop.f32.mrb[39].mxu0  ;;  %7609 = vmatprep.subr.bf16.mxu0 %v8426_v22  ;;  %v686_v22 = vld [vmem:[%s9665_s7 + $0xb18] sm:$0xff]  ;;  %v8593_v27 = vcombine.low %v806_v40, %v810_v60 }
 0x3d1   : > { %v7348_v39 = vpop.f32.mrb[38].mxu1  ;;  %7649 = vmatpush1.bf16.msra.mxu1 %v8545_v18  ;;  %v10758_v45 = vadd.f32 %v7346_v34, %v7306_v33  ;;  %v8594_v18 = vcombine.high %v806_v40, %v810_v60  ;;  %v8474_v55 = vcombine.high %v686_v22, %v690_v24  ;;  %v822_v33 = vld [vmem:[%s9665_s7 + $0xf58] sm:$0xff]  ;;  %v8473_v35 = vcombine.low %v686_v22, %v690_v24 }
 0x3d2   : > { %v7349_v57 = vpop.f32.mrb[39].mxu1  ;;  %7650 = vmatprep.subr.bf16.mxu1 %v8554_v25  ;;  %v814_v25 = vld [vmem:[%s9665_s7 + $0xf18] sm:$0xff]  ;;  %v8482_v39 = vcombine.high %v694_v31, %v698_v32 }
 0x3d3   : > { %7610 = vmatpush1.bf16.msra.mxu0 %v8425_v36  ;;  %v8602_v29 = vcombine.high %v814_v25, %v818_v54  ;;  %v826_v34 = vld [vmem:[%s9665_s7 + $0xf78] sm:$0xff]  ;;  %v8601_v36 = vcombine.low %v814_v25, %v818_v54 }
 0x3d4   : > { %7611 = vmatprep.subr.bf16.mxu0 %v8434_v44  ;;  %v8610_v42 = vcombine.high %v822_v33, %v826_v34  ;;  %v706_v44 = vld [vmem:[%s9665_s7 + $0xbb8] sm:$0xff]  ;;  %v8609_v49 = vcombine.low %v822_v33, %v826_v34 }
 0x3d5   : > { %7651 = vmatpush1.bf16.msra.mxu1 %v8553_v47  ;;  %v702_v47 = vld [vmem:[%s9665_s7 + $0xb98] sm:$0xff] }
 0x3d6   : > { %7652 = vmatprep.subr.bf16.mxu1 %v8562_v20  ;;  %v830_v57 = vld [vmem:[%s9665_s7 + $0xf98] sm:$0xff]  ;;  %v8490_v51 = vcombine.high %v702_v47, %v706_v44  ;;  %v8489_v11 = vcombine.low %v702_v47, %v706_v44 }
 0x3d7   : > { %7612 = vmatpush1.bf16.msra.mxu0 %v8433_v17  ;;  %v834_v20 = vld [vmem:[%s9665_s7 + $0xfb8] sm:$0xff] }
 0x3d8   : > { %7613 = vmatprep.subr.bf16.mxu0 %v8442_v21  ;;  %v8618_v53 = vcombine.high %v830_v57, %v834_v20  ;;  %v710_v17 = vld [vmem:[%s9665_s7 + $0xbd8] sm:$0xff]  ;;  %v8617_v56 = vcombine.low %v830_v57, %v834_v20 }
 0x3d9   : > { %7653 = vmatpush1.bf16.msra.mxu1 %v8561_v61  ;;  %v714_v61 = vld [vmem:[%s9665_s7 + $0xbf8] sm:$0xff] }
 0x3da   : > { %7654 = vmatprep.subr.bf16.mxu1 %v8570_v8  ;;  %v838_v21 = vld [vmem:[%s9665_s7 + $0xfd8] sm:$0xff]  ;;  %v8498_v1 = vcombine.high %v710_v17, %v714_v61  ;;  %v8497_v3 = vcombine.low %v710_v17, %v714_v61 }
 0x3db   : > { %7614 = vmatpush1.bf16.msra.mxu0 %v8441_v58  ;;  %v842_v8 = vld [vmem:[%s9665_s7 + $0xff8] sm:$0xff] }
 0x3dc   : > { %7615 = vmatprep.subr.bf16.mxu0 %v8450_v0  ;;  %v8626_v2 = vcombine.high %v838_v21, %v842_v8  ;;  %v846_v58 = vld [vmem:[%s9665_s7 + $0x1018] sm:$0xff]  ;;  %v8625_v4 = vcombine.low %v838_v21, %v842_v8 }
 0x3dd   : > { %7655 = vmatpush1.bf16.msra.mxu1 %v8569_v28  ;;  %v850_v28 = vld [vmem:[%s9665_s7 + $0x1038] sm:$0xff] }
 0x3de   : > { %7656 = vmatprep.subr.bf16.mxu1 %v8578_v30  ;;  %v974_v0 = vld [vmem:[%s9665_s7 + $0x1418] sm:$0xff]  ;;  %v8634_v6 = vcombine.high %v846_v58, %v850_v28  ;;  %v8633_v13 = vcombine.low %v846_v58, %v850_v28 }
 0x3df   : > { %7616 = vmatpush1.bf16.msra.mxu0 %v8449_v7  ;;  %v978_v30 = vld [vmem:[%s9665_s7 + $0x1438] sm:$0xff] }
 0x3e0   : > { %7617 = vmatprep.subr.bf16.mxu0 %v8458_v10  ;;  %v8762_v62 = vcombine.high %v974_v0, %v978_v30  ;;  %v854_v7 = vld [vmem:[%s9665_s7 + $0x1058] sm:$0xff]  ;;  %v8761_v59 = vcombine.low %v974_v0, %v978_v30 }
 0x3e1   : > { %7657 = vmatpush1.bf16.msra.mxu1 %v8577_v63  ;;  %v858_v63 = vld [vmem:[%s9665_s7 + $0x1078] sm:$0xff] }
 0x3e2   : > { %7658 = vmatprep.subr.bf16.mxu1 %v8586_v12  ;;  %v982_v10 = vld [vmem:[%s9665_s7 + $0x1458] sm:$0xff]  ;;  %v8642_v40 = vcombine.high %v854_v7, %v858_v63  ;;  %v8641_v22 = vcombine.low %v854_v7, %v858_v63 }
 0x3e3   : > { %7618 = vmatpush1.bf16.msra.mxu0 %v8457_v14  ;;  %v986_v12 = vld [vmem:[%s9665_s7 + $0x1478] sm:$0xff] }
 0x3e4   : > { %7619 = vmatprep.subr.bf16.mxu0 %v8466_v43  ;;  %v8770_v60 = vcombine.high %v982_v10, %v986_v12  ;;  %v862_v14 = vld [vmem:[%s9665_s7 + $0x1098] sm:$0xff]  ;;  %v8769_v24 = vcombine.low %v982_v10, %v986_v12 }
 0x3e5   : > { %7659 = vmatpush1.bf16.msra.mxu1 %v8585_v15  ;;  %v866_v15 = vld [vmem:[%s9665_s7 + $0x10b8] sm:$0xff] }
 0x3e6   : > { %7660 = vmatprep.subr.bf16.mxu1 %v8594_v18  ;;  %v990_v43 = vld [vmem:[%s9665_s7 + $0x1498] sm:$0xff]  ;;  %v8650_v25 = vcombine.high %v862_v14, %v866_v15 }
 0x3e7   : > { %7620 = vmatpush1.bf16.msra.mxu0 %v8465_v26  ;;  %v994_v18 = vld [vmem:[%s9665_s7 + $0x14b8] sm:$0xff] }
 0x3e8   : > { %7621 = vmatprep.subr.bf16.mxu0 %v8474_v55  ;;  %v8778_v54 = vcombine.high %v990_v43, %v994_v18  ;;  %v870_v26 = vld [vmem:[%s9665_s7 + $0x10d8] sm:$0xff] }
 0x3e9   : > { %7661 = vmatpush1.bf16.msra.mxu1 %v8593_v27  ;;  %v874_v27 = vld [vmem:[%s9665_s7 + $0x10f8] sm:$0xff] }
 0x3ea   : > { %7662 = vmatprep.subr.bf16.mxu1 %v8602_v29  ;;  %v1002_v55 = vld [vmem:[%s9665_s7 + $0x14f8] sm:$0xff]  ;;  %v8777_v29 = vcombine.low %v990_v43, %v994_v18  ;;  %v8658_v31 = vcombine.high %v870_v26, %v874_v27 }
 0x3eb   : > { %7622 = vmatpush1.bf16.msra.mxu0 %v8473_v35  ;;  %v878_v33 = vld [vmem:[%s9665_s7 + $0x1118] sm:$0xff] }
 0x3ec   : > { %7623 = vmatprep.subr.bf16.mxu0 %v8482_v39  ;;  %v882_v34 = vld [vmem:[%s9665_s7 + $0x1138] sm:$0xff] }
 0x3ed   : > { %7663 = vmatpush1.bf16.msra.mxu1 %v8601_v36  ;;  %v1006_v35 = vld [vmem:[%s9665_s7 + $0x1518] sm:$0xff]  ;;  %v8657_v36 = vcombine.low %v870_v26, %v874_v27  ;;  %v8666_v39 = vcombine.high %v878_v33, %v882_v34 }
 0x3ee   : > { %7664 = vmatprep.subr.bf16.mxu1 %v8610_v42  ;;  %v886_v47 = vld [vmem:[%s9665_s7 + $0x1158] sm:$0xff] }
 0x3ef   : > { %7624 = vmatpush1.bf16.msra.mxu0 %v8481_v46  ;;  %v890_v44 = vld [vmem:[%s9665_s7 + $0x1178] sm:$0xff]  ;;  %v8665_v46 = vcombine.low %v878_v33, %v882_v34 }
 0x3f0   : > { %7625 = vmatprep.subr.bf16.mxu0 %v8490_v51  ;;  %v1014_v57 = vld [vmem:[%s9665_s7 + $0x1558] sm:$0xff]  ;;  %v8674_v51 = vcombine.high %v886_v47, %v890_v44 }
 0x3f1   : > { %7665 = vmatpush1.bf16.msra.mxu1 %v8609_v49  ;;  %v1018_v20 = vld [vmem:[%s9665_s7 + $0x1578] sm:$0xff] }
 0x3f2   : > { %7666 = vmatprep.subr.bf16.mxu1 %v8618_v53  ;;  %v8802_v53 = vcombine.high %v1014_v57, %v1018_v20  ;;  %v894_v17 = vld [vmem:[%s9665_s7 + $0x1198] sm:$0xff] }
 0x3f3   : > { %7626 = vmatpush1.bf16.msra.mxu0 %v8489_v11  ;;  %v898_v61 = vld [vmem:[%s9665_s7 + $0x11b8] sm:$0xff]  ;;  %v8673_v11 = vcombine.low %v886_v47, %v890_v44 }
 0x3f4   : > { %7627 = vmatprep.subr.bf16.mxu0 %v8498_v1  ;;  %v1022_v21 = vld [vmem:[%s9665_s7 + $0x1598] sm:$0xff]  ;;  %v8682_v1 = vcombine.high %v894_v17, %v898_v61  ;;  %v8681_v12 = vcombine.low %v894_v17, %v898_v61 }
 0x3f5   : > { %7667 = vmatpush1.bf16.msra.mxu1 %v8617_v56  ;;  %v1026_v8 = vld [vmem:[%s9665_s7 + $0x15b8] sm:$0xff]  ;;  %v8801_v56 = vcombine.low %v1014_v57, %v1018_v20 }
 0x3f6   : > { %7668 = vmatprep.subr.bf16.mxu1 %v8626_v2  ;;  %v8810_v58 = vcombine.high %v1022_v21, %v1026_v8  ;;  %v902_v28 = vld [vmem:[%s9665_s7 + $0x11d8] sm:$0xff] }
 0x3f7   : > { %7628 = vmatpush1.bf16.msra.mxu0 %v8497_v3  ;;  %v906_v0 = vld [vmem:[%s9665_s7 + $0x11f8] sm:$0xff] }
 0x3f8   : > { %7679 = vmatprep.subr.bf16.mxu0 %v8634_v6  ;;  %v1030_v6 = vld [vmem:[%s9665_s7 + $0x15d8] sm:$0xff] }
 0x3f9   : > { %7669 = vmatpush1.bf16.msra.mxu1 %v8625_v4  ;;  %v910_v43 = vld [vmem:[%s9665_s7 + $0x1218] sm:$0xff] }
 0x3fa   : > { %7720 = vmatprep.subr.bf16.mxu1 %v8762_v62  ;;  %7630 = vmatmul.mubr.bf16.vlgmr.msra.gmra.mrb[52].mxu0 %v9878_v37  ;;  %v998_v37 = vld [vmem:[%s9665_s7 + $0x14d8] sm:$0xff] }
 0x3fb   : > { %7680 = vmatpush1.bf16.msra.mxu0 %v8633_v13  ;;  %7711 = vmatprep.mubr.bf16.mxu0 %v9896_v48  ;;  %v8786_v32 = vcombine.high %v998_v37, %v1002_v55  ;;  %v1010_v48 = vld [vmem:[%s9665_s7 + $0x1538] sm:$0xff] }
 0x3fc   : > { %7671 = vmatmul.mubr.bf16.vlgmr.msra.gmra.mrb[52].mxu1 %v9887_v41  ;;  %7681 = vmatprep.subr.bf16.mxu0 %v8642_v40  ;;  %v8649_v41 = vcombine.low %v862_v14, %v866_v15  ;;  %v8794_v42 = vcombine.high %v1006_v35, %v1010_v48  ;;  %v8793_v49 = vcombine.low %v1006_v35, %v1010_v48  ;;  %v1034_v62 = vld [vmem:[%s9665_s7 + $0x15f8] sm:$0xff] }
 0x3fd   : > { %7721 = vmatpush1.bf16.msra.mxu1 %v8761_v59  ;;  %7752 = vmatprep.mubr.bf16.mxu1 %v9903_v50  ;;  %v8785_v50 = vcombine.low %v998_v37, %v1002_v55  ;;  %v8818_v15 = vcombine.high %v1030_v6, %v1034_v62  ;;  %v914_v18 = vld [vmem:[%s9665_s7 + $0x1238] sm:$0xff] }
 0x3fe   : > { %7722 = vmatprep.subr.bf16.mxu1 %v8770_v60  ;;  %v8690_v60 = vcombine.high %v902_v28, %v906_v0  ;;  %v8698_v26 = vcombine.high %v910_v43, %v914_v18  ;;  %v918_v37 = vld [vmem:[%s9665_s7 + $0x1258] sm:$0xff] }
 0x3ff   : > { %7682 = vmatpush1.bf16.msra.mxu0 %v8641_v22  ;;  %v1038_v22 = vld [vmem:[%s9665_s7 + $0x1618] sm:$0xff] }
 0x400   : > { %7683 = vmatprep.subr.bf16.mxu0 %v8650_v25  ;;  %v8689_v25 = vcombine.low %v902_v28, %v906_v0  ;;  %v922_v55 = vld [vmem:[%s9665_s7 + $0x1278] sm:$0xff] }
 0x401   : > { %7723 = vmatpush1.bf16.msra.mxu1 %v8769_v24  ;;  %v1042_v24 = vld [vmem:[%s9665_s7 + $0x1638] sm:$0xff]  ;;  %v8706_v33 = vcombine.high %v918_v37, %v922_v55 }
 0x402   : > { %7724 = vmatprep.subr.bf16.mxu1 %v8778_v54  ;;  %v8817_v54 = vcombine.low %v1030_v6, %v1034_v62  ;;  %v8826_v27 = vcombine.high %v1038_v22, %v1042_v24  ;;  %v926_v35 = vld [vmem:[%s9665_s7 + $0x1298] sm:$0xff] }
 0x403   : > { %7684 = vmatpush1.bf16.msra.mxu0 %v8649_v41  ;;  %v1046_v41 = vld [vmem:[%s9665_s7 + $0x1658] sm:$0xff] }
 0x404   : > { %7685 = vmatprep.subr.bf16.mxu0 %v8658_v31  ;;  %v8697_v31 = vcombine.low %v910_v43, %v914_v18  ;;  %v930_v48 = vld [vmem:[%s9665_s7 + $0x12b8] sm:$0xff] }
 0x405   : > { %7725 = vmatpush1.bf16.msra.mxu1 %v8777_v29  ;;  %v1050_v29 = vld [vmem:[%s9665_s7 + $0x1678] sm:$0xff]  ;;  %v8714_v47 = vcombine.high %v926_v35, %v930_v48 }
 0x406   : > { %7726 = vmatprep.subr.bf16.mxu1 %v8786_v32  ;;  %v8825_v32 = vcombine.low %v1038_v22, %v1042_v24  ;;  %v8834_v34 = vcombine.high %v1046_v41, %v1050_v29  ;;  %v934_v57 = vld [vmem:[%s9665_s7 + $0x12d8] sm:$0xff] }
 0x407   : > { %7686 = vmatpush1.bf16.msra.mxu0 %v8657_v36  ;;  %v1054_v36 = vld [vmem:[%s9665_s7 + $0x1698] sm:$0xff] }
 0x408   : > { %7687 = vmatprep.subr.bf16.mxu0 %v8666_v39  ;;  %v8705_v39 = vcombine.low %v918_v37, %v922_v55  ;;  %v938_v20 = vld [vmem:[%s9665_s7 + $0x12f8] sm:$0xff] }
 0x409   : > { %7727 = vmatpush1.bf16.msra.mxu1 %v8785_v50  ;;  %v1058_v50 = vld [vmem:[%s9665_s7 + $0x16b8] sm:$0xff]  ;;  %v8722_v17 = vcombine.high %v934_v57, %v938_v20 }
 0x40a   : > { %7728 = vmatprep.subr.bf16.mxu1 %v8794_v42  ;;  %v8833_v42 = vcombine.low %v1046_v41, %v1050_v29  ;;  %v8842_v44 = vcombine.high %v1054_v36, %v1058_v50  ;;  %v950_v0 = vld [vmem:[%s9665_s7 + $0x1358] sm:$0xff] }
 0x40b   : > { %7688 = vmatpush1.bf16.msra.mxu0 %v8665_v46  ;;  %v1062_v46 = vld [vmem:[%s9665_s7 + $0x16d8] sm:$0xff] }
 0x40c   : > { %7689 = vmatprep.subr.bf16.mxu0 %v8674_v51  ;;  %v8713_v51 = vcombine.low %v926_v35, %v930_v48  ;;  %v966_v43 = vld [vmem:[%s9665_s7 + $0x13d8] sm:$0xff] }
 0x40d   : > { %7729 = vmatpush1.bf16.msra.mxu1 %v8793_v49  ;;  %v7385_v2 = vpop.f32.mrb[40].mxu0  ;;  %v1066_v49 = vld [vmem:[%s9665_s7 + $0x16f8] sm:$0xff] }
 0x40e   : > { %7730 = vmatprep.subr.bf16.mxu1 %v8802_v53  ;;  %v7386_v30 = vadd.f32 %v7385_v2, %v10756_v38  ;;  %v7387_v4 = vpop.f32.mrb[41].mxu0  ;;  %v8809_v38 = vcombine.low %v1022_v21, %v1026_v8  ;;  %v8841_v53 = vcombine.low %v1054_v36, %v1058_v50  ;;  %v8850_v61 = vcombine.high %v1062_v46, %v1066_v49  ;;  %v942_v21 = vld [vmem:[%s9665_s7 + $0x1318] sm:$0xff] }
 0x40f   : > { %v7426_v3 = vpop.f32.mrb[40].mxu1  ;;  %v7388_v7 = vadd.f32 %v7387_v4, %v10758_v45  ;;  %v7389_v10 = vpop.f32.mrb[42].mxu0  ;;  %7690 = vmatpush1.bf16.msra.mxu0 %v8673_v11  ;;  %v946_v8 = vld [vmem:[%s9665_s7 + $0x1338] sm:$0xff]  ;;  %v8849_v2 = vcombine.low %v1062_v46, %v1066_v49 }
 0x410   : > { %v7428_v63 = vpop.f32.mrb[41].mxu1  ;;  %v10830_v13 = vadd.f32 %v7426_v3, %v7386_v30  ;;  %v7390_v40 = vpop.f32.mrb[43].mxu0  ;;  %7691 = vmatprep.subr.bf16.mxu0 %v8682_v1  ;;  %v1070_v11 = vld [vmem:[%s9665_s7 + $0x1718] sm:$0xff]  ;;  %v8721_v1 = vcombine.low %v934_v57, %v938_v20  ;;  %v8729_v6 = vcombine.low %v942_v21, %v946_v8 }
 0x411   : > { %v7430_v59 = vpop.f32.mrb[42].mxu1  ;;  %7731 = vmatpush1.bf16.msra.mxu1 %v8801_v56  ;;  %v10832_v14 = vadd.f32 %v7428_v63, %v7388_v7  ;;  %v1074_v56 = vld [vmem:[%s9665_s7 + $0x1738] sm:$0xff] }
 0x412   : > { %v7431_v45 = vpop.f32.mrb[43].mxu1  ;;  %7732 = vmatprep.subr.bf16.mxu1 %v8810_v58  ;;  %v8730_v58 = vcombine.high %v942_v21, %v946_v8  ;;  %v8858_v28 = vcombine.high %v1070_v11, %v1074_v56  ;;  %v954_v30 = vld [vmem:[%s9665_s7 + $0x1378] sm:$0xff]  ;;  %v8857_v62 = vcombine.low %v1070_v11, %v1074_v56 }
 0x413   : > { %7692 = vmatpush1.bf16.msra.mxu0 %v8681_v12  ;;  %v1078_v3 = vld [vmem:[%s9665_s7 + $0x1758] sm:$0xff]  ;;  %v8738_v7 = vcombine.high %v950_v0, %v954_v30 }
 0x414   : > { %7693 = vmatprep.subr.bf16.mxu0 %v8690_v60  ;;  %v1082_v4 = vld [vmem:[%s9665_s7 + $0x1778] sm:$0xff] }
 0x415   : > { %7733 = vmatpush1.bf16.msra.mxu1 %v8809_v38  ;;  %v8866_v63 = vcombine.high %v1078_v3, %v1082_v4  ;;  %v958_v10 = vld [vmem:[%s9665_s7 + $0x1398] sm:$0xff]  ;;  %v8737_v38 = vcombine.low %v950_v0, %v954_v30  ;;  %v8865_v60 = vcombine.low %v1078_v3, %v1082_v4 }
 0x416   : > { %7734 = vmatprep.subr.bf16.mxu1 %v8818_v15  ;;  %v962_v12 = vld [vmem:[%s9665_s7 + $0x13b8] sm:$0xff] }
 0x417   : > { %7694 = vmatpush1.bf16.msra.mxu0 %v8689_v25  ;;  %v1086_v59 = vld [vmem:[%s9665_s7 + $0x1798] sm:$0xff]  ;;  %v8746_v45 = vcombine.high %v958_v10, %v962_v12  ;;  %v8745_v25 = vcombine.low %v958_v10, %v962_v12 }
 0x418   : > { %7695 = vmatprep.subr.bf16.mxu0 %v8698_v26  ;;  %v1090_v40 = vld [vmem:[%s9665_s7 + $0x17b8] sm:$0xff] }
 0x419   : > { %7735 = vmatpush1.bf16.msra.mxu1 %v8817_v54  ;;  %v8874_v15 = vcombine.high %v1086_v59, %v1090_v40  ;;  %v970_v18 = vld [vmem:[%s9665_s7 + $0x13f8] sm:$0xff]  ;;  %v8873_v54 = vcombine.low %v1086_v59, %v1090_v40 }
 0x41a   : > { %7736 = vmatprep.subr.bf16.mxu1 %v8826_v27  ;;  %v1094_v22 = vld [vmem:[%s9665_s7 + $0x17d8] sm:$0xff]  ;;  %v8754_v26 = vcombine.high %v966_v43, %v970_v18 }
 0x41b   : > { %7696 = vmatpush1.bf16.msra.mxu0 %v8697_v31  ;;  %v1098_v24 = vld [vmem:[%s9665_s7 + $0x17f8] sm:$0xff]  ;;  %v8753_v31 = vcombine.low %v966_v43, %v970_v18 }
 0x41c   : > { %7697 = vmatprep.subr.bf16.mxu0 %v8706_v33  ;;  %v8882_v27 = vcombine.high %v1094_v22, %v1098_v24  ;;  %v1102_v37 = vld [vmem:[%s9665_s7 + $0x1818] sm:$0xff] }
 0x41d   : > { %7737 = vmatpush1.bf16.msra.mxu1 %v8825_v32  ;;  %v1106_v55 = vld [vmem:[%s9665_s7 + $0x1838] sm:$0xff]  ;;  %v8881_v32 = vcombine.low %v1094_v22, %v1098_v24 }
 0x41e   : > { %7738 = vmatprep.subr.bf16.mxu1 %v8834_v34  ;;  %v1230_v41 = vld [vmem:[%s9665_s7 + $0x1c18] sm:$0xff]  ;;  %v8890_v33 = vcombine.high %v1102_v37, %v1106_v55 }
 0x41f   : > { %7698 = vmatpush1.bf16.msra.mxu0 %v8705_v39  ;;  %v1234_v29 = vld [vmem:[%s9665_s7 + $0x1c38] sm:$0xff]  ;;  %v8889_v39 = vcombine.low %v1102_v37, %v1106_v55 }
 0x420   : > { %7699 = vmatprep.subr.bf16.mxu0 %v8714_v47  ;;  %v9018_v34 = vcombine.high %v1230_v41, %v1234_v29  ;;  %v1110_v35 = vld [vmem:[%s9665_s7 + $0x1858] sm:$0xff] }
 0x421   : > { %7739 = vmatpush1.bf16.msra.mxu1 %v8833_v42  ;;  %v1114_v48 = vld [vmem:[%s9665_s7 + $0x1878] sm:$0xff]  ;;  %v9017_v42 = vcombine.low %v1230_v41, %v1234_v29 }
 0x422   : > { %7740 = vmatprep.subr.bf16.mxu1 %v8842_v44  ;;  %v1238_v36 = vld [vmem:[%s9665_s7 + $0x1c58] sm:$0xff]  ;;  %v8898_v47 = vcombine.high %v1110_v35, %v1114_v48 }
 0x423   : > { %7700 = vmatpush1.bf16.msra.mxu0 %v8713_v51  ;;  %v1242_v50 = vld [vmem:[%s9665_s7 + $0x1c78] sm:$0xff]  ;;  %v8897_v51 = vcombine.low %v1110_v35, %v1114_v48 }
 0x424   : > { %7701 = vmatprep.subr.bf16.mxu0 %v8722_v17  ;;  %v9026_v44 = vcombine.high %v1238_v36, %v1242_v50  ;;  %v1118_v57 = vld [vmem:[%s9665_s7 + $0x1898] sm:$0xff] }
 0x425   : > { %7741 = vmatpush1.bf16.msra.mxu1 %v8841_v53  ;;  %v1122_v20 = vld [vmem:[%s9665_s7 + $0x18b8] sm:$0xff]  ;;  %v9025_v53 = vcombine.low %v1238_v36, %v1242_v50  ;;  %v320_v36 = vld [vmem:[%s9689_s4 + $0x28] sm:$0xff] }
 0x426   : > { %7742 = vmatprep.subr.bf16.mxu1 %v8850_v61  ;;  %v1246_v46 = vld [vmem:[%s9665_s7 + $0x1c98] sm:$0xff]  ;;  %v8906_v17 = vcombine.high %v1118_v57, %v1122_v20 }
 0x427   : > { %7702 = vmatpush1.bf16.msra.mxu0 %v8721_v1  ;;  %v1250_v49 = vld [vmem:[%s9665_s7 + $0x1cb8] sm:$0xff] }
 0x428   : > { %7703 = vmatprep.subr.bf16.mxu0 %v8730_v58  ;;  %v9034_v61 = vcombine.high %v1246_v46, %v1250_v49  ;;  %v1126_v21 = vld [vmem:[%s9665_s7 + $0x18d8] sm:$0xff]  ;;  %v9033_v56 = vcombine.low %v1246_v46, %v1250_v49 }
 0x429   : > { %7743 = vmatpush1.bf16.msra.mxu1 %v8849_v2  ;;  %v1130_v8 = vld [vmem:[%s9665_s7 + $0x18f8] sm:$0xff] }
 0x42a   : > { %7744 = vmatprep.subr.bf16.mxu1 %v8858_v28  ;;  %v1258_v11 = vld [vmem:[%s9665_s7 + $0x1cf8] sm:$0xff]  ;;  %v8914_v1 = vcombine.high %v1126_v21, %v1130_v8  ;;  %v8913_v30 = vcombine.low %v1126_v21, %v1130_v8 }
 0x42b   : > { %7704 = vmatpush1.bf16.msra.mxu0 %v8729_v6  ;;  %v1134_v58 = vld [vmem:[%s9665_s7 + $0x1918] sm:$0xff] }
 0x42c   : > { %7705 = vmatprep.subr.bf16.mxu0 %v8738_v7  ;;  %v1138_v28 = vld [vmem:[%s9665_s7 + $0x1938] sm:$0xff] }
 0x42d   : > { %7745 = vmatpush1.bf16.msra.mxu1 %v8857_v62  ;;  %v1262_v0 = vld [vmem:[%s9665_s7 + $0x1d18] sm:$0xff]  ;;  %v8922_v3 = vcombine.high %v1134_v58, %v1138_v28  ;;  %v8921_v10 = vcombine.low %v1134_v58, %v1138_v28 }
 0x42e   : > { %7746 = vmatprep.subr.bf16.mxu1 %v8866_v63  ;;  %v1142_v6 = vld [vmem:[%s9665_s7 + $0x1958] sm:$0xff] }
 0x42f   : > { %7706 = vmatpush1.bf16.msra.mxu0 %v8737_v38  ;;  %v1146_v62 = vld [vmem:[%s9665_s7 + $0x1978] sm:$0xff] }
 0x430   : > { %7707 = vmatprep.subr.bf16.mxu0 %v8746_v45  ;;  %v1270_v7 = vld [vmem:[%s9665_s7 + $0x1d58] sm:$0xff]  ;;  %v8930_v59 = vcombine.high %v1142_v6, %v1146_v62  ;;  %v8929_v43 = vcombine.low %v1142_v6, %v1146_v62 }
 0x431   : > { %7747 = vmatpush1.bf16.msra.mxu1 %v8865_v60  ;;  %v1274_v63 = vld [vmem:[%s9665_s7 + $0x1d78] sm:$0xff] }
 0x432   : > { %7748 = vmatprep.subr.bf16.mxu1 %v8874_v15  ;;  %v9058_v40 = vcombine.high %v1270_v7, %v1274_v63  ;;  %v1150_v38 = vld [vmem:[%s9665_s7 + $0x1998] sm:$0xff]  ;;  %v9057_v18 = vcombine.low %v1270_v7, %v1274_v63 }
 0x433   : > { %7708 = vmatpush1.bf16.msra.mxu0 %v8745_v25  ;;  %v1154_v60 = vld [vmem:[%s9665_s7 + $0x19b8] sm:$0xff] }
 0x434   : > { %7709 = vmatprep.subr.bf16.mxu0 %v8754_v26  ;;  %v1278_v45 = vld [vmem:[%s9665_s7 + $0x1d98] sm:$0xff]  ;;  %v8938_v22 = vcombine.high %v1150_v38, %v1154_v60  ;;  %v8937_v35 = vcombine.low %v1150_v38, %v1154_v60 }
 0x435   : > { %7749 = vmatpush1.bf16.msra.mxu1 %v8873_v54  ;;  %v1282_v15 = vld [vmem:[%s9665_s7 + $0x1db8] sm:$0xff] }
 0x436   : > { %7750 = vmatprep.subr.bf16.mxu1 %v8882_v27  ;;  %v9066_v25 = vcombine.high %v1278_v45, %v1282_v15  ;;  %v1158_v54 = vld [vmem:[%s9665_s7 + $0x19d8] sm:$0xff] }
 0x437   : > { %7710 = vmatpush1.bf16.msra.mxu0 %v8753_v31  ;;  %v1162_v26 = vld [vmem:[%s9665_s7 + $0x19f8] sm:$0xff]  ;;  %v319_v31 = vld [vmem:[%s9689_s4 + $0x20] sm:$0xff] }
 0x438   : > { %7761 = vmatprep.subr.bf16.mxu0 %v8890_v33  ;;  %v1286_v41 = vld [vmem:[%s9665_s7 + $0x1dd8] sm:$0xff] }
 0x439   : > { %7751 = vmatpush1.bf16.msra.mxu1 %v8881_v32  ;;  %v1290_v29 = vld [vmem:[%s9665_s7 + $0x1df8] sm:$0xff] }
 0x43a   : > { %7802 = vmatprep.subr.bf16.mxu1 %v9018_v34  ;;  %7712 = vmatmul.mubr.bf16.vlgmr.msra.gmra.mrb[56].mxu0 %v9968_v5  ;;  %v1254_v5 = vld [vmem:[%s9665_s7 + $0x1cd8] sm:$0xff] }
 0x43b   : > { %7762 = vmatpush1.bf16.msra.mxu0 %v8889_v39  ;;  %7793 = vmatprep.mubr.bf16.mxu0 %v9986_v16  ;;  %v9042_v2 = vcombine.high %v1254_v5, %v1258_v11  ;;  %v1266_v16 = vld [vmem:[%s9665_s7 + $0x1d38] sm:$0xff]  ;;  %v9065_v39 = vcombine.low %v1278_v45, %v1282_v15 }
 0x43c   : > { %7753 = vmatmul.mubr.bf16.vlgmr.msra.gmra.mrb[56].mxu1 %v9977_v9  ;;  %7763 = vmatprep.subr.bf16.mxu0 %v8898_v47  ;;  %v8905_v9 = vcombine.low %v1118_v57, %v1122_v20  ;;  %v9050_v4 = vcombine.high %v1262_v0, %v1266_v16  ;;  %v9049_v12 = vcombine.low %v1262_v0, %v1266_v16  ;;  %v1166_v57 = vld [vmem:[%s9665_s7 + $0x1a18] sm:$0xff] }
 0x43d   : > { %7803 = vmatpush1.bf16.msra.mxu1 %v9017_v42  ;;  %7834 = vmatprep.mubr.bf16.mxu1 %v9993_v19  ;;  %v9041_v19 = vcombine.low %v1254_v5, %v1258_v11  ;;  %v8946_v42 = vcombine.high %v1158_v54, %v1162_v26  ;;  %v1170_v20 = vld [vmem:[%s9665_s7 + $0x1a38] sm:$0xff] }
 0x43e   : > { %7804 = vmatprep.subr.bf16.mxu1 %v9026_v44  ;;  %v1294_v49 = vld [vmem:[%s9665_s7 + $0x1e18] sm:$0xff]  ;;  %v8954_v21 = vcombine.high %v1166_v57, %v1170_v20 }
 0x43f   : > { %7764 = vmatpush1.bf16.msra.mxu0 %v8897_v51  ;;  %v1298_v51 = vld [vmem:[%s9665_s7 + $0x1e38] sm:$0xff] }
 0x440   : > { %7765 = vmatprep.subr.bf16.mxu0 %v8906_v17  ;;  %v8945_v17 = vcombine.low %v1158_v54, %v1162_v26  ;;  %v9082_v8 = vcombine.high %v1294_v49, %v1298_v51  ;;  %v1174_v5 = vld [vmem:[%s9665_s7 + $0x1a58] sm:$0xff] }
 0x441   : > { %7805 = vmatpush1.bf16.msra.mxu1 %v9025_v53  ;;  %v1178_v11 = vld [vmem:[%s9665_s7 + $0x1a78] sm:$0xff] }
 0x442   : > { %7806 = vmatprep.subr.bf16.mxu1 %v9034_v61  ;;  %v9073_v61 = vcombine.low %v1286_v41, %v1290_v29  ;;  %v8962_v58 = vcombine.high %v1174_v5, %v1178_v11  ;;  %v1182_v0 = vld [vmem:[%s9665_s7 + $0x1a98] sm:$0xff] }
 0x443   : > { %7766 = vmatpush1.bf16.msra.mxu0 %v8905_v9  ;;  %v1302_v9 = vld [vmem:[%s9665_s7 + $0x1e58] sm:$0xff] }
 0x444   : > { %7767 = vmatprep.subr.bf16.mxu0 %v8914_v1  ;;  %v8953_v1 = vcombine.low %v1166_v57, %v1170_v20  ;;  %v1186_v16 = vld [vmem:[%s9665_s7 + $0x1ab8] sm:$0xff] }
 0x445   : > { %7807 = vmatpush1.bf16.msra.mxu1 %v9033_v56  ;;  %v1306_v56 = vld [vmem:[%s9665_s7 + $0x1e78] sm:$0xff]  ;;  %v8970_v6 = vcombine.high %v1182_v0, %v1186_v16 }
 0x446   : > { %7808 = vmatprep.subr.bf16.mxu1 %v9042_v2  ;;  %v9081_v2 = vcombine.low %v1294_v49, %v1298_v51  ;;  %v9090_v28 = vcombine.high %v1302_v9, %v1306_v56  ;;  %v1190_v7 = vld [vmem:[%s9665_s7 + $0x1ad8] sm:$0xff] }
 0x447   : > { %7768 = vmatpush1.bf16.msra.mxu0 %v8913_v30  ;;  %v1310_v30 = vld [vmem:[%s9665_s7 + $0x1e98] sm:$0xff] }
 0x448   : > { %7769 = vmatprep.subr.bf16.mxu0 %v8922_v3  ;;  %v8961_v3 = vcombine.low %v1174_v5, %v1178_v11  ;;  %v1194_v63 = vld [vmem:[%s9665_s7 + $0x1af8] sm:$0xff] }
 0x449   : > { %7809 = vmatpush1.bf16.msra.mxu1 %v9041_v19  ;;  %v1314_v19 = vld [vmem:[%s9665_s7 + $0x1eb8] sm:$0xff]  ;;  %v8978_v38 = vcombine.high %v1190_v7, %v1194_v63 }
 0x44a   : > { %7810 = vmatprep.subr.bf16.mxu1 %v9050_v4  ;;  %v9089_v4 = vcombine.low %v1302_v9, %v1306_v56  ;;  %v9098_v62 = vcombine.high %v1310_v30, %v1314_v19  ;;  %v1198_v45 = vld [vmem:[%s9665_s7 + $0x1b18] sm:$0xff] }
 0x44b   : > { %7770 = vmatpush1.bf16.msra.mxu0 %v8921_v10  ;;  %v1318_v10 = vld [vmem:[%s9665_s7 + $0x1ed8] sm:$0xff] }
 0x44c   : > { %7771 = vmatprep.subr.bf16.mxu0 %v8930_v59  ;;  %v8969_v59 = vcombine.low %v1182_v0, %v1186_v16  ;;  %v1202_v15 = vld [vmem:[%s9665_s7 + $0x1b38] sm:$0xff] }
 0x44d   : > { %7811 = vmatpush1.bf16.msra.mxu1 %v9049_v12  ;;  %v7467_v24 = vpop.f32.mrb[44].mxu0  ;;  %v1322_v12 = vld [vmem:[%s9665_s7 + $0x1ef8] sm:$0xff] }
 0x44e   : > { %7812 = vmatprep.subr.bf16.mxu1 %v9058_v40  ;;  %v7468_v27 = vadd.f32 %v7467_v24, %v10830_v13  ;;  %v7469_v55 = vpop.f32.mrb[45].mxu0  ;;  %v9097_v40 = vcombine.low %v1310_v30, %v1314_v19  ;;  %v9106_v60 = vcombine.high %v1318_v10, %v1322_v12  ;;  %v9105_v24 = vcombine.low %v1318_v10, %v1322_v12  ;;  %v1206_v26 = vld [vmem:[%s9665_s7 + $0x1b58] sm:$0xff] }
 0x44f   : > { %v7508_v37 = vpop.f32.mrb[44].mxu1  ;;  %v7470_v32 = vadd.f32 %v7469_v55, %v10832_v14  ;;  %v7471_v34 = vpop.f32.mrb[46].mxu0  ;;  %7772 = vmatpush1.bf16.msra.mxu0 %v8929_v43  ;;  %v9074_v14 = vcombine.high %v1286_v41, %v1290_v29  ;;  %v1326_v43 = vld [vmem:[%s9665_s7 + $0x1f18] sm:$0xff]  ;;  %v8985_v41 = vcombine.low %v1198_v45, %v1202_v15 }
 0x450   : > { %v7510_v33 = vpop.f32.mrb[45].mxu1  ;;  %v7509_v48 = vadd.f32 %v7508_v37, %v7468_v27  ;;  %v7472_v13 = vpop.f32.mrb[47].mxu0  ;;  %7773 = vmatprep.subr.bf16.mxu0 %v8938_v22  ;;  %v8977_v22 = vcombine.low %v1190_v7, %v1194_v63  ;;  %v1210_v27 = vld [vmem:[%s9665_s7 + $0x1b78] sm:$0xff] }
 0x451   : > { %v7512_v50 = vpop.f32.mrb[46].mxu1  ;;  %7813 = vmatpush1.bf16.msra.mxu1 %v9057_v18  ;;  %v7511_v47 = vadd.f32 %v7510_v33, %v7470_v32  ;;  %v1330_v18 = vld [vmem:[%s9665_s7 + $0x1f38] sm:$0xff] }
 0x452   : > { %v7513_v44 = vpop.f32.mrb[47].mxu1  ;;  %7814 = vmatprep.subr.bf16.mxu1 %v9066_v25  ;;  %v7847_v46 = vadd.f32 %v7509_v48, %v319_v31  ;;  %v8986_v25 = vcombine.high %v1198_v45, %v1202_v15  ;;  %v9114_v54 = vcombine.high %v1326_v43, %v1330_v18  ;;  %v1334_v37 = vld [vmem:[%s9665_s7 + $0x1f58] sm:$0xff]  ;;  %v9113_v29 = vcombine.low %v1326_v43, %v1330_v18 }
 0x453   : > { %v7848_v53 = vadd.f32 %v7511_v47, %v320_v36  ;;  %7774 = vmatpush1.bf16.msra.mxu0 %v8937_v35  ;;  %v1338_v55 = vld [vmem:[%s9665_s7 + $0x1f78] sm:$0xff]  ;;  %v8994_v31 = vcombine.high %v1206_v26, %v1210_v27  ;;  %v8993_v36 = vcombine.low %v1206_v26, %v1210_v27  ;;  %v321_v26 = vld [vmem:[%s9689_s4 + $0x30] sm:$0xff] }
 0x454   : > { %7855 = vst [vmem:[%s9689_s4 + $0x20] sm:$0xff] %v7847_v46  ;;  %7775 = vmatprep.subr.bf16.mxu0 %v8946_v42  ;;  %v9122_v32 = vcombine.high %v1334_v37, %v1338_v55  ;;  %v1214_v33 = vld [vmem:[%s9665_s7 + $0x1b98] sm:$0xff]  ;;  %v9121_v50 = vcombine.low %v1334_v37, %v1338_v55 }
 0x455   : > { %7815 = vmatpush1.bf16.msra.mxu1 %v9065_v39  ;;  %7856 = vst [vmem:[%s9689_s4 + $0x28] sm:$0xff] %v7848_v53  ;;  %v1218_v34 = vld [vmem:[%s9665_s7 + $0x1bb8] sm:$0xff] }
 0x456   : > { %7816 = vmatprep.subr.bf16.mxu1 %v9074_v14  ;;  %v1342_v35 = vld [vmem:[%s9665_s7 + $0x1f98] sm:$0xff]  ;;  %v9002_v13 = vcombine.high %v1214_v33, %v1218_v34  ;;  %v9001_v57 = vcombine.low %v1214_v33, %v1218_v34 }
 0x457   : > { %7776 = vmatpush1.bf16.msra.mxu0 %v8945_v17  ;;  %v1346_v48 = vld [vmem:[%s9665_s7 + $0x1fb8] sm:$0xff] }
 0x458   : > { %7777 = vmatprep.subr.bf16.mxu0 %v8954_v21  ;;  %v9130_v39 = vcombine.high %v1342_v35, %v1346_v48  ;;  %v1222_v42 = vld [vmem:[%s9665_s7 + $0x1bd8] sm:$0xff]  ;;  %v9129_v20 = vcombine.low %v1342_v35, %v1346_v48 }
 0x459   : > { %7817 = vmatpush1.bf16.msra.mxu1 %v9073_v61  ;;  %v1226_v47 = vld [vmem:[%s9665_s7 + $0x1bf8] sm:$0xff] }
 0x45a   : > { %7818 = vmatprep.subr.bf16.mxu1 %v9082_v8  ;;  %v1350_v44 = vld [vmem:[%s9665_s7 + $0x1fd8] sm:$0xff]  ;;  %v9010_v46 = vcombine.high %v1222_v42, %v1226_v47  ;;  %v9009_v51 = vcombine.low %v1222_v42, %v1226_v47  ;;  %v7864_v47 = vld [vmem:[%s9689_s4 + $0x8] sm:$0xff] (!%p9139_p3) }
 0x45b   : > { %7778 = vmatpush1.bf16.msra.mxu0 %v8953_v1  ;;  %v1354_v14 = vld [vmem:[%s9665_s7 + $0x1ff8] sm:$0xff] }
 0x45c   : > { %7779 = vmatprep.subr.bf16.mxu0 %v8962_v58  ;;  %v9138_v49 = vcombine.high %v1350_v44, %v1354_v14  ;;  %v9137_v53 = vcombine.low %v1350_v44, %v1354_v14  ;;  %v7865_v14 = vld [vmem:[%s9689_s4 + $0x10] sm:$0xff] (!%p9139_p3) }
 0x45d   : > { %7819 = vmatpush1.bf16.msra.mxu1 %v9081_v2 }
 0x45e   : > { %7820 = vmatprep.subr.bf16.mxu1 %v9090_v28 }
 0x45f   : > { %7780 = vmatpush1.bf16.msra.mxu0 %v8961_v3 }
 0x460   : > { %7781 = vmatprep.subr.bf16.mxu0 %v8970_v6 }
 0x461   : > { %7821 = vmatpush1.bf16.msra.mxu1 %v9089_v4 }
 0x462   : > { %7822 = vmatprep.subr.bf16.mxu1 %v9098_v62 }
 0x463   : > { %7782 = vmatpush1.bf16.msra.mxu0 %v8969_v59 }
 0x464   : > { %7783 = vmatprep.subr.bf16.mxu0 %v8978_v38 }
 0x465   : > { %7823 = vmatpush1.bf16.msra.mxu1 %v9097_v40 }
 0x466   : > { %7824 = vmatprep.subr.bf16.mxu1 %v9106_v60 }
 0x467   : > { %7784 = vmatpush1.bf16.msra.mxu0 %v8977_v22 }
 0x468   : > { %7785 = vmatprep.subr.bf16.mxu0 %v8986_v25 }
 0x469   : > { %7825 = vmatpush1.bf16.msra.mxu1 %v9105_v24 }
 0x46a   : > { %7826 = vmatprep.subr.bf16.mxu1 %v9114_v54 }
 0x46b   : > { %7786 = vmatpush1.bf16.msra.mxu0 %v8985_v41 }
 0x46c   : > { %7787 = vmatprep.subr.bf16.mxu0 %v8994_v31 }
 0x46d   : > { %7827 = vmatpush1.bf16.msra.mxu1 %v9113_v29  ;;  %v322_v29 = vld [vmem:[%s9689_s4 + $0x38] sm:$0xff] }
 0x46e   : > { %7828 = vmatprep.subr.bf16.mxu1 %v9122_v32 }
 0x46f   : > { %7788 = vmatpush1.bf16.msra.mxu0 %v8993_v36  ;;  %v7873_v36 = vlaneseq (!%p9139_p3) }
 0x470   : > { %7789 = vmatprep.subr.bf16.mxu0 %v9002_v13  ;;  %v7863_v13 = vld [vmem:[%s9689_s4] sm:$0xff] (!%p9139_p3) }
 0x471   : > { %7829 = vmatpush1.bf16.msra.mxu1 %v9121_v50  ;;  %v7874_v50 = vshrl.u32 (!%p9139_p3), %v7873_v36, 7 }
 0x472   : > { %7830 = vmatprep.subr.bf16.mxu1 %v9130_v39  ;;  %v7871_v39 = vld [vmem:[%s239_s10] sm:$0xff] (!%p9139_p3) }
 0x473   : > { %7790 = vmatpush1.bf16.msra.mxu0 %v9001_v57  ;;  %v7875_v42 = vsub.s32 (!%p9139_p3), 0, %v7874_v50  ;;  %v7879_v44 = vsub.s32 (!%p9139_p3), 1, %v7874_v50  ;;  %v7883_v57 = vsub.s32 (!%p9139_p3), 2, %v7874_v50 }
 0x474   : > { %7791 = vmatprep.subr.bf16.mxu0 %v9010_v46  ;;  %v7866_v46 = vld [vmem:[%s9689_s4 + $0x18] sm:$0xff] (!%p9139_p3) }
 0x475   : > { %7831 = vmatpush1.bf16.msra.mxu1 %v9129_v20  ;;  %v7887_v20 = vsub.s32 (!%p9139_p3), 3, %v7874_v50 }
 0x476   : > { %7832 = vmatprep.subr.bf16.mxu1 %v9138_v49  ;;  %v7867_v49 = vld [vmem:[%s9689_s4 + $0x20] sm:$0xff] (!%p9139_p3) }
 0x477   : > { %7792 = vmatpush1.bf16.msra.mxu0 %v9009_v51  ;;  %v7891_v51 = vsub.s32 (!%p9139_p3), 4, %v7874_v50 }
 0x479   : > { %7833 = vmatpush1.bf16.msra.mxu1 %v9137_v53  ;;  %v7895_v53 = vsub.s32 (!%p9139_p3), 5, %v7874_v50 }
 0x47a   : > { %7794 = vmatmul.mubr.bf16.vlgmr.msra.gmra.mrb[60].mxu0 %v10058_v23 }
 0x47c   : > { %7835 = vmatmul.mubr.bf16.vlgmr.msra.gmra.mrb[60].mxu1 %v10064_v52 }
 0x48d   : > { %v7549_v17 = vpop.f32.mrb[48].mxu0 }
 0x48e   : > { %v7551_v21 = vpop.f32.mrb[49].mxu0 }
 0x48f   : > { %v7590_v61 = vpop.f32.mrb[48].mxu1  ;;  %v7553_v11 = vpop.f32.mrb[50].mxu0 }
 0x490   : > { %v7591_v8 = vadd.f32 %v7590_v61, %v7549_v17  ;;  %v7592_v5 = vpop.f32.mrb[49].mxu1  ;;  %v7554_v1 = vpop.f32.mrb[51].mxu0  ;;  %v7899_v17 = vsub.s32 (!%p9139_p3), 6, %v7874_v50  ;;  %v7903_v61 = vsub.s32 (!%p9139_p3), 7, %v7874_v50  ;;  %v7888_v11 = vrot.slane (!%p9139_p3), %v7871_v39, %v7887_v20 }
 0x491   : > { %v7593_v9 = vadd.f32 %v7592_v5, %v7551_v21  ;;  %v7594_v56 = vpop.f32.mrb[50].mxu1  ;;  %v7876_v21 = vrot.slane (!%p9139_p3), %v7871_v39, %v7875_v42  ;;  %v7884_v5 = vrot.slane (!%p9139_p3), %v7871_v39, %v7883_v57 }
 0x492   : > { %v7595_v2 = vpop.f32.mrb[51].mxu1 }
 0x493   : > { %v7892_v2 = vrot.slane (!%p9139_p3), %v7871_v39, %v7891_v51 }
 0x4cd   : > { %v7631_v58 = vpop.f32.mrb[52].mxu0 }
 0x4ce   : > { %v7632_v28 = vadd.f32 %v7631_v58, %v7591_v8  ;;  %v7633_v16 = vpop.f32.mrb[53].mxu0  ;;  %v7880_v8 = vrot.slane (!%p9139_p3), %v7871_v39, %v7879_v44  ;;  %v7896_v58 = vrot.slane (!%p9139_p3), %v7871_v39, %v7895_v53 }
 0x4cf   : > { %v7672_v0 = vpop.f32.mrb[52].mxu1  ;;  %v7634_v30 = vadd.f32 %v7633_v16, %v7593_v9  ;;  %v7635_v3 = vpop.f32.mrb[54].mxu0  ;;  %v7868_v9 = vld [vmem:[%s9689_s4 + $0x28] sm:$0xff] (!%p9139_p3)  ;;  %v7913_v16 = vadd.f32 (!%p9139_p3), %v7876_v21, %v7863_v13 }
 0x4d0   : > { %v7674_v19 = vpop.f32.mrb[53].mxu1  ;;  %v7673_v23 = vadd.f32 %v7672_v0, %v7632_v28  ;;  %v7636_v52 = vpop.f32.mrb[55].mxu0  ;;  %v7900_v28 = vrot.slane (!%p9139_p3), %v7871_v39, %v7899_v17  ;;  %v7904_v0 = vrot.slane (!%p9139_p3), %v7871_v39, %v7903_v61  ;;  %v7916_v3 = vadd.f32 (!%p9139_p3), %v7888_v11, %v7866_v46 }
 0x4d1   : > { %v7676_v4 = vpop.f32.mrb[54].mxu1  ;;  %v7675_v6 = vadd.f32 %v7674_v19, %v7634_v30  ;;  %v7914_v30 = vadd.f32 (!%p9139_p3), %v7880_v8, %v7864_v47  ;;  %v7915_v19 = vadd.f32 (!%p9139_p3), %v7884_v5, %v7865_v14 }
 0x4d2   : > { %v7677_v62 = vpop.f32.mrb[55].mxu1  ;;  %v7918_v4 = vadd.f32 (!%p9139_p3), %v7896_v58, %v7868_v9 }
 0x4d3   : > { %v7921_v62 = vmax.f32 (!%p9139_p3), %v7913_v16, 0.0 }
 0x4d5   : > { %7929 = vst [vmem:[%s9689_s4] sm:$0xff] (!%p9139_p3), %v7921_v62 }
 0x50d   : > { %v7713_v7 = vpop.f32.mrb[56].mxu0 }
 0x50e   : > { %v7714_v63 = vadd.f32 %v7713_v7, %v7673_v23  ;;  %v7715_v12 = vpop.f32.mrb[57].mxu0  ;;  %v7917_v23 = vadd.f32 (!%p9139_p3), %v7892_v2, %v7867_v49  ;;  %v7922_v7 = vmax.f32 (!%p9139_p3), %v7914_v30, 0.0 }
 0x50f   : > { %v7754_v10 = vpop.f32.mrb[56].mxu1  ;;  %v7716_v59 = vadd.f32 %v7715_v12, %v7675_v6  ;;  %v7717_v38 = vpop.f32.mrb[58].mxu0 }
 0x510   : > { %v7756_v40 = vpop.f32.mrb[57].mxu1  ;;  %v7755_v60 = vadd.f32 %v7754_v10, %v7714_v63  ;;  %v7718_v15 = vpop.f32.mrb[59].mxu0  ;;  %v7923_v63 = vmax.f32 (!%p9139_p3), %v7915_v19, 0.0  ;;  %v7924_v10 = vmax.f32 (!%p9139_p3), %v7916_v3, 0.0  ;;  %v7925_v12 = vmax.f32 (!%p9139_p3), %v7917_v23, 0.0  ;;  %7930 = vst [vmem:[%s9689_s4 + $0x8] sm:$0xff] (!%p9139_p3), %v7922_v7 }
 0x511   : > { %v7758_v45 = vpop.f32.mrb[58].mxu1  ;;  %v7757_v43 = vadd.f32 %v7756_v40, %v7716_v59  ;;  %v7926_v59 = vmax.f32 (!%p9139_p3), %v7918_v4, 0.0 }
 0x512   : > { %v7759_v18 = vpop.f32.mrb[59].mxu1  ;;  %7931 = vst [vmem:[%s9689_s4 + $0x10] sm:$0xff] (!%p9139_p3), %v7923_v63  ;;  %7932 = vst [vmem:[%s9689_s4 + $0x18] sm:$0xff] (!%p9139_p3), %v7924_v10 }
 0x513   : > { %7933 = vst [vmem:[%s9689_s4 + $0x20] sm:$0xff] (!%p9139_p3), %v7925_v12  ;;  %7934 = vst [vmem:[%s9689_s4 + $0x28] sm:$0xff] (!%p9139_p3), %v7926_v59 }
 0x54d   : > { %v7795_v22 = vpop.f32.mrb[60].mxu0 }
 0x54e   : > { %v7796_v24 = vadd.f32 %v7795_v22, %v7755_v60  ;;  %v7797_v54 = vpop.f32.mrb[61].mxu0 }
 0x54f   : > { %v7836_v25 = vpop.f32.mrb[60].mxu1  ;;  %v7798_v27 = vadd.f32 %v7797_v54, %v7757_v43  ;;  %v7799_v55 = vpop.f32.mrb[62].mxu0  ;;  %7862 = sbr.rel (%p9139_p3) target bundleno = 1378 (0x562), region = 48 }
 0x550   : > { %v7838_v37 = vpop.f32.mrb[61].mxu1  ;;  %v7837_v41 = vadd.f32 %v7836_v25, %v7796_v24  ;;  %v7800_v32 = vpop.f32.mrb[63].mxu0 }
 0x551   : > { %v7840_v31 = vpop.f32.mrb[62].mxu1  ;;  %v7839_v33 = vadd.f32 %v7838_v37, %v7798_v27 }
 0x552   : > { %v7841_v34 = vpop.f32.mrb[63].mxu1  ;;  %v7849_v35 = vadd.f32 %v7837_v41, %v321_v26 }
 0x553   : > { %v7850_v48 = vadd.f32 %v7839_v33, %v322_v29 }
 0x554   : > { %7857 = vst [vmem:[%s9689_s4 + $0x30] sm:$0xff] %v7849_v35 }
 0x555   : > { %7858 = vst [vmem:[%s9689_s4 + $0x38] sm:$0xff] %v7850_v48 }
 0x55b   : > { %v7869_v56 = vld [vmem:[%s9689_s4 + $0x30] sm:$0xff] }
 0x55c   : > { %v7870_v1 = vld [vmem:[%s9689_s4 + $0x38] sm:$0xff]  ;;  %v7919_v52 = vadd.f32 %v7900_v28, %v7869_v56 }
 0x55d   : > { %v7920_v6 = vadd.f32 %v7904_v0, %v7870_v1 }
 0x55e   : > { %v7927_v40 = vmax.f32 %v7919_v52, 0.0 }
 0x55f   : > { %v7928_v38 = vmax.f32 %v7920_v6, 0.0 }
 0x560   : > { %7935 = vst [vmem:[%s9689_s4 + $0x30] sm:$0xff] %v7927_v40 }
 0x561   : > { %7936 = vst [vmem:[%s9689_s4 + $0x38] sm:$0xff] %v7928_v38 }
 0x562 PF: > { %s19_s22 = sadd.s32 1, %s9418_s22   ;;  %s11023_s7 = sld [smem:[#allocation8_spill]] }
 0x563   : > { %p16_p11 = scmp.ge.s32.totalorder %s19_s22, 24   ;;  %s11024_s12 = smov %s9382_s13 }
 0x564   : > { %s11025_s13 = smov %s9386_s14  ;;  %s11026_s14 = smov %s9614_s29 }
 0x565   : > { %s11027_s15 = smov %s9394_s16  ;;  %s11028_s16 = smov %s9398_s17 }
 0x566   : > { %s11029_s17 = smov %s9619_s6  ;;  %s11030_s18 = smov %s9410_s20 }
 0x567   : > { %s11031_s19 = smov %s9414_s21  ;;  %s11032_s20 = smov %s11035_s23 }
 0x568   : > { %s11033_s21 = smov %s11023_s7  ;;  %18 = sbr.rel (!%p16_p11) target bundleno = 11 (0xb), region = 96 }
 0x56f   :  { %7967 = vsyncpa [#allocation3], 1 }
 0x570   :  { %7969 = vsyncpa [#allocation3 + $0x1], 1 }
 0x571   :  { %7970 = vsyncpa [#allocation5], 1 }
 0x572   :  { %7972 = vsyncpa [#allocation5 + $0x1], 1 }

</bundles_post_ra>
